<compile_context>
chip_gen: v6e
topology: v6e:2x2x1
jax: 0.10.0
libtpu: 0.0.40
codegen_flags: <defaults>
</compile_context>

<pallas_src>
import math
import numpy as np
import jax
import jax.numpy as jnp
from jax import lax
from jax.experimental import pallas as pl
from jax.experimental.pallas import tpu as pltpu

# ---------------- problem sizes (consistent with the module) ----------------
K = 268          # hard-coded "268" in GSRLayer (hr graph size / weight rows)
LR = 16          # lr_dim (small, chosen for the example)
HR = 2 * LR      # hr_dim; weights @ cat(I, I) requires hr_dim == 2 * lr_dim
KP = 384         # 268 padded up to a multiple of 128 (lane-dense working size)
SLAB = 128       # output row-slab size (pipelined writeback)
N_SLAB = KP // SLAB   # 3


# ---------------------------------- kernel ----------------------------------
def gsr_kernel(w1_ref, w2_ref, u_ref, ft_ref, adj_ref, xabs_ref, adj_sc):
    i = pl.program_id(0)

    # ---- step 0: build the full normalized adjacency, keep it in VMEM scratch
    @pl.when(i == 0)
    def _():
        # a = weights @ [I; I]  ==  W[:, :LR] + W[:, LR:]   (exact, no MXU pass)
        a = w1_ref[...] + w2_ref[...]                               # [KP, LR]
        # m^T = (U^T f)^T = f^T U   (standard MXU form, tiny)
        mT = jnp.dot(ft_ref[...], u_ref[...],
                     preferred_element_type=jnp.float32)            # [KP, LR]
        # f_d   = | a @ (U^T f) | = | a @ mT^T |      (rhs-transposed MXU form)
        fd = jnp.abs(lax.dot_general(a, mT, (((1,), (1,)), ((), ())),
                                     preferred_element_type=jnp.float32))
        # f_d^T = | mT @ a^T |  -> transpose done on the idle MXU, not the XLU
        fdT = jnp.abs(lax.dot_general(mT, a, (((1,), (1,)), ((), ())),
                                      preferred_element_type=jnp.float32))

        rows = lax.broadcasted_iota(jnp.int32, (KP, KP), 0)
        cols = lax.broadcasted_iota(jnp.int32, (KP, KP), 1)
        eye = rows == cols
        fd = jnp.where(eye, 1.0, fd)          # fill_diagonal_(1)
        fdT = jnp.where(eye, 1.0, fdT)

        # r[i] = rowsum(f_d)[i]^-1/2 ; rowsum >= 1 always (diag=1, entries >= 0),
        # so no inf guard is needed.  Same values, two layouts:
        r_col = lax.rsqrt(jnp.sum(fd, axis=1, keepdims=True))       # [KP, 1]
        r_row = lax.rsqrt(jnp.sum(fdT, axis=0, keepdims=True))      # [1, KP]

        # adj[i,j] = r_i * r_j * f_d[j,i]  (= D f_d^T D)
        adj_sc[...] = (r_col * fdT) * r_row

    # ---- every step: store this slab of adj, compute + store this slab of |X|
    row0 = pl.multiple_of(i * SLAB, SLAB)
    adj_slab = adj_sc[pl.ds(row0, SLAB), :]                          # [SLAB, KP]
    adj_ref[...] = adj_slab

    # X[slab] = adj[slab] @ adj^T  (rhs-transposed MXU form).  adj @ adj^T is
    # exactly symmetric, so no explicit symmetrization is needed.
    x_slab = lax.dot_general(adj_slab, adj_sc[...], (((1,), (1,)), ((), ())),
                             preferred_element_type=jnp.float32)     # [SLAB, KP]
    rr = lax.broadcasted_iota(jnp.int32, (SLAB, KP), 0) + i * SLAB
    cc = lax.broadcasted_iota(jnp.int32, (SLAB, KP), 1)
    xabs_ref[...] = jnp.abs(jnp.where(rr == cc, 1.0, x_slab))


# --------------------------------- wrapper -----------------------------------
@jax.jit
def gsr_layer(A, Xf, weights):
    # TODO(synk): eigh has no Pallas/Mosaic equivalent; computed with XLA here.
    # torch.linalg.eigh(A, UPLO='U') -> use the upper triangle of A.
    A_sym = jnp.triu(A) + jnp.triu(A, 1).T
    _, U = jnp.linalg.eigh(A_sym)            # eigenvalues are unused downstream

    # Pad the 268-sized operands to the lane-dense working size KP and present
    # X as X^T so every in-kernel matmul is a native MXU form (no transposes).
    w1 = jnp.pad(weights[:, :LR], ((0, KP - K), (0, 0)))    # [KP, LR]
    w2 = jnp.pad(weights[:, LR:], ((0, KP - K), (0, 0)))    # [KP, LR]
    fT = jnp.pad(Xf.T, ((0, KP - K), (0, 0)))               # [KP, LR]

    adj_p, x_p = pl.pallas_call(
        gsr_kernel,
        out_shape=(jax.ShapeDtypeStruct((KP, KP), jnp.float32),
                   jax.ShapeDtypeStruct((KP, KP), jnp.float32)),
        grid_spec=pltpu.PrefetchScalarGridSpec(
            num_scalar_prefetch=0,
            grid=(N_SLAB,),
            in_specs=[pl.BlockSpec((KP, LR), lambda i: (0, 0)),   # w1
                      pl.BlockSpec((KP, LR), lambda i: (0, 0)),   # w2
                      pl.BlockSpec((LR, LR), lambda i: (0, 0)),   # U
                      pl.BlockSpec((KP, LR), lambda i: (0, 0))],  # f^T
            out_specs=(pl.BlockSpec((SLAB, KP), lambda i: (i, 0)),   # adj slab
                       pl.BlockSpec((SLAB, KP), lambda i: (i, 0))),  # |X| slab
            scratch_shapes=[pltpu.VMEM((KP, KP), jnp.float32)]),     # adj resident
        compiler_params=pltpu.CompilerParams(
            dimension_semantics=("arbitrary",)),
    )(w1, w2, U, fT)

    # Zero-padded rows/cols only add an inert identity block; slice it off
    # (inside the same jit, so XLA fuses the slice with the consumer).
    return adj_p[:K, :K], x_p[:K, :K]


# ---------------------------- pure-JAX reference -----------------------------
def reference(A, Xf, W):
    A_sym = jnp.triu(A) + jnp.triu(A, 1).T
    _, U = jnp.linalg.eigh(A_sym)
    eye_l = jnp.eye(LR, dtype=jnp.float32)
    s_d = jnp.concatenate([eye_l, eye_l], axis=0)         # [2*LR, LR]
    a = W @ s_d                                           # [K, LR]
    b = a @ U.T                                           # [K, LR]
    f_d = jnp.abs(b @ Xf)                                 # [K, K]
    eye_k = jnp.eye(K, dtype=bool)
    f_d = jnp.where(eye_k, 1.0, f_d)
    rowsum = f_d.sum(1)
    r = rowsum ** -0.5
    r = jnp.where(jnp.isinf(r), 0.0, r)
    mx = f_d * r[None, :]
    mx = mx.T
    adj = mx * r[None, :]
    Xo = adj @ adj.T
    Xo = 0.5 * (Xo + Xo.T)
    Xo = jnp.where(eye_k, 1.0, Xo)
    return adj, jnp.abs(Xo)


# ------------------------------------ main ------------------------------------
if __name__ == "__main__":
    key = jax.random.PRNGKey(0)
    k1, k2, k3 = jax.random.split(key, 3)

    # symmetric low-resolution "adjacency" A  [LR, LR]
    R = jax.random.uniform(k1, (LR, LR), jnp.float32)
    A = 0.5 * (R + R.T)
    # node features X  [LR, K]
    Xf = jax.random.normal(k2, (LR, K), jnp.float32)
    # GSRLayer weights: glorot-uniform [K, HR]  (input_dim = 268 hard-coded)
    init_range = math.sqrt(6.0 / (K + HR))
    weights = jax.random.uniform(k3, (K, HR), jnp.float32) * 2.0 * init_range - init_range

    adj, Xout = gsr_layer(A, Xf, weights)
    adj, Xout = jax.block_until_ready((adj, Xout))

    adj_ref, X_ref = reference(A, Xf, weights)
    np.testing.assert_allclose(np.asarray(adj), np.asarray(adj_ref), rtol=2e-3, atol=2e-3)
    np.testing.assert_allclose(np.asarray(Xout), np.asarray(X_ref), rtol=2e-3, atol=2e-3)
    assert adj.shape == (K, K) and Xout.shape == (K, K)

    print("KERNEL_OK")
</pallas_src>

<mosaic_0001>
module attributes {stable_mosaic.version = 11 : i64} {
  func.func @gsr_kernel(%arg0: i32, %arg1: memref<384x16xf32, #tpu.memory_space<vmem>>, %arg2: memref<384x16xf32, #tpu.memory_space<vmem>>, %arg3: memref<16x16xf32, #tpu.memory_space<vmem>>, %arg4: memref<384x16xf32, #tpu.memory_space<vmem>>, %arg5: memref<128x384xf32, #tpu.memory_space<vmem>>, %arg6: memref<128x384xf32, #tpu.memory_space<vmem>>, %arg7: memref<384x384xf32, #tpu.memory_space<vmem>>) attributes {dimension_semantics = [#tpu.dimension_semantics<arbitrary>], iteration_bounds = array<i64: 3>, scalar_prefetch = 0 : i64, scratch_operands = 1 : i64, tpu.core_type = #tpu.core_type<tc>, window_params = [{pipeline_mode = #tpu.pipeline_mode<synchronous>, transform_indices = @transform_0, window_bounds = array<i64: 384, 16>}, {pipeline_mode = #tpu.pipeline_mode<synchronous>, transform_indices = @transform_1, window_bounds = array<i64: 384, 16>}, {pipeline_mode = #tpu.pipeline_mode<synchronous>, transform_indices = @transform_2, window_bounds = array<i64: 16, 16>}, {pipeline_mode = #tpu.pipeline_mode<synchronous>, transform_indices = @transform_3, window_bounds = array<i64: 384, 16>}, {transform_indices = @transform_4, window_bounds = array<i64: 128, 384>}, {transform_indices = @transform_5, window_bounds = array<i64: 128, 384>}]} {
    %c0_i32 = arith.constant 0 : i32
    %0 = arith.cmpi eq, %arg0, %c0_i32 : i32
    %1 = arith.extui %0 : i1 to i32
    %c0_i32_0 = arith.constant 0 : i32
    %2 = arith.cmpi ne, %1, %c0_i32_0 : i32
    scf.if %2 {
      %c0_9 = arith.constant 0 : index
      %c0_10 = arith.constant 0 : index
      %20 = vector.load %arg1[%c0_9, %c0_10] : memref<384x16xf32, #tpu.memory_space<vmem>>, vector<384x16xf32>
      %c0_11 = arith.constant 0 : index
      %c0_12 = arith.constant 0 : index
      %21 = vector.load %arg2[%c0_11, %c0_12] : memref<384x16xf32, #tpu.memory_space<vmem>>, vector<384x16xf32>
      %22 = arith.addf %20, %21 : vector<384x16xf32>
      %c0_13 = arith.constant 0 : index
      %c0_14 = arith.constant 0 : index
      %23 = vector.load %arg4[%c0_13, %c0_14] : memref<384x16xf32, #tpu.memory_space<vmem>>, vector<384x16xf32>
      %c0_15 = arith.constant 0 : index
      %c0_16 = arith.constant 0 : index
      %24 = vector.load %arg3[%c0_15, %c0_16] : memref<16x16xf32, #tpu.memory_space<vmem>>, vector<16x16xf32>
      %cst_17 = arith.constant dense<0.000000e+00> : vector<384x16xf32>
      %25 = tpu.matmul %23, %24, %cst_17 {dimension_numbers = #tpu.dot_dimension_numbers<[1], [0], [0], [1], [0, 0, 1, 1], [], []>} : vector<384x16xf32>, vector<16x16xf32>, vector<384x16xf32> -> vector<384x16xf32>
      %cst_18 = arith.constant dense<0.000000e+00> : vector<384x384xf32>
      %26 = tpu.matmul %22, %25, %cst_18 {dimension_numbers = #tpu.dot_dimension_numbers<[1], [1], [0], [0], [0, 0, 1, 0], [], []>} : vector<384x16xf32>, vector<384x16xf32>, vector<384x384xf32> -> vector<384x384xf32>
      %27 = math.absf %26 : vector<384x384xf32>
      %cst_19 = arith.constant dense<0.000000e+00> : vector<384x384xf32>
      %28 = tpu.matmul %25, %22, %cst_19 {dimension_numbers = #tpu.dot_dimension_numbers<[1], [1], [0], [0], [0, 0, 1, 0], [], []>} : vector<384x16xf32>, vector<384x16xf32>, vector<384x384xf32> -> vector<384x384xf32>
      %29 = math.absf %28 : vector<384x384xf32>
      %30 = tpu.iota {dimensions = array<i32: 0>} : vector<384x384xi32>
      %31 = tpu.iota {dimensions = array<i32: 1>} : vector<384x384xi32>
      %32 = arith.cmpi eq, %30, %31 : vector<384x384xi32>
      %cst_20 = arith.constant 1.000000e+00 : f32
      %33 = vector.broadcast %cst_20 : f32 to vector<384x384xf32>
      %34 = arith.select %32, %33, %27 : vector<384x384xi1>, vector<384x384xf32>
      %cst_21 = arith.constant 1.000000e+00 : f32
      %35 = vector.broadcast %cst_21 : f32 to vector<384x384xf32>
      %36 = arith.select %32, %35, %29 : vector<384x384xi1>, vector<384x384xf32>
      %cst_22 = arith.constant dense<0.000000e+00> : vector<384xf32>
      %37 = vector.multi_reduction <add>, %34, %cst_22 [1] : vector<384x384xf32> to vector<384xf32>
      %38 = vector.shape_cast %37 : vector<384xf32> to vector<384x1xf32>
      %39 = math.rsqrt %38 : vector<384x1xf32>
      %cst_23 = arith.constant dense<0.000000e+00> : vector<384xf32>
      %40 = vector.multi_reduction <add>, %36, %cst_23 [0] : vector<384x384xf32> to vector<384xf32>
      %41 = vector.shape_cast %40 : vector<384xf32> to vector<1x384xf32>
      %42 = math.rsqrt %41 : vector<1x384xf32>
      %43 = vector.broadcast %39 : vector<384x1xf32> to vector<384x384xf32>
      %44 = arith.mulf %43, %36 : vector<384x384xf32>
      %45 = vector.broadcast %42 : vector<1x384xf32> to vector<384x384xf32>
      %46 = arith.mulf %44, %45 : vector<384x384xf32>
      %c0_24 = arith.constant 0 : index
      %c0_25 = arith.constant 0 : index
      %47 = vector.load %arg7[%c0_24, %c0_25] : memref<384x384xf32, #tpu.memory_space<vmem>>, vector<384x384xf32>
      tpu.vector_store %arg7[%c0_24, %c0_25], %46 {strides = array<i32>} : memref<384x384xf32, #tpu.memory_space<vmem>>, vector<384x384xf32>,
    } else {
    }
    %c128_i32 = arith.constant 128 : i32
    %3 = arith.muli %arg0, %c128_i32 : i32
    %4 = tpu.assume_multiple %3, 128 : i32
    %5 = arith.index_cast %4 : i32 to index
    %c0 = arith.constant 0 : index
    %6 = vector.load %arg7[%5, %c0] : memref<384x384xf32, #tpu.memory_space<vmem>>, vector<128x384xf32>
    %c0_1 = arith.constant 0 : index
    %c0_2 = arith.constant 0 : index
    %7 = vector.load %arg5[%c0_1, %c0_2] : memref<128x384xf32, #tpu.memory_space<vmem>>, vector<128x384xf32>
    tpu.vector_store %arg5[%c0_1, %c0_2], %6 {strides = array<i32>} : memref<128x384xf32, #tpu.memory_space<vmem>>, vector<128x384xf32>,
    %c0_3 = arith.constant 0 : index
    %c0_4 = arith.constant 0 : index
    %8 = vector.load %arg7[%c0_3, %c0_4] : memref<384x384xf32, #tpu.memory_space<vmem>>, vector<384x384xf32>
    %cst = arith.constant dense<0.000000e+00> : vector<128x384xf32>
    %9 = tpu.matmul %6, %8, %cst {dimension_numbers = #tpu.dot_dimension_numbers<[1], [1], [0], [0], [0, 0, 1, 0], [], []>} : vector<128x384xf32>, vector<384x384xf32>, vector<128x384xf32> -> vector<128x384xf32>
    %10 = tpu.iota {dimensions = array<i32: 0>} : vector<128x384xi32>
    %c128_i32_5 = arith.constant 128 : i32
    %11 = arith.muli %arg0, %c128_i32_5 : i32
    %12 = vector.broadcast %11 : i32 to vector<128x384xi32>
    %13 = arith.addi %10, %12 : vector<128x384xi32>
    %14 = tpu.iota {dimensions = array<i32: 1>} : vector<128x384xi32>
    %15 = arith.cmpi eq, %13, %14 : vector<128x384xi32>
    %cst_6 = arith.constant 1.000000e+00 : f32
    %16 = vector.broadcast %cst_6 : f32 to vector<128x384xf32>
    %17 = arith.select %15, %16, %9 : vector<128x384xi1>, vector<128x384xf32>
    %18 = math.absf %17 : vector<128x384xf32>
    %c0_7 = arith.constant 0 : index
    %c0_8 = arith.constant 0 : index
    %19 = vector.load %arg6[%c0_7, %c0_8] : memref<128x384xf32, #tpu.memory_space<vmem>>, vector<128x384xf32>
    tpu.vector_store %arg6[%c0_7, %c0_8], %18 {strides = array<i32>} : memref<128x384xf32, #tpu.memory_space<vmem>>, vector<128x384xf32>,
    return
  }
  func.func @transform_0(%arg0: i32) -> (i32, i32) {
    %c0_i32 = arith.constant 0 : i32
    %c0_i32_0 = arith.constant 0 : i32
    %c0_i32_1 = arith.constant 0 : i32
    return %c0_i32, %c0_i32_0 : i32, i32
  }
  func.func @transform_1(%arg0: i32) -> (i32, i32) {
    %c0_i32 = arith.constant 0 : i32
    %c0_i32_0 = arith.constant 0 : i32
    %c0_i32_1 = arith.constant 0 : i32
    return %c0_i32, %c0_i32_0 : i32, i32
  }
  func.func @transform_2(%arg0: i32) -> (i32, i32) {
    %c0_i32 = arith.constant 0 : i32
    %c0_i32_0 = arith.constant 0 : i32
    %c0_i32_1 = arith.constant 0 : i32
    return %c0_i32, %c0_i32_0 : i32, i32
  }
  func.func @transform_3(%arg0: i32) -> (i32, i32) {
    %c0_i32 = arith.constant 0 : i32
    %c0_i32_0 = arith.constant 0 : i32
    %c0_i32_1 = arith.constant 0 : i32
    return %c0_i32, %c0_i32_0 : i32, i32
  }
  func.func @transform_4(%arg0: i32) -> (i32, i32) {
    %c0_i32 = arith.constant 0 : i32
    %c0_i32_0 = arith.constant 0 : i32
    return %arg0, %c0_i32 : i32, i32
  }
  func.func @transform_5(%arg0: i32) -> (i32, i32) {
    %c0_i32 = arith.constant 0 : i32
    %c0_i32_0 = arith.constant 0 : i32
    return %arg0, %c0_i32 : i32, i32
  }
}

</mosaic_0001>

<bundles_post_ra>
// kernel: custom-call.2
= control target key start
LH: loop header
LB: loop body
LE: loop exit
PB: predicated region body
PF: predicated region fallthrough
CT: control target
= control target key end

     0   :  { %s2389_s30 = smov [#allocation0]   ;;  %s2738_s0 = inlined_call_operand.vmem [shape: f32[8,8], index: 0, kind: input, shape index: {}]   ;;  %s2739_s1 = inlined_call_operand.vmem [shape: f32[8,8], index: 1, kind: input, shape index: {}]   ;;  %s2740_s2 = inlined_call_operand.vmem [shape: f32[8,8], index: 2, kind: input, shape index: {}]   ;;  %s2741_s3 = inlined_call_operand.vmem [shape: f32[8,8], index: 3, kind: input, shape index: {}]   ;;  %s2742_s4 = inlined_call_operand.vmem [shape: f32[8], index: 4, kind: output, shape index: {0}]   ;;  %s2743_s5 = inlined_call_operand.vmem [shape: f32[8], index: 5, kind: output, shape index: {1}]   ;;  %s2744_s6 = inlined_call_operand.vmem [shape: f32[8,8], index: 6, kind: output, shape index: {2}]   ;;  %s2745_s7 = inlined_call_operand.vmem [shape: f32[8,8], index: 7, kind: output, shape index: {3}]   ;;  %s2746_s8 = inlined_call_operand.vmem [shape: f32[8,8], index: 8, kind: output, shape index: {4}]   ;;  %s2747_s9 = inlined_call_operand.vmem [shape: f32[8,8], index: 9, kind: output, shape index: {5}]  }
   0x1   :  { %s2393_s12 = smov %s2738_s0  }
   0x2 LB: > { %v58_v0 = vld [vmem:[%s2395_s12] sm:$0xff]  ;;  %s60_s12 = scalar_lea.vmem %s2395_s12, 8   ;;  %s2395_s12 = sphi %s2393_s12, %s60_s12   ;;  %s2391_s30 = sphi %s2389_s30, %s61_s30  }
   0x3   : > { %59 = vst [vmem:[%s2391_s30] sm:$0xff] %v58_v0  ;;  %s61_s30 = scalar_lea.vmem %s2391_s30, 8   ;;  %p55_p0 = scmp.gt.s32.totalorder %s60_s12, %s2738_s0 }
   0x4   :  { %s2397_s15 = smov (%p55_p0), [#allocation1]   ;;  %s2401_s18 = smov (%p55_p0), %s2739_s1  }
   0x5   :  { %57 = sbr.rel (!%p55_p0) target bundleno = 2 (0x2), region = 358 }
   0xa LB: > { %v121_v1 = vld [vmem:[%s2403_s18] sm:$0xff]  ;;  %s123_s18 = scalar_lea.vmem %s2403_s18, 8   ;;  %s2403_s18 = sphi %s2401_s18, %s123_s18   ;;  %s2399_s15 = sphi %s2397_s15, %s124_s15  }
   0xb   : > { %122 = vst [vmem:[%s2399_s15] sm:$0xff] %v121_v1  ;;  %s124_s15 = scalar_lea.vmem %s2399_s15, 8   ;;  %p118_p1 = scmp.gt.s32.totalorder %s123_s18, %s2739_s1 }
   0xc   :  { %s2405_s0 = smov (%p118_p1), [#allocation2]   ;;  %s2409_s23 = smov (%p118_p1), %s2740_s2  }
   0xd   :  { %120 = sbr.rel (!%p118_p1) target bundleno = 10 (0xa), region = 380 }
  0x12 LB: > { %v184_v2 = vld [vmem:[%s2411_s23] sm:$0xff]  ;;  %s186_s23 = scalar_lea.vmem %s2411_s23, 8   ;;  %s2411_s23 = sphi %s2409_s23, %s186_s23   ;;  %s2407_s0 = sphi %s2405_s0, %s187_s0  }
  0x13   : > { %185 = vst [vmem:[%s2407_s0] sm:$0xff] %v184_v2  ;;  %s187_s0 = scalar_lea.vmem %s2407_s0, 8   ;;  %p181_p2 = scmp.gt.s32.totalorder %s186_s23, %s2740_s2 }
  0x14   :  { %s2413_s1 = smov (%p181_p2), [#allocation3]   ;;  %s2417_s28 = smov (%p181_p2), %s2741_s3  }
  0x15   :  { %183 = sbr.rel (!%p181_p2) target bundleno = 18 (0x12), region = 402 }
  0x1a LB: > { %v247_v3 = vld [vmem:[%s2419_s28] sm:$0xff]  ;;  %s249_s28 = scalar_lea.vmem %s2419_s28, 8   ;;  %s2419_s28 = sphi %s2417_s28, %s249_s28   ;;  %s2415_s1 = sphi %s2413_s1, %s250_s1  }
  0x1b   : > { %248 = vst [vmem:[%s2415_s1] sm:$0xff] %v247_v3  ;;  %s250_s1 = scalar_lea.vmem %s2415_s1, 8   ;;  %p244_p3 = scmp.gt.s32.totalorder %s249_s28, %s2741_s3 }
  0x1c   :  { %s263_s2 = smov (%p244_p3), [#allocation12]  ;;  %v264_v4 = vld [vmem:[#allocation0] sm:$0xff] (%p244_p3)  ;;  %s266_s10 = smov (%p244_p3), [#allocation13]  ;;  %v267_v5 = vld [vmem:[#allocation1] sm:$0xff] (%p244_p3)  ;;  %v270_v6 = vld [vmem:[#allocation2] sm:$0xff] (%p244_p3)  ;;  %v280_v7 = vlaneseq (%p244_p3)  ;;  %v2461_v9 = vmov (%p244_p3), 0.0  }
  0x1d   :  { %246 = sbr.rel (!%p244_p3) target bundleno = 26 (0x1a), region = 424  ;;  %265 = vst [vmem:[%s263_s2] sm:$0xff] (%p244_p3), %v264_v4  ;;  %268 = vst [vmem:[%s266_s10] sm:$0xff] (%p244_p3), %v267_v5  ;;  %s269_s11 = smov (%p244_p3), [#allocation14] }
  0x1e   :  { %s272_s12 = smov (%p244_p3), [#allocation15]  ;;  %275 = vst [vmem:[#allocation8] sm:$0xff] (%p244_p3), %v2461_v9  ;;  %276 = vst [vmem:[#allocation9] sm:$0xff] (%p244_p3), %v2461_v9  ;;  %v2538_v10 = vand.u32 (%p244_p3), 127, %v280_v7  ;;  %v2540_v11 = vshrl.u32 (%p244_p3), %v280_v7, 7  ;;  %s279_s3 = smov (%p244_p3), [#allocation8] }
  0x1f   :  { %277 = vst [vmem:[#allocation10] sm:$0xff] (%p244_p3), %v2461_v9  ;;  %278 = vst [vmem:[#allocation11] sm:$0xff] (%p244_p3), %v2461_v9  ;;  %s292_s13 = smov (%p244_p3), [#allocation11]  ;;  %s1415_s14 = smov (%p244_p3), [#allocation12] }
  0x20   :  { %271 = vst [vmem:[%s269_s11] sm:$0xff] (%p244_p3), %v270_v6  ;;  %v282_v10 = vmov (%p244_p3), %v2538_v10  ;;  %v285_v11 = vmov (%p244_p3), %v2540_v11  ;;  %vm1419_vm2 = vcmp.lt.s32.totalorder (%p244_p3), %v2538_v10, 8  ;;  %s1432_s15 = smov (%p244_p3), [#allocation13]  ;;  %s1449_s16 = smov (%p244_p3), [#allocation14] }
  0x21   :  { %v295_v10 = vmov (%p244_p3), %v2538_v10  ;;  %v298_v11 = vmov (%p244_p3), %v2540_v11  ;;  %vm289_vm0 = vcmp.eq.s32.totalorder (%p244_p3), %v285_v11, %v282_v10  ;;  %s1466_s17 = smov (%p244_p3), [#allocation15] }
  0x22   :  { %v273_v8 = vld [vmem:[#allocation3] sm:$0xff]  ;;  %vm302_vm1 = vcmp.eq.s32.totalorder %v298_v11, %v295_v10  ;;  %v1411_v10 = vmov %v2538_v10  ;;  %v1414_v11 = vmov %v2540_v11 }
  0x23   :  { %274 = vst [vmem:[%s272_s12] sm:$0xff] %v273_v8  ;;  %vm1424_vm3 = vcmp.eq.s32.totalorder %v1414_v11, %v1411_v10  ;;  %v1462_v10 = vmov %v2538_v10  ;;  %v1431_v11 = vmov %v2540_v11 }
  0x24   :  { %v1421_v16 = vld [vmem:[%s1415_s14] sm:$0xff]  ;;  %v1428_v10 = vmov %v2538_v10  ;;  %v1465_v11 = vmov %v2540_v11 }
  0x25   :  { %v286_v12 = vld [vmem:[%s279_s3] sm:$0xff]  ;;  %v1422_v18 = vsel %vm1419_vm2, %v1421_v16, 0.0  ;;  %v1445_v10 = vmov %v2538_v10  ;;  %v1448_v11 = vmov %v2540_v11  ;;  %vm1475_vm4 = vcmp.eq.s32.totalorder %v1465_v11, %v1462_v10 }
  0x26   :  { %v299_v13 = vld [vmem:[%s292_s13] sm:$0xff]  ;;  %v290_v14 = vsel %vm289_vm0, 1.0, %v286_v12  ;;  %v1423_v22 = vmul.f32 %v1422_v18, %v1422_v18 }
  0x27   :  { %v303_v15 = vsel %vm302_vm1, 1.0, %v299_v13  ;;  %291 = vst [vmem:[%s279_s3] sm:$0xff] %v290_v14  ;;  %v1438_v17 = vld [vmem:[%s1432_s15] sm:$0xff] }
  0x28   :  { %304 = vst [vmem:[%s292_s13] sm:$0xff] %v303_v15  ;;  %v1439_v19 = vsel %vm1419_vm2, %v1438_v17, 0.0  ;;  %v1455_v20 = vld [vmem:[%s1449_s16] sm:$0xff]  ;;  %v1425_v29 = vsel %vm1424_vm3, 0.0, %v1423_v22 }
  0x29   :  { %v1440_v23 = vmul.f32 %v1439_v19, %v1439_v19  ;;  %v1456_v24 = vsel %vm1419_vm2, %v1455_v20, 0.0 }
  0x2a   :  { %v1472_v21 = vld [vmem:[%s1466_s17] sm:$0xff]  ;;  %v1457_v26 = vmul.f32 %v1456_v24, %v1456_v24 }
  0x2b   :  { %v1473_v25 = vsel %vm1419_vm2, %v1472_v21, 0.0  ;;  %v1442_v27 = vadd.f32 %v1440_v23, %v1423_v22  ;;  %v1441_v30 = vadd.f32 %v1440_v23, %v1425_v29 }
  0x2c   :  { %v1474_v28 = vmul.f32 %v1473_v25, %v1473_v25 }
  0x2d   :  { %v1459_v31 = vadd.f32 %v1457_v26, %v1442_v27  ;;  %v1458_v32 = vadd.f32 %v1457_v26, %v1441_v30 }
  0x2e   :  { %v1476_v33 = vsel %vm1475_vm4, 0.0, %v1474_v28 }
  0x2f   :  { %v1478_v34 = vadd.f32 %v1474_v28, %v1459_v31  ;;  %v1477_v35 = vadd.f32 %v1476_v33, %v1458_v32 }
  0x31   :  { %1479 = vadd.xlane.f32.xlu0 %v1478_v34 }
  0x35   :  { %1487 = vadd.xlane.f32.xlu0 %v1477_v35 }
  0xba   :  { %v1480_v36 = vpop.xlane.xlu0 %1479 }
  0xbb   :  { %v1481_v37 = vrot.slane %v1480_v36, 4 }
  0xbd   :  { %v1482_v38 = vadd.f32 %v1481_v37, %v1480_v36 }
  0xbe   :  { %v1488_v39 = vpop.xlane.xlu0 %1487 }
  0xbf   :  { %v1483_v40 = vrot.slane %v1482_v38, 2  ;;  %v1489_v41 = vrot.slane %v1488_v39, 4 }
  0xc1   :  { %v1490_v42 = vadd.f32 %v1489_v41, %v1488_v39  ;;  %v1484_v43 = vadd.f32 %v1483_v40, %v1482_v38 }
  0xc3   :  { %v1491_v44 = vrot.slane %v1490_v42, 2  ;;  %v1485_v46 = vrot.slane %v1484_v43, 1 }
  0xc5   :  { %v1492_v45 = vadd.f32 %v1491_v44, %v1490_v42  ;;  %v1486_v49 = vadd.f32 %v1485_v46, %v1484_v43 }
  0xc7   :  { %v1493_v47 = vrot.slane %v1492_v45, 1 }
  0xc9   :  { %v1494_v48 = vadd.f32 %v1493_v47, %v1492_v45 }
  0xcb   :  { %1670 = vpush %v1494_v48 }
  0xcc   :  { %1672 = vpush %v1486_v49 }
  0xfc   :  { %s1671_s18 = spop %1670 }
  0xfd   :  { %s1673_s19 = spop %1672 }
  0xfe   :  { %s1497_s20 = smul.f32 1e-10, %s1673_s19 }
 0x100   :  { %p1498_p4 = scmp.le.f32.partialorder %s1671_s18, %s1497_s20 }
 0x101   :  { %s2564_s0 = smov (!%p1498_p4), 0  }
 0x102   :  { %1501 = sbr.rel (%p1498_p4) target bundleno = 940 (0x3ac), region = 440 }
 0x107 LB: > { %s2569_s21 = smov 0   ;;  %s2423_s0 = sphi %s2564_s0, %s2748_s0  }
 0x108 LB: >> { %s409_s22 = smov [#allocation12]  ;;  %v413_v10 = vmov %v2538_v10  ;;  %v416_v11 = vmov %v2540_v11  ;;  %s429_s23 = smov [#allocation13]  ;;  %vm732_vm14 = vcmp.eq.s32.totalorder %v2540_v11, 0  ;;  %vm744_vm15 = vcmp.eq.s32.totalorder %v2540_v11, 7  ;;  %s2427_s21 = sphi %s2569_s21, %s408_s21  }
 0x109   : >> { %v433_v10 = vmov %v2538_v10  ;;  %v436_v11 = vmov %v2540_v11  ;;  %v417_v50 = vld [vmem:[%s409_s22] sm:$0xff]  ;;  %vm420_vm5 = vcmp.eq.s32.totalorder %v416_v11, %v413_v10  ;;  %s449_s24 = smov [#allocation15]  ;;  %s410_s25 = smov [#allocation16] }
 0x10a   : >> { %vm440_vm6 = vcmp.eq.s32.totalorder %v436_v11, %v433_v10  ;;  %v453_v10 = vmov %v2538_v10  ;;  %v456_v11 = vmov %v2540_v11  ;;  %v421_v51 = vsel %vm420_vm5, %v417_v50, 0.0  ;;  %v437_v52 = vld [vmem:[%s429_s23] sm:$0xff]  ;;  %s430_s1 = smov [#allocation17]  ;;  %s450_s26 = smov [#allocation18] }
 0x10b   : >> { %vm460_vm7 = vcmp.eq.s32.totalorder %v456_v11, %v453_v10  ;;  %v422_v53 = vrot.slane %v421_v51, 4  ;;  %v441_v54 = vsel %vm440_vm6, %v437_v52, 0.0  ;;  %v457_v55 = vld [vmem:[%s449_s24] sm:$0xff]  ;;  %s473_s27 = smov [#allocation17]  ;;  %s471_s28 = smov [#allocation16]  ;;  %v522_v10 = vmov %v2538_v10 }
 0x10c   : >> { %v442_v56 = vrot.slane %v441_v54, 4  ;;  %v461_v57 = vsel %vm460_vm7, %v457_v55, 0.0  ;;  %s475_s29 = smov [#allocation18]  ;;  %s510_s30 = smov [#allocation19]  ;;  %v525_v11 = vmov %v2540_v11  ;;  %v537_v10 = vmov %v2538_v10 }
 0x10d   : >> { %v423_v58 = vadd.f32 %v422_v53, %v421_v51  ;;  %v462_v59 = vrot.slane %v461_v57, 4  ;;  %s512_s2 = smov [#allocation20]  ;;  %s469_s10 = smov [#allocation21]  ;;  %v540_v11 = vmov %v2540_v11  ;;  %vm527_vm12 = vcmp.eq.s32.totalorder %v525_v11, %v522_v10 }
 0x10e   : >> { %v443_v60 = vadd.f32 %v442_v56, %v441_v54  ;;  %s470_s11 = smov [#allocation22]  ;;  %s514_s10 = smov %s469_s10  ;;  %vm542_vm13 = vcmp.eq.s32.totalorder %v540_v11, %v537_v10  ;;  %v635_v10 = vmov %v2538_v10  ;;  %v638_v11 = vmov %v2540_v11 }
 0x10f   : >> { %v424_v61 = vrot.slane %v423_v58, 2  ;;  %v463_v62 = vadd.f32 %v462_v59, %v461_v57  ;;  %s516_s11 = smov %s470_s11  ;;  %s518_s12 = smov [#allocation21]  ;;  %v608_v10 = vmov %v2538_v10  ;;  %v611_v11 = vmov %v2540_v11 }
 0x110   : >> { %v444_v63 = vrot.slane %v443_v60, 2  ;;  %s533_s3 = smov [#allocation22]  ;;  %s531_s13 = smov [#allocation23]  ;;  %v649_v10 = vmov %v2538_v10  ;;  %v652_v11 = vmov %v2540_v11  ;;  %vm642_vm0 = vcmp.eq.s32.totalorder %v638_v11, %v635_v10 }
 0x111   : >> { %v425_v0 = vadd.f32 %v424_v61, %v423_v58  ;;  %v464_v1 = vrot.slane %v463_v62, 2  ;;  %s548_s14 = smov [#allocation23]  ;;  %s2584_s15 = smov [#allocation12]  ;;  %v622_v10 = vmov %v2538_v10  ;;  %v625_v11 = vmov %v2540_v11 }
 0x112   : >> { %v445_v2 = vadd.f32 %v444_v63, %v443_v60  ;;  %s546_s16 = smov [#allocation24]  ;;  %s2586_s17 = smov [#allocation13]  ;;  %v556_v49 = vld [vmem:[%s2584_s15] sm:$0xff]  ;;  %vm616_vm1 = vcmp.eq.s32.totalorder %v611_v11, %v608_v10  ;;  %vm657_vm3 = vcmp.eq.s32.totalorder %v652_v11, %v649_v10  ;;  %vm629_vm4 = vcmp.eq.s32.totalorder %v625_v11, %v622_v10 }
 0x113   : >> { %v426_v3 = vrot.slane %v425_v0, 1  ;;  %v465_v4 = vadd.f32 %v464_v1, %v463_v62  ;;  %s2588_s18 = smov [#allocation15]  ;;  %s772_s19 = smov [#allocation23]  ;;  %v557_v50 = vld [vmem:[%s2586_s17] sm:$0xff]  ;;  %vm671_vm5 = vcmp.eq.s32.totalorder %v2538_v10, 0  ;;  %vm675_vm6 = vcmp.eq.s32.totalorder %v2538_v10, 1 }
 0x114   : >> { %v446_v5 = vrot.slane %v445_v2, 1  ;;  %s2590_s20 = smov [#allocation8]  ;;  %s2592_s22 = smov [#allocation9]  ;;  %v559_v51 = vld [vmem:[%s2588_s18] sm:$0xff]  ;;  %vm688_vm7 = vcmp.eq.s32.totalorder %v2538_v10, 7 }
 0x115   : >> { %v427_v6 = vadd.f32 %v426_v3, %v425_v0  ;;  %v466_v7 = vrot.slane %v465_v4, 1  ;;  %s2594_s23 = smov [#allocation10]  ;;  %s2597_s24 = smov [#allocation11]  ;;  %v780_v52 = vld [vmem:[%s2590_s20] sm:$0xff] }
 0x116   : >> { %v447_v8 = vadd.f32 %v446_v5, %v445_v2  ;;  %v781_v53 = vld [vmem:[%s2592_s22] sm:$0xff]  ;;  %s408_s21 = sadd.s32 1, %s2427_s21  }
 0x117   : >> { %428 = vst [vmem:[%s410_s25] sm:$0x1] %v427_v6  ;;  %v467_v9 = vadd.f32 %v466_v7, %v465_v4  ;;  %s2599_s25 = smov [#allocation14]  ;;  %v782_v56 = vld [vmem:[%s2594_s23] sm:$0xff]  ;;  %p405_p5 = scmp.ge.s32.totalorder %s408_s21, 15  }
 0x118   : >> { %448 = vst [vmem:[%s430_s1] sm:$0x1] %v447_v8  ;;  %v783_v57 = vld [vmem:[%s2597_s24] sm:$0xff]  ;;  %s550_s1 = smov [#allocation24]  ;;  %v309_v10 = vmov (%p405_p5), %v2538_v10  ;;  %v312_v11 = vmov (%p405_p5), %v2540_v11 }
 0x119   : >> { %468 = vst [vmem:[%s450_s26] sm:$0x1] %v467_v9  ;;  %s774_s26 = smov [#allocation24]  ;;  %v558_v58 = vld [vmem:[%s2599_s25] sm:$0xff]  ;;  %v362_v10 = vmov (%p405_p5), %v2538_v10 }
 0x11e   : >> { %v472_v14 = vld [vmem:[%s471_s28] sm:$0xff]  ;;  %s801_s28 = smov [#allocation10] }
 0x11f   : >> { %v474_v12 = vld [vmem:[%s473_s27] sm:$0xff]  ;;  %v495_v29 = vand.u32 2147483647, %v472_v14  ;;  %s800_s27 = smov [#allocation8] }
 0x120   : >> { %v478_v13 = vmul.f32 2.0, %v474_v12  ;;  %v476_v15 = vld [vmem:[%s475_s29] sm:$0xff]  ;;  %v496_v32 = vand.u32 2147483647, %v474_v12  ;;  %s576_s29 = smov [#allocation21] }
 0x121   : >> { %v477_v16 = vsub.f32 %v476_v15, %v472_v14  ;;  %v497_v30 = vand.u32 2147483647, %v476_v15 }
 0x122   : >> { %2149 = vrcp.f32 %v478_v13 }
 0x123   : >> { %v498_v31 = vmin.f32 %v495_v29, %v497_v30 }
 0x125   : >> { %v499_v33 = vmul.f32 1.1920929e-08, %v498_v31 }
 0x127   : >> { %vm500_vm11 = vcmp.le.f32.partialorder %v496_v32, %v499_v33 }
 0x12f   : >> { %v2150_v17 = vpop.eup %2149 }
 0x130   : >> { %v480_v18 = vmul.f32 %v2150_v17, %v477_v16 }
 0x132   : >> { %v482_v19 = vmul.f32 %v480_v18, %v480_v18  ;;  %vm481_vm10 = vcmp.ge.f32.partialorder %v480_v18, 0.0 }
 0x134   : >> { %v483_v20 = vadd.f32 1.0, %v482_v19 }
 0x136   : >> { %2151 = vrsqrt.f32 %v483_v20  ;;  %vm486_vm8 = vcmp.eq.f32.partialorder %v483_v20, inf  ;;  %v489_v22 = vand.u32 2147483648, %v483_v20  ;;  %vm488_vm9 = vcmp.eq.f32.partialorder %v483_v20, 0.0 }
 0x143   : >> { %v2152_v21 = vpop.eup %2151 }
 0x144   : >> { %v485_v23 = vmul.f32 %v2152_v21, %v483_v20 }
 0x146   : >> { %v487_v24 = vsel %vm486_vm8, %v483_v20, %v485_v23  ;;  %vm324_vm8 = vcmp.eq.s32.totalorder (%p405_p5), %v312_v11, %v309_v10  ;;  %v365_v11 = vmov (%p405_p5), %v2540_v11  ;;  %v328_v10 = vmov (%p405_p5), %v2538_v10 }
 0x147   : >> { %v490_v25 = vsel %vm488_vm9, %v489_v22, %v487_v24  ;;  %v331_v11 = vmov (%p405_p5), %v2540_v11  ;;  %v345_v10 = vmov (%p405_p5), %v2538_v10  ;;  %vm377_vm9 = vcmp.eq.s32.totalorder (%p405_p5), %v365_v11, %v362_v10 }
 0x148   : >> { %v491_v26 = vxor.u32 2147483648, %v490_v25  ;;  %v348_v11 = vmov (%p405_p5), %v2540_v11 }
 0x14a   : >> { %v492_v27 = vsel %vm481_vm10, %v490_v25, %v491_v26 }
 0x14b   : >> { %v493_v28 = vadd.f32 %v492_v27, %v480_v18 }
 0x14d   : >> { %2153 = vrcp.f32 %v493_v28 }
 0x15a   : >> { %v2154_v34 = vpop.eup %2153 }
 0x15b   : >> { %v501_v35 = vsel %vm500_vm11, 0.0, %v2154_v34 }
 0x15c   : >> { %v502_v36 = vmul.f32 %v501_v35, %v501_v35  ;;  %v506_v37 = vmul.f32 %v501_v35, %v474_v12 }
 0x15e   : >> { %v503_v38 = vadd.f32 1.0, %v502_v36  ;;  %v507_v39 = vsub.f32 %v472_v14, %v506_v37  ;;  %v509_v40 = vadd.f32 %v506_v37, %v476_v15 }
 0x160   : >> { %2155 = vrsqrt.f32 %v503_v38  ;;  %511 = vst [vmem:[%s510_s30] sm:$0xff] %v507_v39  ;;  %513 = vst [vmem:[%s512_s2] sm:$0xff] %v509_v40  ;;  %s578_s30 = smov [#allocation22]  ;;  %s2616_s2 = smov [#allocation9] }
 0x16d   : >> { %v2156_v41 = vpop.eup %2155 }
 0x16e   : >> { %515 = vst [vmem:[%s514_s10] sm:$0xff] %v2156_v41  ;;  %v505_v42 = vmul.f32 %v2156_v41, %v501_v35  ;;  %s2618_s10 = smov [#allocation11] }
 0x170   : >> { %517 = vst [vmem:[%s516_s11] sm:$0xff] %v505_v42  ;;  %s2622_s11 = smov [#allocation14] }
 0x175   : >> { %v519_v43 = vld [vmem:[%s518_s12] ss:$0 sm:$0xff]  ;;  %s2624_s12 = smov [#allocation15] }
 0x176   : >> { %v528_v44 = vsel %vm527_vm12, %v519_v43, 0.0  ;;  %v577_v23 = vld [vmem:[%s576_s29] ss:$0 sm:$0xff]  ;;  %s749_s29 = smov [#allocation15] }
 0x177   : >> { %529 = vadd.xlane.f32.xlu0 %v528_v44  ;;  %v534_v45 = vld [vmem:[%s533_s3] ss:$0 sm:$0xff]  ;;  %s2626_s3 = smov [#allocation12] }
 0x178   : >> { %v543_v46 = vsel %vm542_vm13, %v534_v45, 0.0  ;;  %v579_v24 = vld [vmem:[%s578_s30] ss:$0 sm:$0xff]  ;;  %s848_s30 = sadd.s32 (%p405_p5), 1, %s2423_s0  }
 0x179   : > { %p401_p6 = scmp.ge.s32.totalorder (%p405_p5), %s848_s30, 15  ;;  %s2748_s0 = smov (%p405_p5), %s848_s30 }
 0x17b   : >> { %544 = vadd.xlane.f32.xlu0 %v543_v46 }
 0x200   : >> { %v530_v47 = vpop.xlane.xlu0 %529 }
 0x201   : >> { %532 = vst [vmem:[%s531_s13] sm:$0xff] %v530_v47  ;;  %s2628_s13 = smov [#allocation13] }
 0x204   : >> { %v545_v48 = vpop.xlane.xlu0 %544 }
 0x205   : >> { %547 = vst [vmem:[%s546_s16] sm:$0xff] %v545_v48  ;;  %s632_s16 = smov [#allocation14] }
 0x208   : >> { %v549_v54 = vld [vmem:[%s548_s14] sm:$0xff]  ;;  %s605_s14 = smov [#allocation19] }
 0x209   : >> { %v773_v55 = vld [vmem:[%s772_s19] sm:$0xff]  ;;  %v560_v59 = vmul.f32 %v556_v49, %v549_v54  ;;  %v563_v60 = vmul.f32 %v557_v50, %v549_v54  ;;  %v570_v61 = vmul.f32 %v559_v51, %v549_v54  ;;  %v567_v4 = vmul.f32 %v558_v58, %v549_v54  ;;  %s619_s19 = smov [#allocation13] }
 0x20a   : >> { %v784_v62 = vmul.f32 %v780_v52, %v773_v55  ;;  %v787_v63 = vmul.f32 %v781_v53, %v773_v55  ;;  %v791_v0 = vmul.f32 %v782_v56, %v773_v55  ;;  %v794_v1 = vmul.f32 %v783_v57, %v773_v55  ;;  %v612_v55 = vld [vmem:[%s605_s14] ss:$0 sm:$0xff] }
 0x20c   : >> { %v551_v2 = vld [vmem:[%s550_s1] sm:$0xff]  ;;  %s2665_s1 = smov [#allocation15] }
 0x20d   : >> { %v775_v3 = vld [vmem:[%s774_s26] sm:$0xff]  ;;  %v564_v5 = vmul.f32 %v559_v51, %v551_v2  ;;  %v566_v6 = vmul.f32 %v556_v49, %v551_v2  ;;  %v569_v7 = vmul.f32 %v557_v50, %v551_v2  ;;  %v561_v14 = vmul.f32 %v558_v58, %v551_v2  ;;  %s724_s26 = smov [#allocation12] }
 0x20e   : >> { %v785_v8 = vmul.f32 %v782_v56, %v775_v3  ;;  %v788_v9 = vmul.f32 %v783_v57, %v775_v3  ;;  %v790_v12 = vmul.f32 %v780_v52, %v775_v3  ;;  %v793_v13 = vmul.f32 %v781_v53, %v775_v3 }
 0x20f   : >> { %v565_v15 = vsub.f32 %v563_v60, %v564_v5  ;;  %v571_v16 = vadd.f32 %v570_v61, %v569_v7  ;;  %v568_v18 = vadd.f32 %v567_v4, %v566_v6  ;;  %v562_v22 = vsub.f32 %v560_v59, %v561_v14 }
 0x210   : >> { %v786_v17 = vsub.f32 %v784_v62, %v785_v8  ;;  %v789_v19 = vsub.f32 %v787_v63, %v788_v9  ;;  %v792_v20 = vadd.f32 %v791_v0, %v790_v12  ;;  %v795_v21 = vadd.f32 %v794_v1, %v793_v13 }
 0x211   : >> { %573 = vst [vmem:[%s2586_s17] sm:$0xff] %v565_v15  ;;  %575 = vst [vmem:[%s2588_s18] sm:$0xff] %v571_v16  ;;  %s604_s17 = smov [#allocation12]  ;;  %s645_s18 = smov [#allocation15] }
 0x212   : >> { %796 = vst [vmem:[%s2590_s20] sm:$0xff] %v786_v17  ;;  %574 = vst [vmem:[%s2599_s25] sm:$0xff] %v568_v18  ;;  %s2662_s20 = smov [#allocation14]  ;;  %s2463_s25 = smov 127  }
 0x213   : >> { %797 = vst [vmem:[%s2592_s22] sm:$0xff] %v789_v19  ;;  %798 = vst [vmem:[%s2594_s23] sm:$0xff] %v792_v20  ;;  %s660_s22 = smov [#allocation12]  ;;  %s2462_s23 = smov 1  }
 0x214   : >> { %799 = vst [vmem:[%s2597_s24] sm:$0xff] %v795_v21  ;;  %572 = vst [vmem:[%s2584_s15] sm:$0xff] %v562_v22  ;;  %s646_s15 = smov [#allocation20]  ;;  %s661_s24 = smov [#allocation13] }
 0x215   : >> { %v653_v56 = vld [vmem:[%s646_s15] ss:$0 sm:$0xff] }
 0x218   : >> { %v587_v39 = vld [vmem:[%s2624_s12] sm:$0xff] }
 0x219   : >> { %v802_v25 = vld [vmem:[%s800_s27] ss:$0 sm:$0xff]  ;;  %v1641_v27 = vld [vmem:[%s800_s27 + $0x7] ss:$0 sm:$0xff]  ;;  %v595_v42 = vmul.f32 %v587_v39, %v579_v24  ;;  %v598_v46 = vmul.f32 %v587_v39, %v577_v23 }
 0x21a   : >> { %v1640_v26 = vld [vmem:[%s800_s27 - $0x1] sm:$0xfe]  ;;  %v1645_v34 = vld [vmem:[%s2616_s2 + $0x7] ss:$0 sm:$0xff] }
 0x21b   : >> { %v809_v28 = vsel %vm732_vm14, %v802_v25, %v1640_v26  ;;  %v813_v29 = vld [vmem:[%s801_s28] ss:$0 sm:$0xff]  ;;  %v1643_v30 = vld [vmem:[%s801_s28 + $0x1] sm:$0x7f] }
 0x21c   : >> { %v826_v31 = vld [vmem:[%s2616_s2] ss:$0 sm:$0xff]  ;;  %812 = vst [vmem:[%s800_s27] sm:$0xff] %v809_v28  ;;  %v821_v32 = vsel %vm744_vm15, %v1641_v27, %v1643_v30  ;;  %v1647_v37 = vld [vmem:[%s2618_s10 + $0x1] sm:$0x7f] }
 0x21d   : >> { %v1644_v33 = vld [vmem:[%s2616_s2 - $0x1] sm:$0xfe]  ;;  %1642 = vst [vmem:[%s800_s27 + $0x1] sm:$0x1] %v813_v29  ;;  %823 = vst [vmem:[%s801_s28] sm:$0xff] %v821_v32  ;;  %v845_v40 = vsel %vm744_vm15, %v1645_v34, %v1647_v37  ;;  %s748_s27 = smov [#allocation13]  ;;  %s725_s28 = smov [#allocation14] }
 0x21e   : >> { %v837_v35 = vld [vmem:[%s2618_s10] ss:$0 sm:$0xff]  ;;  %v833_v36 = vsel %vm732_vm14, %v826_v31, %v1644_v33 }
 0x21f   : >> { %v586_v38 = vld [vmem:[%s2622_s11] sm:$0xff]  ;;  %836 = vst [vmem:[%s2616_s2] sm:$0xff] %v833_v36  ;;  %847 = vst [vmem:[%s2618_s10] sm:$0xff] %v845_v40  ;;  %s332_s10 = smov (%p405_p5), [#allocation13] }
 0x220   : >> { %v594_v41 = vmul.f32 %v586_v38, %v577_v23  ;;  %v597_v43 = vmul.f32 %v586_v38, %v579_v24  ;;  %v584_v44 = vld [vmem:[%s2626_s3] sm:$0xff]  ;;  %1646 = vst [vmem:[%s2616_s2 + $0x1] sm:$0x1] %v837_v35  ;;  %s313_s2 = smov (%p405_p5), [#allocation12] }
 0x221   : >> { %v585_v45 = vld [vmem:[%s2628_s13] sm:$0xff]  ;;  %v588_v47 = vmul.f32 %v584_v44, %v577_v23  ;;  %v591_v49 = vmul.f32 %v584_v44, %v579_v24 }
 0x222   : >> { %v589_v48 = vmul.f32 %v585_v45, %v579_v24  ;;  %v596_v50 = vsub.f32 %v594_v41, %v595_v42  ;;  %v592_v51 = vmul.f32 %v585_v45, %v577_v23  ;;  %v599_v52 = vadd.f32 %v598_v46, %v597_v43 }
 0x224   : >> { %v590_v53 = vsub.f32 %v588_v47, %v589_v48  ;;  %602 = vst [vmem:[%s2622_s11] sm:$0xff] %v596_v50  ;;  %v593_v54 = vadd.f32 %v592_v51, %v591_v49  ;;  %603 = vst [vmem:[%s2624_s12] sm:$0xff] %v599_v52  ;;  %s349_s11 = smov (%p405_p5), [#allocation14]  ;;  %s366_s12 = smov (%p405_p5), [#allocation15] }
 0x226   : >> { %600 = vst [vmem:[%s2626_s3] sm:$0xff] %v590_v53  ;;  %601 = vst [vmem:[%s2628_s13] sm:$0xff] %v593_v54 }
 0x22b   : >> { %v639_v57 = vld [vmem:[%s632_s16] sm:$0xff] }
 0x22c   : >> { %v643_v58 = vsel %vm642_vm0, 0.0, %v639_v57  ;;  %v654_v60 = vld [vmem:[%s645_s18] sm:$0xff] }
 0x22d   : >> { %v613_v59 = vld [vmem:[%s604_s17] sm:$0xff]  ;;  %644 = vst [vmem:[%s632_s16] sm:$0xff] %v643_v58  ;;  %v658_v63 = vsel %vm657_vm3, %v653_v56, %v654_v60 }
 0x22e   : >> { %v617_v61 = vsel %vm616_vm1, %v612_v55, %v613_v59  ;;  %v626_v62 = vld [vmem:[%s619_s19] sm:$0xff]  ;;  %659 = vst [vmem:[%s645_s18] sm:$0xff] %v658_v63 }
 0x22f   : >> { %618 = vst [vmem:[%s604_s17] sm:$0xff] %v617_v61  ;;  %v630_v0 = vsel %vm629_vm4, 0.0, %v626_v62 }
 0x230   : >> { %631 = vst [vmem:[%s619_s19] sm:$0xff] %v630_v0 }
 0x234   : >> { %v698_v1 = vld [vmem:[%s2662_s20] sm:$0xff] }
 0x235   : >> { %699 = vrot.lane.b32.xlu0 %v698_v1, %s2462_s23  ;;  %v694_v4 = vld [vmem:[%s2665_s1] sm:$0xff] }
 0x236   : >> { %v666_v2 = vld [vmem:[%s660_s22] sm:$0xff] }
 0x237   : >> { %667 = vrot.lane.b32.xlu1 %v666_v2, %s2462_s23  ;;  %v662_v3 = vld [vmem:[%s661_s24] sm:$0xff] }
 0x23b   : >> { %663 = vrot.lane.b32.xlu1 %v662_v3, %s2462_s23 }
 0x23f   : >> { %684 = vrot.lane.b32.xlu1 %v662_v3, %s2463_s25 }
 0x243   : >> { %695 = vrot.lane.b32.xlu1 %v694_v4, %s2462_s23 }
 0x247   : >> { %716 = vrot.lane.b32.xlu1 %v694_v4, %s2463_s25 }
 0x2a7   : >> { %v700_v13 = vpop.permute.xlu0 %699 }
 0x2a8   : >> { %v704_v15 = vsel %vm671_vm5, %v698_v1, %v700_v13 }
 0x2a9   : >> { %v668_v5 = vpop.permute.xlu1 %667 }
 0x2aa   : >> { %v672_v6 = vsel %vm671_vm5, %v666_v2, %v668_v5 }
 0x2ad   : >> { %v664_v7 = vpop.permute.xlu1 %663 }
 0x2ae   : >> { %v676_v8 = vsel %vm675_vm6, %v664_v7, %v672_v6 }
 0x2af   : >> { %v682_v9 = vsel %vm1419_vm2, %v676_v8, 0.0 }
 0x2b0   : >> { %690 = vst [vmem:[%s660_s22] sm:$0xff] %v682_v9 }
 0x2b1   : >> { %v685_v12 = vpop.permute.xlu1 %684 }
 0x2b2   : >> { %v689_v14 = vsel %vm688_vm7, %v666_v2, %v685_v12 }
 0x2b3   : >> { %691 = vst [vmem:[%s661_s24] sm:$0xff] %v689_v14 }
 0x2b5   : >> { %v696_v16 = vpop.permute.xlu1 %695 }
 0x2b6   : >> { %v708_v17 = vsel %vm675_vm6, %v696_v16, %v704_v15 }
 0x2b7   : >> { %v726_v18 = vld [vmem:[%s724_s26] ss:$0 sm:$0xff]  ;;  %v1633_v20 = vld [vmem:[%s724_s26 + $0x7] ss:$0 sm:$0xff]  ;;  %v714_v22 = vsel %vm1419_vm2, %v708_v17, 0.0 }
 0x2b8   : >> { %v1632_v19 = vld [vmem:[%s724_s26 - $0x1] sm:$0xfe]  ;;  %722 = vst [vmem:[%s2662_s20] sm:$0xff] %v714_v22 }
 0x2b9   : >> { %v733_v21 = vsel %vm732_vm14, %v726_v18, %v1632_v19  ;;  %v717_v23 = vpop.permute.xlu1 %716 }
 0x2ba   : >> { %736 = vst [vmem:[%s724_s26] sm:$0xff] %v733_v21  ;;  %v750_v24 = vld [vmem:[%s748_s27] ss:$0 sm:$0xff]  ;;  %v1637_v26 = vld [vmem:[%s748_s27 + $0x7] ss:$0 sm:$0xff]  ;;  %v721_v27 = vsel %vm688_vm7, %v698_v1, %v717_v23 }
 0x2bb   : >> { %v1636_v25 = vld [vmem:[%s748_s27 - $0x1] sm:$0xfe]  ;;  %723 = vst [vmem:[%s2665_s1] sm:$0xff] %v721_v27 }
 0x2bc   : >> { %v757_v28 = vsel %vm732_vm14, %v750_v24, %v1636_v25 }
 0x2bd   : >> { %760 = vst [vmem:[%s748_s27] sm:$0xff] %v757_v28 }
 0x2bf   : >> { %v737_v29 = vld [vmem:[%s725_s28] ss:$0 sm:$0xff]  ;;  %v1635_v30 = vld [vmem:[%s725_s28 + $0x1] sm:$0x7f] }
 0x2c0   : >> { %1634 = vst [vmem:[%s724_s26 + $0x1] sm:$0x1] %v737_v29  ;;  %v745_v31 = vsel %vm744_vm15, %v1633_v20, %v1635_v30 }
 0x2c1   : >> { %747 = vst [vmem:[%s725_s28] sm:$0xff] %v745_v31 }
 0x2c2   : >> { %v761_v32 = vld [vmem:[%s749_s29] ss:$0 sm:$0xff]  ;;  %v1639_v33 = vld [vmem:[%s749_s29 + $0x1] sm:$0x7f] }
 0x2c3   : >> { %1638 = vst [vmem:[%s748_s27 + $0x1] sm:$0x1] %v761_v32  ;;  %v769_v34 = vsel %vm744_vm15, %v1637_v26, %v1639_v33 }
 0x2c4   : >> { %771 = vst [vmem:[%s749_s29] sm:$0xff] %v769_v34  ;;  %407 = sbr.rel (!%p405_p5) target bundleno = 264 (0x108), region = 435 }
 0x2c7   : > { %v319_v35 = vld [vmem:[%s313_s2] sm:$0xff] (%p405_p5) }
 0x2c8   : > { %v320_v37 = vsel (%p405_p5), %vm1419_vm2, %v319_v35, 0.0  ;;  %v355_v39 = vld [vmem:[%s349_s11] sm:$0xff] (%p405_p5) }
 0x2c9   : > { %v321_v41 = vmul.f32 %v320_v37, %v320_v37  ;;  %v356_v43 = vsel %vm1419_vm2, %v355_v39, 0.0 }
 0x2ca   : > { %v338_v36 = vld [vmem:[%s332_s10] sm:$0xff]  ;;  %v357_v45 = vmul.f32 %v356_v43, %v356_v43 }
 0x2cb   : > { %v339_v38 = vsel %vm1419_vm2, %v338_v36, 0.0  ;;  %v372_v40 = vld [vmem:[%s366_s12] sm:$0xff]  ;;  %v325_v48 = vsel %vm324_vm8, 0.0, %v321_v41 }
 0x2cc   : > { %v340_v42 = vmul.f32 %v339_v38, %v339_v38  ;;  %v373_v44 = vsel %vm1419_vm2, %v372_v40, 0.0 }
 0x2cd   : > { %v374_v47 = vmul.f32 %v373_v44, %v373_v44 }
 0x2ce   : > { %v342_v46 = vadd.f32 %v340_v42, %v321_v41  ;;  %v341_v49 = vadd.f32 %v340_v42, %v325_v48 }
 0x2cf   : > { %v378_v52 = vsel %vm377_vm9, 0.0, %v374_v47 }
 0x2d0   : > { %v359_v50 = vadd.f32 %v357_v45, %v342_v46  ;;  %v358_v51 = vadd.f32 %v357_v45, %v341_v49 }
 0x2d2   : > { %v380_v53 = vadd.f32 %v374_v47, %v359_v50  ;;  %v379_v54 = vadd.f32 %v378_v52, %v358_v51 }
 0x2d4   : > { %381 = vadd.xlane.f32.xlu0 %v380_v53 }
 0x2d8   : > { %389 = vadd.xlane.f32.xlu0 %v379_v54 }
 0x35d   : > { %v382_v55 = vpop.xlane.xlu0 %381 }
 0x35e   : > { %v383_v56 = vrot.slane %v382_v55, 4 }
 0x360   : > { %v384_v57 = vadd.f32 %v383_v56, %v382_v55 }
 0x361   : > { %v390_v58 = vpop.xlane.xlu0 %389 }
 0x362   : > { %v385_v59 = vrot.slane %v384_v57, 2  ;;  %v391_v60 = vrot.slane %v390_v58, 4 }
 0x364   : > { %v392_v61 = vadd.f32 %v391_v60, %v390_v58  ;;  %v386_v62 = vadd.f32 %v385_v59, %v384_v57 }
 0x366   : > { %v393_v63 = vrot.slane %v392_v61, 2  ;;  %v387_v1 = vrot.slane %v386_v62, 1 }
 0x368   : > { %v394_v0 = vadd.f32 %v393_v63, %v392_v61  ;;  %v388_v4 = vadd.f32 %v387_v1, %v386_v62 }
 0x36a   : > { %v395_v2 = vrot.slane %v394_v0, 1 }
 0x36c   : > { %v396_v3 = vadd.f32 %v395_v2, %v394_v0 }
 0x36e   : > { %1674 = vpush %v396_v3 }
 0x36f   : > { %1676 = vpush %v388_v4 }
 0x39f   : > { %s1675_s21 = spop %1674 }
 0x3a0   : > { %s1677_s3 = spop %1676 }
 0x3a1   : > { %s399_s13 = smul.f32 1e-10, %s1677_s3 }
 0x3a3   : > { %p400_p7 = scmp.le.f32.partialorder %s1675_s21, %s399_s13 }
 0x3a5   : > { %p402_p8 = por %p401_p6, %p400_p7 }
 0x3a7   :  { %850 = sbr.rel (!%p402_p8) target bundleno = 263 (0x107), region = 446 }
 0x3ac PF:  { %s851_s14 = smov [#allocation12]  ;;  %v855_v10 = vmov %v2538_v10  ;;  %v858_v11 = vmov %v2540_v11  ;;  %s871_s15 = smov [#allocation15] }
 0x3ad   :  { %v875_v10 = vmov %v2538_v10  ;;  %v878_v11 = vmov %v2540_v11  ;;  %v859_v5 = vld [vmem:[%s851_s14] sm:$0xff]  ;;  %vm862_vm10 = vcmp.eq.s32.totalorder %v858_v11, %v855_v10  ;;  %s852_s0 = smov [#allocation4]  ;;  %s872_s16 = smov [#allocation6] }
 0x3ae   :  { %vm882_vm11 = vcmp.eq.s32.totalorder %v878_v11, %v875_v10  ;;  %v863_v6 = vsel %vm862_vm10, %v859_v5, 0.0  ;;  %v879_v7 = vld [vmem:[%s871_s15] sm:$0xff]  ;;  %s2429_s24 = smov %s2744_s6   ;;  %s2433_s25 = smov [#allocation8]  }
 0x3af   :  { %v864_v8 = vrot.slane %v863_v6, 4  ;;  %v883_v9 = vsel %vm882_vm11, %v879_v7, 0.0 }
 0x3b0   :  { %v884_v12 = vrot.slane %v883_v9, 4 }
 0x3b1   :  { %v865_v13 = vadd.f32 %v864_v8, %v863_v6 }
 0x3b2   :  { %v885_v14 = vadd.f32 %v884_v12, %v883_v9 }
 0x3b3   :  { %v866_v15 = vrot.slane %v865_v13, 2 }
 0x3b4   :  { %v886_v16 = vrot.slane %v885_v14, 2 }
 0x3b5   :  { %v867_v17 = vadd.f32 %v866_v15, %v865_v13 }
 0x3b6   :  { %v887_v18 = vadd.f32 %v886_v16, %v885_v14 }
 0x3b7   :  { %v868_v19 = vrot.slane %v867_v17, 1 }
 0x3b8   :  { %v888_v20 = vrot.slane %v887_v18, 1 }
 0x3b9   :  { %v869_v21 = vadd.f32 %v868_v19, %v867_v17 }
 0x3ba   :  { %v889_v22 = vadd.f32 %v888_v20, %v887_v18 }
 0x3bb   :  { %870 = vst [vmem:[%s852_s0] sm:$0x1] %v869_v21 }
 0x3bc   :  { %890 = vst [vmem:[%s872_s16] sm:$0x1] %v889_v22 }
 0x3c2   :  { %v895_v10 = vld [vmem:[#allocation4] sm:$0x1] }
 0x3c3   :  { %898 = vst [vmem:[#allocation5] sm:$0x1] %v895_v10  ;;  %v903_v11 = vld [vmem:[#allocation6] sm:$0x1] }
 0x3c4   :  { %906 = vst [vmem:[#allocation7] sm:$0x1] %v903_v11 }
 0x3ca   :  { %v970_v23 = vld [vmem:[#allocation5] sm:$0x1] }
 0x3cb   :  { %971 = vst [vmem:[%s2742_s4] sm:$0x1] %v970_v23  ;;  %v1035_v24 = vld [vmem:[#allocation7] sm:$0x1] }
 0x3cc   :  { %1036 = vst [vmem:[%s2743_s5] sm:$0x1] %v1035_v24 }
 0x3cd LB: > { %v1084_v25 = vld [vmem:[%s2435_s25] sm:$0xff]  ;;  %s1086_s25 = scalar_lea.vmem %s2435_s25, 8   ;;  %s2435_s25 = sphi %s2433_s25, %s1086_s25   ;;  %s2431_s24 = sphi %s2429_s24, %s1087_s24  }
 0x3ce   : > { %1085 = vst [vmem:[%s2431_s24] sm:$0xff] %v1084_v25  ;;  %s1087_s24 = scalar_lea.vmem %s2431_s24, 8   ;;  %p1081_p9 = scmp.gt.s32.totalorder %s1086_s25, [#allocation8] }
 0x3cf   :  { %s2437_s5 = smov (%p1081_p9), %s2745_s7   ;;  %s2441_s26 = smov (%p1081_p9), [#allocation9]  }
 0x3d0   :  { %1083 = sbr.rel (!%p1081_p9) target bundleno = 973 (0x3cd), region = 512 }
 0x3d5 LB: > { %v1147_v26 = vld [vmem:[%s2443_s26] sm:$0xff]  ;;  %s1149_s26 = scalar_lea.vmem %s2443_s26, 8   ;;  %s2443_s26 = sphi %s2441_s26, %s1149_s26   ;;  %s2439_s5 = sphi %s2437_s5, %s1150_s5  }
 0x3d6   : > { %1148 = vst [vmem:[%s2439_s5] sm:$0xff] %v1147_v26  ;;  %s1150_s5 = scalar_lea.vmem %s2439_s5, 8   ;;  %p1144_p10 = scmp.gt.s32.totalorder %s1149_s26, [#allocation9] }
 0x3d7   :  { %s2445_s28 = smov (%p1144_p10), %s2746_s8   ;;  %s2449_s29 = smov (%p1144_p10), [#allocation10]  }
 0x3d8   :  { %1146 = sbr.rel (!%p1144_p10) target bundleno = 981 (0x3d5), region = 534 }
 0x3dd LB: > { %v1210_v27 = vld [vmem:[%s2451_s29] sm:$0xff]  ;;  %s1212_s29 = scalar_lea.vmem %s2451_s29, 8   ;;  %s2451_s29 = sphi %s2449_s29, %s1212_s29   ;;  %s2447_s28 = sphi %s2445_s28, %s1213_s28  }
 0x3de   : > { %1211 = vst [vmem:[%s2447_s28] sm:$0xff] %v1210_v27  ;;  %s1213_s28 = scalar_lea.vmem %s2447_s28, 8   ;;  %p1207_p11 = scmp.gt.s32.totalorder %s1212_s29, [#allocation10] }
 0x3df   :  { %s2453_s2 = smov (%p1207_p11), %s2747_s9   ;;  %s2457_s10 = smov (%p1207_p11), [#allocation11]  }
 0x3e0   :  { %1209 = sbr.rel (!%p1207_p11) target bundleno = 989 (0x3dd), region = 556 }
 0x3e5 LB: > { %v1273_v28 = vld [vmem:[%s2459_s10] sm:$0xff]  ;;  %s1275_s10 = scalar_lea.vmem %s2459_s10, 8   ;;  %s2459_s10 = sphi %s2457_s10, %s1275_s10   ;;  %s2455_s2 = sphi %s2453_s2, %s1276_s2  }
 0x3e6   : > { %1274 = vst [vmem:[%s2455_s2] sm:$0xff] %v1273_v28  ;;  %s1276_s2 = scalar_lea.vmem %s2455_s2, 8   ;;  %p1270_p12 = scmp.gt.s32.totalorder %s1275_s10, [#allocation11] }
 0x3e8   :  { %1272 = sbr.rel (!%p1270_p12) target bundleno = 997 (0x3e5), region = 578 }

// kernel: gsr_layer.1
= control target key start
LH: loop header
LB: loop body
LE: loop exit
PB: predicated region body
PF: predicated region fallthrough
CT: control target
= control target key end

     0   :  { %s6660_s18 = smov 0   ;;  %s11022_s0 = inlined_call_operand.vmem [shape: f32[384,16], index: 0, kind: input, shape index: {}]   ;;  %s11023_s1 = inlined_call_operand.vmem [shape: f32[384,16], index: 1, kind: input, shape index: {}]   ;;  %s11024_s2 = inlined_call_operand.vmem [shape: f32[16,16], index: 2, kind: input, shape index: {}]   ;;  %s11025_s3 = inlined_call_operand.vmem [shape: f32[384,16], index: 3, kind: input, shape index: {}]   ;;  %s11026_s4 = inlined_call_operand.vmem [shape: f32[384,384], index: 4, kind: output, shape index: {0}]   ;;  %s11027_s5 = inlined_call_operand.vmem [shape: f32[384,384], index: 5, kind: output, shape index: {1}]  }
   0x1 LB: > { %s6666_s19 = sadd.s32 4294967295, %s6628_s18   ;;  %p5258_p0 = scmp.ge.s32.totalorder %s6628_s18, 1  ;;  %s6628_s18 = sphi %s6660_s18, %s16_s18  }
   0x2   : > { %p180_p1 = scmp.lt.s32.totalorder %s6628_s18, 4 }
   0x4   : > { %p181_p2 = pnand %p5258_p0, %p180_p1 }
   0x5   : > { %s5259_s20 = sshll.u32 (!%p181_p2), %s6666_s19, 4  ;;  %p5263_p4 = scmp.ne.s32.totalorder (!%p181_p2), %s6666_s19, 0 }
   0x6   : > { %184 = sbr.rel (%p181_p2) target bundleno = 1331 (0x533), region = 36  ;;  %p211_p3 = scmp.lt.s32.totalorder (!%p181_p2), %s5259_s20, 47 }
   0xb   : > { %s11843_s20 = smov (!%p211_p3, %s5259_s20), 47  ;;  %227 = sbr.rel (%p5263_p4) target bundleno = 925 (0x39d), region = 40 }
   0xc   : > { %s6511_s21 = smul.u32 24, %s11843_s20 }
   0xe   : > { %s6674_s24 = scalar_lea.vmem %s11026_s4, %s6511_s21  ;;  %s6679_s27 = scalar_lea.vmem %s11027_s5, %s6511_s21 }
  0x10   : > { %v421_v0 = vld [vmem:[%s11024_s2 + $0x8] sm:$0xff]  ;;  %v420_v1 = vld [vmem:[%s11024_s2] sm:$0xff]  ;;  %vm422_vm0 = vcmask 130048   ;;  %v374_v6 = vld [vmem:[%s11025_s3 + $0x10] sm:$0xff] }
  0x11   : > { %6135 = vmatprep.subr.mxu0 %v421_v0  ;;  %6475 = vmatprep.subr.mxu1 %v421_v0  ;;  %v372_v2 = vld [vmem:[%s11025_s3] sm:$0xff]  ;;  %v373_v4 = vld [vmem:[%s11025_s3 + $0x8] sm:$0xff]  ;;  %v406_v7 = vld [vmem:[%s11025_s3 + $0x110] sm:$0xff] }
  0x12   : > { %6136 = vmatpush3.msra.mxu0 %v421_v0  ;;  %6477 = vmatpush3.msra.mxu1 %v421_v0  ;;  %v404_v3 = vld [vmem:[%s11025_s3 + $0x100] sm:$0xff]  ;;  %v405_v5 = vld [vmem:[%s11025_s3 + $0x108] sm:$0xff]  ;;  %v375_v8 = vld [vmem:[%s11025_s3 + $0x18] sm:$0xff] }
  0x13   : > { %6137 = vmatprep.subr.mxu0 %v420_v1  ;;  %6476 = vmatprep.subr.mxu1 %v420_v1  ;;  %v407_v9 = vld [vmem:[%s11025_s3 + $0x118] sm:$0xff]  ;;  %v376_v10 = vld [vmem:[%s11025_s3 + $0x20] sm:$0xff]  ;;  %v377_v12 = vld [vmem:[%s11025_s3 + $0x28] sm:$0xff] }
  0x14   : > { %6138 = vmatpush3.msra.mxu0 %v420_v1  ;;  %6478 = vmatpush3.msra.mxu1 %v420_v1  ;;  %v408_v11 = vld [vmem:[%s11025_s3 + $0x120] sm:$0xff]  ;;  %v409_v13 = vld [vmem:[%s11025_s3 + $0x128] sm:$0xff]  ;;  %v378_v14 = vld [vmem:[%s11025_s3 + $0x30] sm:$0xff] }
  0x15   : > { %6139 = vmatprep.mubr.msk.f32.mxu0 %vm422_vm0, %v372_v2  ;;  %6187 = vmatprep.mubr.msk.f32.mxu1 %vm422_vm0, %v404_v3  ;;  %v410_v15 = vld [vmem:[%s11025_s3 + $0x130] sm:$0xff]  ;;  %v379_v16 = vld [vmem:[%s11025_s3 + $0x38] sm:$0xff]  ;;  %v380_v18 = vld [vmem:[%s11025_s3 + $0x40] sm:$0xff] }
  0x16   : > { %6140 = vmatmul.mubr.msk.f32.vlgmr.msra.gmra.mxu0 %vm422_vm0, %v373_v4  ;;  %6188 = vmatmul.mubr.msk.f32.vlgmr.msra.gmra.mxu1 %vm422_vm0, %v405_v5  ;;  %v411_v17 = vld [vmem:[%s11025_s3 + $0x138] sm:$0xff]  ;;  %v412_v19 = vld [vmem:[%s11025_s3 + $0x140] sm:$0xff]  ;;  %v381_v20 = vld [vmem:[%s11025_s3 + $0x48] sm:$0xff] }
  0x17   : > { %6142 = vmatprep.mubr.msk.f32.mxu0 %vm422_vm0, %v374_v6  ;;  %6190 = vmatprep.mubr.msk.f32.mxu1 %vm422_vm0, %v406_v7  ;;  %v413_v21 = vld [vmem:[%s11025_s3 + $0x148] sm:$0xff]  ;;  %v382_v22 = vld [vmem:[%s11025_s3 + $0x50] sm:$0xff]  ;;  %v383_v24 = vld [vmem:[%s11025_s3 + $0x58] sm:$0xff] }
  0x18   : > { %v414_v23 = vld [vmem:[%s11025_s3 + $0x150] sm:$0xff]  ;;  %v415_v25 = vld [vmem:[%s11025_s3 + $0x158] sm:$0xff]  ;;  %v384_v26 = vld [vmem:[%s11025_s3 + $0x60] sm:$0xff] }
  0x19   : > { %v416_v27 = vld [vmem:[%s11025_s3 + $0x160] sm:$0xff]  ;;  %v385_v28 = vld [vmem:[%s11025_s3 + $0x68] sm:$0xff]  ;;  %v386_v30 = vld [vmem:[%s11025_s3 + $0x70] sm:$0xff] }
  0x1a   : > { %6143 = vmatmul.mubr.msk.f32.gmra.mxu0 %vm422_vm0, %v375_v8  ;;  %6191 = vmatmul.mubr.msk.f32.gmra.mxu1 %vm422_vm0, %v407_v9  ;;  %v417_v29 = vld [vmem:[%s11025_s3 + $0x168] sm:$0xff]  ;;  %v418_v31 = vld [vmem:[%s11025_s3 + $0x170] sm:$0xff]  ;;  %v387_v32 = vld [vmem:[%s11025_s3 + $0x78] sm:$0xff] }
  0x1b   : > { %6145 = vmatprep.mubr.msk.f32.mxu0 %vm422_vm0, %v376_v10  ;;  %6193 = vmatprep.mubr.msk.f32.mxu1 %vm422_vm0, %v408_v11  ;;  %v419_v33 = vld [vmem:[%s11025_s3 + $0x178] sm:$0xff]  ;;  %v388_v34 = vld [vmem:[%s11025_s3 + $0x80] sm:$0xff]  ;;  %v389_v35 = vld [vmem:[%s11025_s3 + $0x88] sm:$0xff] }
  0x1c   : > { %v390_v36 = vld [vmem:[%s11025_s3 + $0x90] sm:$0xff]  ;;  %v391_v37 = vld [vmem:[%s11025_s3 + $0x98] sm:$0xff]  ;;  %v392_v38 = vld [vmem:[%s11025_s3 + $0xa0] sm:$0xff] }
  0x1d   : > { %v393_v39 = vld [vmem:[%s11025_s3 + $0xa8] sm:$0xff]  ;;  %v394_v40 = vld [vmem:[%s11025_s3 + $0xb0] sm:$0xff]  ;;  %v395_v41 = vld [vmem:[%s11025_s3 + $0xb8] sm:$0xff] }
  0x1e   : > { %6146 = vmatmul.mubr.msk.f32.gmra.mxu0 %vm422_vm0, %v377_v12  ;;  %6194 = vmatmul.mubr.msk.f32.gmra.mxu1 %vm422_vm0, %v409_v13  ;;  %v396_v42 = vld [vmem:[%s11025_s3 + $0xc0] sm:$0xff]  ;;  %v397_v43 = vld [vmem:[%s11025_s3 + $0xc8] sm:$0xff]  ;;  %v398_v44 = vld [vmem:[%s11025_s3 + $0xd0] sm:$0xff] }
  0x1f   : > { %6148 = vmatprep.mubr.msk.f32.mxu0 %vm422_vm0, %v378_v14  ;;  %6196 = vmatprep.mubr.msk.f32.mxu1 %vm422_vm0, %v410_v15  ;;  %v399_v45 = vld [vmem:[%s11025_s3 + $0xd8] sm:$0xff]  ;;  %v400_v46 = vld [vmem:[%s11025_s3 + $0xe0] sm:$0xff]  ;;  %v401_v47 = vld [vmem:[%s11025_s3 + $0xe8] sm:$0xff] }
  0x20   : > { %v402_v48 = vld [vmem:[%s11025_s3 + $0xf0] sm:$0xff]  ;;  %v403_v49 = vld [vmem:[%s11025_s3 + $0xf8] sm:$0xff]  ;;  %v228_v50 = vld [vmem:[%s11022_s0] sm:$0xff] }
  0x21   : > { %v276_v51 = vld [vmem:[%s11023_s1] sm:$0xff] }
  0x22   : > { %6149 = vmatmul.mubr.msk.f32.gmra.mxu0 %vm422_vm0, %v379_v16  ;;  %6197 = vmatmul.mubr.msk.f32.gmra.mxu1 %vm422_vm0, %v411_v17  ;;  %v6886_v52 = vadd.f32 %v276_v51, %v228_v50  ;;  %v243_v50 = vld [vmem:[%s11022_s0 + $0x78] sm:$0xff] }
  0x23   : > { %6151 = vmatprep.mubr.msk.f32.mxu0 %vm422_vm0, %v380_v18  ;;  %6199 = vmatprep.mubr.msk.f32.mxu1 %vm422_vm0, %v412_v19  ;;  %v291_v51 = vld [vmem:[%s11023_s1 + $0x78] sm:$0xff] }
  0x26   : > { %6152 = vmatmul.mubr.msk.f32.gmra.mxu0 %vm422_vm0, %v381_v20  ;;  %6200 = vmatmul.mubr.msk.f32.gmra.mxu1 %vm422_vm0, %v413_v21 }
  0x27   : > { %6154 = vmatprep.mubr.msk.f32.mxu0 %vm422_vm0, %v382_v22  ;;  %6202 = vmatprep.mubr.msk.f32.mxu1 %vm422_vm0, %v414_v23 }
  0x2a   : > { %6155 = vmatmul.mubr.msk.f32.gmra.mxu0 %vm422_vm0, %v383_v24  ;;  %6203 = vmatmul.mubr.msk.f32.gmra.mxu1 %vm422_vm0, %v415_v25 }
  0x2b   : > { %6157 = vmatprep.mubr.msk.f32.mxu0 %vm422_vm0, %v384_v26  ;;  %6205 = vmatprep.mubr.msk.f32.mxu1 %vm422_vm0, %v416_v27 }
  0x2e   : > { %6158 = vmatmul.mubr.msk.f32.gmra.mxu0 %vm422_vm0, %v385_v28  ;;  %6206 = vmatmul.mubr.msk.f32.gmra.mxu1 %vm422_vm0, %v417_v29 }
  0x2f   : > { %6160 = vmatprep.mubr.msk.f32.mxu0 %vm422_vm0, %v386_v30  ;;  %6208 = vmatprep.mubr.msk.f32.mxu1 %vm422_vm0, %v418_v31 }
  0x32   : > { %6161 = vmatmul.mubr.msk.f32.gmra.mxu0 %vm422_vm0, %v387_v32  ;;  %6209 = vmatmul.mubr.msk.f32.gmra.mxu1 %vm422_vm0, %v419_v33 }
  0x33   : > { %6163 = vmatprep.mubr.msk.f32.mxu0 %vm422_vm0, %v388_v34  ;;  %5687 = vmatprep.mubr.msk.f32.mxu1 %vm422_vm0, %v6886_v52 }
  0x36   : > { %6164 = vmatmul.mubr.msk.f32.gmra.mxu0 %vm422_vm0, %v389_v35 }
  0x37   : > { %6166 = vmatprep.mubr.msk.f32.mxu0 %vm422_vm0, %v390_v36 }
  0x3a   : > { %6167 = vmatmul.mubr.msk.f32.gmra.mxu0 %vm422_vm0, %v391_v37  ;;  %v259_v37 = vld [vmem:[%s11022_s0 + $0xf8] sm:$0xff] }
  0x3b   : > { %6169 = vmatprep.mubr.msk.f32.mxu0 %vm422_vm0, %v392_v38  ;;  %v307_v38 = vld [vmem:[%s11023_s1 + $0xf8] sm:$0xff] }
  0x3e   : > { %6170 = vmatmul.mubr.msk.f32.gmra.mxu0 %vm422_vm0, %v393_v39  ;;  %v229_v39 = vld [vmem:[%s11022_s0 + $0x8] sm:$0xff] }
  0x3f   : > { %6172 = vmatprep.mubr.msk.f32.mxu0 %vm422_vm0, %v394_v40  ;;  %v277_v40 = vld [vmem:[%s11023_s1 + $0x8] sm:$0xff] }
  0x42   : > { %6173 = vmatmul.mubr.msk.f32.gmra.mxu0 %vm422_vm0, %v395_v41  ;;  %v230_v41 = vld [vmem:[%s11022_s0 + $0x10] sm:$0xff] }
  0x43   : > { %6175 = vmatprep.mubr.msk.f32.mxu0 %vm422_vm0, %v396_v42  ;;  %v278_v42 = vld [vmem:[%s11023_s1 + $0x10] sm:$0xff] }
  0x46   : > { %6176 = vmatmul.mubr.msk.f32.gmra.mxu0 %vm422_vm0, %v397_v43  ;;  %v7098_v43 = vadd.f32 %v307_v38, %v259_v37  ;;  %v232_v37 = vld [vmem:[%s11022_s0 + $0x20] sm:$0xff] }
  0x47   : > { %6178 = vmatprep.mubr.msk.f32.mxu0 %vm422_vm0, %v398_v44  ;;  %v7100_v44 = vadd.f32 %v277_v40, %v229_v39  ;;  %v280_v38 = vld [vmem:[%s11023_s1 + $0x20] sm:$0xff] }
  0x4a   : > { %6179 = vmatmul.mubr.msk.f32.gmra.mxu0 %vm422_vm0, %v399_v45  ;;  %v231_v45 = vld [vmem:[%s11022_s0 + $0x18] sm:$0xff] }
  0x4b   : > { %6181 = vmatprep.mubr.msk.f32.mxu0 %vm422_vm0, %v400_v46  ;;  %v258_v46 = vld [vmem:[%s11022_s0 + $0xf0] sm:$0xff] }
  0x4e   : > { %6182 = vmatmul.mubr.msk.f32.gmra.mxu0 %vm422_vm0, %v401_v47  ;;  %v306_v47 = vld [vmem:[%s11023_s1 + $0xf0] sm:$0xff] }
  0x4f   : > { %6184 = vmatprep.mubr.msk.f32.mxu0 %vm422_vm0, %v402_v48  ;;  %v7115_v48 = vadd.f32 %v278_v42, %v230_v41  ;;  %v7136_v39 = vadd.f32 %v306_v47, %v258_v46  ;;  %v233_v41 = vld [vmem:[%s11022_s0 + $0x28] sm:$0xff]  ;;  %v7145_v42 = vadd.f32 %v291_v51, %v243_v50  ;;  %v290_v50 = vld [vmem:[%s11023_s1 + $0x70] sm:$0xff] }
  0x50   : > { %v305_v46 = vld [vmem:[%s11023_s1 + $0xe8] sm:$0xff]  ;;  %v234_v51 = vld [vmem:[%s11022_s0 + $0x30] sm:$0xff] }
  0x51   : > { %v281_v47 = vld [vmem:[%s11023_s1 + $0x28] sm:$0xff] }
  0x52   : > { %6185 = vmatmul.mubr.msk.f32.gmra.mxu0 %vm422_vm0, %v403_v49  ;;  %v279_v49 = vld [vmem:[%s11023_s1 + $0x18] sm:$0xff] }
  0x53   : > { %6243 = vmatprep.mubr.msk.f32.mxu0 %vm422_vm0, %v6886_v52  ;;  %v7140_v40 = vadd.f32 %v279_v49, %v231_v45  ;;  %v7157_v45 = vadd.f32 %v280_v38, %v232_v37  ;;  %v242_v49 = vld [vmem:[%s11022_s0 + $0x70] sm:$0xff] }
  0x54   : > { %v282_v37 = vld [vmem:[%s11023_s1 + $0x30] sm:$0xff] }
  0xd6   : > { %v6892_v53 = vpop.f32.mrf.mxu0  ;;  %v6894_v54 = vpop.f32.mrf.mxu1 }
  0xd7   : > { %11246 = vst [vmem:[#allocation3_spill] sm:$0xff] %v6894_v54 }
  0xd8   : > { %v6896_v55 = vpop.f32.mrf.mxu0  ;;  %v6898_v56 = vpop.f32.mrf.mxu1 }
  0xd9   : > { %11247 = vst [vmem:[#allocation4_spill] sm:$0xff] %v6898_v56 }
  0xda   : > { %v6900_v57 = vpop.f32.mrf.mxu0  ;;  %v6902_v58 = vpop.f32.mrf.mxu1 }
  0xdb   : > { %11248 = vst [vmem:[#allocation5_spill] sm:$0xff] %v6902_v58 }
  0xdc   : > { %v6904_v59 = vpop.f32.mrf.mxu0  ;;  %v6906_v60 = vpop.f32.mrf.mxu1 }
  0xdd   : > { %11249 = vst [vmem:[#allocation6_spill] sm:$0xff] %v6906_v60 }
  0xde   : > { %v6908_v61 = vpop.f32.mrf.mxu0  ;;  %v6910_v62 = vpop.f32.mrf.mxu1 }
  0xdf   : > { %11250 = vst [vmem:[#allocation7_spill] sm:$0xff] %v6910_v62 }
  0xe0   : > { %v6912_v63 = vpop.f32.mrf.mxu0  ;;  %v6914_v0 = vpop.f32.mrf.mxu1 }
  0xe1   : > { %11251 = vst [vmem:[#allocation8_spill] sm:$0xff] %v6914_v0 }
  0xe2   : > { %v6916_v1 = vpop.f32.mrf.mxu0  ;;  %v6918_v2 = vpop.f32.mrf.mxu1 }
  0xe3   : > { %11252 = vst [vmem:[#allocation9_spill] sm:$0xff] %v6918_v2 }
  0xe4   : > { %v6920_v3 = vpop.f32.mrf.mxu0  ;;  %v6922_v4 = vpop.f32.mrf.mxu1 }
  0xe5   : > { %11253 = vst [vmem:[#allocation10_spill] sm:$0xff] %v6922_v4 }
  0xe6   : > { %v6924_v5 = vpop.f32.mrf.mxu0  ;;  %v6926_v6 = vpop.f32.mrf.mxu1 }
  0xe7   : > { %11254 = vst [vmem:[#allocation11_spill] sm:$0xff] %v6926_v6 }
  0xe8   : > { %v6928_v7 = vpop.f32.mrf.mxu0  ;;  %v6930_v8 = vpop.f32.mrf.mxu1 }
  0xe9   : > { %11255 = vst [vmem:[#allocation12_spill] sm:$0xff] %v6930_v8 }
  0xea   : > { %v6932_v9 = vpop.f32.mrf.mxu0  ;;  %v6934_v10 = vpop.f32.mrf.mxu1 }
  0xeb   : > { %11256 = vst [vmem:[#allocation13_spill] sm:$0xff] %v6934_v10 }
  0xec   : > { %v6936_v11 = vpop.f32.mrf.mxu0  ;;  %v6938_v12 = vpop.f32.mrf.mxu1 }
  0xed   : > { %11257 = vst [vmem:[#allocation14_spill] sm:$0xff] %v6938_v12 }
  0xee   : > { %v6940_v13 = vpop.f32.mrf.mxu0  ;;  %v6942_v14 = vpop.f32.mrf.mxu1 }
  0xef   : > { %11258 = vst [vmem:[#allocation15_spill] sm:$0xff] %v6942_v14 }
  0xf0   : > { %v6944_v15 = vpop.f32.mrf.mxu0  ;;  %v6946_v16 = vpop.f32.mrf.mxu1 }
  0xf1   : > { %11259 = vst [vmem:[#allocation16_spill] sm:$0xff] %v6946_v16 }
  0xf2   : > { %v6948_v17 = vpop.f32.mrf.mxu0  ;;  %v6950_v18 = vpop.f32.mrf.mxu1 }
  0xf3   : > { %11260 = vst [vmem:[#allocation17_spill] sm:$0xff] %v6950_v18  ;;  %6211 = vmatprep.subr.msk.mxu0 %vm422_vm0, %v6950_v18 }
  0xf4   : > { %v6954_v19 = vpop.f32.mrf.mxu0  ;;  %6212 = vmatpush3.xpose.msk.msra.mxu0 %vm422_vm0, %v6950_v18  ;;  %v6958_v20 = vpop.f32.mrf.mxu1  ;;  %v257_v18 = vld [vmem:[%s11022_s0 + $0xe8] sm:$0xff] }
  0xf5   : > { %11261 = vst [vmem:[#allocation18_spill] sm:$0xff] %v6958_v20  ;;  %6213 = vmatprep.subr.msk.mxu0 %vm422_vm0, %v6958_v20  ;;  %v7180_v38 = vadd.f32 %v305_v46, %v257_v18  ;;  %v304_v18 = vld [vmem:[%s11023_s1 + $0xe0] sm:$0xff]  ;;  %v283_v46 = vld [vmem:[%s11023_s1 + $0x38] sm:$0xff] }
  0xf6   : > { %v6962_v21 = vpop.f32.mrf.mxu0 }
  0xf8   : > { %v6964_v22 = vpop.f32.mrf.mxu0  ;;  %6214 = vmatpush3.xpose.msk.msra.mxu0 %vm422_vm0, %v6958_v20  ;;  %v7184_v20 = vadd.f32 %v281_v47, %v233_v41  ;;  %v7201_v41 = vadd.f32 %v282_v37, %v234_v51  ;;  %v241_v47 = vld [vmem:[%s11022_s0 + $0x68] sm:$0xff]  ;;  %v284_v51 = vld [vmem:[%s11023_s1 + $0x40] sm:$0xff] }
  0xf9   : > { %6215 = vmatprep.subr.msk.mxu0 %vm422_vm0, %v6942_v14 }
  0xfa   : > { %v6970_v23 = vpop.f32.mrf.mxu0 }
  0xfb   : > { %11262 = vst [vmem:[#allocation19_spill] sm:$0xff] %v6970_v23 }
  0xfc   : > { %v6972_v24 = vpop.f32.mrf.mxu0  ;;  %6216 = vmatpush3.xpose.msk.msra.mxu0 %vm422_vm0, %v6942_v14  ;;  %v235_v14 = vld [vmem:[%s11022_s0 + $0x38] sm:$0xff] }
  0xfd   : > { %11263 = vst [vmem:[#allocation20_spill] sm:$0xff] %v6972_v24  ;;  %6217 = vmatprep.subr.msk.mxu0 %vm422_vm0, %v6946_v16 }
  0xfe   : > { %v6978_v25 = vpop.f32.mrf.mxu0 }
  0xff   : > { %11264 = vst [vmem:[#allocation21_spill] sm:$0xff] %v6978_v25 }
 0x100   : > { %v6980_v26 = vpop.f32.mrf.mxu0  ;;  %6218 = vmatpush3.xpose.msk.msra.mxu0 %vm422_vm0, %v6946_v16  ;;  %v7189_v16 = vadd.f32 %v290_v50, %v242_v49  ;;  %v289_v49 = vld [vmem:[%s11023_s1 + $0x68] sm:$0xff]  ;;  %v236_v50 = vld [vmem:[%s11022_s0 + $0x40] sm:$0xff] }
 0x101   : > { %11265 = vst [vmem:[#allocation22_spill] sm:$0xff] %v6980_v26  ;;  %6219 = vmatprep.subr.msk.mxu0 %vm422_vm0, %v6934_v10 }
 0x102   : > { %v6986_v27 = vpop.f32.mrf.mxu0 }
 0x103   : > { %11266 = vst [vmem:[#allocation23_spill] sm:$0xff] %v6986_v27 }
 0x104   : > { %v6988_v28 = vpop.f32.mrf.mxu0  ;;  %6220 = vmatpush3.xpose.msk.msra.mxu0 %vm422_vm0, %v6934_v10  ;;  %v256_v10 = vld [vmem:[%s11022_s0 + $0xe0] sm:$0xff] }
 0x105   : > { %11267 = vst [vmem:[#allocation24_spill] sm:$0xff] %v6988_v28  ;;  %6221 = vmatprep.subr.msk.mxu0 %vm422_vm0, %v6938_v12  ;;  %v7224_v37 = vadd.f32 %v304_v18, %v256_v10  ;;  %v303_v10 = vld [vmem:[%s11023_s1 + $0xd8] sm:$0xff]  ;;  %v285_v18 = vld [vmem:[%s11023_s1 + $0x48] sm:$0xff] }
 0x106   : > { %v6994_v29 = vpop.f32.mrf.mxu0 }
 0x107   : > { %11268 = vst [vmem:[#allocation25_spill] sm:$0xff] %v6994_v29 }
 0x108   : > { %v6996_v30 = vpop.f32.mrf.mxu0  ;;  %6222 = vmatpush3.xpose.msk.msra.mxu0 %vm422_vm0, %v6938_v12  ;;  %v7228_v12 = vadd.f32 %v283_v46, %v235_v14  ;;  %v7245_v14 = vadd.f32 %v284_v51, %v236_v50  ;;  %v240_v46 = vld [vmem:[%s11022_s0 + $0x60] sm:$0xff]  ;;  %v286_v50 = vld [vmem:[%s11023_s1 + $0x50] sm:$0xff] }
 0x109   : > { %11269 = vst [vmem:[#allocation26_spill] sm:$0xff] %v6996_v30  ;;  %6223 = vmatprep.subr.msk.mxu0 %vm422_vm0, %v6926_v6 }
 0x10a   : > { %v7002_v31 = vpop.f32.mrf.mxu0 }
 0x10b   : > { %11270 = vst [vmem:[#allocation27_spill] sm:$0xff] %v7002_v31 }
 0x10c   : > { %v7004_v32 = vpop.f32.mrf.mxu0  ;;  %6224 = vmatpush3.xpose.msk.msra.mxu0 %vm422_vm0, %v6926_v6  ;;  %v237_v6 = vld [vmem:[%s11022_s0 + $0x48] sm:$0xff] }
 0x10d   : > { %11271 = vst [vmem:[#allocation28_spill] sm:$0xff] %v7004_v32  ;;  %6225 = vmatprep.subr.msk.mxu0 %vm422_vm0, %v6930_v8 }
 0x10e   : > { %v7010_v33 = vpop.f32.mrf.mxu0 }
 0x10f   : > { %11272 = vst [vmem:[#allocation29_spill] sm:$0xff] %v7010_v33 }
 0x110   : > { %v7012_v34 = vpop.f32.mrf.mxu0  ;;  %6226 = vmatpush3.xpose.msk.msra.mxu0 %vm422_vm0, %v6930_v8  ;;  %v7233_v8 = vadd.f32 %v289_v49, %v241_v47  ;;  %v288_v47 = vld [vmem:[%s11023_s1 + $0x60] sm:$0xff]  ;;  %v238_v49 = vld [vmem:[%s11022_s0 + $0x50] sm:$0xff] }
 0x111   : > { %11273 = vst [vmem:[#allocation30_spill] sm:$0xff] %v7012_v34  ;;  %6227 = vmatprep.subr.msk.mxu0 %vm422_vm0, %v6918_v2 }
 0x112   : > { %v7018_v35 = vpop.f32.mrf.mxu0 }
 0x113   : > { %11274 = vst [vmem:[#allocation31_spill] sm:$0xff] %v7018_v35  ;;  %5655 = vmatprep.subr.msk.mxu1 %vm422_vm0, %v7018_v35  ;;  %v275_v35 = vld [vmem:[%s11022_s0 + $0x178] sm:$0xff] }
 0x114   : > { %v7022_v36 = vpop.f32.mrf.mxu0  ;;  %5656 = vmatpush3.xpose.msk.msra.mxu1 %vm422_vm0, %v6948_v17  ;;  %6228 = vmatpush3.xpose.msk.msra.mxu0 %vm422_vm0, %v6918_v2  ;;  %v255_v2 = vld [vmem:[%s11022_s0 + $0xd8] sm:$0xff] }
 0x115   : > { %11275 = vst [vmem:[#allocation32_spill] sm:$0xff] %v7022_v36  ;;  %5657 = vmatprep.subr.msk.mxu1 %vm422_vm0, %v7022_v36  ;;  %6229 = vmatprep.subr.msk.mxu0 %vm422_vm0, %v6922_v4  ;;  %v7268_v51 = vadd.f32 %v303_v10, %v255_v2  ;;  %v7286_v2 = vadd.f32 %v286_v50, %v238_v49  ;;  %v287_v10 = vld [vmem:[%s11023_s1 + $0x58] sm:$0xff]  ;;  %v292_v50 = vld [vmem:[%s11023_s1 + $0x80] sm:$0xff] }
 0x116   : > { %v323_v36 = vld [vmem:[%s11023_s1 + $0x178] sm:$0xff] }
 0x118   : > { %5658 = vmatpush3.xpose.msk.msra.mxu1 %vm422_vm0, %v6954_v19  ;;  %6230 = vmatpush3.xpose.msk.msra.mxu0 %vm422_vm0, %v6922_v4  ;;  %v7272_v4 = vadd.f32 %v285_v18, %v237_v6  ;;  %v239_v6 = vld [vmem:[%s11022_s0 + $0x58] sm:$0xff] }
 0x119   : > { %5659 = vmatprep.subr.msk.mxu1 %vm422_vm0, %v7010_v33  ;;  %6231 = vmatprep.subr.msk.mxu0 %vm422_vm0, %v6910_v62  ;;  %v247_v33 = vld [vmem:[%s11022_s0 + $0x98] sm:$0xff] }
 0x11c   : > { %5660 = vmatpush3.xpose.msk.msra.mxu1 %vm422_vm0, %v6940_v13  ;;  %6232 = vmatpush3.xpose.msk.msra.mxu0 %vm422_vm0, %v6910_v62  ;;  %v7274_v62 = vadd.f32 %v288_v47, %v240_v46  ;;  %v7304_v46 = vadd.f32 %v287_v10, %v239_v6  ;;  %v253_v47 = vld [vmem:[%s11022_s0 + $0xc8] sm:$0xff]  ;;  %v252_v6 = vld [vmem:[%s11022_s0 + $0xc0] sm:$0xff] }
 0x11d   : > { %5661 = vmatprep.subr.msk.mxu1 %vm422_vm0, %v7012_v34  ;;  %6233 = vmatprep.subr.msk.mxu0 %vm422_vm0, %v6914_v0  ;;  %v300_v10 = vld [vmem:[%s11023_s1 + $0xc0] sm:$0xff]  ;;  %v295_v34 = vld [vmem:[%s11023_s1 + $0x98] sm:$0xff] }
 0x120   : > { %5662 = vmatpush3.xpose.msk.msra.mxu1 %vm422_vm0, %v6944_v15  ;;  %6234 = vmatpush3.xpose.msk.msra.mxu0 %vm422_vm0, %v6914_v0  ;;  %v254_v0 = vld [vmem:[%s11022_s0 + $0xd0] sm:$0xff] }
 0x121   : > { %5663 = vmatprep.subr.msk.mxu1 %vm422_vm0, %v7002_v31  ;;  %6235 = vmatprep.subr.msk.mxu0 %vm422_vm0, %v6902_v58  ;;  %v7398_v31 = vadd.f32 %v323_v36, %v275_v35  ;;  %v250_v35 = vld [vmem:[%s11022_s0 + $0xb0] sm:$0xff] }
 0x124   : > { %5664 = vmatpush3.xpose.msk.msra.mxu1 %vm422_vm0, %v6932_v9  ;;  %6236 = vmatpush3.xpose.msk.msra.mxu0 %vm422_vm0, %v6902_v58  ;;  %v302_v58 = vld [vmem:[%s11023_s1 + $0xd0] sm:$0xff] }
 0x125   : > { %5665 = vmatprep.subr.msk.mxu1 %vm422_vm0, %v7004_v32  ;;  %6237 = vmatprep.subr.msk.mxu0 %vm422_vm0, %v6906_v60  ;;  %v7300_v18 = vadd.f32 %v302_v58, %v254_v0  ;;  %v301_v58 = vld [vmem:[%s11023_s1 + $0xc8] sm:$0xff]  ;;  %v244_v0 = vld [vmem:[%s11022_s0 + $0x80] sm:$0xff] }
 0x126   : > { %v7331_v49 = vadd.f32 %v301_v58, %v253_v47  ;;  %v245_v47 = vld [vmem:[%s11022_s0 + $0x88] sm:$0xff] }
 0x127   : > { %v293_v58 = vld [vmem:[%s11023_s1 + $0x88] sm:$0xff] }
 0x128   : > { %5666 = vmatpush3.xpose.msk.msra.mxu1 %vm422_vm0, %v6936_v11  ;;  %6238 = vmatpush3.xpose.msk.msra.mxu0 %vm422_vm0, %v6906_v60  ;;  %v7360_v60 = vadd.f32 %v292_v50, %v244_v0  ;;  %v294_v0 = vld [vmem:[%s11023_s1 + $0x90] sm:$0xff]  ;;  %v251_v50 = vld [vmem:[%s11022_s0 + $0xb8] sm:$0xff] }
 0x129   : > { %5667 = vmatprep.subr.msk.mxu1 %vm422_vm0, %v6994_v29  ;;  %6239 = vmatprep.subr.msk.mxu0 %vm422_vm0, %v6894_v54  ;;  %v298_v29 = vld [vmem:[%s11023_s1 + $0xb0] sm:$0xff] }
 0x12c   : > { %5668 = vmatpush3.xpose.msk.msra.mxu1 %vm422_vm0, %v6924_v5  ;;  %6240 = vmatpush3.xpose.msk.msra.mxu0 %vm422_vm0, %v6894_v54  ;;  %v246_v54 = vld [vmem:[%s11022_s0 + $0x90] sm:$0xff] }
 0x12d   : > { %5669 = vmatprep.subr.msk.mxu1 %vm422_vm0, %v6996_v30  ;;  %6241 = vmatprep.subr.msk.mxu0 %vm422_vm0, %v6898_v56  ;;  %v7404_v32 = vadd.f32 %v294_v0, %v246_v54  ;;  %v274_v54 = vld [vmem:[%s11022_s0 + $0x170] sm:$0xff]  ;;  %v249_v30 = vld [vmem:[%s11022_s0 + $0xa8] sm:$0xff] }
 0x12e   : > { %v322_v0 = vld [vmem:[%s11023_s1 + $0x170] sm:$0xff] }
 0x130   : > { %5670 = vmatpush3.xpose.msk.msra.mxu1 %vm422_vm0, %v6928_v7  ;;  %6242 = vmatpush3.xpose.msk.msra.mxu0 %vm422_vm0, %v6898_v56  ;;  %v7365_v56 = vadd.f32 %v300_v10, %v252_v6  ;;  %v299_v6 = vld [vmem:[%s11023_s1 + $0xb8] sm:$0xff]  ;;  %v7390_v10 = vadd.f32 %v293_v58, %v245_v47  ;;  %v248_v47 = vld [vmem:[%s11022_s0 + $0xa0] sm:$0xff] }
 0x131   : > { %5671 = vmatprep.subr.msk.mxu1 %vm422_vm0, %v6986_v27  ;;  %5847 = vmatprep.subr.msk.mxu0 %vm422_vm0, %v7098_v43  ;;  %v296_v58 = vld [vmem:[%s11023_s1 + $0xa0] sm:$0xff]  ;;  %v7415_v36 = vadd.f32 %v299_v6, %v251_v50  ;;  %v7436_v50 = vadd.f32 %v295_v34, %v247_v33  ;;  %v297_v27 = vld [vmem:[%s11023_s1 + $0xa8] sm:$0xff]  ;;  %v7452_v33 = vadd.f32 %v322_v0, %v274_v54  ;;  %v271_v54 = vld [vmem:[%s11022_s0 + $0x158] sm:$0xff] }
 0x132   : > { %v7442_v6 = vadd.f32 %v296_v58, %v248_v47  ;;  %v273_v34 = vld [vmem:[%s11022_s0 + $0x168] sm:$0xff]  ;;  %v319_v0 = vld [vmem:[%s11023_s1 + $0x158] sm:$0xff] }
 0x133   : > { %6244 = vmatmul.mubr.msk.f32.vlgmr.msra.gmra.mxu0 %vm422_vm0, %v7100_v44  ;;  %v321_v47 = vld [vmem:[%s11023_s1 + $0x168] sm:$0xff] }
 0x134   : > { %5672 = vmatpush3.xpose.msk.msra.mxu1 %vm422_vm0, %v6916_v1  ;;  %6246 = vmatprep.mubr.msk.f32.mxu0 %vm422_vm0, %v7115_v48  ;;  %v7478_v58 = vadd.f32 %v321_v47, %v273_v34  ;;  %v7526_v34 = vadd.f32 %v319_v0, %v271_v54  ;;  %v270_v47 = vld [vmem:[%s11022_s0 + $0x150] sm:$0xff]  ;;  %v269_v54 = vld [vmem:[%s11022_s0 + $0x148] sm:$0xff] }
 0x135   : > { %5673 = vmatprep.subr.msk.mxu1 %vm422_vm0, %v6988_v28  ;;  %5848 = vmatpush3.xpose.msk.msra.mxu0 %vm422_vm0, %v7145_v42  ;;  %v7450_v28 = vadd.f32 %v298_v29, %v250_v35  ;;  %v7472_v29 = vadd.f32 %v297_v27, %v249_v30  ;;  %v272_v35 = vld [vmem:[%s11022_s0 + $0x160] sm:$0xff]  ;;  %v317_v0 = vld [vmem:[%s11023_s1 + $0x148] sm:$0xff] }
 0x136   : > { %5849 = vmatprep.subr.msk.mxu0 %vm422_vm0, %v7136_v39  ;;  %v320_v27 = vld [vmem:[%s11023_s1 + $0x160] sm:$0xff] }
 0x137   : > { %6247 = vmatmul.mubr.msk.f32.gmra.mxu0 %vm422_vm0, %v7140_v40  ;;  %v7502_v30 = vadd.f32 %v320_v27, %v272_v35  ;;  %v318_v35 = vld [vmem:[%s11023_s1 + $0x150] sm:$0xff] }
 0x138   : > { %5674 = vmatpush3.xpose.msk.msra.mxu1 %vm422_vm0, %v6920_v3  ;;  %6249 = vmatprep.mubr.msk.f32.mxu0 %vm422_vm0, %v7157_v45  ;;  %v7550_v27 = vadd.f32 %v318_v35, %v270_v47  ;;  %v308_v47 = vld [vmem:[%s11023_s1 + $0x100] sm:$0xff] }
 0x139   : > { %5675 = vmatprep.subr.msk.mxu1 %vm422_vm0, %v6978_v25  ;;  %5850 = vmatpush3.xpose.msk.msra.mxu0 %vm422_vm0, %v7189_v16  ;;  %v316_v35 = vld [vmem:[%s11023_s1 + $0x140] sm:$0xff] }
 0x13a   : > { %5851 = vmatprep.subr.msk.mxu0 %vm422_vm0, %v7180_v38 }
 0x13b   : > { %6250 = vmatmul.mubr.msk.f32.gmra.mxu0 %vm422_vm0, %v7184_v20 }
 0x13c   : > { %5676 = vmatpush3.xpose.msk.msra.mxu1 %vm422_vm0, %v6908_v61  ;;  %6252 = vmatprep.mubr.msk.f32.mxu0 %vm422_vm0, %v7201_v41 }
 0x13d   : > { %5677 = vmatprep.subr.msk.mxu1 %vm422_vm0, %v6980_v26  ;;  %5852 = vmatpush3.xpose.msk.msra.mxu0 %vm422_vm0, %v7233_v8  ;;  %v310_v26 = vld [vmem:[%s11023_s1 + $0x110] sm:$0xff] }
 0x13e   : > { %5853 = vmatprep.subr.msk.mxu0 %vm422_vm0, %v7224_v37 }
 0x13f   : > { %6253 = vmatmul.mubr.msk.f32.gmra.mxu0 %vm422_vm0, %v7228_v12 }
 0x140   : > { %5678 = vmatpush3.xpose.msk.msra.mxu1 %vm422_vm0, %v6912_v63  ;;  %6255 = vmatprep.mubr.msk.f32.mxu0 %vm422_vm0, %v7245_v14 }
 0x141   : > { %5679 = vmatprep.subr.msk.mxu1 %vm422_vm0, %v6970_v23  ;;  %5854 = vmatpush3.xpose.msk.msra.mxu0 %vm422_vm0, %v7274_v62  ;;  %v312_v23 = vld [vmem:[%s11023_s1 + $0x120] sm:$0xff] }
 0x142   : > { %5855 = vmatprep.subr.msk.mxu0 %vm422_vm0, %v7268_v51 }
 0x143   : > { %6256 = vmatmul.mubr.msk.f32.gmra.mxu0 %vm422_vm0, %v7272_v4 }
 0x144   : > { %5680 = vmatpush3.xpose.msk.msra.mxu1 %vm422_vm0, %v6900_v57  ;;  %6258 = vmatprep.mubr.msk.f32.mxu0 %vm422_vm0, %v7286_v2 }
 0x145   : > { %5681 = vmatprep.subr.msk.mxu1 %vm422_vm0, %v6972_v24  ;;  %5856 = vmatpush3.xpose.msk.msra.mxu0 %vm422_vm0, %v7304_v46 }
 0x146   : > { %5857 = vmatprep.subr.msk.mxu0 %vm422_vm0, %v7300_v18 }
 0x147   : > { %6259 = vmatmul.mubr.msk.f32.gmra.mxu0 %vm422_vm0, %v7304_v46 }
 0x148   : > { %5682 = vmatpush3.xpose.msk.msra.mxu1 %vm422_vm0, %v6904_v59  ;;  %6261 = vmatprep.mubr.msk.f32.mxu0 %vm422_vm0, %v7274_v62 }
 0x149   : > { %5683 = vmatprep.subr.msk.mxu1 %vm422_vm0, %v6962_v21  ;;  %5858 = vmatpush3.xpose.msk.msra.mxu0 %vm422_vm0, %v7286_v2 }
 0x14a   : > { %5859 = vmatprep.subr.msk.mxu0 %vm422_vm0, %v7331_v49 }
 0x14b   : > { %6262 = vmatmul.mubr.msk.f32.gmra.mxu0 %vm422_vm0, %v7233_v8 }
 0x14c   : > { %5684 = vmatpush3.xpose.msk.msra.mxu1 %vm422_vm0, %v6892_v53  ;;  %6264 = vmatprep.mubr.msk.f32.mxu0 %vm422_vm0, %v7189_v16 }
 0x14d   : > { %5685 = vmatprep.subr.msk.mxu1 %vm422_vm0, %v6964_v22  ;;  %5860 = vmatpush3.xpose.msk.msra.mxu0 %vm422_vm0, %v7272_v4 }
 0x14e   : > { %5861 = vmatprep.subr.msk.mxu0 %vm422_vm0, %v7365_v56 }
 0x14f   : > { %6265 = vmatmul.mubr.msk.f32.gmra.mxu0 %vm422_vm0, %v7145_v42 }
 0x150   : > { %5686 = vmatpush3.xpose.msk.msra.mxu1 %vm422_vm0, %v6896_v55  ;;  %6267 = vmatprep.mubr.msk.f32.mxu0 %vm422_vm0, %v7360_v60 }
 0x151   : > { %5862 = vmatpush3.xpose.msk.msra.mxu0 %vm422_vm0, %v7245_v14  ;;  %6315 = vmatprep.subr.msk.mxu1 %vm422_vm0, %v7398_v31 }
 0x152   : > { %5863 = vmatprep.subr.msk.mxu0 %vm422_vm0, %v7415_v36 }
 0x153   : > { %5688 = vmatmul.mubr.msk.f32.vlgmr.msra.gmra.mxu1 %vm422_vm0, %v6886_v52  ;;  %6268 = vmatmul.mubr.msk.f32.gmra.mxu0 %vm422_vm0, %v7390_v10 }
 0x154   : > { %5689 = vmatprep.mubr.msk.f32.mxu1 %vm422_vm0, %v7100_v44  ;;  %6270 = vmatprep.mubr.msk.f32.mxu0 %vm422_vm0, %v7404_v32 }
 0x155   : > { %6316 = vmatpush3.xpose.msk.msra.mxu1 %vm422_vm0, %v7398_v31  ;;  %5864 = vmatpush3.xpose.msk.msra.mxu0 %vm422_vm0, %v7228_v12 }
 0x156   : > { %5865 = vmatprep.subr.msk.mxu0 %vm422_vm0, %v7450_v28  ;;  %6317 = vmatprep.subr.msk.mxu1 %vm422_vm0, %v7452_v33 }
 0x157   : > { %5690 = vmatmul.mubr.msk.f32.gmra.mxu1 %vm422_vm0, %v7100_v44  ;;  %6271 = vmatmul.mubr.msk.f32.gmra.mxu0 %vm422_vm0, %v7436_v50 }
 0x158   : > { %5691 = vmatprep.mubr.msk.f32.mxu1 %vm422_vm0, %v7115_v48  ;;  %6273 = vmatprep.mubr.msk.f32.mxu0 %vm422_vm0, %v7442_v6 }
 0x159   : > { %5866 = vmatpush3.xpose.msk.msra.mxu0 %vm422_vm0, %v7201_v41  ;;  %6318 = vmatpush3.xpose.msk.msra.mxu1 %vm422_vm0, %v7452_v33 }
 0x15a   : > { %5867 = vmatprep.subr.msk.mxu0 %vm422_vm0, %v7472_v29  ;;  %6319 = vmatprep.subr.msk.mxu1 %vm422_vm0, %v7478_v58 }
 0x15b   : > { %5692 = vmatmul.mubr.msk.f32.gmra.mxu1 %vm422_vm0, %v7115_v48  ;;  %6274 = vmatmul.mubr.msk.f32.gmra.mxu0 %vm422_vm0, %v7472_v29 }
 0x15c   : > { %5693 = vmatprep.mubr.msk.f32.mxu1 %vm422_vm0, %v7140_v40  ;;  %6276 = vmatprep.mubr.msk.f32.mxu0 %vm422_vm0, %v7450_v28 }
 0x15d   : > { %5868 = vmatpush3.xpose.msk.msra.mxu0 %vm422_vm0, %v7184_v20  ;;  %6320 = vmatpush3.xpose.msk.msra.mxu1 %vm422_vm0, %v7478_v58 }
 0x15e   : > { %5869 = vmatprep.subr.msk.mxu0 %vm422_vm0, %v7442_v6  ;;  %6321 = vmatprep.subr.msk.mxu1 %vm422_vm0, %v7502_v30 }
 0x15f   : > { %5694 = vmatmul.mubr.msk.f32.gmra.mxu1 %vm422_vm0, %v7140_v40  ;;  %6277 = vmatmul.mubr.msk.f32.gmra.mxu0 %vm422_vm0, %v7415_v36 }
 0x160   : > { %5695 = vmatprep.mubr.msk.f32.mxu1 %vm422_vm0, %v7157_v45  ;;  %6279 = vmatprep.mubr.msk.f32.mxu0 %vm422_vm0, %v7365_v56 }
 0x161   : > { %5870 = vmatpush3.xpose.msk.msra.mxu0 %vm422_vm0, %v7157_v45  ;;  %6322 = vmatpush3.xpose.msk.msra.mxu1 %vm422_vm0, %v7502_v30 }
 0x162   : > { %5871 = vmatprep.subr.msk.mxu0 %vm422_vm0, %v7436_v50  ;;  %6323 = vmatprep.subr.msk.mxu1 %vm422_vm0, %v7526_v34 }
 0x163   : > { %5696 = vmatmul.mubr.msk.f32.gmra.mxu1 %vm422_vm0, %v7157_v45  ;;  %6280 = vmatmul.mubr.msk.f32.gmra.mxu0 %vm422_vm0, %v7331_v49  ;;  %v7577_v45 = vadd.f32 %v317_v0, %v269_v54  ;;  %v261_v54 = vld [vmem:[%s11022_s0 + $0x108] sm:$0xff] }
 0x164   : > { %5697 = vmatprep.mubr.msk.f32.mxu1 %vm422_vm0, %v7184_v20  ;;  %6282 = vmatprep.mubr.msk.f32.mxu0 %vm422_vm0, %v7300_v18  ;;  %v309_v0 = vld [vmem:[%s11023_s1 + $0x108] sm:$0xff] }
 0x165   : > { %5872 = vmatpush3.xpose.msk.msra.mxu0 %vm422_vm0, %v7140_v40  ;;  %6324 = vmatpush3.xpose.msk.msra.mxu1 %vm422_vm0, %v7526_v34  ;;  %v260_v40 = vld [vmem:[%s11022_s0 + $0x100] sm:$0xff] }
 0x166   : > { %5873 = vmatprep.subr.msk.mxu0 %vm422_vm0, %v7404_v32  ;;  %6325 = vmatprep.subr.msk.mxu1 %vm422_vm0, %v7550_v27 }
 0x167   : > { %5698 = vmatmul.mubr.msk.f32.gmra.mxu1 %vm422_vm0, %v7184_v20  ;;  %6283 = vmatmul.mubr.msk.f32.gmra.mxu0 %vm422_vm0, %v7268_v51  ;;  %v268_v20 = vld [vmem:[%s11022_s0 + $0x140] sm:$0xff] }
 0x168   : > { %5699 = vmatprep.mubr.msk.f32.mxu1 %vm422_vm0, %v7201_v41  ;;  %6285 = vmatprep.mubr.msk.f32.mxu0 %vm422_vm0, %v7224_v37  ;;  %v7615_v25 = vadd.f32 %v316_v35, %v268_v20  ;;  %v7638_v20 = vadd.f32 %v309_v0, %v261_v54  ;;  %v263_v35 = vld [vmem:[%s11022_s0 + $0x118] sm:$0xff]  ;;  %v264_v54 = vld [vmem:[%s11022_s0 + $0x120] sm:$0xff] }
 0x169   : > { %5874 = vmatpush3.xpose.msk.msra.mxu0 %vm422_vm0, %v7115_v48  ;;  %6326 = vmatpush3.xpose.msk.msra.mxu1 %vm422_vm0, %v7550_v27  ;;  %v7604_v48 = vadd.f32 %v308_v47, %v260_v40  ;;  %v267_v40 = vld [vmem:[%s11022_s0 + $0x138] sm:$0xff] }
 0x16a   : > { %5875 = vmatprep.subr.msk.mxu0 %vm422_vm0, %v7390_v10  ;;  %6327 = vmatprep.subr.msk.mxu1 %vm422_vm0, %v7577_v45  ;;  %v315_v47 = vld [vmem:[%s11023_s1 + $0x138] sm:$0xff] }
 0x16b   : > { %5700 = vmatmul.mubr.msk.f32.gmra.mxu1 %vm422_vm0, %v7201_v41  ;;  %6286 = vmatmul.mubr.msk.f32.gmra.mxu0 %vm422_vm0, %v7180_v38  ;;  %v262_v41 = vld [vmem:[%s11022_s0 + $0x110] sm:$0xff]  ;;  %v7655_v0 = vadd.f32 %v315_v47, %v267_v40  ;;  %v265_v47 = vld [vmem:[%s11022_s0 + $0x128] sm:$0xff] }
 0x16c   : > { %5701 = vmatprep.mubr.msk.f32.mxu1 %vm422_vm0, %v7228_v12  ;;  %6288 = vmatprep.mubr.msk.f32.mxu0 %vm422_vm0, %v7136_v39 }
 0x16d   : > { %5876 = vmatpush3.xpose.msk.msra.mxu0 %vm422_vm0, %v7100_v44  ;;  %6328 = vmatpush3.xpose.msk.msra.mxu1 %vm422_vm0, %v7577_v45  ;;  %v7644_v44 = vadd.f32 %v310_v26, %v262_v41  ;;  %v266_v26 = vld [vmem:[%s11022_s0 + $0x130] sm:$0xff] }
 0x16e   : > { %5877 = vmatprep.subr.msk.mxu0 %vm422_vm0, %v7360_v60  ;;  %6329 = vmatprep.subr.msk.mxu1 %vm422_vm0, %v7615_v25  ;;  %v314_v41 = vld [vmem:[%s11023_s1 + $0x130] sm:$0xff] }
 0x16f   : > { %5702 = vmatmul.mubr.msk.f32.gmra.mxu1 %vm422_vm0, %v7228_v12  ;;  %6289 = vmatmul.mubr.msk.f32.gmra.mxu0 %vm422_vm0, %v7098_v43  ;;  %v311_v12 = vld [vmem:[%s11023_s1 + $0x118] sm:$0xff]  ;;  %v7690_v24 = vadd.f32 %v314_v41, %v266_v26 }
 0x170   : > { %5703 = vmatprep.mubr.msk.f32.mxu1 %vm422_vm0, %v7245_v14  ;;  %6291 = vmatprep.mubr.msk.f32.mxu0 %vm422_vm0, %v7604_v48  ;;  %v7676_v40 = vadd.f32 %v311_v12, %v263_v35 }
 0x171   : > { %5878 = vmatpush3.xpose.msk.msra.mxu0 %vm422_vm0, %v6886_v52  ;;  %6330 = vmatpush3.xpose.msk.msra.mxu1 %vm422_vm0, %v7615_v25  ;;  %v7682_v52 = vadd.f32 %v312_v23, %v264_v54 }
 0x172   : > { %6331 = vmatprep.subr.msk.mxu1 %vm422_vm0, %v7655_v0 }
 0x173   : > { %5704 = vmatmul.mubr.msk.f32.gmra.mxu1 %vm422_vm0, %v7245_v14  ;;  %6292 = vmatmul.mubr.msk.f32.gmra.mxu0 %vm422_vm0, %v7638_v20  ;;  %v313_v14 = vld [vmem:[%s11023_s1 + $0x128] sm:$0xff] }
 0x174   : > { %5705 = vmatprep.mubr.msk.f32.mxu1 %vm422_vm0, %v7272_v4  ;;  %6294 = vmatprep.mubr.msk.f32.mxu0 %vm422_vm0, %v7644_v44  ;;  %v7700_v23 = vadd.f32 %v313_v14, %v265_v47 }
 0x175   : > { %6332 = vmatpush3.xpose.msk.msra.mxu1 %vm422_vm0, %v7655_v0 }
 0x176   : > { %6333 = vmatprep.subr.msk.mxu1 %vm422_vm0, %v7690_v24 }
 0x177   : > { %5706 = vmatmul.mubr.msk.f32.gmra.mxu1 %vm422_vm0, %v7272_v4  ;;  %6295 = vmatmul.mubr.msk.f32.gmra.mxu0 %vm422_vm0, %v7676_v40  ;;  %v11279_v4 = vld [vmem:[#allocation21_spill] sm:$0xff] }
 0x178   : > { %5707 = vmatprep.mubr.msk.f32.mxu1 %vm422_vm0, %v7286_v2  ;;  %6297 = vmatprep.mubr.msk.f32.mxu0 %vm422_vm0, %v7682_v52 }
 0x179   : > { %6334 = vmatpush3.xpose.msk.msra.mxu1 %vm422_vm0, %v7690_v24 }
 0x17a   : > { %6335 = vmatprep.subr.msk.mxu1 %vm422_vm0, %v7700_v23 }
 0x17b   : > { %5708 = vmatmul.mubr.msk.f32.gmra.mxu1 %vm422_vm0, %v7286_v2  ;;  %6298 = vmatmul.mubr.msk.f32.gmra.mxu0 %vm422_vm0, %v7700_v23 }
 0x17c   : > { %5709 = vmatprep.mubr.msk.f32.mxu1 %vm422_vm0, %v7304_v46  ;;  %6300 = vmatprep.mubr.msk.f32.mxu0 %vm422_vm0, %v7690_v24 }
 0x17d   : > { %6336 = vmatpush3.xpose.msk.msra.mxu1 %vm422_vm0, %v7700_v23 }
 0x17e   : > { %6337 = vmatprep.subr.msk.mxu1 %vm422_vm0, %v7682_v52 }
 0x17f   : > { %5710 = vmatmul.mubr.msk.f32.gmra.mxu1 %vm422_vm0, %v7304_v46  ;;  %6301 = vmatmul.mubr.msk.f32.gmra.mxu0 %vm422_vm0, %v7655_v0 }
 0x180   : > { %5711 = vmatprep.mubr.msk.f32.mxu1 %vm422_vm0, %v7274_v62  ;;  %6303 = vmatprep.mubr.msk.f32.mxu0 %vm422_vm0, %v7615_v25 }
 0x181   : > { %6338 = vmatpush3.xpose.msk.msra.mxu1 %vm422_vm0, %v7682_v52 }
 0x182   : > { %6339 = vmatprep.subr.msk.mxu1 %vm422_vm0, %v7676_v40 }
 0x183   : > { %5712 = vmatmul.mubr.msk.f32.gmra.mxu1 %vm422_vm0, %v7274_v62  ;;  %6304 = vmatmul.mubr.msk.f32.gmra.mxu0 %vm422_vm0, %v7577_v45  ;;  %v11278_v62 = vld [vmem:[#allocation22_spill] sm:$0xff] }
 0x184   : > { %5713 = vmatprep.mubr.msk.f32.mxu1 %vm422_vm0, %v7233_v8  ;;  %6306 = vmatprep.mubr.msk.f32.mxu0 %vm422_vm0, %v7550_v27 }
 0x185   : > { %6340 = vmatpush3.xpose.msk.msra.mxu1 %vm422_vm0, %v7676_v40 }
 0x186   : > { %6341 = vmatprep.subr.msk.mxu1 %vm422_vm0, %v7644_v44 }
 0x187   : > { %5714 = vmatmul.mubr.msk.f32.gmra.mxu1 %vm422_vm0, %v7233_v8  ;;  %6307 = vmatmul.mubr.msk.f32.gmra.mxu0 %vm422_vm0, %v7526_v34  ;;  %v11280_v8 = vld [vmem:[#allocation24_spill] sm:$0xff] }
 0x188   : > { %5715 = vmatprep.mubr.msk.f32.mxu1 %vm422_vm0, %v7189_v16  ;;  %6309 = vmatprep.mubr.msk.f32.mxu0 %vm422_vm0, %v7502_v30 }
 0x189   : > { %6342 = vmatpush3.xpose.msk.msra.mxu1 %vm422_vm0, %v7644_v44 }
 0x18a   : > { %6343 = vmatprep.subr.msk.mxu1 %vm422_vm0, %v7638_v20 }
 0x18b   : > { %5716 = vmatmul.mubr.msk.f32.gmra.mxu1 %vm422_vm0, %v7189_v16  ;;  %6310 = vmatmul.mubr.msk.f32.gmra.mxu0 %vm422_vm0, %v7478_v58  ;;  %v11281_v16 = vld [vmem:[#allocation23_spill] sm:$0xff] }
 0x18c   : > { %5717 = vmatprep.mubr.msk.f32.mxu1 %vm422_vm0, %v7145_v42  ;;  %6312 = vmatprep.mubr.msk.f32.mxu0 %vm422_vm0, %v7452_v33 }
 0x18d   : > { %6344 = vmatpush3.xpose.msk.msra.mxu1 %vm422_vm0, %v7638_v20 }
 0x18e   : > { %6345 = vmatprep.subr.msk.mxu1 %vm422_vm0, %v7604_v48 }
 0x18f   : > { %5718 = vmatmul.mubr.msk.f32.gmra.mxu1 %vm422_vm0, %v7145_v42  ;;  %6313 = vmatmul.mubr.msk.f32.gmra.mxu0 %vm422_vm0, %v7398_v31 }
 0x190   : > { %5879 = vmatprep.mubr.msk.f32.mxu0 %vm422_vm0, %v6896_v55  ;;  %5719 = vmatprep.mubr.msk.f32.mxu1 %vm422_vm0, %v7360_v60 }
 0x191   : > { %6346 = vmatpush3.xpose.msk.msra.mxu1 %vm422_vm0, %v7604_v48 }
 0x193   : > { %5720 = vmatmul.mubr.msk.f32.gmra.mxu1 %vm422_vm0, %v7360_v60  ;;  %5880 = vmatmul.mubr.msk.f32.vlgmr.msra.gmra.mxu0 %vm422_vm0, %v6896_v55  ;;  %v11277_v60 = vld [vmem:[#allocation19_spill] sm:$0xff] }
 0x194   : > { %5881 = vmatprep.mubr.msk.f32.mxu0 %vm422_vm0, %v6892_v53  ;;  %5721 = vmatprep.mubr.msk.f32.mxu1 %vm422_vm0, %v7390_v10 }
 0x197   : > { %5722 = vmatmul.mubr.msk.f32.gmra.mxu1 %vm422_vm0, %v7390_v10  ;;  %5882 = vmatmul.mubr.msk.f32.gmra.mxu0 %vm422_vm0, %v6892_v53  ;;  %v11287_v10 = vld [vmem:[#allocation29_spill] sm:$0xff] }
 0x198   : > { %5883 = vmatprep.mubr.msk.f32.mxu0 %vm422_vm0, %v6904_v59  ;;  %5723 = vmatprep.mubr.msk.f32.mxu1 %vm422_vm0, %v7404_v32 }
 0x19b   : > { %5724 = vmatmul.mubr.msk.f32.gmra.mxu1 %vm422_vm0, %v7404_v32  ;;  %5884 = vmatmul.mubr.msk.f32.gmra.mxu0 %vm422_vm0, %v6904_v59  ;;  %v11283_v32 = vld [vmem:[#allocation25_spill] sm:$0xff] }
 0x19c   : > { %5885 = vmatprep.mubr.msk.f32.mxu0 %vm422_vm0, %v6900_v57  ;;  %5725 = vmatprep.mubr.msk.f32.mxu1 %vm422_vm0, %v7436_v50 }
 0x19f   : > { %5726 = vmatmul.mubr.msk.f32.gmra.mxu1 %vm422_vm0, %v7436_v50  ;;  %5886 = vmatmul.mubr.msk.f32.gmra.mxu0 %vm422_vm0, %v6900_v57 }
 0x1a0   : > { %5887 = vmatprep.mubr.msk.f32.mxu0 %vm422_vm0, %v6912_v63  ;;  %5727 = vmatprep.mubr.msk.f32.mxu1 %vm422_vm0, %v7442_v6 }
 0x1a3   : > { %5728 = vmatmul.mubr.msk.f32.gmra.mxu1 %vm422_vm0, %v7442_v6  ;;  %5888 = vmatmul.mubr.msk.f32.gmra.mxu0 %vm422_vm0, %v6912_v63  ;;  %v11288_v6 = vld [vmem:[#allocation32_spill] sm:$0xff] }
 0x1a4   : > { %5889 = vmatprep.mubr.msk.f32.mxu0 %vm422_vm0, %v6908_v61  ;;  %5729 = vmatprep.mubr.msk.f32.mxu1 %vm422_vm0, %v7472_v29 }
 0x1a7   : > { %5730 = vmatmul.mubr.msk.f32.gmra.mxu1 %vm422_vm0, %v7472_v29  ;;  %5890 = vmatmul.mubr.msk.f32.gmra.mxu0 %vm422_vm0, %v6908_v61 }
 0x1a8   : > { %5891 = vmatprep.mubr.msk.f32.mxu0 %vm422_vm0, %v6920_v3  ;;  %5731 = vmatprep.mubr.msk.f32.mxu1 %vm422_vm0, %v7450_v28 }
 0x1ab   : > { %5732 = vmatmul.mubr.msk.f32.gmra.mxu1 %vm422_vm0, %v7450_v28  ;;  %5892 = vmatmul.mubr.msk.f32.gmra.mxu0 %vm422_vm0, %v6920_v3  ;;  %v11282_v28 = vld [vmem:[#allocation26_spill] sm:$0xff] }
 0x1ac   : > { %5893 = vmatprep.mubr.msk.f32.mxu0 %vm422_vm0, %v6916_v1  ;;  %5733 = vmatprep.mubr.msk.f32.mxu1 %vm422_vm0, %v7415_v36 }
 0x1af   : > { %5734 = vmatmul.mubr.msk.f32.gmra.mxu1 %vm422_vm0, %v7415_v36  ;;  %5894 = vmatmul.mubr.msk.f32.gmra.mxu0 %vm422_vm0, %v6916_v1 }
 0x1b0   : > { %5895 = vmatprep.mubr.msk.f32.mxu0 %vm422_vm0, %v6928_v7  ;;  %5735 = vmatprep.mubr.msk.f32.mxu1 %vm422_vm0, %v7365_v56 }
 0x1b3   : > { %5736 = vmatmul.mubr.msk.f32.gmra.mxu1 %vm422_vm0, %v7365_v56  ;;  %5896 = vmatmul.mubr.msk.f32.gmra.mxu0 %vm422_vm0, %v6928_v7  ;;  %v11276_v56 = vld [vmem:[#allocation20_spill] sm:$0xff] }
 0x1b4   : > { %5897 = vmatprep.mubr.msk.f32.mxu0 %vm422_vm0, %v6924_v5  ;;  %5737 = vmatprep.mubr.msk.f32.mxu1 %vm422_vm0, %v7331_v49 }
 0x1b7   : > { %5738 = vmatmul.mubr.msk.f32.gmra.mxu1 %vm422_vm0, %v7331_v49  ;;  %5898 = vmatmul.mubr.msk.f32.gmra.mxu0 %vm422_vm0, %v6924_v5 }
 0x1b8   : > { %5899 = vmatprep.mubr.msk.f32.mxu0 %vm422_vm0, %v6936_v11  ;;  %5739 = vmatprep.mubr.msk.f32.mxu1 %vm422_vm0, %v7300_v18 }
 0x1bb   : > { %5740 = vmatmul.mubr.msk.f32.gmra.mxu1 %vm422_vm0, %v7300_v18  ;;  %5900 = vmatmul.mubr.msk.f32.gmra.mxu0 %vm422_vm0, %v6936_v11  ;;  %v11286_v18 = vld [vmem:[#allocation30_spill] sm:$0xff] }
 0x1bc   : > { %5901 = vmatprep.mubr.msk.f32.mxu0 %vm422_vm0, %v6932_v9  ;;  %5741 = vmatprep.mubr.msk.f32.mxu1 %vm422_vm0, %v7268_v51 }
 0x1bf   : > { %5742 = vmatmul.mubr.msk.f32.gmra.mxu1 %vm422_vm0, %v7268_v51  ;;  %5902 = vmatmul.mubr.msk.f32.gmra.mxu0 %vm422_vm0, %v6932_v9 }
 0x1c0   : > { %5903 = vmatprep.mubr.msk.f32.mxu0 %vm422_vm0, %v6944_v15  ;;  %5743 = vmatprep.mubr.msk.f32.mxu1 %vm422_vm0, %v7224_v37 }
 0x1c3   : > { %5744 = vmatmul.mubr.msk.f32.gmra.mxu1 %vm422_vm0, %v7224_v37  ;;  %5904 = vmatmul.mubr.msk.f32.gmra.mxu0 %vm422_vm0, %v6944_v15  ;;  %v11285_v37 = vld [vmem:[#allocation27_spill] sm:$0xff] }
 0x1c4   : > { %5905 = vmatprep.mubr.msk.f32.mxu0 %vm422_vm0, %v6940_v13  ;;  %5745 = vmatprep.mubr.msk.f32.mxu1 %vm422_vm0, %v7180_v38 }
 0x1c7   : > { %5746 = vmatmul.mubr.msk.f32.gmra.mxu1 %vm422_vm0, %v7180_v38  ;;  %5906 = vmatmul.mubr.msk.f32.gmra.mxu0 %vm422_vm0, %v6940_v13 }
 0x1c8   : > { %5907 = vmatprep.mubr.msk.f32.mxu0 %vm422_vm0, %v6954_v19  ;;  %5747 = vmatprep.mubr.msk.f32.mxu1 %vm422_vm0, %v7136_v39 }
 0x1cb   : > { %5748 = vmatmul.mubr.msk.f32.gmra.mxu1 %vm422_vm0, %v7136_v39  ;;  %5908 = vmatmul.mubr.msk.f32.gmra.mxu0 %vm422_vm0, %v6954_v19 }
 0x1cc   : > { %5909 = vmatprep.mubr.msk.f32.mxu0 %vm422_vm0, %v6948_v17  ;;  %5749 = vmatprep.mubr.msk.f32.mxu1 %vm422_vm0, %v7098_v43 }
 0x1cf   : > { %5750 = vmatmul.mubr.msk.f32.gmra.mxu1 %vm422_vm0, %v7098_v43  ;;  %5910 = vmatmul.mubr.msk.f32.gmra.mxu0 %vm422_vm0, %v6948_v17 }
 0x1d0   : > { %5911 = vmatprep.mubr.msk.f32.mxu0 %vm422_vm0, %v6964_v22  ;;  %5751 = vmatprep.mubr.msk.f32.mxu1 %vm422_vm0, %v7604_v48 }
 0x1d3   : > { %5752 = vmatmul.mubr.msk.f32.gmra.mxu1 %vm422_vm0, %v7604_v48  ;;  %5912 = vmatmul.mubr.msk.f32.gmra.mxu0 %vm422_vm0, %v6964_v22 }
 0x1d4   : > { %5913 = vmatprep.mubr.msk.f32.mxu0 %vm422_vm0, %v6962_v21  ;;  %5753 = vmatprep.mubr.msk.f32.mxu1 %vm422_vm0, %v7638_v20 }
 0x1d7   : > { %5754 = vmatmul.mubr.msk.f32.gmra.mxu1 %vm422_vm0, %v7638_v20  ;;  %5914 = vmatmul.mubr.msk.f32.gmra.mxu0 %vm422_vm0, %v6962_v21  ;;  %v11290_v20 = vld [vmem:[#allocation4_spill] sm:$0xff] }
 0x1d8   : > { %5915 = vmatprep.mubr.msk.f32.mxu0 %vm422_vm0, %v11276_v56  ;;  %5755 = vmatprep.mubr.msk.f32.mxu1 %vm422_vm0, %v7644_v44 }
 0x1db   : > { %5756 = vmatmul.mubr.msk.f32.gmra.mxu1 %vm422_vm0, %v7644_v44  ;;  %5916 = vmatmul.mubr.msk.f32.gmra.mxu0 %vm422_vm0, %v11276_v56 }
 0x1dc   : > { %5917 = vmatprep.mubr.msk.f32.mxu0 %vm422_vm0, %v11277_v60  ;;  %5757 = vmatprep.mubr.msk.f32.mxu1 %vm422_vm0, %v7676_v40 }
 0x1df   : > { %5758 = vmatmul.mubr.msk.f32.gmra.mxu1 %vm422_vm0, %v7676_v40  ;;  %5918 = vmatmul.mubr.msk.f32.gmra.mxu0 %vm422_vm0, %v11277_v60 }
 0x1e0   : > { %5919 = vmatprep.mubr.msk.f32.mxu0 %vm422_vm0, %v11278_v62  ;;  %5759 = vmatprep.mubr.msk.f32.mxu1 %vm422_vm0, %v7682_v52 }
 0x1e3   : > { %5760 = vmatmul.mubr.msk.f32.gmra.mxu1 %vm422_vm0, %v7682_v52  ;;  %5920 = vmatmul.mubr.msk.f32.gmra.mxu0 %vm422_vm0, %v11278_v62 }
 0x1e4   : > { %5921 = vmatprep.mubr.msk.f32.mxu0 %vm422_vm0, %v11279_v4  ;;  %5761 = vmatprep.mubr.msk.f32.mxu1 %vm422_vm0, %v7700_v23 }
 0x1e7   : > { %5762 = vmatmul.mubr.msk.f32.gmra.mxu1 %vm422_vm0, %v7700_v23  ;;  %5922 = vmatmul.mubr.msk.f32.gmra.mxu0 %vm422_vm0, %v11279_v4  ;;  %v11294_v23 = vld [vmem:[#allocation6_spill] sm:$0xff] }
 0x1e8   : > { %5923 = vmatprep.mubr.msk.f32.mxu0 %vm422_vm0, %v11280_v8  ;;  %5763 = vmatprep.mubr.msk.f32.mxu1 %vm422_vm0, %v7690_v24 }
 0x1eb   : > { %5764 = vmatmul.mubr.msk.f32.gmra.mxu1 %vm422_vm0, %v7690_v24  ;;  %5924 = vmatmul.mubr.msk.f32.gmra.mxu0 %vm422_vm0, %v11280_v8 }
 0x1ec   : > { %5925 = vmatprep.mubr.msk.f32.mxu0 %vm422_vm0, %v11281_v16  ;;  %5765 = vmatprep.mubr.msk.f32.mxu1 %vm422_vm0, %v7655_v0 }
 0x1ef   : > { %5766 = vmatmul.mubr.msk.f32.gmra.mxu1 %vm422_vm0, %v7655_v0  ;;  %5926 = vmatmul.mubr.msk.f32.gmra.mxu0 %vm422_vm0, %v11281_v16  ;;  %v11292_v0 = vld [vmem:[#allocation3_spill] sm:$0xff] }
 0x1f0   : > { %5927 = vmatprep.mubr.msk.f32.mxu0 %vm422_vm0, %v11282_v28  ;;  %5767 = vmatprep.mubr.msk.f32.mxu1 %vm422_vm0, %v7615_v25 }
 0x1f3   : > { %5768 = vmatmul.mubr.msk.f32.gmra.mxu1 %vm422_vm0, %v7615_v25  ;;  %v7974_v24 = vpop.f32.mrf.mxu0  ;;  %5928 = vmatmul.mubr.msk.f32.gmra.mxu0 %vm422_vm0, %v11282_v28  ;;  %v11284_v25 = vld [vmem:[#allocation28_spill] sm:$0xff] }
 0x1f4   : > { %5929 = vmatprep.mubr.msk.f32.mxu0 %vm422_vm0, %v11283_v32  ;;  %5769 = vmatprep.mubr.msk.f32.mxu1 %vm422_vm0, %v7577_v45 }
 0x1f5   : > { %v7982_v43 = vpop.f32.mrf.mxu0 }
 0x1f6   : > { %v1820_v41 = vand.u32 2147483647, %v7982_v43 }
 0x1f7   : > { %5770 = vmatmul.mubr.msk.f32.gmra.mxu1 %vm422_vm0, %v7577_v45  ;;  %v7986_v39 = vpop.f32.mrf.mxu0  ;;  %5930 = vmatmul.mubr.msk.f32.gmra.mxu0 %vm422_vm0, %v11283_v32 }
 0x1f8   : > { %5931 = vmatprep.mubr.msk.f32.mxu0 %vm422_vm0, %v11284_v25  ;;  %5771 = vmatprep.mubr.msk.f32.mxu1 %vm422_vm0, %v7550_v27 }
 0x1f9   : > { %v7994_v42 = vpop.f32.mrf.mxu0 }
 0x1fb   : > { %5772 = vmatmul.mubr.msk.f32.gmra.mxu1 %vm422_vm0, %v7550_v27  ;;  %v7998_v38 = vpop.f32.mrf.mxu0  ;;  %5932 = vmatmul.mubr.msk.f32.gmra.mxu0 %vm422_vm0, %v11284_v25 }
 0x1fc   : > { %5933 = vmatprep.mubr.msk.f32.mxu0 %vm422_vm0, %v11285_v37  ;;  %5773 = vmatprep.mubr.msk.f32.mxu1 %vm422_vm0, %v7526_v34 }
 0x1fd   : > { %v8006_v51 = vpop.f32.mrf.mxu0 }
 0x1ff   : > { %5774 = vmatmul.mubr.msk.f32.gmra.mxu1 %vm422_vm0, %v7526_v34  ;;  %v8010_v2 = vpop.f32.mrf.mxu0  ;;  %5934 = vmatmul.mubr.msk.f32.gmra.mxu0 %vm422_vm0, %v11285_v37  ;;  %v11289_v34 = vld [vmem:[#allocation31_spill] sm:$0xff] }
 0x200   : > { %5935 = vmatprep.mubr.msk.f32.mxu0 %vm422_vm0, %v11286_v18  ;;  %5775 = vmatprep.mubr.msk.f32.mxu1 %vm422_vm0, %v7502_v30 }
 0x201   : > { %v8018_v46 = vpop.f32.mrf.mxu0 }
 0x203   : > { %5776 = vmatmul.mubr.msk.f32.gmra.mxu1 %vm422_vm0, %v7502_v30  ;;  %v8022_v49 = vpop.f32.mrf.mxu0  ;;  %5936 = vmatmul.mubr.msk.f32.gmra.mxu0 %vm422_vm0, %v11286_v18 }
 0x204   : > { %5937 = vmatprep.mubr.msk.f32.mxu0 %vm422_vm0, %v11287_v10  ;;  %5777 = vmatprep.mubr.msk.f32.mxu1 %vm422_vm0, %v7478_v58 }
 0x205   : > { %v8030_v36 = vpop.f32.mrf.mxu0 }
 0x207   : > { %5778 = vmatmul.mubr.msk.f32.gmra.mxu1 %vm422_vm0, %v7478_v58  ;;  %v8034_v50 = vpop.f32.mrf.mxu0  ;;  %5938 = vmatmul.mubr.msk.f32.gmra.mxu0 %vm422_vm0, %v11287_v10  ;;  %v2764_v58 = vlaneseq }
 0x208   : > { %5939 = vmatprep.mubr.msk.f32.mxu0 %vm422_vm0, %v11288_v6  ;;  %5779 = vmatprep.mubr.msk.f32.mxu1 %vm422_vm0, %v7452_v33 }
 0x209   : > { %v8042_v29 = vpop.f32.mrf.mxu0  ;;  %v8064_v48 = vand.u32 127, %v2764_v58 }
 0x20b   : > { %5780 = vmatmul.mubr.msk.f32.gmra.mxu1 %vm422_vm0, %v7452_v33  ;;  %v8046_v30 = vpop.f32.mrf.mxu0  ;;  %5940 = vmatmul.mubr.msk.f32.gmra.mxu0 %vm422_vm0, %v11288_v6  ;;  %v8062_v33 = vshrl.u32 %v2764_v58, 7 }
 0x20c   : > { %5941 = vmatprep.mubr.msk.f32.mxu0 %vm422_vm0, %v11289_v34  ;;  %5781 = vmatprep.mubr.msk.f32.mxu1 %vm422_vm0, %v7398_v31 }
 0x20d   : > { %v8054_v27 = vpop.f32.mrf.mxu0  ;;  %vm2817_vm1 = vcmp.eq.s32.totalorder %v8062_v33, %v8064_v48  ;;  %v8081_v12 = vadd.s32 8, %v8062_v33 }
 0x20f   : > { %5782 = vmatmul.mubr.msk.f32.gmra.mxu1 %vm422_vm0, %v7398_v31  ;;  %v8058_v45 = vpop.f32.mrf.mxu0  ;;  %5942 = vmatmul.mubr.msk.f32.gmra.mxu0 %vm422_vm0, %v11289_v34  ;;  %vm2820_vm2 = vcmp.eq.s32.totalorder %v8081_v12, %v8064_v48 }
 0x210   : > { %5943 = vmatprep.mubr.msk.f32.mxu0 %vm422_vm0, %v11290_v20  ;;  %6347 = vmatprep.mubr.msk.f32.mxu1 %vm422_vm0, %v6896_v55 }
 0x211   : > { %v8070_v44 = vpop.f32.mrf.mxu0 }
 0x213   : > { %v1226_v35 = vpop.f32.mrf.mxu1  ;;  %v8074_v31 = vpop.f32.mrf.mxu0  ;;  %5944 = vmatmul.mubr.msk.f32.gmra.mxu0 %vm422_vm0, %v11290_v20  ;;  %6348 = vmatmul.mubr.msk.f32.vlgmr.msra.gmra.mxu1 %vm422_vm0, %v6892_v53 }
 0x214   : > { %11291 = vst [vmem:[#allocation20_spill] sm:$0xff] %v8074_v31  ;;  %v1818_v54 = vand.u32 2147483647, %v1226_v35  ;;  %5945 = vmatprep.mubr.msk.f32.mxu0 %vm422_vm0, %v11292_v0  ;;  %6350 = vmatprep.mubr.msk.f32.mxu1 %vm422_vm0, %v6904_v59  ;;  %v8102_v59 = vadd.s32 16, %v8062_v33 }
 0x215   : > { %v1228_v55 = vpop.f32.mrf.mxu1  ;;  %v8087_v26 = vpop.f32.mrf.mxu0 }
 0x216   : > { %v2961_v40 = vsel %vm2817_vm1, 1.0, %v1818_v54  ;;  %v1819_v53 = vand.u32 2147483647, %v1228_v55  ;;  %v1823_v54 = vand.u32 2147483647, %v7974_v24  ;;  %vm2823_vm3 = vcmp.eq.s32.totalorder %v8102_v59, %v8064_v48 }
 0x217   : > { %v1232_v52 = vpop.f32.mrf.mxu1  ;;  %v8095_v47 = vpop.f32.mrf.mxu0  ;;  %5946 = vmatmul.mubr.msk.f32.gmra.mxu0 %vm422_vm0, %v11292_v0  ;;  %6351 = vmatmul.mubr.msk.f32.gmra.mxu1 %vm422_vm0, %v6900_v57 }
 0x218   : > { %11293 = vst [vmem:[#allocation19_spill] sm:$0xff] %v8095_v47  ;;  %v1821_v14 = vand.u32 2147483647, %v1232_v52  ;;  %5947 = vmatprep.mubr.msk.f32.mxu0 %vm422_vm0, %v11294_v23  ;;  %6353 = vmatprep.mubr.msk.f32.mxu1 %vm422_vm0, %v6912_v63  ;;  %v3249_v43 = vadd.f32 %v2961_v40, %v1819_v53  ;;  %v8123_v63 = vadd.s32 24, %v8062_v33  ;;  %v11297_v40 = vld [vmem:[#allocation5_spill] sm:$0xff] }
 0x219   : > { %v1234_v58 = vpop.f32.mrf.mxu1  ;;  %v8108_v35 = vpop.f32.mrf.mxu0 }
 0x21a   : > { %11295 = vst [vmem:[#allocation22_spill] sm:$0xff] %v8108_v35  ;;  %v2964_v57 = vsel %vm2820_vm2, 1.0, %v1821_v14  ;;  %v1822_v55 = vand.u32 2147483647, %v1234_v58  ;;  %v3250_v47 = vadd.f32 %v3249_v43, %v1820_v41  ;;  %v1826_v43 = vand.u32 2147483647, %v7994_v42 }
 0x21b   : > { %v1238_v31 = vpop.f32.mrf.mxu1  ;;  %v8116_v52 = vpop.f32.mrf.mxu0  ;;  %5948 = vmatmul.mubr.msk.f32.gmra.mxu0 %vm422_vm0, %v11294_v23  ;;  %6354 = vmatmul.mubr.msk.f32.gmra.mxu1 %vm422_vm0, %v6908_v61  ;;  %vm2826_vm4 = vcmp.eq.s32.totalorder %v8123_v63, %v8064_v48 }
 0x21c   : > { %11296 = vst [vmem:[#allocation21_spill] sm:$0xff] %v8116_v52  ;;  %v1824_v24 = vand.u32 2147483647, %v1238_v31  ;;  %5949 = vmatprep.mubr.msk.f32.mxu0 %vm422_vm0, %v11297_v40  ;;  %6356 = vmatprep.mubr.msk.f32.mxu1 %vm422_vm0, %v6920_v3  ;;  %v3253_v41 = vadd.f32 %v2964_v57, %v1822_v55  ;;  %v8144_v3 = vadd.s32 32, %v8062_v33 }
 0x21d   : > { %3251 = vadd.xlane.f32.xlu0 %v3250_v47  ;;  %v1240_v53 = vpop.f32.mrf.mxu1  ;;  %v8129_v14 = vpop.f32.mrf.mxu0  ;;  %v11299_v47 = vld [vmem:[#allocation8_spill] sm:$0xff] }
 0x21e   : > { %v2967_v61 = vsel %vm2823_vm3, 1.0, %v1824_v24  ;;  %v1825_v58 = vand.u32 2147483647, %v1240_v53  ;;  %v3254_v52 = vadd.f32 %v3253_v41, %v1823_v54  ;;  %v1829_v24 = vand.u32 2147483647, %v7986_v39 }
 0x21f   : > { %v1244_v31 = vpop.f32.mrf.mxu1  ;;  %v8137_v35 = vpop.f32.mrf.mxu0  ;;  %5950 = vmatmul.mubr.msk.f32.gmra.mxu0 %vm422_vm0, %v11297_v40  ;;  %6357 = vmatmul.mubr.msk.f32.gmra.mxu1 %vm422_vm0, %v6916_v1  ;;  %vm2829_vm5 = vcmp.eq.s32.totalorder %v8144_v3, %v8064_v48  ;;  %v1880_v3 = vand.u32 2147483647, %v8129_v14 }
 0x220   : > { %11298 = vst [vmem:[#allocation24_spill] sm:$0xff] %v8137_v35  ;;  %v1827_v42 = vand.u32 2147483647, %v1244_v31  ;;  %5951 = vmatprep.mubr.msk.f32.mxu0 %vm422_vm0, %v11299_v47  ;;  %6359 = vmatprep.mubr.msk.f32.mxu1 %vm422_vm0, %v6928_v7  ;;  %v3257_v54 = vadd.f32 %v2967_v61, %v1825_v58  ;;  %v8165_v7 = vadd.s32 40, %v8062_v33 }
 0x221   : > { %3255 = vadd.xlane.f32.xlu0 %v3254_v52  ;;  %v1246_v57 = vpop.f32.mrf.mxu1  ;;  %v8150_v55 = vpop.f32.mrf.mxu0  ;;  %v11301_v52 = vld [vmem:[#allocation7_spill] sm:$0xff] }
 0x222   : > { %v2970_v1 = vsel %vm2826_vm4, 1.0, %v1827_v42  ;;  %v1828_v41 = vand.u32 2147483647, %v1246_v57  ;;  %v3258_v53 = vadd.f32 %v3257_v54, %v1826_v43  ;;  %v1832_v42 = vand.u32 2147483647, %v8006_v51 }
 0x223   : > { %v1250_v31 = vpop.f32.mrf.mxu1  ;;  %v8158_v35 = vpop.f32.mrf.mxu0  ;;  %5952 = vmatmul.mubr.msk.f32.gmra.mxu0 %vm422_vm0, %v11299_v47  ;;  %6360 = vmatmul.mubr.msk.f32.gmra.mxu1 %vm422_vm0, %v6924_v5  ;;  %vm2832_vm6 = vcmp.eq.s32.totalorder %v8165_v7, %v8064_v48 }
 0x224   : > { %11300 = vst [vmem:[#allocation23_spill] sm:$0xff] %v8158_v35  ;;  %v1830_v39 = vand.u32 2147483647, %v1250_v31  ;;  %5953 = vmatprep.mubr.msk.f32.mxu0 %vm422_vm0, %v11301_v52  ;;  %6362 = vmatprep.mubr.msk.f32.mxu1 %vm422_vm0, %v6936_v11  ;;  %v3261_v43 = vadd.f32 %v2970_v1, %v1828_v41  ;;  %v8186_v11 = vadd.s32 48, %v8062_v33  ;;  %v11303_v1 = vld [vmem:[#allocation10_spill] sm:$0xff] }
 0x225   : > { %3259 = vadd.xlane.f32.xlu1 %v3258_v53  ;;  %v1252_v61 = vpop.f32.mrf.mxu1  ;;  %v8171_v58 = vpop.f32.mrf.mxu0 }
 0x226   : > { %v2973_v5 = vsel %vm2829_vm5, 1.0, %v1830_v39  ;;  %v1831_v54 = vand.u32 2147483647, %v1252_v61  ;;  %v3262_v57 = vadd.f32 %v3261_v43, %v1829_v24  ;;  %v1835_v39 = vand.u32 2147483647, %v7998_v38 }
 0x227   : > { %v1256_v31 = vpop.f32.mrf.mxu1  ;;  %v8179_v35 = vpop.f32.mrf.mxu0  ;;  %5954 = vmatmul.mubr.msk.f32.gmra.mxu0 %vm422_vm0, %v11301_v52  ;;  %6363 = vmatmul.mubr.msk.f32.gmra.mxu1 %vm422_vm0, %v6932_v9  ;;  %vm2835_vm7 = vcmp.eq.s32.totalorder %v8186_v11, %v8064_v48 }
 0x228   : > { %11302 = vst [vmem:[#allocation26_spill] sm:$0xff] %v8179_v35  ;;  %v1833_v51 = vand.u32 2147483647, %v1256_v31  ;;  %5955 = vmatprep.mubr.msk.f32.mxu0 %vm422_vm0, %v11303_v1  ;;  %6365 = vmatprep.mubr.msk.f32.mxu1 %vm422_vm0, %v6944_v15  ;;  %v3265_v24 = vadd.f32 %v2973_v5, %v1831_v54  ;;  %v8207_v15 = vadd.s32 56, %v8062_v33  ;;  %v11305_v5 = vld [vmem:[#allocation9_spill] sm:$0xff] }
 0x229   : > { %3263 = vadd.xlane.f32.xlu1 %v3262_v57  ;;  %v1258_v41 = vpop.f32.mrf.mxu1  ;;  %v8192_v53 = vpop.f32.mrf.mxu0 }
 0x22a   : > { %v2976_v9 = vsel %vm2832_vm6, 1.0, %v1833_v51  ;;  %v1834_v43 = vand.u32 2147483647, %v1258_v41  ;;  %v3266_v61 = vadd.f32 %v3265_v24, %v1832_v42  ;;  %v1838_v51 = vand.u32 2147483647, %v8018_v46 }
 0x22b   : > { %v1262_v31 = vpop.f32.mrf.mxu1  ;;  %v8200_v35 = vpop.f32.mrf.mxu0  ;;  %5956 = vmatmul.mubr.msk.f32.gmra.mxu0 %vm422_vm0, %v11303_v1  ;;  %6366 = vmatmul.mubr.msk.f32.gmra.mxu1 %vm422_vm0, %v6940_v13  ;;  %vm2838_vm8 = vcmp.eq.s32.totalorder %v8207_v15, %v8064_v48 }
 0x22c   : > { %11304 = vst [vmem:[#allocation25_spill] sm:$0xff] %v8200_v35  ;;  %v1836_v38 = vand.u32 2147483647, %v1262_v31  ;;  %5957 = vmatprep.mubr.msk.f32.mxu0 %vm422_vm0, %v11305_v5  ;;  %6368 = vmatprep.mubr.msk.f32.mxu1 %vm422_vm0, %v6954_v19  ;;  %v3269_v42 = vadd.f32 %v2976_v9, %v1834_v43  ;;  %v8228_v19 = vadd.s32 64, %v8062_v33  ;;  %v11307_v9 = vld [vmem:[#allocation12_spill] sm:$0xff] }
 0x22d   : > { %3267 = vadd.xlane.f32.xlu0 %v3266_v61  ;;  %v1264_v54 = vpop.f32.mrf.mxu1  ;;  %v8213_v57 = vpop.f32.mrf.mxu0 }
 0x22e   : > { %v2979_v13 = vsel %vm2835_vm7, 1.0, %v1836_v38  ;;  %v1837_v24 = vand.u32 2147483647, %v1264_v54  ;;  %v3270_v41 = vadd.f32 %v3269_v42, %v1835_v39  ;;  %v1841_v38 = vand.u32 2147483647, %v8010_v2 }
 0x22f   : > { %v1268_v31 = vpop.f32.mrf.mxu1  ;;  %v8221_v35 = vpop.f32.mrf.mxu0  ;;  %5958 = vmatmul.mubr.msk.f32.gmra.mxu0 %vm422_vm0, %v11305_v5  ;;  %6369 = vmatmul.mubr.msk.f32.gmra.mxu1 %vm422_vm0, %v6948_v17  ;;  %vm2841_vm9 = vcmp.eq.s32.totalorder %v8228_v19, %v8064_v48 }
 0x230   : > { %11306 = vst [vmem:[#allocation28_spill] sm:$0xff] %v8221_v35  ;;  %v1839_v46 = vand.u32 2147483647, %v1268_v31  ;;  %5959 = vmatprep.mubr.msk.f32.mxu0 %vm422_vm0, %v11307_v9  ;;  %6371 = vmatprep.mubr.msk.f32.mxu1 %vm422_vm0, %v6964_v22  ;;  %v3273_v39 = vadd.f32 %v2979_v13, %v1837_v24  ;;  %v8249_v22 = vadd.s32 72, %v8062_v33  ;;  %v11309_v13 = vld [vmem:[#allocation11_spill] sm:$0xff] }
 0x231   : > { %3271 = vadd.xlane.f32.xlu1 %v3270_v41  ;;  %v1270_v43 = vpop.f32.mrf.mxu1  ;;  %v8234_v61 = vpop.f32.mrf.mxu0 }
 0x232   : > { %v2982_v17 = vsel %vm2838_vm8, 1.0, %v1839_v46  ;;  %v1840_v42 = vand.u32 2147483647, %v1270_v43  ;;  %v3274_v54 = vadd.f32 %v3273_v39, %v1838_v51  ;;  %v1844_v46 = vand.u32 2147483647, %v8030_v36 }
 0x233   : > { %v1274_v31 = vpop.f32.mrf.mxu1  ;;  %v8242_v35 = vpop.f32.mrf.mxu0  ;;  %5960 = vmatmul.mubr.msk.f32.gmra.mxu0 %vm422_vm0, %v11307_v9  ;;  %6372 = vmatmul.mubr.msk.f32.gmra.mxu1 %vm422_vm0, %v6962_v21  ;;  %vm2844_vm10 = vcmp.eq.s32.totalorder %v8249_v22, %v8064_v48 }
 0x234   : > { %11308 = vst [vmem:[#allocation27_spill] sm:$0xff] %v8242_v35  ;;  %v1842_v2 = vand.u32 2147483647, %v1274_v31  ;;  %5961 = vmatprep.mubr.msk.f32.mxu0 %vm422_vm0, %v11309_v13  ;;  %6374 = vmatprep.mubr.msk.f32.mxu1 %vm422_vm0, %v11276_v56  ;;  %v3277_v51 = vadd.f32 %v2982_v17, %v1840_v42  ;;  %v8270_v56 = vadd.s32 80, %v8062_v33  ;;  %v11311_v17 = vld [vmem:[#allocation14_spill] sm:$0xff] }
 0x235   : > { %3275 = vadd.xlane.f32.xlu0 %v3274_v54  ;;  %v1276_v24 = vpop.f32.mrf.mxu1  ;;  %v8255_v41 = vpop.f32.mrf.mxu0 }
 0x236   : > { %v2985_v21 = vsel %vm2841_vm9, 1.0, %v1842_v2  ;;  %v1843_v39 = vand.u32 2147483647, %v1276_v24  ;;  %v3278_v43 = vadd.f32 %v3277_v51, %v1841_v38  ;;  %v1847_v2 = vand.u32 2147483647, %v8022_v49 }
 0x237   : > { %v1280_v31 = vpop.f32.mrf.mxu1  ;;  %v8263_v35 = vpop.f32.mrf.mxu0  ;;  %5962 = vmatmul.mubr.msk.f32.gmra.mxu0 %vm422_vm0, %v11309_v13  ;;  %6375 = vmatmul.mubr.msk.f32.gmra.mxu1 %vm422_vm0, %v11277_v60  ;;  %vm2847_vm11 = vcmp.eq.s32.totalorder %v8270_v56, %v8064_v48 }
 0x238   : > { %11310 = vst [vmem:[#allocation30_spill] sm:$0xff] %v8263_v35  ;;  %v1845_v36 = vand.u32 2147483647, %v1280_v31  ;;  %5963 = vmatprep.mubr.msk.f32.mxu0 %vm422_vm0, %v11311_v17  ;;  %6377 = vmatprep.mubr.msk.f32.mxu1 %vm422_vm0, %v11278_v62  ;;  %v3281_v38 = vadd.f32 %v2985_v21, %v1843_v39  ;;  %v8291_v62 = vadd.s32 88, %v8062_v33  ;;  %v11313_v21 = vld [vmem:[#allocation13_spill] sm:$0xff] }
 0x239   : > { %3279 = vadd.xlane.f32.xlu1 %v3278_v43  ;;  %v1282_v42 = vpop.f32.mrf.mxu1  ;;  %v8276_v54 = vpop.f32.mrf.mxu0 }
 0x23a   : > { %v2988_v60 = vsel %vm2844_vm10, 1.0, %v1845_v36  ;;  %v1846_v51 = vand.u32 2147483647, %v1282_v42  ;;  %v3282_v24 = vadd.f32 %v3281_v38, %v1844_v46  ;;  %v1850_v36 = vand.u32 2147483647, %v8042_v29 }
 0x23b   : > { %v1286_v31 = vpop.f32.mrf.mxu1  ;;  %v8284_v35 = vpop.f32.mrf.mxu0  ;;  %5964 = vmatmul.mubr.msk.f32.gmra.mxu0 %vm422_vm0, %v11311_v17  ;;  %6378 = vmatmul.mubr.msk.f32.gmra.mxu1 %vm422_vm0, %v11279_v4  ;;  %vm2850_vm12 = vcmp.eq.s32.totalorder %v8291_v62, %v8064_v48 }
 0x23c   : > { %11312 = vst [vmem:[#allocation29_spill] sm:$0xff] %v8284_v35  ;;  %v1848_v49 = vand.u32 2147483647, %v1286_v31  ;;  %5965 = vmatprep.mubr.msk.f32.mxu0 %vm422_vm0, %v11313_v21  ;;  %6380 = vmatprep.mubr.msk.f32.mxu1 %vm422_vm0, %v11280_v8  ;;  %v3285_v46 = vadd.f32 %v2988_v60, %v1846_v51  ;;  %v8312_v8 = vadd.s32 96, %v8062_v33  ;;  %v11315_v60 = vld [vmem:[#allocation16_spill] sm:$0xff] }
 0x23d   : > { %3283 = vadd.xlane.f32.xlu0 %v3282_v24  ;;  %v1288_v39 = vpop.f32.mrf.mxu1  ;;  %v8297_v43 = vpop.f32.mrf.mxu0 }
 0x23e   : > { %v2991_v4 = vsel %vm2847_vm11, 1.0, %v1848_v49  ;;  %v1849_v38 = vand.u32 2147483647, %v1288_v39  ;;  %v3286_v42 = vadd.f32 %v3285_v46, %v1847_v2  ;;  %v1853_v49 = vand.u32 2147483647, %v8034_v50 }
 0x23f   : > { %v1292_v31 = vpop.f32.mrf.mxu1  ;;  %v8305_v35 = vpop.f32.mrf.mxu0  ;;  %5966 = vmatmul.mubr.msk.f32.gmra.mxu0 %vm422_vm0, %v11313_v21  ;;  %6381 = vmatmul.mubr.msk.f32.gmra.mxu1 %vm422_vm0, %v11281_v16  ;;  %vm2853_vm13 = vcmp.eq.s32.totalorder %v8312_v8, %v8064_v48 }
 0x240   : > { %11314 = vst [vmem:[#allocation32_spill] sm:$0xff] %v8305_v35  ;;  %v1851_v29 = vand.u32 2147483647, %v1292_v31  ;;  %5967 = vmatprep.mubr.msk.f32.mxu0 %vm422_vm0, %v11315_v60  ;;  %6383 = vmatprep.mubr.msk.f32.mxu1 %vm422_vm0, %v11282_v28  ;;  %v3289_v2 = vadd.f32 %v2991_v4, %v1849_v38  ;;  %v8333_v28 = vadd.s32 104, %v8062_v33  ;;  %v11317_v4 = vld [vmem:[#allocation15_spill] sm:$0xff] }
 0x241   : > { %3287 = vadd.xlane.f32.xlu1 %v3286_v42  ;;  %v1294_v51 = vpop.f32.mrf.mxu1  ;;  %v8318_v24 = vpop.f32.mrf.mxu0 }
 0x242   : > { %v2994_v16 = vsel %vm2850_vm12, 1.0, %v1851_v29  ;;  %v1852_v46 = vand.u32 2147483647, %v1294_v51  ;;  %v3290_v39 = vadd.f32 %v3289_v2, %v1850_v36  ;;  %v1856_v29 = vand.u32 2147483647, %v8054_v27 }
 0x243   : > { %v1298_v31 = vpop.f32.mrf.mxu1  ;;  %v8326_v35 = vpop.f32.mrf.mxu0  ;;  %5968 = vmatmul.mubr.msk.f32.gmra.mxu0 %vm422_vm0, %v11315_v60  ;;  %6384 = vmatmul.mubr.msk.f32.gmra.mxu1 %vm422_vm0, %v11283_v32  ;;  %vm11088_vm14 = vcmp.eq.s32.totalorder %v8333_v28, %v8064_v48 }
 0x244   : > { %11316 = vst [vmem:[#allocation31_spill] sm:$0xff] %v8326_v35  ;;  %v1854_v50 = vand.u32 2147483647, %v1298_v31  ;;  %5969 = vmatprep.mubr.msk.f32.mxu0 %vm422_vm0, %v11317_v4  ;;  %6386 = vmatprep.mubr.msk.f32.mxu1 %vm422_vm0, %v11284_v25  ;;  %v3293_v36 = vadd.f32 %v2994_v16, %v1852_v46  ;;  %v8354_v25 = vadd.s32 112, %v8062_v33  ;;  %v11319_v16 = vld [vmem:[#allocation18_spill] sm:$0xff] }
 0x245   : > { %3291 = vadd.xlane.f32.xlu0 %v3290_v39  ;;  %v1300_v38 = vpop.f32.mrf.mxu1  ;;  %v8339_v42 = vpop.f32.mrf.mxu0 }
 0x246   : > { %v2997_v32 = vsel %vm2853_vm13, 1.0, %v1854_v50  ;;  %v1855_v2 = vand.u32 2147483647, %v1300_v38  ;;  %v3294_v51 = vadd.f32 %v3293_v36, %v1853_v49  ;;  %v1859_v50 = vand.u32 2147483647, %v8046_v30 }
 0x247   : > { %v1304_v31 = vpop.f32.mrf.mxu1  ;;  %v8347_v35 = vpop.f32.mrf.mxu0  ;;  %5970 = vmatmul.mubr.msk.f32.gmra.mxu0 %vm422_vm0, %v11317_v4  ;;  %6387 = vmatmul.mubr.msk.f32.gmra.mxu1 %vm422_vm0, %v11285_v37  ;;  %vm11089_vm15 = vcmp.eq.s32.totalorder %v8354_v25, %v8064_v48 }
 0x248   : > { %11318 = vst [vmem:[#allocation4_spill] sm:$0xff] %v8347_v35  ;;  %v1857_v27 = vand.u32 2147483647, %v1304_v31  ;;  %5971 = vmatprep.mubr.msk.f32.mxu0 %vm422_vm0, %v11319_v16  ;;  %6389 = vmatprep.mubr.msk.f32.mxu1 %vm422_vm0, %v11286_v18  ;;  %v3297_v49 = vadd.f32 %v2997_v32, %v1855_v2  ;;  %v8375_v18 = vadd.s32 120, %v8062_v33  ;;  %v11321_v32 = vld [vmem:[#allocation17_spill] sm:$0xff] }
 0x249   : > { %3295 = vadd.xlane.f32.xlu1 %v3294_v51  ;;  %v1306_v46 = vpop.f32.mrf.mxu1  ;;  %v8360_v39 = vpop.f32.mrf.mxu0 }
 0x24a   : > { %v3000_v37 = vsel %vm11088_vm14, 1.0, %v1857_v27  ;;  %v1858_v36 = vand.u32 2147483647, %v1306_v46  ;;  %v3298_v38 = vadd.f32 %v3297_v49, %v1856_v29  ;;  %v1862_v27 = vand.u32 2147483647, %v8070_v44 }
 0x24b   : > { %v1310_v31 = vpop.f32.mrf.mxu1  ;;  %v8368_v35 = vpop.f32.mrf.mxu0  ;;  %5972 = vmatmul.mubr.msk.f32.gmra.mxu0 %vm422_vm0, %v11319_v16  ;;  %6390 = vmatmul.mubr.msk.f32.gmra.mxu1 %vm422_vm0, %v11287_v10  ;;  %vm2862_vm14 = vcmp.eq.s32.totalorder %v8375_v18, %v8064_v48 }
 0x24c   : > { %11320 = vst [vmem:[#allocation3_spill] sm:$0xff] %v8368_v35  ;;  %v1860_v30 = vand.u32 2147483647, %v1310_v31  ;;  %5973 = vmatprep.mubr.msk.f32.mxu0 %vm422_vm0, %v11321_v32  ;;  %6392 = vmatprep.mubr.msk.f32.mxu1 %vm422_vm0, %v11288_v6  ;;  %v3301_v29 = vadd.f32 %v3000_v37, %v1858_v36  ;;  %v8400_v36 = vadd.s32 128, %v8062_v33 }
 0x24d   : > { %3299 = vadd.xlane.f32.xlu0 %v3298_v38  ;;  %v1312_v2 = vpop.f32.mrf.mxu1  ;;  %v8381_v51 = vpop.f32.mrf.mxu0  ;;  %v8403_v38 = vadd.s32 128, %v8064_v48 }
 0x24e   : > { %v3003_v10 = vsel %vm11089_vm15, 1.0, %v1860_v30  ;;  %v1861_v49 = vand.u32 2147483647, %v1312_v2  ;;  %v3302_v46 = vadd.f32 %v3301_v29, %v1859_v50 }
 0x24f   : > { %v1316_v31 = vpop.f32.mrf.mxu1  ;;  %v8389_v35 = vpop.f32.mrf.mxu0  ;;  %5974 = vmatmul.mubr.msk.f32.gmra.mxu0 %vm422_vm0, %v11321_v32  ;;  %6393 = vmatmul.mubr.msk.f32.gmra.mxu1 %vm422_vm0, %v11289_v34  ;;  %vm2866_vm15 = vcmp.eq.s32.totalorder %v8400_v36, %v8403_v38  ;;  %v8719_v36 = vadd.s32 272, %v8062_v33 }
 0x250   : > { %11322 = vst [vmem:[#allocation6_spill] sm:$0xff] %v8389_v35  ;;  %v1863_v6 = vand.u32 2147483647, %v1316_v31  ;;  %6395 = vmatprep.mubr.msk.f32.mxu1 %vm422_vm0, %v11290_v20  ;;  %3303 = vadd.xlane.f32.xlu1 %v3302_v46  ;;  %v3305_v44 = vadd.f32 %v3003_v10, %v1861_v49  ;;  %v1865_v20 = vand.u32 2147483647, %v8058_v45 }
 0x251   : > { %v1318_v37 = vpop.f32.mrf.mxu1  ;;  %v8397_v50 = vpop.f32.mrf.mxu0 }
 0x252   : > { %11323 = vst [vmem:[#allocation5_spill] sm:$0xff] %v8397_v50  ;;  %v3006_v30 = vsel %vm2862_vm14, 1.0, %v1863_v6  ;;  %v1864_v34 = vand.u32 2147483647, %v1318_v37  ;;  %v3306_v29 = vadd.f32 %v3305_v44, %v1862_v27  ;;  %v8418_v27 = vadd.s32 136, %v8062_v33 }
 0x253   : > { %v1322_v2 = vpop.f32.mrf.mxu1  ;;  %v2028_v31 = vpop.f32.mrf.mxu0  ;;  %6396 = vmatmul.mubr.msk.f32.gmra.mxu1 %vm422_vm0, %v11292_v0  ;;  %v8699_v50 = vadd.s32 264, %v8062_v33 }
 0x254   : > { %v2620_v10 = vand.u32 2147483647, %v2028_v31  ;;  %6398 = vmatprep.mubr.msk.f32.mxu1 %vm422_vm0, %v11294_v23  ;;  %3307 = vadd.xlane.f32.xlu0 %v3306_v29  ;;  %v3309_v49 = vadd.f32 %v3006_v30, %v1864_v34  ;;  %11325 = vst [vmem:[#allocation7_spill] sm:$0xff] %v8418_v27  ;;  %v1866_v37 = vand.u32 2147483647, %v1322_v2 }
 0x255   : > { %v1324_v46 = vpop.f32.mrf.mxu1  ;;  %v8415_v6 = vpop.f32.mrf.mxu0  ;;  %v1868_v31 = vand.u32 2147483647, %v8087_v26 }
 0x256   : > { %11324 = vst [vmem:[#allocation8_spill] sm:$0xff] %v8415_v6  ;;  %v8423_v0 = vsel %vm2817_vm1, 1.0, %v2620_v10  ;;  %v1867_v45 = vand.u32 2147483647, %v1324_v46  ;;  %v3310_v44 = vadd.f32 %v3309_v49, %v1865_v20  ;;  %vm2869_vm1 = vcmp.eq.s32.totalorder %v8418_v27, %v8403_v38 }
 0x257   : > { %11326 = vst [vmem:[#allocation10_spill] sm:$0xff] %v8423_v0  ;;  %v1328_v23 = vpop.f32.mrf.mxu1  ;;  %v2034_v29 = vpop.f32.mrf.mxu0  ;;  %6399 = vmatmul.mubr.msk.f32.gmra.mxu1 %vm422_vm0, %v11297_v40  ;;  %v8438_v40 = vadd.s32 144, %v8062_v33 }
 0x258   : > { %v3010_v30 = vsel %vm2866_vm15, 1.0, %v1867_v45  ;;  %v2623_v34 = vand.u32 2147483647, %v2034_v29  ;;  %6401 = vmatprep.mubr.msk.f32.mxu1 %vm422_vm0, %v11299_v47  ;;  %3311 = vadd.xlane.f32.xlu1 %v3310_v44  ;;  %v1869_v47 = vand.u32 2147483647, %v1328_v23 }
 0x259   : > { %v1330_v10 = vpop.f32.mrf.mxu1  ;;  %v8435_v2 = vpop.f32.mrf.mxu0  ;;  %v3313_v20 = vadd.f32 %v3010_v30, %v1866_v37  ;;  %11328 = vst [vmem:[#allocation12_spill] sm:$0xff] %v8438_v40  ;;  %v11330_v30 = vld [vmem:[#allocation20_spill] sm:$0xff] }
 0x25a   : > { %11327 = vst [vmem:[#allocation9_spill] sm:$0xff] %v8435_v2  ;;  %v8443_v49 = vsel %vm2820_vm2, 1.0, %v2623_v34  ;;  %v1870_v46 = vand.u32 2147483647, %v1330_v10  ;;  %v1871_v12 = vand.u32 2147483647, %v11330_v30  ;;  %vm2872_vm2 = vcmp.eq.s32.totalorder %v8438_v40, %v8403_v38 }
 0x25b   : > { %11329 = vst [vmem:[#allocation11_spill] sm:$0xff] %v8443_v49  ;;  %v1334_v45 = vpop.f32.mrf.mxu1  ;;  %v2040_v44 = vpop.f32.mrf.mxu0  ;;  %6402 = vmatmul.mubr.msk.f32.gmra.mxu1 %vm422_vm0, %v11301_v52  ;;  %v3314_v26 = vadd.f32 %v3313_v20, %v1868_v31  ;;  %v8458_v52 = vadd.s32 152, %v8062_v33  ;;  %v11333_v30 = vld [vmem:[#allocation22_spill] sm:$0xff] }
 0x25c   : > { %v3013_v37 = vsel %vm2869_vm1, 1.0, %v1870_v46  ;;  %v2626_v29 = vand.u32 2147483647, %v2040_v44  ;;  %6404 = vmatprep.mubr.msk.f32.mxu1 %vm422_vm0, %v11303_v1  ;;  %v1872_v1 = vand.u32 2147483647, %v1334_v45 }
 0x25d   : > { %v8453_v34 = vpop.f32.mrf.mxu0  ;;  %3315 = vadd.xlane.f32.xlu0 %v3314_v26  ;;  %v1336_v23 = vpop.f32.mrf.mxu1  ;;  %v3317_v10 = vadd.f32 %v3013_v37, %v1869_v47  ;;  %11331 = vst [vmem:[#allocation14_spill] sm:$0xff] %v8458_v52  ;;  %v1874_v59 = vand.u32 2147483647, %v11333_v30  ;;  %v11336_v30 = vld [vmem:[#allocation19_spill] sm:$0xff] }
 0x25e   : > { %v8463_v31 = vsel %vm2823_vm3, 1.0, %v2626_v29  ;;  %v1873_v20 = vand.u32 2147483647, %v1336_v23  ;;  %vm2875_vm3 = vcmp.eq.s32.totalorder %v8458_v52, %v8403_v38  ;;  %v1877_v63 = vand.u32 2147483647, %v11336_v30 }
 0x25f   : > { %11332 = vst [vmem:[#allocation13_spill] sm:$0xff] %v8463_v31  ;;  %v1340_v46 = vpop.f32.mrf.mxu1  ;;  %v2046_v44 = vpop.f32.mrf.mxu0  ;;  %6405 = vmatmul.mubr.msk.f32.gmra.mxu1 %vm422_vm0, %v11305_v5  ;;  %v3318_v26 = vadd.f32 %v3317_v10, %v1871_v12  ;;  %v8478_v5 = vadd.s32 160, %v8062_v33 }
 0x260   : > { %v3016_v47 = vsel %vm2872_vm2, 1.0, %v1873_v20  ;;  %v2629_v37 = vand.u32 2147483647, %v2046_v44  ;;  %6407 = vmatprep.mubr.msk.f32.mxu1 %vm422_vm0, %v11307_v9  ;;  %v1875_v9 = vand.u32 2147483647, %v1340_v46 }
 0x261   : > { %v8473_v29 = vpop.f32.mrf.mxu0  ;;  %3319 = vadd.xlane.f32.xlu1 %v3318_v26  ;;  %v1342_v45 = vpop.f32.mrf.mxu1  ;;  %v3321_v23 = vadd.f32 %v3016_v47, %v1872_v1  ;;  %11334 = vst [vmem:[#allocation16_spill] sm:$0xff] %v8478_v5 }
 0x262   : > { %v8483_v12 = vsel %vm2826_vm4, 1.0, %v2629_v37  ;;  %v1876_v10 = vand.u32 2147483647, %v1342_v45  ;;  %vm2878_vm4 = vcmp.eq.s32.totalorder %v8478_v5, %v8403_v38 }
 0x263   : > { %11335 = vst [vmem:[#allocation15_spill] sm:$0xff] %v8483_v12  ;;  %v1346_v20 = vpop.f32.mrf.mxu1  ;;  %v2052_v44 = vpop.f32.mrf.mxu0  ;;  %6408 = vmatmul.mubr.msk.f32.gmra.mxu1 %vm422_vm0, %v11309_v13  ;;  %v3322_v26 = vadd.f32 %v3321_v23, %v1874_v59  ;;  %v8498_v13 = vadd.s32 168, %v8062_v33 }
 0x264   : > { %v3019_v1 = vsel %vm2875_vm3, 1.0, %v1876_v10  ;;  %v2632_v47 = vand.u32 2147483647, %v2052_v44  ;;  %6410 = vmatprep.mubr.msk.f32.mxu1 %vm422_vm0, %v11311_v17  ;;  %v1878_v17 = vand.u32 2147483647, %v1346_v20 }
 0x265   : > { %v8493_v37 = vpop.f32.mrf.mxu0  ;;  %3323 = vadd.xlane.f32.xlu0 %v3322_v26  ;;  %v1348_v46 = vpop.f32.mrf.mxu1  ;;  %v3325_v45 = vadd.f32 %v3019_v1, %v1875_v9  ;;  %11337 = vst [vmem:[#allocation18_spill] sm:$0xff] %v8498_v13 }
 0x266   : > { %v8503_v59 = vsel %vm2829_vm5, 1.0, %v2632_v47  ;;  %v1879_v23 = vand.u32 2147483647, %v1348_v46  ;;  %vm2881_vm5 = vcmp.eq.s32.totalorder %v8498_v13, %v8403_v38 }
 0x267   : > { %11338 = vst [vmem:[#allocation17_spill] sm:$0xff] %v8503_v59  ;;  %v1352_v10 = vpop.f32.mrf.mxu1  ;;  %v2058_v44 = vpop.f32.mrf.mxu0  ;;  %6411 = vmatmul.mubr.msk.f32.gmra.mxu1 %vm422_vm0, %v11313_v21  ;;  %v3326_v26 = vadd.f32 %v3325_v45, %v1877_v63  ;;  %v8518_v21 = vadd.s32 176, %v8062_v33 }
 0x268   : > { %v3022_v9 = vsel %vm2878_vm4, 1.0, %v1879_v23  ;;  %v2635_v1 = vand.u32 2147483647, %v2058_v44  ;;  %6413 = vmatprep.mubr.msk.f32.mxu1 %vm422_vm0, %v11315_v60  ;;  %v1881_v60 = vand.u32 2147483647, %v1352_v10 }
 0x269   : > { %v8513_v47 = vpop.f32.mrf.mxu0  ;;  %3327 = vadd.xlane.f32.xlu1 %v3326_v26  ;;  %v1354_v20 = vpop.f32.mrf.mxu1  ;;  %v3329_v30 = vadd.f32 %v3022_v9, %v1878_v17  ;;  %11339 = vst [vmem:[#allocation20_spill] sm:$0xff] %v8518_v21  ;;  %v11341_v26 = vld [vmem:[#allocation21_spill] sm:$0xff] }
 0x26a   : > { %v8523_v63 = vsel %vm2832_vm6, 1.0, %v2635_v1  ;;  %v1882_v46 = vand.u32 2147483647, %v1354_v20  ;;  %v1883_v7 = vand.u32 2147483647, %v11341_v26  ;;  %vm2884_vm6 = vcmp.eq.s32.totalorder %v8518_v21, %v8403_v38  ;;  %v11346_v21 = vld [vmem:[#allocation24_spill] sm:$0xff] }
 0x26b   : > { %11340 = vst [vmem:[#allocation22_spill] sm:$0xff] %v8523_v63  ;;  %v1358_v45 = vpop.f32.mrf.mxu1  ;;  %v2064_v14 = vpop.f32.mrf.mxu0  ;;  %6414 = vmatmul.mubr.msk.f32.gmra.mxu1 %vm422_vm0, %v11317_v4  ;;  %v3330_v23 = vadd.f32 %v3329_v30, %v1880_v3  ;;  %v8538_v4 = vadd.s32 184, %v8062_v33 }
 0x26c   : > { %v3025_v17 = vsel %vm2881_vm5, 1.0, %v1882_v46  ;;  %v2638_v44 = vand.u32 2147483647, %v2064_v14  ;;  %6416 = vmatprep.mubr.msk.f32.mxu1 %vm422_vm0, %v11319_v16  ;;  %v1884_v16 = vand.u32 2147483647, %v1358_v45 }
 0x26d   : > { %v8533_v9 = vpop.f32.mrf.mxu0  ;;  %3331 = vadd.xlane.f32.xlu0 %v3330_v23  ;;  %v1360_v10 = vpop.f32.mrf.mxu1  ;;  %v3333_v1 = vadd.f32 %v3025_v17, %v1881_v60  ;;  %11342 = vst [vmem:[#allocation19_spill] sm:$0xff] %v8538_v4  ;;  %v1886_v17 = vand.u32 2147483647, %v8150_v55 }
 0x26e   : > { %v8543_v3 = vsel %vm2835_vm7, 1.0, %v2638_v44  ;;  %v1885_v20 = vand.u32 2147483647, %v1360_v10  ;;  %vm2887_vm7 = vcmp.eq.s32.totalorder %v8538_v4, %v8403_v38  ;;  %v8556_v44 = vadd.s32 192, %v8062_v33 }
 0x26f   : > { %v1364_v30 = vpop.f32.mrf.mxu1  ;;  %v2070_v46 = vpop.f32.mrf.mxu0  ;;  %6417 = vmatmul.mubr.msk.f32.gmra.mxu1 %vm422_vm0, %v11321_v32  ;;  %v3334_v14 = vadd.f32 %v3333_v1, %v1883_v7 }
 0x270   : > { %v3028_v60 = vsel %vm2884_vm6, 1.0, %v1885_v20  ;;  %v2641_v23 = vand.u32 2147483647, %v2070_v46  ;;  %11344 = vst [vmem:[#allocation33_spill] sm:$0xff] %v8556_v44  ;;  %v1887_v10 = vand.u32 2147483647, %v1364_v30  ;;  %vm2890_vm0 = vcmp.eq.s32.totalorder %v8556_v44, %v8403_v38 }
 0x271   : > { %v8551_v26 = vpop.f32.mrf.mxu0  ;;  %3335 = vadd.xlane.f32.xlu1 %v3334_v14  ;;  %v1366_v11 = vpop.f32.mrf.mxu1  ;;  %v3337_v45 = vadd.f32 %v3028_v60, %v1884_v16  ;;  %v1889_v16 = vand.u32 2147483647, %v11346_v21  ;;  %v8572_v30 = vadd.s32 200, %v8062_v33  ;;  %v11351_v44 = vld [vmem:[#allocation23_spill] sm:$0xff] }
 0x272   : > { %11343 = vst [vmem:[#allocation21_spill] sm:$0xff] %v8551_v26  ;;  %v8561_v32 = vsel %vm2838_vm8, 1.0, %v2641_v23  ;;  %v1888_v7 = vand.u32 2147483647, %v1366_v11 }
 0x273   : > { %11345 = vst [vmem:[#allocation34_spill] sm:$0xff] %v8561_v32  ;;  %v1370_v1 = vpop.f32.mrf.mxu1  ;;  %v2076_v55 = vpop.f32.mrf.mxu0  ;;  %v3338_v20 = vadd.f32 %v3337_v45, %v1886_v17  ;;  %11347 = vst [vmem:[#allocation24_spill] sm:$0xff] %v8572_v30  ;;  %vm2893_vm8 = vcmp.eq.s32.totalorder %v8572_v30, %v8403_v38 }
 0x274   : > { %v3031_v46 = vsel %vm2887_vm7, 1.0, %v1888_v7  ;;  %v2644_v14 = vand.u32 2147483647, %v2076_v55  ;;  %v1890_v11 = vand.u32 2147483647, %v1370_v1 }
 0x275   : > { %v8567_v60 = vpop.f32.mrf.mxu0  ;;  %3339 = vadd.xlane.f32.xlu0 %v3338_v20  ;;  %v1372_v13 = vpop.f32.mrf.mxu1  ;;  %v3341_v15 = vadd.f32 %v3031_v46, %v1887_v10  ;;  %v1892_v10 = vand.u32 2147483647, %v8171_v58 }
 0x276   : > { %v8577_v23 = vsel %vm2841_vm9, 1.0, %v2644_v14  ;;  %v1891_v17 = vand.u32 2147483647, %v1372_v13  ;;  %v8588_v13 = vadd.s32 208, %v8062_v33 }
 0x277   : > { %11348 = vst [vmem:[#allocation35_spill] sm:$0xff] %v8577_v23  ;;  %v1376_v45 = vpop.f32.mrf.mxu1  ;;  %v2082_v21 = vpop.f32.mrf.mxu0  ;;  %v3342_v7 = vadd.f32 %v3341_v15, %v1889_v16 }
 0x278   : > { %v3034_v55 = vsel %vm2890_vm0, 1.0, %v1891_v17  ;;  %v2647_v20 = vand.u32 2147483647, %v2082_v21  ;;  %11349 = vst [vmem:[#allocation36_spill] sm:$0xff] %v8588_v13  ;;  %v1893_v16 = vand.u32 2147483647, %v1376_v45  ;;  %vm2896_vm9 = vcmp.eq.s32.totalorder %v8588_v13, %v8403_v38 }
 0x279   : > { %v8583_v46 = vpop.f32.mrf.mxu0  ;;  %3343 = vadd.xlane.f32.xlu1 %v3342_v7  ;;  %v1378_v4 = vpop.f32.mrf.mxu1  ;;  %v3345_v19 = vadd.f32 %v3034_v55, %v1890_v11  ;;  %v1895_v11 = vand.u32 2147483647, %v11351_v44  ;;  %v11357_v13 = vld [vmem:[#allocation26_spill] sm:$0xff] }
 0x27a   : > { %v8593_v1 = vsel %vm2844_vm10, 1.0, %v2647_v20  ;;  %v1894_v14 = vand.u32 2147483647, %v1378_v4  ;;  %v8604_v4 = vadd.s32 216, %v8062_v33 }
 0x27b   : > { %11350 = vst [vmem:[#allocation37_spill] sm:$0xff] %v8593_v1  ;;  %v1382_v15 = vpop.f32.mrf.mxu1  ;;  %v2088_v58 = vpop.f32.mrf.mxu0  ;;  %v3346_v17 = vadd.f32 %v3345_v19, %v1892_v10 }
 0x27c   : > { %v3037_v21 = vsel %vm2893_vm8, 1.0, %v1894_v14  ;;  %v2650_v7 = vand.u32 2147483647, %v2088_v58  ;;  %11353 = vst [vmem:[#allocation38_spill] sm:$0xff] %v8604_v4  ;;  %v1896_v10 = vand.u32 2147483647, %v1382_v15  ;;  %vm2899_vm10 = vcmp.eq.s32.totalorder %v8604_v4, %v8403_v38 }
 0x27d   : > { %v8599_v55 = vpop.f32.mrf.mxu0  ;;  %3347 = vadd.xlane.f32.xlu0 %v3346_v17  ;;  %v1384_v5 = vpop.f32.mrf.mxu1  ;;  %v3349_v22 = vadd.f32 %v3037_v21, %v1893_v16  ;;  %v1898_v16 = vand.u32 2147483647, %v8192_v53 }
 0x27e   : > { %11352 = vst [vmem:[#allocation23_spill] sm:$0xff] %v8599_v55  ;;  %v8609_v45 = vsel %vm2847_vm11, 1.0, %v2650_v7  ;;  %v1897_v20 = vand.u32 2147483647, %v1384_v5  ;;  %v8620_v5 = vadd.s32 224, %v8062_v33 }
 0x27f   : > { %v1388_v19 = vpop.f32.mrf.mxu1  ;;  %v2094_v44 = vpop.f32.mrf.mxu0  ;;  %v3350_v14 = vadd.f32 %v3349_v22, %v1895_v11 }
 0x280   : > { %v3040_v58 = vsel %vm2896_vm9, 1.0, %v1897_v20  ;;  %v2653_v17 = vand.u32 2147483647, %v2094_v44  ;;  %11355 = vst [vmem:[#allocation40_spill] sm:$0xff] %v8620_v5  ;;  %v1899_v11 = vand.u32 2147483647, %v1388_v19  ;;  %vm11100_vm11 = vcmp.eq.s32.totalorder %v8620_v5, %v8403_v38 }
 0x281   : > { %v8615_v21 = vpop.f32.mrf.mxu0  ;;  %3351 = vadd.xlane.f32.xlu1 %v3350_v14  ;;  %v1390_v30 = vpop.f32.mrf.mxu1  ;;  %v3353_v56 = vadd.f32 %v3040_v58, %v1896_v10  ;;  %v1901_v10 = vand.u32 2147483647, %v11357_v13  ;;  %v11363_v5 = vld [vmem:[#allocation25_spill] sm:$0xff] }
 0x282   : > { %11354 = vst [vmem:[#allocation39_spill] sm:$0xff] %v8615_v21  ;;  %v8625_v15 = vsel %vm2850_vm12, 1.0, %v2653_v17  ;;  %v1900_v7 = vand.u32 2147483647, %v1390_v30  ;;  %v8636_v30 = vadd.s32 232, %v8062_v33 }
 0x283   : > { %11356 = vst [vmem:[#allocation41_spill] sm:$0xff] %v8625_v15  ;;  %v1394_v22 = vpop.f32.mrf.mxu1  ;;  %v2100_v53 = vpop.f32.mrf.mxu0  ;;  %v3354_v20 = vadd.f32 %v3353_v56, %v1898_v16 }
 0x284   : > { %v3043_v44 = vsel %vm2899_vm10, 1.0, %v1900_v7  ;;  %v2656_v14 = vand.u32 2147483647, %v2100_v53  ;;  %11358 = vst [vmem:[#allocation26_spill] sm:$0xff] %v8636_v30  ;;  %v1902_v16 = vand.u32 2147483647, %v1394_v22  ;;  %vm2905_vm12 = vcmp.eq.s32.totalorder %v8636_v30, %v8403_v38 }
 0x285   : > { %v8631_v58 = vpop.f32.mrf.mxu0  ;;  %3355 = vadd.xlane.f32.xlu0 %v3354_v20  ;;  %v1396_v52 = vpop.f32.mrf.mxu1  ;;  %v3357_v62 = vadd.f32 %v3043_v44, %v1899_v11  ;;  %v1904_v11 = vand.u32 2147483647, %v8213_v57 }
 0x286   : > { %v8641_v19 = vsel %vm2853_vm13, 1.0, %v2656_v14  ;;  %v1903_v17 = vand.u32 2147483647, %v1396_v52  ;;  %v8652_v52 = vadd.s32 240, %v8062_v33  ;;  %vm11361_vm13 = vcmp.eq.s32.totalorder %v8333_v28, %v8064_v48 }
 0x287   : > { %11359 = vst [vmem:[#allocation42_spill] sm:$0xff] %v8641_v19  ;;  %v1400_v56 = vpop.f32.mrf.mxu1  ;;  %v2106_v13 = vpop.f32.mrf.mxu0  ;;  %v3358_v7 = vadd.f32 %v3357_v62, %v1901_v10 }
 0x288   : > { %v3046_v53 = vsel %vm11100_vm11, 1.0, %v1903_v17  ;;  %v2659_v20 = vand.u32 2147483647, %v2106_v13  ;;  %11360 = vst [vmem:[#allocation43_spill] sm:$0xff] %v8652_v52  ;;  %v1905_v10 = vand.u32 2147483647, %v1400_v56  ;;  %vm11365_vm11 = vcmp.eq.s32.totalorder %v8354_v25, %v8064_v48 }
 0x289   : > { %v8647_v44 = vpop.f32.mrf.mxu0  ;;  %3359 = vadd.xlane.f32.xlu1 %v3358_v7  ;;  %v1402_v4 = vpop.f32.mrf.mxu1  ;;  %v3361_v8 = vadd.f32 %v3046_v53, %v1902_v16  ;;  %v1907_v16 = vand.u32 2147483647, %v11363_v5 }
 0x28a   : > { %v8657_v22 = vsel %vm11361_vm13, 1.0, %v2659_v20  ;;  %v1906_v14 = vand.u32 2147483647, %v1402_v4  ;;  %vm11106_vm13 = vcmp.eq.s32.totalorder %v8652_v52, %v8403_v38  ;;  %v8668_v4 = vadd.s32 248, %v8062_v33  ;;  %v11369_v52 = vld [vmem:[#allocation28_spill] sm:$0xff] }
 0x28b   : > { %11362 = vst [vmem:[#allocation44_spill] sm:$0xff] %v8657_v22  ;;  %v1406_v62 = vpop.f32.mrf.mxu1  ;;  %v2112_v57 = vpop.f32.mrf.mxu0  ;;  %v3362_v17 = vadd.f32 %v3361_v8, %v1904_v11  ;;  %v1913_v30 = vand.u32 2147483647, %v11369_v52  ;;  %11370 = vst [vmem:[#allocation28_spill] sm:$0xff] %v8699_v50 }
 0x28c   : > { %v3049_v13 = vsel %vm2905_vm12, 1.0, %v1906_v14  ;;  %v2662_v7 = vand.u32 2147483647, %v2112_v57  ;;  %11364 = vst [vmem:[#allocation25_spill] sm:$0xff] %v8668_v4  ;;  %v1908_v11 = vand.u32 2147483647, %v1406_v62 }
 0x28d   : > { %v8663_v53 = vpop.f32.mrf.mxu0  ;;  %3363 = vadd.xlane.f32.xlu0 %v3362_v17  ;;  %v1408_v35 = vpop.f32.mrf.mxu1  ;;  %v3365_v28 = vadd.f32 %v3049_v13, %v1905_v10  ;;  %v1910_v10 = vand.u32 2147483647, %v8234_v61  ;;  %v8686_v62 = vadd.s32 256, %v8062_v33 }
 0x28e   : > { %v8673_v56 = vsel %vm11365_vm11, 1.0, %v2662_v7  ;;  %v1909_v20 = vand.u32 2147483647, %v1408_v35  ;;  %vm11107_vm11 = vcmp.eq.s32.totalorder %v8668_v4, %v8403_v38  ;;  %v8689_v7 = vadd.s32 256, %v8064_v48 }
 0x28f   : > { %v1412_v8 = vpop.f32.mrf.mxu1  ;;  %v8675_v5 = vpop.f32.mrf.mxu0  ;;  %v3366_v14 = vadd.f32 %v3365_v28, %v1907_v16  ;;  %11367 = vst [vmem:[#allocation46_spill] sm:$0xff] %v8686_v62 }
 0x290   : > { %v3052_v57 = vsel %vm11106_vm13, 1.0, %v1909_v20  ;;  %v1911_v16 = vand.u32 2147483647, %v1412_v8  ;;  %vm2915_vm13 = vcmp.eq.s32.totalorder %v8686_v62, %v8689_v7 }
 0x291   : > { %v8681_v17 = vpop.f32.mrf.mxu0  ;;  %3367 = vadd.xlane.f32.xlu1 %v3366_v14  ;;  %v1414_v13 = vpop.f32.mrf.mxu1  ;;  %v3369_v25 = vadd.f32 %v3052_v57, %v1908_v11  ;;  %v1916_v11 = vand.u32 2147483647, %v8255_v41 }
 0x292   : > { %11366 = vst [vmem:[#allocation45_spill] sm:$0xff] %v8681_v17  ;;  %v1912_v35 = vand.u32 2147483647, %v1414_v13 }
 0x293   : > { %v1418_v28 = vpop.f32.mrf.mxu1  ;;  %v8691_v20 = vpop.f32.mrf.mxu0  ;;  %v3370_v61 = vadd.f32 %v3369_v25, %v1910_v10 }
 0x294   : > { %11368 = vst [vmem:[#allocation47_spill] sm:$0xff] %v8691_v20  ;;  %v3055_v14 = vsel %vm11107_vm11, 1.0, %v1912_v35  ;;  %v1914_v8 = vand.u32 2147483647, %v1418_v28  ;;  %vm11112_vm11 = vcmp.eq.s32.totalorder %v8699_v50, %v8689_v7 }
 0x295   : > { %v2126_v57 = vpop.f32.mrf.mxu0  ;;  %3371 = vadd.xlane.f32.xlu0 %v3370_v61  ;;  %v1420_v13 = vpop.f32.mrf.mxu1  ;;  %v3373_v40 = vadd.f32 %v3055_v14, %v1911_v16  ;;  %v11373_v16 = vld [vmem:[#allocation27_spill] sm:$0xff] }
 0x296   : > { %v2669_v27 = vand.u32 2147483647, %v2126_v57  ;;  %v1915_v17 = vand.u32 2147483647, %v1420_v13  ;;  %v1919_v61 = vand.u32 2147483647, %v11373_v16 }
 0x297   : > { %v1424_v10 = vpop.f32.mrf.mxu1  ;;  %v8703_v25 = vpop.f32.mrf.mxu0  ;;  %v3374_v35 = vadd.f32 %v3373_v40, %v1913_v30  ;;  %v3059_v57 = vsel %vm2915_vm13, 1.0, %v1916_v11  ;;  %11374 = vst [vmem:[#allocation27_spill] sm:$0xff] %v8719_v36 }
 0x298   : > { %11371 = vst [vmem:[#allocation48_spill] sm:$0xff] %v8703_v25  ;;  %v8708_v41 = vsel %vm2866_vm15, 1.0, %v2669_v27  ;;  %v3377_v52 = vadd.f32 %v1915_v17, %v1914_v8  ;;  %v1917_v40 = vand.u32 2147483647, %v1424_v10  ;;  %v3062_v11 = vsel %vm11112_vm11, 1.0, %v1919_v61 }
 0x299   : > { %11372 = vst [vmem:[#allocation49_spill] sm:$0xff] %v8708_v41  ;;  %v8711_v14 = vpop.f32.mrf.mxu0  ;;  %3375 = vadd.xlane.f32.xlu1 %v3374_v35  ;;  %v1426_v28 = vpop.f32.mrf.mxu1  ;;  %v1922_v35 = vand.u32 2147483647, %v8276_v54  ;;  %v8730_v10 = vadd.s32 280, %v8062_v33  ;;  %vm11115_vm15 = vcmp.eq.s32.totalorder %v8719_v36, %v8689_v7 }
 0x29a   : > { %v1918_v30 = vand.u32 2147483647, %v1426_v28  ;;  %v3378_v13 = vadd.f32 %v3377_v52, %v3059_v57 }
 0x29b   : > { %v1430_v27 = vpop.f32.mrf.mxu1  ;;  %v8721_v17 = vpop.f32.mrf.mxu0  ;;  %11376 = vst [vmem:[#allocation51_spill] sm:$0xff] %v8730_v10  ;;  %v3065_v61 = vsel %vm11115_vm15, 1.0, %v1922_v35  ;;  %vm11118_vm11 = vcmp.eq.s32.totalorder %v8730_v10, %v8689_v7  ;;  %v3489_v10 = vadd.f32 %v8443_v49, %v8423_v0 }
 0x29c   : > { %11375 = vst [vmem:[#allocation50_spill] sm:$0xff] %v8721_v17  ;;  %v3381_v8 = vadd.f32 %v1918_v30, %v1917_v40  ;;  %3379 = vadd.xlane.f32.xlu0 %v3378_v13  ;;  %v1920_v52 = vand.u32 2147483647, %v1430_v27  ;;  %v11378_v13 = vld [vmem:[#allocation30_spill] sm:$0xff] }
 0x29d   : > { %v1432_v16 = vpop.f32.mrf.mxu1  ;;  %v8724_v4 = vpop.f32.mrf.mxu0  ;;  %v1925_v62 = vand.u32 2147483647, %v11378_v13  ;;  %v1928_v13 = vand.u32 2147483647, %v8297_v43  ;;  %v11384_v43 = vld [vmem:[#allocation29_spill] sm:$0xff] }
 0x29e   : > { %v1921_v28 = vand.u32 2147483647, %v1432_v16  ;;  %v3382_v57 = vadd.f32 %v3381_v8, %v3062_v11  ;;  %v8745_v11 = vadd.s32 288, %v8062_v33 }
 0x29f   : > { %v1436_v40 = vpop.f32.mrf.mxu1  ;;  %v8734_v30 = vpop.f32.mrf.mxu0  ;;  %v3068_v35 = vsel %vm11118_vm11, 1.0, %v1925_v62  ;;  %v11391_v62 = vld [vmem:[#allocation32_spill] sm:$0xff] }
 0x2a0   : > { %11377 = vst [vmem:[#allocation52_spill] sm:$0xff] %v8734_v30  ;;  %v3385_v54 = vadd.f32 %v1921_v28, %v1920_v52  ;;  %3383 = vadd.xlane.f32.xlu1 %v3382_v57  ;;  %v1923_v27 = vand.u32 2147483647, %v1436_v40  ;;  %11379 = vst [vmem:[#allocation30_spill] sm:$0xff] %v8745_v11  ;;  %vm11129_vm15 = vcmp.eq.s32.totalorder %v8745_v11, %v8689_v7 }
 0x2a1   : > { %v1438_v41 = vpop.f32.mrf.mxu1  ;;  %v8737_v17 = vpop.f32.mrf.mxu0 }
 0x2a2   : > { %v1924_v8 = vand.u32 2147483647, %v1438_v41  ;;  %v3386_v16 = vadd.f32 %v3385_v54, %v3065_v61  ;;  %v8756_v41 = vadd.s32 296, %v8062_v33 }
 0x2a3   : > { %v1442_v52 = vpop.f32.mrf.mxu1  ;;  %v8747_v28 = vpop.f32.mrf.mxu0 }
 0x2a4   : > { %11380 = vst [vmem:[#allocation53_spill] sm:$0xff] %v8747_v28  ;;  %v3389_v57 = vadd.f32 %v1924_v8, %v1923_v27  ;;  %3387 = vadd.xlane.f32.xlu0 %v3386_v16  ;;  %11382 = vst [vmem:[#allocation55_spill] sm:$0xff] %v8756_v41  ;;  %v1926_v40 = vand.u32 2147483647, %v1442_v52  ;;  %v1931_v16 = vand.u32 2147483647, %v11384_v43  ;;  %vm11123_vm11 = vcmp.eq.s32.totalorder %v8756_v41, %v8689_v7 }
 0x2a5   : > { %v8750_v50 = vpop.f32.mrf.mxu0  ;;  %v1444_v36 = vpop.f32.mrf.mxu1 }
 0x2a6   : > { %11381 = vst [vmem:[#allocation54_spill] sm:$0xff] %v8750_v50  ;;  %v1927_v54 = vand.u32 2147483647, %v1444_v36  ;;  %v3390_v61 = vadd.f32 %v3389_v57, %v3068_v35  ;;  %v3071_v36 = vsel %vm11129_vm15, 1.0, %v1928_v13  ;;  %v3074_v13 = vsel %vm11123_vm11, 1.0, %v1931_v16 }
 0x2a7   : > { %v1448_v27 = vpop.f32.mrf.mxu1  ;;  %v8760_v8 = vpop.f32.mrf.mxu0 }
 0x2a8   : > { %11383 = vst [vmem:[#allocation56_spill] sm:$0xff] %v8760_v8  ;;  %v3393_v28 = vadd.f32 %v1927_v54, %v1926_v40  ;;  %3391 = vadd.xlane.f32.xlu1 %v3390_v61  ;;  %v1929_v57 = vand.u32 2147483647, %v1448_v27  ;;  %v8774_v40 = vadd.s32 304, %v8062_v33  ;;  %v11126_v54 = vand.u32 2147483647, %v8415_v6 }
 0x2a9   : > { %v8766_v50 = vpop.f32.mrf.mxu0  ;;  %v1450_v52 = vpop.f32.mrf.mxu1  ;;  %v3490_v61 = vadd.f32 %v3489_v10, %v8463_v31  ;;  %v1934_v27 = vand.u32 2147483647, %v8318_v24  ;;  %v11388_v10 = vand.u32 2147483647, %v8435_v2  ;;  %v11389_v24 = vand.u32 2147483647, %v8453_v34 }
 0x2aa   : > { %v1930_v35 = vand.u32 2147483647, %v1450_v52  ;;  %v3394_v43 = vadd.f32 %v3393_v28, %v3071_v36  ;;  %11385 = vst [vmem:[#allocation29_spill] sm:$0xff] %v8774_v40  ;;  %v8785_v28 = vadd.s32 312, %v8062_v33  ;;  %vm11137_vm11 = vcmp.eq.s32.totalorder %v8774_v40, %v8689_v7 }
 0x2ab   : > { %v1454_v49 = vpop.f32.mrf.mxu1  ;;  %v8779_v0 = vpop.f32.mrf.mxu0  ;;  %v3542_v52 = vadd.f32 %v11388_v10, %v11126_v54  ;;  %v3491_v36 = vadd.f32 %v3490_v61, %v8483_v12  ;;  %v11132_v10 = vand.u32 2147483647, %v8493_v37  ;;  %v1937_v12 = vand.u32 2147483647, %v11391_v62 }
 0x2ac   : > { %11386 = vst [vmem:[#allocation57_spill] sm:$0xff] %v8779_v0  ;;  %v3397_v11 = vadd.f32 %v1930_v35, %v1929_v57  ;;  %3395 = vadd.xlane.f32.xlu0 %v3394_v43  ;;  %11387 = vst [vmem:[#allocation58_spill] sm:$0xff] %v8785_v28  ;;  %v1932_v43 = vand.u32 2147483647, %v1454_v49  ;;  %vm11133_vm15 = vcmp.eq.s32.totalorder %v8785_v28, %v8689_v7  ;;  %v11392_v49 = vand.u32 2147483647, %v8473_v29 }
 0x2ad   : > { %v8794_v57 = vpop.f32.mrf.mxu0  ;;  %v1456_v35 = vpop.f32.mrf.mxu1  ;;  %v3543_v31 = vadd.f32 %v3542_v52, %v11389_v24  ;;  %v3492_v6 = vadd.f32 %v3491_v36, %v8503_v59  ;;  %v3077_v24 = vsel %vm11137_vm11, 1.0, %v1934_v27  ;;  %v1940_v27 = vand.u32 2147483647, %v8339_v42 }
 0x2ae   : > { %v1933_v41 = vand.u32 2147483647, %v1456_v35  ;;  %v3398_v16 = vadd.f32 %v3397_v11, %v3074_v13 }
 0x2af   : > { %v1460_v54 = vpop.f32.mrf.mxu1  ;;  %v8802_v61 = vpop.f32.mrf.mxu0  ;;  %v3544_v11 = vadd.f32 %v3543_v31, %v11392_v49  ;;  %v3493_v13 = vadd.f32 %v3492_v6, %v8523_v63 }
 0x2b0   : > { %11390 = vst [vmem:[#allocation59_spill] sm:$0xff] %v8802_v61  ;;  %v3401_v2 = vadd.f32 %v1933_v41, %v1932_v43  ;;  %3399 = vadd.xlane.f32.xlu1 %v3398_v16  ;;  %v1935_v62 = vand.u32 2147483647, %v1460_v54  ;;  %v8817_v16 = vadd.s32 320, %v8062_v33  ;;  %v3080_v54 = vsel %vm11133_vm15, 1.0, %v1937_v12 }
 0x2b1   : > { %v8811_v36 = vpop.f32.mrf.mxu0  ;;  %v1462_v35 = vpop.f32.mrf.mxu1  ;;  %v3545_v31 = vadd.f32 %v3544_v11, %v11132_v10  ;;  %v3494_v6 = vadd.f32 %v3493_v13, %v8543_v3  ;;  %v11396_v11 = vand.u32 2147483647, %v8513_v47  ;;  %v11397_v12 = vand.u32 2147483647, %v8533_v9 }
 0x2b2   : > { %v1936_v41 = vand.u32 2147483647, %v1462_v35  ;;  %v3402_v43 = vadd.f32 %v3401_v2, %v3077_v24  ;;  %11393 = vst [vmem:[#allocation32_spill] sm:$0xff] %v8817_v16  ;;  %v8829_v2 = vadd.s32 328, %v8062_v33  ;;  %vm11141_vm15 = vcmp.eq.s32.totalorder %v8817_v16, %v8689_v7  ;;  %v11399_v24 = vld [vmem:[#allocation31_spill] sm:$0xff] }
 0x2b3   : > { %v1466_v52 = vpop.f32.mrf.mxu1  ;;  %v8823_v63 = vpop.f32.mrf.mxu0  ;;  %v3546_v35 = vadd.f32 %v3545_v31, %v11396_v11  ;;  %v3495_v13 = vadd.f32 %v3494_v6, %v8561_v32  ;;  %v11142_v31 = vand.u32 2147483647, %v8567_v60  ;;  %v1943_v40 = vand.u32 2147483647, %v11399_v24 }
 0x2b4   : > { %11394 = vst [vmem:[#allocation60_spill] sm:$0xff] %v8823_v63  ;;  %v3405_v59 = vadd.f32 %v1936_v41, %v1935_v62  ;;  %3403 = vadd.xlane.f32.xlu0 %v3402_v43  ;;  %11395 = vst [vmem:[#allocation61_spill] sm:$0xff] %v8829_v2  ;;  %v1938_v41 = vand.u32 2147483647, %v1466_v52  ;;  %vm11145_vm11 = vcmp.eq.s32.totalorder %v8829_v2, %v8689_v7  ;;  %v11401_v52 = vand.u32 2147483647, %v8551_v26 }
 0x2b5   : > { %v8836_v10 = vpop.f32.mrf.mxu0  ;;  %v1468_v62 = vpop.f32.mrf.mxu1  ;;  %v3547_v28 = vadd.f32 %v3546_v35, %v11397_v12  ;;  %v3496_v42 = vadd.f32 %v3495_v13, %v8577_v23  ;;  %v8868_v13 = vadd.s32 344, %v8062_v33  ;;  %v11405_v2 = vand.u32 2147483647, %v8599_v55 }
 0x2b6   : > { %v1939_v43 = vand.u32 2147483647, %v1468_v62  ;;  %v3406_v49 = vadd.f32 %v3405_v59, %v3080_v54  ;;  %v8850_v59 = vadd.s32 336, %v8062_v33  ;;  %v3260_v55 = vpop.xlane.xlu1 %3259 }
 0x2b7   : > { %v1472_v11 = vpop.f32.mrf.mxu1  ;;  %v8844_v6 = vpop.f32.mrf.mxu0  ;;  %v3548_v54 = vadd.f32 %v3547_v28, %v11401_v52  ;;  %v3497_v35 = vadd.f32 %v3496_v42, %v8593_v1  ;;  %11403 = vst [vmem:[#allocation64_spill] sm:$0xff] %v8868_v13 }
 0x2b8   : > { %11398 = vst [vmem:[#allocation62_spill] sm:$0xff] %v8844_v6  ;;  %v3409_v32 = vadd.f32 %v1939_v43, %v1938_v41  ;;  %3407 = vadd.xlane.f32.xlu1 %v3406_v49  ;;  %11400 = vst [vmem:[#allocation31_spill] sm:$0xff] %v8850_v59  ;;  %v3083_v49 = vsel %vm11141_vm15, 1.0, %v1940_v27  ;;  %v1941_v24 = vand.u32 2147483647, %v1472_v11  ;;  %v3086_v27 = vsel %vm11145_vm11, 1.0, %v1943_v40 }
 0x2b9   : > { %v8856_v62 = vpop.f32.mrf.mxu0  ;;  %v1474_v12 = vpop.f32.mrf.mxu1  ;;  %v3549_v23 = vadd.f32 %v3548_v54, %v11142_v31  ;;  %v3498_v26 = vadd.f32 %v3497_v35, %v8609_v45  ;;  %vm2945_vm15 = vcmp.eq.s32.totalorder %v8850_v59, %v8689_v7  ;;  %v11404_v11 = vand.u32 2147483647, %v8583_v46 }
 0x2ba   : > { %v1942_v41 = vand.u32 2147483647, %v1474_v12  ;;  %v3410_v43 = vadd.f32 %v3409_v32, %v3083_v49  ;;  %v1946_v32 = vand.u32 2147483647, %v8360_v39  ;;  %vm11152_vm11 = vcmp.eq.s32.totalorder %v8868_v13, %v8689_v7  ;;  %v11407_v12 = vld [vmem:[#allocation4_spill] sm:$0xff] }
 0x2bb   : > { %v1478_v42 = vpop.f32.mrf.mxu1  ;;  %v8865_v52 = vpop.f32.mrf.mxu0  ;;  %v3550_v54 = vadd.f32 %v3549_v23, %v11404_v11  ;;  %v3499_v35 = vadd.f32 %v3498_v26, %v8625_v15 }
 0x2bc   : > { %11402 = vst [vmem:[#allocation63_spill] sm:$0xff] %v8865_v52  ;;  %v3413_v1 = vadd.f32 %v1942_v41, %v1941_v24  ;;  %3411 = vadd.xlane.f32.xlu0 %v3410_v43  ;;  %v2665_v41 = vand.u32 2147483647, %v8675_v5  ;;  %v8883_v43 = vpop.xlane.xlu0 %3251  ;;  %v1944_v40 = vand.u32 2147483647, %v1478_v42  ;;  %v8895_v42 = vadd.s32 352, %v8062_v33 }
 0x2bd   : > { %v8880_v49 = vpop.f32.mrf.mxu0  ;;  %v1480_v24 = vpop.f32.mrf.mxu1  ;;  %v3551_v39 = vadd.f32 %v3550_v54, %v11405_v2  ;;  %v3500_v16 = vadd.f32 %v3499_v35, %v8641_v19  ;;  %v1949_v5 = vand.u32 2147483647, %v11407_v12  ;;  %v11410_v2 = vand.u32 2147483647, %v8615_v21 }
 0x2be   : > { %v1945_v31 = vand.u32 2147483647, %v1480_v24  ;;  %v3414_v28 = vadd.f32 %v3413_v1, %v3086_v27  ;;  %11408 = vst [vmem:[#allocation4_spill] sm:$0xff] %v8895_v42  ;;  %v8898_v1 = vadd.s32 360, %v8062_v33  ;;  %v11153_v35 = vand.u32 2147483647, %v8663_v53 }
 0x2bf   : > { %v1484_v26 = vpop.f32.mrf.mxu1  ;;  %v8889_v11 = vpop.f32.mrf.mxu0  ;;  %v3552_v27 = vadd.f32 %v3551_v39, %v11410_v2  ;;  %v3501_v54 = vadd.f32 %v3500_v16, %v8657_v22  ;;  %v11412_v39 = vand.u32 2147483647, %v8631_v58  ;;  %v3092_v18 = vsel %vm11152_vm11, 1.0, %v1949_v5  ;;  %v11416_v5 = vld [vmem:[#allocation3_spill] sm:$0xff] }
 0x2c0   : > { %11406 = vst [vmem:[#allocation65_spill] sm:$0xff] %v8889_v11  ;;  %v3417_v15 = vadd.f32 %v1945_v31, %v1944_v40  ;;  %3415 = vadd.xlane.f32.xlu1 %v3414_v28  ;;  %11409 = vst [vmem:[#allocation66_spill] sm:$0xff] %v8898_v1  ;;  %v3089_v31 = vsel %vm2945_vm15, 1.0, %v1946_v32  ;;  %v8912_v28 = vsel %vm2862_vm14, 1.0, %v2665_v41  ;;  %v1947_v12 = vand.u32 2147483647, %v1484_v26  ;;  %v3256_v59 = vpop.xlane.xlu0 %3255 }
 0x2c1   : > { %v8904_v24 = vpop.f32.mrf.mxu0  ;;  %v1486_v23 = vpop.f32.mrf.mxu1  ;;  %11411 = vst [vmem:[#allocation67_spill] sm:$0xff] %v8912_v28  ;;  %v3553_v16 = vadd.f32 %v3552_v27, %v11412_v39  ;;  %v3502_v2 = vadd.f32 %v3501_v54, %v8673_v56  ;;  %v1952_v32 = vand.u32 2147483647, %v8381_v51  ;;  %vm11156_vm14 = vcmp.eq.s32.totalorder %v8895_v42, %v8689_v7  ;;  %v11415_v26 = vld [vmem:[#allocation45_spill] sm:$0xff] }
 0x2c2   : > { %v1948_v40 = vand.u32 2147483647, %v1486_v23  ;;  %v3418_v19 = vadd.f32 %v3417_v15, %v3089_v31  ;;  %v11414_v15 = vand.u32 2147483647, %v8647_v44  ;;  %vm2954_vm11 = vcmp.eq.s32.totalorder %v8898_v1, %v8689_v7 }
 0x2c3   : > { %v1490_v22 = vpop.f32.mrf.mxu1  ;;  %v8918_v21 = vpop.f32.mrf.mxu0  ;;  %v3503_v23 = vadd.f32 %v3502_v2, %v8912_v28  ;;  %v1955_v39 = vand.u32 2147483647, %v11416_v5  ;;  %v2672_v2 = vand.u32 2147483647, %v8711_v14  ;;  %v8942_v51 = vadd.s32 368, %v8062_v33 }
 0x2c4   : > { %11413 = vst [vmem:[#allocation68_spill] sm:$0xff] %v8918_v21  ;;  %v3421_v48 = vadd.f32 %v1948_v40, %v1947_v12  ;;  %3419 = vadd.xlane.f32.xlu0 %v3418_v19  ;;  %v3554_v41 = vadd.f32 %v3553_v16, %v11414_v15  ;;  %v1950_v19 = vand.u32 2147483647, %v1490_v22  ;;  %6520 = vrsqrt.f32 %v3256_v59 }
 0x2c5   : > { %v8931_v54 = vpop.f32.mrf.mxu0  ;;  %v1492_v31 = vpop.f32.mrf.mxu1  ;;  %11418 = vst [vmem:[#allocation69_spill] sm:$0xff] %v8942_v51  ;;  %v3095_v59 = vsel %vm11156_vm14, 1.0, %v1952_v32  ;;  %6522 = vrsqrt.f32 %v8883_v43  ;;  %v3098_v32 = vsel %vm2954_vm11, 1.0, %v1955_v39  ;;  %vm2957_vm14 = vcmp.eq.s32.totalorder %v8942_v51, %v8689_v7  ;;  %v11426_v43 = vld [vmem:[#allocation5_spill] sm:$0xff] }
 0x2c6   : > { %v1951_v12 = vand.u32 2147483647, %v1492_v31  ;;  %v3422_v40 = vadd.f32 %v3421_v48, %v3092_v18  ;;  %v3555_v16 = vadd.f32 %v3554_v41, %v11153_v35  ;;  %v8946_v18 = vadd.s32 376, %v8062_v33 }
 0x2c7   : > { %v1496_v15 = vpop.f32.mrf.mxu1  ;;  %v8939_v27 = vpop.f32.mrf.mxu0  ;;  %v11420_v31 = vand.u32 2147483647, %v11415_v26  ;;  %v11421_v41 = vand.u32 2147483647, %v8691_v20  ;;  %v2675_v35 = vand.u32 2147483647, %v8724_v4 }
 0x2c8   : > { %11417 = vst [vmem:[#allocation3_spill] sm:$0xff] %v8939_v27  ;;  %v3425_v48 = vadd.f32 %v1951_v12, %v1950_v19  ;;  %3423 = vadd.xlane.f32.xlu1 %v3422_v40  ;;  %11419 = vst [vmem:[#allocation70_spill] sm:$0xff] %v8946_v18  ;;  %v3264_v19 = vpop.xlane.xlu1 %3263  ;;  %v1953_v33 = vand.u32 2147483647, %v1496_v15  ;;  %v11427_v15 = vld [vmem:[#allocation49_spill] sm:$0xff]  ;;  %v11432_v4 = vld [vmem:[#allocation54_spill] sm:$0xff] }
 0x2c9   : > { %v3556_v5 = vadd.f32 %v3555_v16, %v11420_v31  ;;  %v3504_v14 = vadd.f32 %v3503_v23, %v11421_v41  ;;  %v8953_v13 = vpop.f32.mrf.mxu0  ;;  %v1498_v28 = vpop.f32.mrf.mxu1  ;;  %v8962_v16 = vsel %vm2869_vm1, 1.0, %v2672_v2  ;;  %v11424_v23 = vld [vmem:[#allocation50_spill] sm:$0xff]  ;;  %v11428_v22 = vand.u32 2147483647, %v8703_v25 }
 0x2ca   : > { %v1954_v12 = vand.u32 2147483647, %v1498_v28  ;;  %v3426_v40 = vadd.f32 %v3425_v48, %v3095_v59  ;;  %11423 = vst [vmem:[#allocation7_spill] sm:$0xff] %v8962_v16  ;;  %v1958_v28 = vand.u32 2147483647, %v11426_v43  ;;  %v8979_v42 = vsel %vm2872_vm2, 1.0, %v2675_v35 }
 0x2cb   : > { %v1502_v31 = vpop.f32.mrf.mxu1  ;;  %v8965_v41 = vpop.f32.mrf.mxu0  ;;  %v3557_v48 = vadd.f32 %v3556_v5, %v11427_v15  ;;  %v3505_v2 = vadd.f32 %v3504_v14, %v11428_v22  ;;  %11430 = vst [vmem:[#allocation5_spill] sm:$0xff] %v8979_v42  ;;  %v2678_v39 = vand.u32 2147483647, %v8737_v17  ;;  %6524 = vrsqrt.f32 %v3264_v19  ;;  %v11434_v17 = vld [vmem:[#allocation6_spill] sm:$0xff] }
 0x2cc   : > { %11425 = vst [vmem:[#allocation71_spill] sm:$0xff] %v8965_v41  ;;  %v3429_v59 = vadd.f32 %v1954_v12, %v1953_v33  ;;  %3427 = vadd.xlane.f32.xlu0 %v3426_v40  ;;  %v3272_v15 = vpop.xlane.xlu1 %3271  ;;  %v1956_v25 = vand.u32 2147483647, %v1502_v31  ;;  %v11431_v12 = vand.u32 2147483647, %v11424_v23  ;;  %6526 = vrsqrt.f32 %v3260_v55 }
 0x2cd   : > { %v8983_v20 = vpop.f32.mrf.mxu0  ;;  %v1504_v43 = vpop.f32.mrf.mxu1  ;;  %v3558_v5 = vadd.f32 %v3557_v48, %v8962_v16  ;;  %v2681_v35 = vand.u32 2147483647, %v11432_v4  ;;  %vm2960_vm1 = vcmp.eq.s32.totalorder %v8946_v18, %v8689_v7  ;;  %v1961_v19 = vand.u32 2147483647, %v11434_v17 }
 0x2ce   : > { %v1957_v14 = vand.u32 2147483647, %v1504_v43  ;;  %v3430_v33 = vadd.f32 %v3429_v59, %v3098_v32  ;;  %v3506_v40 = vadd.f32 %v3505_v2, %v11431_v12  ;;  %v3268_v16 = vpop.xlane.xlu0 %3267  ;;  %v3101_v32 = vsel %vm2957_vm14, 1.0, %v1958_v28  ;;  %v11438_v12 = vld [vmem:[#allocation53_spill] sm:$0xff] }
 0x2cf   : > { %v1508_v22 = vpop.f32.mrf.mxu1  ;;  %v8989_v1 = vpop.f32.mrf.mxu0  ;;  %v3559_v48 = vadd.f32 %v3558_v5, %v8979_v42  ;;  %v11435_v2 = vand.u32 2147483647, %v8734_v30  ;;  %v9003_v43 = vsel %vm2875_vm3, 1.0, %v2678_v39  ;;  %v2684_v17 = vand.u32 2147483647, %v8766_v50 }
 0x2d0   : > { %11433 = vst [vmem:[#allocation12_spill] sm:$0xff] %v8989_v1  ;;  %v3433_v31 = vadd.f32 %v1957_v14, %v1956_v25  ;;  %3431 = vadd.xlane.f32.xlu1 %v3430_v33  ;;  %11437 = vst [vmem:[#allocation54_spill] sm:$0xff] %v9003_v43  ;;  %6528 = vrsqrt.f32 %v3272_v15  ;;  %v3280_v14 = vpop.xlane.xlu1 %3279  ;;  %v1959_v33 = vand.u32 2147483647, %v1508_v22  ;;  %v11167_v39 = vand.u32 2147483647, %v8760_v8 }
 0x2d1   : > { %v3507_v55 = vadd.f32 %v3506_v40, %v11435_v2  ;;  %v9007_v5 = vpop.f32.mrf.mxu0  ;;  %v1510_v25 = vpop.f32.mrf.mxu1  ;;  %v9012_v40 = vsel %vm2878_vm4, 1.0, %v2681_v35  ;;  %v2687_v2 = vand.u32 2147483647, %v8794_v57  ;;  %6530 = vrsqrt.f32 %v3268_v16 }
 0x2d2   : > { %v1960_v51 = vand.u32 2147483647, %v1510_v25  ;;  %v3434_v28 = vadd.f32 %v3433_v31, %v3101_v32  ;;  %11440 = vst [vmem:[#allocation6_spill] sm:$0xff] %v9012_v40  ;;  %v3560_v4 = vadd.f32 %v3559_v48, %v9003_v43  ;;  %v3276_v15 = vpop.xlane.xlu0 %3275  ;;  %v3104_v42 = vsel %vm2960_vm1, 1.0, %v1961_v19  ;;  %v9022_v35 = vpop.eup %6520  ;;  %v11480_v43 = vld [vmem:[#allocation40_spill] sm:$0xff] }
 0x2d3   : > { %v9016_v59 = vpop.f32.mrf.mxu0  ;;  %v6349_v50 = vpop.f32.mrf.mxu1  ;;  %v11442_v31 = vand.u32 2147483647, %v11438_v12  ;;  %v9029_v16 = vsel %vm2881_vm5, 1.0, %v2684_v17  ;;  %6532 = vrsqrt.f32 %v3280_v14  ;;  %vm11481_vm2 = vcmp.eq.s32.totalorder %v11480_v43, %v8403_v38 }
 0x2d4   : > { %11441 = vst [vmem:[#allocation14_spill] sm:$0xff] %v9016_v59  ;;  %v3437_v30 = vadd.f32 %v1960_v51, %v1959_v33  ;;  %v2625_v22 = vand.u32 2147483647, %v6349_v50  ;;  %3435 = vadd.xlane.f32.xlu0 %v3434_v28  ;;  %11444 = vst [vmem:[#allocation16_spill] sm:$0xff] %v9029_v16  ;;  %v2690_v51 = vand.u32 2147483647, %v8811_v36  ;;  %v3561_v28 = vadd.f32 %v3560_v4, %v9012_v40  ;;  %v3288_v19 = vpop.xlane.xlu1 %3287 }
 0x2d5   : > { %v3508_v32 = vadd.f32 %v3507_v55, %v11442_v31  ;;  %v9033_v25 = vpop.f32.mrf.mxu0  ;;  %v2381_v33 = vpop.f32.mrf.mxu1  ;;  %v9046_v36 = vsel %vm2884_vm6, 1.0, %v2687_v2  ;;  %6534 = vrsqrt.f32 %v3276_v15  ;;  %v2693_v15 = vand.u32 2147483647, %v8836_v10 }
 0x2d6   : > { %11445 = vst [vmem:[#allocation18_spill] sm:$0xff] %v9033_v25  ;;  %v9037_v50 = vmul.f32 %v9022_v35, %v2625_v22  ;;  %v2622_v55 = vand.u32 2147483647, %v2381_v33  ;;  %v9039_v31 = vpop.eup %6522  ;;  %11448 = vst [vmem:[#allocation20_spill] sm:$0xff] %v9046_v36  ;;  %v3438_v14 = vadd.f32 %v3437_v30, %v3104_v42  ;;  %v3562_v18 = vadd.f32 %v3561_v28, %v9029_v16  ;;  %v3284_v33 = vpop.xlane.xlu0 %3283 }
 0x2d7   : > { %v3509_v17 = vadd.f32 %v3508_v32, %v11167_v39  ;;  %v9048_v48 = vpop.f32.mrf.mxu0  ;;  %v6352_v4 = vpop.f32.mrf.mxu1  ;;  %v11451_v32 = vand.u32 2147483647, %v8779_v0  ;;  %v9060_v2 = vsel %vm2887_vm7, 1.0, %v2690_v51  ;;  %6536 = vrsqrt.f32 %v3288_v19 }
 0x2d8   : > { %11446 = vst [vmem:[#allocation72_spill] sm:$0xff] %v9037_v50  ;;  %11449 = vst [vmem:[#allocation73_spill] sm:$0xff] %v9048_v48  ;;  %v9053_v40 = vmul.f32 %v9039_v31, %v2622_v55  ;;  %v2631_v57 = vand.u32 2147483647, %v6352_v4  ;;  %3439 = vadd.xlane.f32.xlu1 %v3438_v14  ;;  %v9065_v42 = vpop.eup %6524  ;;  %v3563_v28 = vadd.f32 %v3562_v18, %v9046_v36  ;;  %6538 = vrsqrt.f32 %v3284_v33 }
 0x2d9   : > { %v3510_v39 = vadd.f32 %v3509_v17, %v11451_v32  ;;  %11453 = vst [vmem:[#allocation19_spill] sm:$0xff] %v9060_v2  ;;  %v9063_v30 = vpop.f32.mrf.mxu0  ;;  %v3296_v17 = vpop.xlane.xlu1 %3295  ;;  %v3595_v8 = vadd.f32 %v2625_v22, %v2622_v55  ;;  %v11457_v0 = vand.u32 2147483647, %v8802_v61  ;;  %v2699_v19 = vand.u32 2147483647, %v8880_v49 }
 0x2da   : > { %11450 = vst [vmem:[#allocation74_spill] sm:$0xff] %v9053_v40  ;;  %11454 = vst [vmem:[#allocation75_spill] sm:$0xff] %v9063_v30  ;;  %v2696_v40 = vand.u32 2147483647, %v8856_v62  ;;  %v2391_v32 = vpop.f32.mrf.mxu1  ;;  %v9071_v51 = vmul.f32 %v9065_v42, %v2631_v57  ;;  %v9075_v14 = vpop.eup %6526  ;;  %v3564_v50 = vadd.f32 %v3563_v28, %v9060_v2  ;;  %v9085_v55 = vsel %vm2890_vm0, 1.0, %v2693_v15 }
 0x2db   : > { %v2628_v10 = vand.u32 2147483647, %v2391_v32  ;;  %v9073_v4 = vpop.f32.mrf.mxu0  ;;  %v3511_v18 = vadd.f32 %v3510_v39, %v11457_v0  ;;  %v3292_v36 = vpop.xlane.xlu0 %3291  ;;  %11459 = vst [vmem:[#allocation33_spill] sm:$0xff] %v9085_v55  ;;  %6540 = vrsqrt.f32 %v3296_v17  ;;  %v11462_v0 = vand.u32 2147483647, %v8823_v63 }
 0x2dc   : > { %11455 = vst [vmem:[#allocation76_spill] sm:$0xff] %v9071_v51  ;;  %11456 = vst [vmem:[#allocation77_spill] sm:$0xff] %v9073_v4  ;;  %v6355_v33 = vpop.f32.mrf.mxu1  ;;  %v2702_v49 = vand.u32 2147483647, %v8904_v24  ;;  %v9101_v17 = vsel %vm2893_vm8, 1.0, %v2696_v40  ;;  %6542 = vrsqrt.f32 %v3292_v36  ;;  %v9113_v63 = vsel %vm2896_vm9, 1.0, %v2699_v19 }
 0x2dd   : > { %v3596_v32 = vadd.f32 %v3595_v8, %v2628_v10  ;;  %v9088_v51 = vmul.f32 %v9075_v14, %v2628_v10  ;;  %v9090_v61 = vpop.f32.mrf.mxu0  ;;  %v3512_v39 = vadd.f32 %v3511_v18, %v11462_v0  ;;  %v3304_v62 = vpop.xlane.xlu1 %3303  ;;  %v2637_v2 = vand.u32 2147483647, %v6355_v33  ;;  %11464 = vst [vmem:[#allocation24_spill] sm:$0xff] %v9101_v17  ;;  %11468 = vst [vmem:[#allocation36_spill] sm:$0xff] %v9113_v63 }
 0x2de   : > { %11461 = vst [vmem:[#allocation79_spill] sm:$0xff] %v9090_v61  ;;  %v2401_v16 = vpop.f32.mrf.mxu1  ;;  %v9096_v22 = vpop.eup %6528  ;;  %v3565_v0 = vadd.f32 %v3564_v50, %v9085_v55  ;;  %v11466_v24 = vand.u32 2147483647, %v8844_v6  ;;  %6544 = vrsqrt.f32 %v3304_v62  ;;  %v11472_v28 = vand.u32 2147483647, %v8865_v52 }
 0x2df   : > { %11460 = vst [vmem:[#allocation78_spill] sm:$0xff] %v9088_v51  ;;  %v2634_v8 = vand.u32 2147483647, %v2401_v16  ;;  %v3597_v10 = vadd.f32 %v3596_v32, %v2631_v57  ;;  %v9103_v51 = vpop.f32.mrf.mxu0  ;;  %v9105_v18 = vpop.eup %6530  ;;  %v9116_v40 = vmul.f32 %v9096_v22, %v2637_v2  ;;  %v9130_v6 = vsel %vm2899_vm10, 1.0, %v2702_v49 }
 0x2e0   : > { %11465 = vst [vmem:[#allocation80_spill] sm:$0xff] %v9103_v51  ;;  %v3513_v33 = vadd.f32 %v3512_v39, %v11466_v24  ;;  %v3300_v15 = vpop.xlane.xlu0 %3299  ;;  %v6358_v16 = vpop.f32.mrf.mxu1  ;;  %v3566_v39 = vadd.f32 %v3565_v0, %v9101_v17  ;;  %11474 = vst [vmem:[#allocation38_spill] sm:$0xff] %v9130_v6  ;;  %v2708_v49 = vand.u32 2147483647, %v8953_v13  ;;  %v2711_v13 = vand.u32 2147483647, %v8983_v20 }
 0x2e1   : > { %11469 = vst [vmem:[#allocation81_spill] sm:$0xff] %v9116_v40  ;;  %v3598_v57 = vadd.f32 %v3597_v10, %v2634_v8  ;;  %v9120_v32 = vmul.f32 %v9105_v18, %v2634_v8  ;;  %v9122_v50 = vpop.f32.mrf.mxu0  ;;  %v2643_v40 = vand.u32 2147483647, %v6358_v16  ;;  %v3312_v55 = vpop.xlane.xlu1 %3311  ;;  %v2705_v8 = vand.u32 2147483647, %v8931_v54 }
 0x2e2   : > { %11471 = vst [vmem:[#allocation83_spill] sm:$0xff] %v9122_v50  ;;  %v3514_v19 = vadd.f32 %v3513_v33, %v11472_v28  ;;  %v2411_v36 = vpop.f32.mrf.mxu1  ;;  %v9132_v62 = vpop.eup %6532  ;;  %6546 = vrsqrt.f32 %v3300_v15  ;;  %v3567_v33 = vadd.f32 %v3566_v39, %v9113_v63  ;;  %v11477_v54 = vand.u32 2147483647, %v8889_v11 }
 0x2e3   : > { %11470 = vst [vmem:[#allocation82_spill] sm:$0xff] %v9120_v32  ;;  %v2640_v10 = vand.u32 2147483647, %v2411_v36  ;;  %v3599_v32 = vadd.f32 %v3598_v57, %v2637_v2  ;;  %v9135_v12 = vpop.f32.mrf.mxu0  ;;  %v9137_v0 = vpop.eup %6534  ;;  %v9143_v24 = vmul.f32 %v9132_v62, %v2643_v40  ;;  %6548 = vrsqrt.f32 %v3312_v55 }
 0x2e4   : > { %11475 = vst [vmem:[#allocation84_spill] sm:$0xff] %v9135_v12  ;;  %v3308_v16 = vpop.xlane.xlu0 %3307  ;;  %v6361_v52 = vpop.f32.mrf.mxu1  ;;  %v3515_v15 = vadd.f32 %v3514_v19, %v11477_v54  ;;  %v3568_v39 = vadd.f32 %v3567_v33, %v9130_v6  ;;  %v9160_v55 = vsel %vm11481_vm2, 1.0, %v2705_v8  ;;  %v11484_v33 = vand.u32 2147483647, %v8918_v21  ;;  %v11491_v6 = vld [vmem:[#allocation43_spill] sm:$0xff] }
 0x2e5   : > { %11476 = vst [vmem:[#allocation85_spill] sm:$0xff] %v9143_v24  ;;  %v3600_v2 = vadd.f32 %v3599_v32, %v2640_v10  ;;  %v9148_v36 = vmul.f32 %v9137_v0, %v2640_v10  ;;  %v9150_v57 = vpop.f32.mrf.mxu0  ;;  %v2649_v63 = vand.u32 2147483647, %v6361_v52  ;;  %v9155_v24 = vpop.eup %6536  ;;  %11482 = vst [vmem:[#allocation40_spill] sm:$0xff] %v9160_v55  ;;  %6550 = vrsqrt.f32 %v3308_v16 }
 0x2e6   : > { %11479 = vst [vmem:[#allocation87_spill] sm:$0xff] %v9150_v57  ;;  %v2421_v17 = vpop.f32.mrf.mxu1  ;;  %v9164_v54 = vpop.eup %6538  ;;  %v3516_v28 = vadd.f32 %v3515_v15, %v11484_v33  ;;  %v9171_v52 = vsel %vm2905_vm12, 1.0, %v2708_v49  ;;  %v3569_v49 = vadd.f32 %v3568_v39, %v9160_v55  ;;  %v11490_v20 = vand.u32 2147483647, %v8939_v27 }
 0x2e7   : > { %11478 = vst [vmem:[#allocation86_spill] sm:$0xff] %v9148_v36  ;;  %v2646_v32 = vand.u32 2147483647, %v2421_v17  ;;  %v3601_v19 = vadd.f32 %v3600_v2, %v2643_v40  ;;  %v9162_v10 = vpop.f32.mrf.mxu0  ;;  %11486 = vst [vmem:[#allocation26_spill] sm:$0xff] %v9171_v52  ;;  %v9175_v43 = vmul.f32 %v9155_v24, %v2649_v63  ;;  %v2714_v40 = vand.u32 2147483647, %v9007_v5 }
 0x2e8   : > { %11483 = vst [vmem:[#allocation88_spill] sm:$0xff] %v9162_v10  ;;  %v3316_v8 = vpop.xlane.xlu0 %3315  ;;  %v6364_v17 = vpop.f32.mrf.mxu1  ;;  %v3517_v36 = vadd.f32 %v3516_v28, %v11490_v20  ;;  %vm11492_vm3 = vcmp.eq.s32.totalorder %v11491_v6, %v8403_v38  ;;  %v3570_v28 = vadd.f32 %v3569_v49, %v9171_v52  ;;  %v11496_v6 = vand.u32 2147483647, %v8965_v41  ;;  %v11497_v5 = vld [vmem:[#allocation25_spill] sm:$0xff] }
 0x2e9   : > { %11487 = vst [vmem:[#allocation89_spill] sm:$0xff] %v9175_v43  ;;  %v3602_v16 = vadd.f32 %v3601_v19, %v2646_v32  ;;  %v9179_v2 = vmul.f32 %v9164_v54, %v2646_v32  ;;  %v2655_v21 = vand.u32 2147483647, %v6364_v17  ;;  %v9181_v15 = vpop.f32.mrf.mxu0  ;;  %v9183_v33 = vpop.eup %6540  ;;  %v9191_v43 = vsel %vm11492_vm3, 1.0, %v2711_v13 }
 0x2ea   : > { %11489 = vst [vmem:[#allocation91_spill] sm:$0xff] %v9181_v15  ;;  %11493 = vst [vmem:[#allocation43_spill] sm:$0xff] %v9191_v43  ;;  %v2431_v19 = vpop.f32.mrf.mxu1  ;;  %v3320_v32 = vpop.xlane.xlu1 %3319  ;;  %6552 = vrsqrt.f32 %v3316_v8  ;;  %v3518_v13 = vadd.f32 %v3517_v36, %v11496_v6  ;;  %vm11498_vm4 = vcmp.eq.s32.totalorder %v11497_v5, %v8403_v38  ;;  %v3571_v49 = vadd.f32 %v3570_v28, %v9191_v43 }
 0x2eb   : > { %11488 = vst [vmem:[#allocation90_spill] sm:$0xff] %v9179_v2  ;;  %v9195_v17 = vmul.f32 %v9183_v33, %v2655_v21  ;;  %v2652_v2 = vand.u32 2147483647, %v2431_v19  ;;  %v3603_v11 = vadd.f32 %v3602_v16, %v2649_v63  ;;  %v9197_v23 = vpop.f32.mrf.mxu0  ;;  %v9199_v39 = vpop.eup %6542  ;;  %6554 = vrsqrt.f32 %v3320_v32 }
 0x2ec   : > { %11495 = vst [vmem:[#allocation93_spill] sm:$0xff] %v9197_v23  ;;  %v6367_v20 = vpop.f32.mrf.mxu1  ;;  %v9207_v8 = vsel %vm11498_vm4, 1.0, %v2714_v40  ;;  %v11502_v41 = vand.u32 2147483647, %v8989_v1  ;;  %v11510_v1 = vand.u32 2147483647, %v9033_v25 }
 0x2ed   : > { %11494 = vst [vmem:[#allocation92_spill] sm:$0xff] %v9195_v17  ;;  %11499 = vst [vmem:[#allocation25_spill] sm:$0xff] %v9207_v8  ;;  %v3604_v27 = vadd.f32 %v3603_v11, %v2652_v2  ;;  %v9210_v19 = vmul.f32 %v9199_v39, %v2652_v2  ;;  %v2661_v63 = vand.u32 2147483647, %v6367_v20  ;;  %v9212_v16 = vpop.f32.mrf.mxu0  ;;  %v9214_v17 = vpop.eup %6544 }
 0x2ee   : > { %11501 = vst [vmem:[#allocation95_spill] sm:$0xff] %v9212_v16  ;;  %v2441_v32 = vpop.f32.mrf.mxu1  ;;  %v3324_v6 = vpop.xlane.xlu0 %3323  ;;  %v3519_v38 = vadd.f32 %v3518_v13, %v11502_v41 }
 0x2ef   : > { %11500 = vst [vmem:[#allocation94_spill] sm:$0xff] %v9210_v19  ;;  %v9221_v40 = vmul.f32 %v9214_v17, %v2661_v63  ;;  %v2658_v11 = vand.u32 2147483647, %v2441_v32  ;;  %v3605_v2 = vadd.f32 %v3604_v27, %v2655_v21  ;;  %v9223_v5 = vpop.f32.mrf.mxu0  ;;  %v9225_v20 = vpop.eup %6546  ;;  %v3572_v19 = vadd.f32 %v3571_v49, %v9207_v8 }
 0x2f0   : > { %11504 = vst [vmem:[#allocation97_spill] sm:$0xff] %v9223_v5  ;;  %6556 = vrsqrt.f32 %v3324_v6  ;;  %v6370_v43 = vpop.f32.mrf.mxu1  ;;  %v9235_v21 = vpop.eup %6548  ;;  %v11507_v27 = vand.u32 2147483647, %v9016_v59 }
 0x2f1   : > { %11503 = vst [vmem:[#allocation96_spill] sm:$0xff] %v9221_v40  ;;  %v3606_v52 = vadd.f32 %v3605_v2, %v2658_v11  ;;  %v9231_v41 = vmul.f32 %v9225_v20, %v2658_v11  ;;  %v2667_v13 = vand.u32 2147483647, %v6370_v43  ;;  %v9233_v40 = vpop.f32.mrf.mxu0  ;;  %v3573_v55 = vadd.f32 %v3572_v19, %v11510_v1 }
 0x2f2   : > { %11506 = vst [vmem:[#allocation99_spill] sm:$0xff] %v9233_v40  ;;  %v3520_v32 = vadd.f32 %v3519_v38, %v11507_v27  ;;  %v2451_v8 = vpop.f32.mrf.mxu1  ;;  %v3328_v36 = vpop.xlane.xlu1 %3327  ;;  %v11511_v38 = vand.u32 2147483647, %v9048_v48  ;;  %v11515_v1 = vand.u32 2147483647, %v9073_v4 }
 0x2f3   : > { %11505 = vst [vmem:[#allocation98_spill] sm:$0xff] %v9231_v41  ;;  %v9242_v6 = vmul.f32 %v9235_v21, %v2667_v13  ;;  %v2664_v2 = vand.u32 2147483647, %v2451_v8  ;;  %v3607_v11 = vadd.f32 %v3606_v52, %v2661_v63  ;;  %v9244_v41 = vpop.f32.mrf.mxu0  ;;  %v9246_v43 = vpop.eup %6550  ;;  %6558 = vrsqrt.f32 %v3328_v36 }
 0x2f4   : > { %11509 = vst [vmem:[#allocation101_spill] sm:$0xff] %v9244_v41  ;;  %v3521_v27 = vadd.f32 %v3520_v32, %v11511_v38  ;;  %v6373_v28 = vpop.f32.mrf.mxu1  ;;  %v11514_v63 = vand.u32 2147483647, %v9063_v30  ;;  %v11518_v32 = vand.u32 2147483647, %v9103_v51 }
 0x2f5   : > { %11508 = vst [vmem:[#allocation100_spill] sm:$0xff] %v9242_v6  ;;  %v3608_v26 = vadd.f32 %v3607_v11, %v2664_v2  ;;  %v9255_v8 = vmul.f32 %v9246_v43, %v2664_v2  ;;  %v9257_v52 = vpop.f32.mrf.mxu0  ;;  %v11521_v36 = vand.u32 2147483647, %v9122_v50 }
 0x2f6   : > { %11513 = vst [vmem:[#allocation103_spill] sm:$0xff] %v9257_v52  ;;  %v3574_v6 = vadd.f32 %v3573_v55, %v11514_v63  ;;  %v3522_v19 = vadd.f32 %v3521_v27, %v11515_v1  ;;  %v2461_v38 = vpop.f32.mrf.mxu1  ;;  %v3332_v49 = vpop.xlane.xlu0 %3331  ;;  %v2673_v63 = vand.u32 2147483647, %v6373_v28 }
 0x2f7   : > { %11512 = vst [vmem:[#allocation102_spill] sm:$0xff] %v9255_v8  ;;  %v2670_v48 = vand.u32 2147483647, %v2461_v38  ;;  %v3609_v59 = vadd.f32 %v3608_v26, %v2667_v13  ;;  %6560 = vrsqrt.f32 %v3332_v49  ;;  %v9265_v11 = vpop.f32.mrf.mxu0  ;;  %v9267_v2 = vpop.eup %6552  ;;  %v11517_v8 = vand.u32 2147483647, %v9090_v61 }
 0x2f8   : > { %11516 = vst [vmem:[#allocation104_spill] sm:$0xff] %v9265_v11  ;;  %v6376_v27 = vpop.f32.mrf.mxu1  ;;  %v9272_v1 = vpop.eup %6554  ;;  %v3523_v4 = vadd.f32 %v3522_v19, %v11518_v32  ;;  %v11523_v19 = vand.u32 2147483647, %v9135_v12 }
 0x2f9   : > { %v3575_v30 = vadd.f32 %v3574_v6, %v11517_v8  ;;  %v3610_v26 = vadd.f32 %v3609_v59, %v2670_v48  ;;  %v9278_v13 = vmul.f32 %v9267_v2, %v2670_v48  ;;  %v9280_v49 = vpop.f32.mrf.mxu0  ;;  %v9286_v28 = vmul.f32 %v9272_v1, %v2673_v63 }
 0x2fa   : > { %11520 = vst [vmem:[#allocation106_spill] sm:$0xff] %v9280_v49  ;;  %v2471_v55 = vpop.f32.mrf.mxu1  ;;  %v3336_v61 = vpop.xlane.xlu1 %3335  ;;  %v3524_v32 = vadd.f32 %v3523_v4, %v11523_v19  ;;  %v11527_v4 = vld [vmem:[#allocation8_spill] sm:$0xff]  ;;  %v11539_v8 = vand.u32 2147483647, %v9197_v23 }
 0x2fb   : > { %11519 = vst [vmem:[#allocation105_spill] sm:$0xff] %v9278_v13  ;;  %v3576_v6 = vadd.f32 %v3575_v30, %v11521_v36  ;;  %11522 = vst [vmem:[#allocation107_spill] sm:$0xff] %v9286_v28  ;;  %v2676_v38 = vand.u32 2147483647, %v2471_v55  ;;  %v3611_v59 = vadd.f32 %v3610_v26, %v2673_v63  ;;  %6562 = vrsqrt.f32 %v3336_v61  ;;  %v9290_v48 = vpop.f32.mrf.mxu0  ;;  %v11525_v13 = vld [vmem:[#allocation10_spill] sm:$0xff] }
 0x2fc   : > { %11524 = vst [vmem:[#allocation108_spill] sm:$0xff] %v9290_v48  ;;  %v9294_v51 = vmul.f32 %v9039_v31, %v11525_v13  ;;  %v11526_v30 = vand.u32 2147483647, %v9150_v57  ;;  %v9300_v50 = vpop.f32.mrf.mxu1  ;;  %v11528_v55 = vand.u32 2147483647, %v11527_v4 }
 0x2fd   : > { %v9302_v12 = vpop.eup %6556  ;;  %v11530_v63 = vand.u32 2147483647, %v9162_v10  ;;  %v2679_v13 = vand.u32 2147483647, %v6376_v27  ;;  %v3612_v19 = vadd.f32 %v3611_v59, %v2676_v38  ;;  %v9311_v57 = vpop.f32.mrf.mxu0  ;;  %v11540_v28 = vand.u32 2147483647, %v9212_v16 }
 0x2fe   : > { %v3577_v36 = vadd.f32 %v3576_v6, %v11526_v30  ;;  %v9307_v61 = vmul.f32 %v9039_v31, %v11528_v55  ;;  %11531 = vst [vmem:[#allocation8_spill] sm:$0xff] %v9311_v57  ;;  %v11532_v6 = vand.u32 2147483647, %v9181_v15  ;;  %v9318_v25 = vmul.f32 %v9302_v12, %v2676_v38  ;;  %v2481_v4 = vpop.f32.mrf.mxu1  ;;  %v3340_v31 = vpop.xlane.xlu0 %3339  ;;  %v11534_v55 = vld [vmem:[#allocation11_spill] sm:$0xff] }
 0x2ff   : > { %v3525_v26 = vadd.f32 %v3524_v32, %v11530_v63  ;;  %v9322_v10 = vmul.f32 %v9022_v35, %v11534_v55  ;;  %v2682_v27 = vand.u32 2147483647, %v2481_v4  ;;  %v3613_v32 = vadd.f32 %v3612_v19, %v2679_v13  ;;  %v9324_v59 = vpop.f32.mrf.mxu0  ;;  %v11536_v63 = vld [vmem:[#allocation9_spill] sm:$0xff] }
 0x300   : > { %11529 = vst [vmem:[#allocation10_spill] sm:$0xff] %v9307_v61  ;;  %v3578_v30 = vadd.f32 %v3577_v36, %v11532_v6  ;;  %11533 = vst [vmem:[#allocation109_spill] sm:$0xff] %v9318_v25  ;;  %6564 = vrsqrt.f32 %v3340_v31  ;;  %v11537_v36 = vand.u32 2147483647, %v11536_v63  ;;  %v9336_v55 = vpop.f32.mrf.mxu1  ;;  %v9338_v4 = vpop.eup %6558  ;;  %v11541_v19 = vld [vmem:[#allocation13_spill] sm:$0xff] }
 0x301   : > { %11535 = vst [vmem:[#allocation11_spill] sm:$0xff] %v9324_v59  ;;  %v3526_v38 = vadd.f32 %v3525_v26, %v11539_v8  ;;  %v9342_v31 = vmul.f32 %v9075_v14, %v11541_v19  ;;  %v9346_v23 = vpop.f32.mrf.mxu0  ;;  %v11544_v8 = vand.u32 2147483647, %v9223_v5  ;;  %v11545_v26 = vand.u32 2147483647, %v9233_v40 }
 0x302   : > { %v9329_v6 = vmul.f32 %v9022_v35, %v11537_v36  ;;  %v3579_v25 = vadd.f32 %v3578_v30, %v11540_v28  ;;  %v2685_v35 = vand.u32 2147483647, %v9300_v50  ;;  %v3614_v36 = vadd.f32 %v3613_v32, %v2682_v27  ;;  %11543 = vst [vmem:[#allocation110_spill] sm:$0xff] %v9346_v23  ;;  %v2491_v19 = vpop.f32.mrf.mxu1 }
 0x303   : > { %11542 = vst [vmem:[#allocation13_spill] sm:$0xff] %v9342_v31  ;;  %v3527_v28 = vadd.f32 %v3526_v38, %v11544_v8  ;;  %v9354_v16 = vmul.f32 %v9338_v4, %v2679_v13  ;;  %v2688_v61 = vand.u32 2147483647, %v2491_v19  ;;  %v9357_v32 = vpop.f32.mrf.mxu0  ;;  %v11548_v38 = vand.u32 2147483647, %v8453_v34  ;;  %v11549_v8 = vld [vmem:[#allocation15_spill] sm:$0xff] }
 0x304   : > { %11538 = vst [vmem:[#allocation9_spill] sm:$0xff] %v9329_v6  ;;  %v3580_v30 = vadd.f32 %v3579_v25, %v11545_v26  ;;  %v3344_v6 = vpop.xlane.xlu1 %3343  ;;  %v3615_v50 = vadd.f32 %v3614_v36, %v2685_v35  ;;  %11547 = vst [vmem:[#allocation112_spill] sm:$0xff] %v9357_v32  ;;  %v9359_v31 = vpop.eup %6560  ;;  %v9368_v13 = vmul.f32 %v9065_v42, %v11549_v8  ;;  %v11550_v26 = vand.u32 2147483647, %v9244_v41 }
 0x305   : > { %11546 = vst [vmem:[#allocation111_spill] sm:$0xff] %v9354_v16  ;;  %6566 = vrsqrt.f32 %v3344_v6  ;;  %v9364_v25 = vmul.f32 %v9075_v14, %v11548_v38  ;;  %v9373_v36 = vpop.f32.mrf.mxu1  ;;  %v11551_v6 = vand.u32 2147483647, %v8473_v29  ;;  %v11552_v34 = vand.u32 2147483647, %v9257_v52  ;;  %v9386_v16 = vpop.f32.mrf.mxu0 }
 0x306   : > { %v3528_v15 = vadd.f32 %v3527_v28, %v11550_v26  ;;  %v9384_v8 = vmul.f32 %v9359_v31, %v2682_v27  ;;  %11554 = vst [vmem:[#allocation113_spill] sm:$0xff] %v9386_v16  ;;  %v11555_v28 = vand.u32 2147483647, %v9265_v11  ;;  %v2691_v29 = vand.u32 2147483647, %v9336_v55 }
 0x307   : > { %v9378_v63 = vmul.f32 %v9065_v42, %v11551_v6  ;;  %v3581_v14 = vadd.f32 %v3580_v30, %v11552_v34  ;;  %v3616_v41 = vadd.f32 %v3615_v50, %v2688_v61  ;;  %v9392_v42 = vpop.f32.mrf.mxu1  ;;  %v3348_v6 = vpop.xlane.xlu0 %3347  ;;  %v11556_v30 = vand.u32 2147483647, %v9280_v49 }
 0x308   : > { %11553 = vst [vmem:[#allocation15_spill] sm:$0xff] %v9384_v8  ;;  %v3529_v26 = vadd.f32 %v3528_v15, %v11555_v28  ;;  %6568 = vrsqrt.f32 %v3348_v6  ;;  %v9398_v8 = vpop.f32.mrf.mxu0  ;;  %v9400_v11 = vpop.eup %6562  ;;  %v11558_v15 = vld [vmem:[#allocation17_spill] sm:$0xff]  ;;  %v11559_v55 = vand.u32 2147483647, %v9290_v48  ;;  %v11563_v27 = vand.u32 2147483647, %v9311_v57 }
 0x309   : > { %v3582_v34 = vadd.f32 %v3581_v14, %v11556_v30  ;;  %11557 = vst [vmem:[#allocation114_spill] sm:$0xff] %v9398_v8  ;;  %v9404_v28 = vmul.f32 %v9105_v18, %v11558_v15  ;;  %v3617_v49 = vadd.f32 %v3616_v41, %v2691_v29  ;;  %v9409_v14 = vpop.f32.mrf.mxu1  ;;  %v11561_v30 = vand.u32 2147483647, %v8493_v37 }
 0x30a   : > { %v3530_v50 = vadd.f32 %v3529_v26, %v11559_v55  ;;  %11560 = vst [vmem:[#allocation17_spill] sm:$0xff] %v9409_v14  ;;  %v9417_v38 = vmul.f32 %v9400_v11, %v2685_v35  ;;  %v9422_v48 = vpop.f32.mrf.mxu0  ;;  %v11565_v26 = vand.u32 2147483647, %v9324_v59  ;;  %v11216_v55 = vand.u32 2147483647, %v9373_v36  ;;  %v3352_v35 = vpop.xlane.xlu1 %3351 }
 0x30b   : > { %v9414_v6 = vmul.f32 %v9105_v18, %v11561_v30  ;;  %v3583_v15 = vadd.f32 %v3582_v34, %v11563_v27  ;;  %11564 = vst [vmem:[#allocation116_spill] sm:$0xff] %v9422_v48  ;;  %v11566_v37 = vand.u32 2147483647, %v9392_v42  ;;  %v9430_v30 = vpop.f32.mrf.mxu1  ;;  %v11568_v27 = vand.u32 2147483647, %v9346_v23  ;;  %v11585_v23 = vld [vmem:[#allocation21_spill] sm:$0xff] }
 0x30c   : > { %11562 = vst [vmem:[#allocation115_spill] sm:$0xff] %v9417_v38  ;;  %v3531_v41 = vadd.f32 %v3530_v50, %v11565_v26  ;;  %v11567_v38 = vld [vmem:[#allocation22_spill] sm:$0xff]  ;;  %v11219_v59 = vand.u32 2147483647, %v9430_v30  ;;  %6570 = vrsqrt.f32 %v3352_v35  ;;  %v9439_v50 = vpop.f32.mrf.mxu0 }
 0x30d   : > { %v3618_v19 = vadd.f32 %v3617_v49, %v11566_v37  ;;  %v9434_v34 = vmul.f32 %v9096_v22, %v11567_v38  ;;  %v3584_v52 = vadd.f32 %v3583_v15, %v11568_v27  ;;  %11569 = vst [vmem:[#allocation22_spill] sm:$0xff] %v9439_v50  ;;  %v9441_v26 = vpop.eup %6564  ;;  %v11570_v49 = vand.u32 2147483647, %v9357_v32  ;;  %v9449_v40 = vpop.f32.mrf.mxu1 }
 0x30e   : > { %11571 = vst [vmem:[#allocation117_spill] sm:$0xff] %v9449_v40  ;;  %v11572_v15 = vand.u32 2147483647, %v8513_v47  ;;  %v9458_v27 = vmul.f32 %v9137_v0, %v8543_v3  ;;  %v3356_v32 = vpop.xlane.xlu0 %3355  ;;  %v11582_v47 = vand.u32 2147483647, %v9439_v50 }
 0x30f   : > { %v3532_v37 = vadd.f32 %v3531_v41, %v11570_v49  ;;  %v3619_v57 = vadd.f32 %v3618_v19, %v11216_v55  ;;  %v9461_v41 = vmul.f32 %v9441_v26, %v2688_v61  ;;  %v11574_v49 = vand.u32 2147483647, %v9386_v16  ;;  %v9465_v19 = vpop.f32.mrf.mxu0  ;;  %v9473_v3 = vpop.f32.mrf.mxu1 }
 0x310   : > { %v9454_v35 = vmul.f32 %v9096_v22, %v11572_v15  ;;  %11575 = vst [vmem:[#allocation119_spill] sm:$0xff] %v9465_v19  ;;  %v11576_v55 = vand.u32 2147483647, %v9398_v8  ;;  %11577 = vst [vmem:[#allocation120_spill] sm:$0xff] %v9473_v3  ;;  %v11578_v61 = vand.u32 2147483647, %v8533_v9  ;;  %6572 = vrsqrt.f32 %v3356_v32 }
 0x311   : > { %11573 = vst [vmem:[#allocation118_spill] sm:$0xff] %v9461_v41  ;;  %v3585_v18 = vadd.f32 %v3584_v52, %v11574_v49  ;;  %v3620_v22 = vadd.f32 %v3619_v57, %v11219_v59  ;;  %v11579_v52 = vld [vmem:[#allocation34_spill] sm:$0xff]  ;;  %v11581_v59 = vand.u32 2147483647, %v9422_v48  ;;  %v11587_v41 = vld [vmem:[#allocation35_spill] sm:$0xff] }
 0x312   : > { %v3533_v38 = vadd.f32 %v3532_v37, %v11576_v55  ;;  %v9478_v16 = vmul.f32 %v9137_v0, %v11578_v61  ;;  %v9482_v49 = vmul.f32 %v9132_v62, %v11579_v52  ;;  %v9485_v37 = vpop.f32.mrf.mxu0  ;;  %v9487_v57 = vpop.eup %6566  ;;  %v11583_v0 = vand.u32 2147483647, %v9409_v14 }
 0x313   : > { %11580 = vst [vmem:[#allocation34_spill] sm:$0xff] %v9485_v37  ;;  %v3586_v15 = vadd.f32 %v3585_v18, %v11581_v59  ;;  %v11225_v8 = vand.u32 2147483647, %v9485_v37  ;;  %v9496_v52 = vpop.f32.mrf.mxu1  ;;  %v11586_v55 = vand.u32 2147483647, %v11585_v23  ;;  %v9505_v5 = vmul.f32 %v9164_v54, %v11587_v41  ;;  %v11594_v18 = vld [vmem:[#allocation37_spill] sm:$0xff] }
 0x314   : > { %v3534_v9 = vadd.f32 %v3533_v38, %v11582_v47  ;;  %v3621_v61 = vadd.f32 %v3620_v22, %v11583_v0  ;;  %11584 = vst [vmem:[#allocation121_spill] sm:$0xff] %v9496_v52  ;;  %v9508_v59 = vmul.f32 %v9487_v57, %v2691_v29  ;;  %v9511_v38 = vpop.f32.mrf.mxu0  ;;  %v11590_v47 = vand.u32 2147483647, %v9465_v19  ;;  %v11600_v19 = vld [vmem:[#allocation39_spill] sm:$0xff] }
 0x315   : > { %v9501_v32 = vmul.f32 %v9132_v62, %v11586_v55  ;;  %11589 = vst [vmem:[#allocation35_spill] sm:$0xff] %v9511_v38  ;;  %v11591_v0 = vand.u32 2147483647, %v9473_v3  ;;  %v11228_v55 = vand.u32 2147483647, %v9511_v38  ;;  %v9520_v41 = vpop.f32.mrf.mxu1  ;;  %v9529_v48 = vmul.f32 %v9155_v24, %v11594_v18  ;;  %v3360_v38 = vpop.xlane.xlu1 %3359 }
 0x316   : > { %11588 = vst [vmem:[#allocation21_spill] sm:$0xff] %v9508_v59  ;;  %v3587_v22 = vadd.f32 %v3586_v15, %v11590_v47  ;;  %v3535_v62 = vadd.f32 %v3534_v9, %v11225_v8  ;;  %11592 = vst [vmem:[#allocation122_spill] sm:$0xff] %v9520_v41  ;;  %v11593_v29 = vand.u32 2147483647, %v8567_v60  ;;  %v11595_v15 = vand.u32 2147483647, %v8583_v46  ;;  %v9537_v47 = vpop.eup %6568 }
 0x317   : > { %v3622_v23 = vadd.f32 %v3621_v61, %v11591_v0  ;;  %v9541_v0 = vmul.f32 %v9199_v39, %v8609_v45  ;;  %v11596_v18 = vand.u32 2147483647, %v9449_v40  ;;  %v6397_v8 = vpop.f32.mrf.mxu1  ;;  %v11597_v46 = vld [vmem:[#allocation23_spill] sm:$0xff]  ;;  %v11601_v45 = vand.u32 2147483647, %v11600_v19  ;;  %v11605_v40 = vld [vmem:[#allocation42_spill] sm:$0xff] }
 0x318   : > { %v9525_v50 = vmul.f32 %v9164_v54, %v11593_v29  ;;  %v9534_v61 = vmul.f32 %v9155_v24, %v11595_v15  ;;  %v3536_v60 = vrot.slane %v3535_v62, 4  ;;  %v3588_v54 = vadd.f32 %v3587_v22, %v11228_v55  ;;  %v11599_v15 = vld [vmem:[#allocation41_spill] sm:$0xff] }
 0x319   : > { %v3623_v29 = vadd.f32 %v3622_v23, %v11596_v18  ;;  %v11598_v37 = vand.u32 2147483647, %v11597_v46  ;;  %v9554_v9 = vmul.f32 %v9183_v33, %v11599_v15  ;;  %v9559_v59 = vmul.f32 %v9183_v33, %v11601_v45  ;;  %v2541_v15 = vpop.f32.mrf.mxu1  ;;  %v11607_v18 = vld [vmem:[#allocation44_spill] sm:$0xff] }
 0x31a   : > { %v11602_v22 = vand.u32 2147483647, %v9392_v42  ;;  %v3537_v23 = vadd.f32 %v3536_v60, %v3535_v62  ;;  %v3589_v46 = vrot.slane %v3588_v54, 4  ;;  %v9571_v19 = vmul.f32 %v9225_v20, %v11605_v40  ;;  %v3364_v62 = vpop.xlane.xlu0 %3363  ;;  %v9578_v60 = vpop.eup %6570 }
 0x31b   : > { %v9550_v24 = vmul.f32 %v9199_v39, %v11598_v37  ;;  %v11604_v39 = vand.u32 2147483647, %v9520_v41  ;;  %v11606_v33 = vand.u32 2147483647, %v8631_v58  ;;  %v2721_v45 = vand.u32 2147483647, %v6397_v8  ;;  %v6400_v3 = vpop.f32.mrf.mxu1 }
 0x31c   : > { %v9564_v55 = vmul.f32 %v9537_v47, %v11602_v22  ;;  %v2718_v22 = vand.u32 2147483647, %v2541_v15  ;;  %v11608_v41 = vand.u32 2147483647, %v9496_v52  ;;  %v11609_v58 = vand.u32 2147483647, %v8647_v44 }
 0x31d   : > { %v3624_v37 = vadd.f32 %v3623_v29, %v11604_v39  ;;  %v9576_v42 = vmul.f32 %v9225_v20, %v11606_v33  ;;  %v3538_v29 = vrot.slane %v3537_v23, 2  ;;  %v3590_v39 = vadd.f32 %v3589_v46, %v3588_v54  ;;  %v2551_v44 = vpop.f32.mrf.mxu1 }
 0x31e   : > { %11603 = vst [vmem:[#allocation37_spill] sm:$0xff] %v9564_v55  ;;  %v9582_v55 = vmul.f32 %v9214_v17, %v11607_v18  ;;  %v9589_v20 = vmul.f32 %v9214_v17, %v11609_v58  ;;  %v11610_v8 = vand.u32 2147483647, %v9373_v36  ;;  %6574 = vrsqrt.f32 %v3360_v38  ;;  %v11614_v36 = vld [vmem:[#allocation28_spill] sm:$0xff] }
 0x31f   : > { %v3625_v40 = vadd.f32 %v3624_v37, %v11608_v41  ;;  %v9599_v18 = vsel %vm2915_vm13, 1.0, %v2718_v22  ;;  %v3539_v54 = vadd.f32 %v3538_v29, %v3537_v23  ;;  %v3591_v46 = vrot.slane %v3590_v39, 2  ;;  %v3368_v37 = vpop.xlane.xlu1 %3367  ;;  %v9611_v22 = vpop.eup %6572 }
 0x320   : > { %v9594_v15 = vmul.f32 %v9578_v60, %v11610_v8  ;;  %11613 = vst [vmem:[#allocation41_spill] sm:$0xff] %v9599_v18  ;;  %6576 = vrsqrt.f32 %v3364_v62  ;;  %v9604_v17 = vmul.f32 %v9246_v43, %v8673_v56  ;;  %vm11615_vm5 = vcmp.eq.s32.totalorder %v11614_v36, %v8689_v7  ;;  %v6403_v62 = vpop.f32.mrf.mxu1 }
 0x321   : > { %v3626_v41 = vadd.f32 %v3625_v40, %v9599_v18  ;;  %v9609_v38 = vsel %vm11615_vm5, 1.0, %v2721_v45  ;;  %v2727_v58 = vand.u32 2147483647, %v6400_v3  ;;  %v2724_v8 = vand.u32 2147483647, %v2551_v44  ;;  %v11621_v44 = vld [vmem:[#allocation27_spill] sm:$0xff] }
 0x322   : > { %11611 = vst [vmem:[#allocation23_spill] sm:$0xff] %v9594_v15  ;;  %11616 = vst [vmem:[#allocation39_spill] sm:$0xff] %v9609_v38  ;;  %v3540_v23 = vrot.slane %v3539_v54, 1  ;;  %v3592_v29 = vadd.f32 %v3591_v46, %v3590_v39  ;;  %6578 = vrsqrt.f32 %v3368_v37  ;;  %v11617_v33 = vand.u32 2147483647, %v8663_v53  ;;  %v11618_v15 = vld [vmem:[#allocation67_spill] sm:$0xff] }
 0x323   : > { %v3627_v40 = vadd.f32 %v3626_v41, %v9609_v38  ;;  %v9621_v36 = vmul.f32 %v9235_v21, %v11618_v15  ;;  %v11619_v3 = vand.u32 2147483647, %v9430_v30  ;;  %vm11622_vm6 = vcmp.eq.s32.totalorder %v11621_v44, %v8689_v7  ;;  %v11624_v46 = vld [vmem:[#allocation45_spill] sm:$0xff]  ;;  %v3372_v38 = vpop.xlane.xlu0 %3371  ;;  %v11626_v30 = vld [vmem:[#allocation51_spill] sm:$0xff] }
 0x324   : > { %v9617_v56 = vmul.f32 %v9246_v43, %v11617_v33  ;;  %v9631_v39 = vsel %vm11622_vm6, 1.0, %v2724_v8  ;;  %v11625_v41 = vand.u32 2147483647, %v11624_v46  ;;  %v3541_v43 = vadd.f32 %v3540_v23, %v3539_v54  ;;  %v2561_v33 = vpop.f32.mrf.mxu1  ;;  %v11629_v8 = vld [vmem:[#allocation47_spill] sm:$0xff] }
 0x325   : > { %v9626_v45 = vmul.f32 %v9611_v22, %v11619_v3  ;;  %11623 = vst [vmem:[#allocation44_spill] sm:$0xff] %v9631_v39  ;;  %v3593_v37 = vrot.slane %v3592_v29, 1  ;;  %v3628_v15 = vadd.f32 %v3627_v40, %v9631_v39  ;;  %vm11627_vm7 = vcmp.eq.s32.totalorder %v11626_v30, %v8689_v7  ;;  %v11631_v40 = vld [vmem:[#allocation49_spill] sm:$0xff]  ;;  %v11632_v30 = vld [vmem:[#allocation48_spill] sm:$0xff] }
 0x326   : > { %v9636_v53 = vmul.f32 %v9235_v21, %v11625_v41  ;;  %v9642_v3 = vsel %vm11627_vm7, 1.0, %v2727_v58  ;;  %v2730_v44 = vand.u32 2147483647, %v2561_v33  ;;  %6580 = vrsqrt.f32 %v3372_v38  ;;  %v6406_v23 = vpop.f32.mrf.mxu1  ;;  %v11634_v38 = vld [vmem:[#allocation7_spill] sm:$0xff] }
 0x327   : > { %11620 = vst [vmem:[#allocation42_spill] sm:$0xff] %v9626_v45  ;;  %11628 = vst [vmem:[#allocation46_spill] sm:$0xff] %v9642_v3  ;;  %v2733_v45 = vand.u32 2147483647, %v6403_v62  ;;  %v11630_v18 = vand.u32 2147483647, %v11629_v8  ;;  %6582 = vrsqrt.f32 %v3541_v43  ;;  %v3594_v21 = vadd.f32 %v3593_v37, %v3592_v29 }
 0x328   : > { %v3629_v54 = vadd.f32 %v3628_v15, %v9642_v3  ;;  %v9652_v41 = vmul.f32 %v9267_v2, %v11631_v40  ;;  %v11633_v58 = vand.u32 2147483647, %v11632_v30  ;;  %v9661_v33 = vmul.f32 %v9272_v1, %v11634_v38  ;;  %v11639_v43 = vld [vmem:[#allocation50_spill] sm:$0xff]  ;;  %v11643_v40 = vld [vmem:[#allocation52_spill] sm:$0xff]  ;;  %v2571_v38 = vpop.f32.mrf.mxu1 }
 0x329   : > { %v9647_v46 = vmul.f32 %v9267_v2, %v11630_v18  ;;  %v11636_v18 = vld [vmem:[#allocation30_spill] sm:$0xff]  ;;  %v11640_v37 = vand.u32 2147483647, %v11639_v43  ;;  %v11641_v2 = vld [vmem:[#allocation5_spill] sm:$0xff]  ;;  %v11644_v30 = vand.u32 2147483647, %v11643_v40  ;;  %6584 = vrsqrt.f32 %v3594_v21 }
 0x32a   : > { %v9657_v62 = vmul.f32 %v9272_v1, %v11633_v58  ;;  %11635 = vst [vmem:[#allocation28_spill] sm:$0xff] %v9661_v33  ;;  %vm11637_vm0 = vcmp.eq.s32.totalorder %v11636_v18, %v8689_v7  ;;  %v9675_v8 = vmul.f32 %v9302_v12, %v11641_v2  ;;  %v11645_v18 = vld [vmem:[#allocation54_spill] sm:$0xff]  ;;  %v11647_v43 = vld [vmem:[#allocation55_spill] sm:$0xff]  ;;  %v2739_v3 = vand.u32 2147483647, %v6406_v23  ;;  %v11650_v2 = vld [vmem:[#allocation53_spill] sm:$0xff] }
 0x32b   : > { %v9666_v29 = vsel %vm11637_vm0, 1.0, %v2730_v44  ;;  %v9671_v15 = vmul.f32 %v9302_v12, %v11640_v37  ;;  %v9680_v58 = vmul.f32 %v9338_v4, %v11644_v30  ;;  %v9685_v44 = vmul.f32 %v9338_v4, %v11645_v18  ;;  %v11652_v30 = vld [vmem:[#allocation6_spill] sm:$0xff]  ;;  %v6409_v18 = vpop.f32.mrf.mxu1  ;;  %v11656_v23 = vld [vmem:[#allocation16_spill] sm:$0xff] }
 0x32c   : > { %11638 = vst [vmem:[#allocation67_spill] sm:$0xff] %v9666_v29  ;;  %11642 = vst [vmem:[#allocation27_spill] sm:$0xff] %v9675_v8  ;;  %v3630_v1 = vadd.f32 %v3629_v54, %v9666_v29  ;;  %vm11648_vm8 = vcmp.eq.s32.totalorder %v11647_v43, %v8689_v7  ;;  %v2736_v12 = vand.u32 2147483647, %v2571_v38  ;;  %v11651_v39 = vand.u32 2147483647, %v11650_v2 }
 0x32d   : > { %11646 = vst [vmem:[#allocation45_spill] sm:$0xff] %v9685_v44  ;;  %v9690_v37 = vsel %vm11648_vm8, 1.0, %v2733_v45  ;;  %v9699_v54 = vmul.f32 %v9359_v31, %v11652_v30  ;;  %v11654_v29 = vld [vmem:[#allocation56_spill] sm:$0xff]  ;;  %v9709_v38 = vmul.f32 %v9400_v11, %v11656_v23  ;;  %v11658_v43 = vld [vmem:[#allocation57_spill] sm:$0xff]  ;;  %v9721_v30 = vpop.eup %6574 }
 0x32e   : > { %11649 = vst [vmem:[#allocation51_spill] sm:$0xff] %v9690_v37  ;;  %v9695_v40 = vmul.f32 %v9359_v31, %v11651_v39  ;;  %v3631_v4 = vadd.f32 %v3630_v1, %v9690_v37  ;;  %v11655_v52 = vand.u32 2147483647, %v11654_v29  ;;  %v11659_v39 = vand.u32 2147483647, %v11658_v43  ;;  %v11660_v31 = vld [vmem:[#allocation29_spill] sm:$0xff]  ;;  %v3376_v1 = vpop.xlane.xlu1 %3375  ;;  %v9737_v14 = vpop.eup %6576 }
 0x32f   : > { %11653 = vst [vmem:[#allocation47_spill] sm:$0xff] %v9699_v54  ;;  %11657 = vst [vmem:[#allocation49_spill] sm:$0xff] %v9709_v38  ;;  %vm11661_vm9 = vcmp.eq.s32.totalorder %v11660_v31, %v8689_v7  ;;  %v11664_v29 = vld [vmem:[#allocation20_spill] sm:$0xff]  ;;  %v11666_v37 = vld [vmem:[#allocation59_spill] sm:$0xff]  ;;  %6586 = vrsqrt.f32 %v3376_v1 }
 0x330   : > { %v9705_v45 = vmul.f32 %v9400_v11, %v11655_v52  ;;  %v9714_v2 = vmul.f32 %v9441_v26, %v11659_v39  ;;  %v9719_v21 = vsel %vm11661_vm9, 1.0, %v2736_v12  ;;  %11663 = vst [vmem:[#allocation7_spill] sm:$0xff] %v9721_v30  ;;  %v9725_v52 = vmul.f32 %v9441_v26, %v11664_v29  ;;  %v11668_v43 = vld [vmem:[#allocation19_spill] sm:$0xff]  ;;  %v2581_v12 = vpop.f32.mrf.mxu1  ;;  %11670 = vst [vmem:[#allocation5_spill] sm:$0xff] %v9737_v14  ;;  %v11671_v38 = vld [vmem:[#allocation60_spill] sm:$0xff] }
 0x331   : > { %11662 = vst [vmem:[#allocation48_spill] sm:$0xff] %v9719_v21  ;;  %v11667_v11 = vand.u32 2147483647, %v11666_v37  ;;  %v9734_v39 = vmul.f32 %v9487_v57, %v11668_v43  ;;  %v3632_v31 = vadd.f32 %v3631_v4, %v9719_v21  ;;  %v11672_v54 = vand.u32 2147483647, %v11671_v38  ;;  %v11673_v26 = vld [vmem:[#allocation58_spill] sm:$0xff] }
 0x332   : > { %11665 = vst [vmem:[#allocation30_spill] sm:$0xff] %v9725_v52  ;;  %vm11674_vm10 = vcmp.eq.s32.totalorder %v11673_v26, %v8689_v7  ;;  %v2745_v29 = vand.u32 2147483647, %v6409_v18  ;;  %v11676_v52 = vld [vmem:[#allocation33_spill] sm:$0xff]  ;;  %v11678_v4 = vld [vmem:[#allocation62_spill] sm:$0xff]  ;;  %v11680_v38 = vld [vmem:[#allocation24_spill] sm:$0xff]  ;;  %v9765_v18 = vpop.eup %6578 }
 0x333   : > { %v9730_v23 = vmul.f32 %v9487_v57, %v11667_v11  ;;  %11669 = vst [vmem:[#allocation50_spill] sm:$0xff] %v9734_v39  ;;  %v9742_v44 = vmul.f32 %v9537_v47, %v11672_v54  ;;  %v9747_v37 = vsel %vm11674_vm10, 1.0, %v2739_v3  ;;  %v2742_v11 = vand.u32 2147483647, %v2581_v12  ;;  %v3380_v39 = vpop.xlane.xlu0 %3379  ;;  %v9763_v3 = vpop.f32.mrf.mxu1  ;;  %v11682_v12 = vld [vmem:[#allocation63_spill] sm:$0xff] }
 0x334   : > { %11675 = vst [vmem:[#allocation52_spill] sm:$0xff] %v9747_v37  ;;  %v9751_v57 = vmul.f32 %v9537_v47, %v11676_v52  ;;  %v11679_v43 = vand.u32 2147483647, %v11678_v4  ;;  %v9760_v54 = vmul.f32 %v9578_v60, %v11680_v38  ;;  %v3633_v26 = vadd.f32 %v3632_v31, %v9747_v37  ;;  %v11684_v52 = vld [vmem:[#allocation36_spill] sm:$0xff]  ;;  %v3384_v37 = vpop.xlane.xlu1 %3383 }
 0x335   : > { %v11683_v8 = vand.u32 2147483647, %v11682_v12  ;;  %v9774_v4 = vmul.f32 %v9611_v22, %v11684_v52  ;;  %v11688_v38 = vld [vmem:[#allocation32_spill] sm:$0xff]  ;;  %6588 = vrsqrt.f32 %v3380_v39 }
 0x336   : > { %11677 = vst [vmem:[#allocation54_spill] sm:$0xff] %v9751_v57  ;;  %v9756_v21 = vmul.f32 %v9578_v60, %v11679_v43  ;;  %11681 = vst [vmem:[#allocation55_spill] sm:$0xff] %v9760_v54  ;;  %v11685_v43 = vld [vmem:[#allocation65_spill] sm:$0xff]  ;;  %vm11689_vm12 = vcmp.eq.s32.totalorder %v11688_v38, %v8689_v7  ;;  %v11691_v54 = vld [vmem:[#allocation38_spill] sm:$0xff]  ;;  %6590 = vrsqrt.f32 %v3384_v37 }
 0x337   : > { %v9770_v47 = vmul.f32 %v9611_v22, %v11683_v8  ;;  %v11686_v57 = vand.u32 2147483647, %v11685_v43  ;;  %v9784_v31 = vsel %vm11689_vm12, 1.0, %v2742_v11  ;;  %v9788_v12 = vmul.f32 %v9721_v30, %v11691_v54  ;;  %v11692_v8 = vld [vmem:[#allocation68_spill] sm:$0xff]  ;;  %v11695_v11 = vld [vmem:[#allocation61_spill] sm:$0xff] }
 0x338   : > { %11690 = vst [vmem:[#allocation6_spill] sm:$0xff] %v9784_v31  ;;  %v11693_v33 = vand.u32 2147483647, %v11692_v8  ;;  %v3634_v52 = vadd.f32 %v3633_v26, %v9784_v31  ;;  %v11694_v43 = vld [vmem:[#allocation40_spill] sm:$0xff]  ;;  %vm11696_vm13 = vcmp.eq.s32.totalorder %v11695_v11, %v8689_v7  ;;  %v11697_v8 = vld [vmem:[#allocation3_spill] sm:$0xff]  ;;  %v11700_v26 = vld [vmem:[#allocation26_spill] sm:$0xff] }
 0x339   : > { %v9779_v60 = vmul.f32 %v9721_v30, %v11686_v57  ;;  %v2591_v57 = vpop.f32.mrf.mxu1  ;;  %v9803_v38 = vsel %vm11696_vm13, 1.0, %v2745_v29  ;;  %v9805_v30 = vpop.eup %6580  ;;  %v9814_v31 = vmul.f32 %v9765_v18, %v11700_v26  ;;  %v11701_v29 = vld [vmem:[#allocation71_spill] sm:$0xff] }
 0x33a   : > { %v9793_v22 = vmul.f32 %v9737_v14, %v11693_v33  ;;  %v2748_v54 = vand.u32 2147483647, %v2591_v57  ;;  %v11698_v33 = vand.u32 2147483647, %v11697_v8  ;;  %v11702_v11 = vand.u32 2147483647, %v11701_v29 }
 0x33b   : > { %11687 = vst [vmem:[#allocation53_spill] sm:$0xff] %v9779_v60  ;;  %v9798_v60 = vmul.f32 %v9737_v14, %v11694_v43  ;;  %v9817_v14 = vpop.eup %6582  ;;  %v11703_v57 = vld [vmem:[#allocation43_spill] sm:$0xff]  ;;  %v9834_v26 = vadd.f32 %v3634_v52, %v9803_v38 }
 0x33c   : > { %v9810_v1 = vmul.f32 %v9765_v18, %v11698_v33  ;;  %v9822_v39 = vmul.f32 %v9805_v30, %v11702_v11  ;;  %v9826_v8 = vmul.f32 %v9805_v30, %v11703_v57  ;;  %v3795_v37 = vmul.f32 %v9817_v14, %v9294_v51  ;;  %v11705_v11 = vld [vmem:[#allocation13_spill] sm:$0xff] }
 0x33d   : > { %v3798_v29 = vmul.f32 %v9817_v14, %v9322_v10  ;;  %v3801_v43 = vmul.f32 %v9817_v14, %v11705_v11  ;;  %v3804_v57 = vmul.f32 %v9817_v14, %v9368_v13  ;;  %v3807_v33 = vmul.f32 %v9817_v14, %v9404_v28 }
 0x33e   : > { %11699 = vst [vmem:[#allocation56_spill] sm:$0xff] %v9810_v1  ;;  %v9831_v1 = vsel %vm2945_vm15, 1.0, %v2748_v54  ;;  %v3810_v54 = vmul.f32 %v9817_v14, %v9434_v34  ;;  %v3813_v52 = vmul.f32 %v9817_v14, %v9458_v27  ;;  %v3816_v51 = vmul.f32 %v9817_v14, %v9482_v49  ;;  %3939 = vst [vmem:[#allocation2] sm:$0xff] %v3795_v37  ;;  %v9860_v34 = vpop.eup %6584 }
 0x33f   : > { %v3819_v10 = vmul.f32 %v9817_v14, %v9505_v5  ;;  %v3822_v11 = vmul.f32 %v9817_v14, %v9529_v48  ;;  %v3825_v13 = vmul.f32 %v9817_v14, %v9541_v0  ;;  %v3828_v28 = vmul.f32 %v9817_v14, %v9554_v9  ;;  %3942 = vst [vmem:[#allocation2 + $0x18] sm:$0xff] %v3798_v29 }
 0x340   : > { %3945 = vst [vmem:[#allocation2 + $0x30] sm:$0xff] %v3801_v43  ;;  %3948 = vst [vmem:[#allocation2 + $0x48] sm:$0xff] %v3804_v57  ;;  %v3831_v27 = vmul.f32 %v9817_v14, %v9571_v19  ;;  %v3834_v5 = vmul.f32 %v9817_v14, %v9582_v55  ;;  %v3837_v48 = vmul.f32 %v9817_v14, %v9604_v17 }
 0x341   : > { %v3840_v49 = vmul.f32 %v9817_v14, %v9621_v36  ;;  %3951 = vst [vmem:[#allocation2 + $0x60] sm:$0xff] %v3807_v33  ;;  %3954 = vst [vmem:[#allocation2 + $0x78] sm:$0xff] %v3810_v54  ;;  %v3843_v9 = vmul.f32 %v9817_v14, %v9647_v46  ;;  %v3846_v0 = vmul.f32 %v9817_v14, %v9657_v62 }
 0x342   : > { %3957 = vst [vmem:[#allocation2 + $0x90] sm:$0xff] %v3813_v52  ;;  %3960 = vst [vmem:[#allocation2 + $0xa8] sm:$0xff] %v3816_v51  ;;  %v3849_v19 = vmul.f32 %v9817_v14, %v9671_v15  ;;  %v3852_v55 = vmul.f32 %v9817_v14, %v9680_v58  ;;  %v3855_v17 = vmul.f32 %v9817_v14, %v9695_v40  ;;  %v11708_v51 = vld [vmem:[#allocation28_spill] sm:$0xff] }
 0x343   : > { %3963 = vst [vmem:[#allocation2 + $0xc0] sm:$0xff] %v3819_v10  ;;  %3966 = vst [vmem:[#allocation2 + $0xd8] sm:$0xff] %v3822_v11  ;;  %v3858_v36 = vmul.f32 %v9817_v14, %v9705_v45  ;;  %v3861_v46 = vmul.f32 %v9817_v14, %v9714_v2  ;;  %v3864_v62 = vmul.f32 %v9817_v14, %v9730_v23  ;;  %v11706_v45 = vld [vmem:[#allocation10_spill] sm:$0xff]  ;;  %v9894_v23 = vpop.f32.mrf.mxu1  ;;  %v11709_v10 = vld [vmem:[#allocation27_spill] sm:$0xff] }
 0x344   : > { %3969 = vst [vmem:[#allocation2 + $0xf0] sm:$0xff] %v3825_v13  ;;  %3972 = vst [vmem:[#allocation2 + $0x108] sm:$0xff] %v3828_v28  ;;  %v3867_v15 = vmul.f32 %v9817_v14, %v9742_v44  ;;  %v3870_v58 = vmul.f32 %v9817_v14, %v9756_v21  ;;  %v3873_v40 = vmul.f32 %v9817_v14, %v9770_v47  ;;  %v11707_v44 = vld [vmem:[#allocation9_spill] sm:$0xff]  ;;  %v11711_v13 = vld [vmem:[#allocation47_spill] sm:$0xff]  ;;  %v3388_v28 = vpop.xlane.xlu0 %3387 }
 0x345   : > { %3975 = vst [vmem:[#allocation2 + $0x120] sm:$0xff] %v3831_v27  ;;  %3978 = vst [vmem:[#allocation2 + $0x138] sm:$0xff] %v3834_v5  ;;  %v3796_v2 = vmul.f32 %v9860_v34, %v11706_v45  ;;  %v3799_v43 = vmul.f32 %v9860_v34, %v11707_v44  ;;  %v3802_v21 = vmul.f32 %v9860_v34, %v9364_v25  ;;  %v11710_v11 = vld [vmem:[#allocation45_spill] sm:$0xff]  ;;  %6592 = vrsqrt.f32 %v3388_v28 }
 0x346   : > { %3981 = vst [vmem:[#allocation2 + $0x150] sm:$0xff] %v3837_v48  ;;  %3984 = vst [vmem:[#allocation2 + $0x168] sm:$0xff] %v3840_v49  ;;  %v3805_v47 = vmul.f32 %v9860_v34, %v9378_v63  ;;  %v3808_v37 = vmul.f32 %v9860_v34, %v9414_v6  ;;  %v3811_v29 = vmul.f32 %v9860_v34, %v9454_v35  ;;  %v9912_v63 = vpop.eup %6586  ;;  %v11712_v27 = vld [vmem:[#allocation49_spill] sm:$0xff]  ;;  %v11713_v48 = vld [vmem:[#allocation30_spill] sm:$0xff] }
 0x347   : > { %3987 = vst [vmem:[#allocation2 + $0x180] sm:$0xff] %v3843_v9  ;;  %3990 = vst [vmem:[#allocation2 + $0x198] sm:$0xff] %v3846_v0  ;;  %v3814_v57 = vmul.f32 %v9860_v34, %v9478_v16  ;;  %v3817_v33 = vmul.f32 %v9860_v34, %v9501_v32  ;;  %v3820_v25 = vmul.f32 %v9860_v34, %v9525_v50  ;;  %v9922_v50 = vpop.eup %6588  ;;  %v11714_v9 = vld [vmem:[#allocation50_spill] sm:$0xff] }
 0x348   : > { %3993 = vst [vmem:[#allocation2 + $0x1b0] sm:$0xff] %v3849_v19  ;;  %3996 = vst [vmem:[#allocation2 + $0x1c8] sm:$0xff] %v3852_v55  ;;  %v3823_v6 = vmul.f32 %v9860_v34, %v9534_v61  ;;  %v3826_v54 = vmul.f32 %v9860_v34, %v9550_v24  ;;  %v3829_v35 = vmul.f32 %v9860_v34, %v9559_v59  ;;  %v9934_v52 = vpop.eup %6590  ;;  %v11715_v19 = vld [vmem:[#allocation54_spill] sm:$0xff] }
 0x349   : > { %3999 = vst [vmem:[#allocation2 + $0x1e0] sm:$0xff] %v3855_v17  ;;  %4002 = vst [vmem:[#allocation2 + $0x1f8] sm:$0xff] %v3858_v36  ;;  %v3832_v16 = vmul.f32 %v9860_v34, %v9576_v42  ;;  %v3835_v32 = vmul.f32 %v9860_v34, %v9589_v20  ;;  %v3838_v61 = vmul.f32 %v9860_v34, %v9617_v56  ;;  %v9932_v42 = vpop.f32.mrf.mxu1  ;;  %v11716_v17 = vld [vmem:[#allocation55_spill] sm:$0xff] }
 0x34a   : > { %4005 = vst [vmem:[#allocation2 + $0x210] sm:$0xff] %v3861_v46  ;;  %4008 = vst [vmem:[#allocation2 + $0x228] sm:$0xff] %v3864_v62  ;;  %v3841_v24 = vmul.f32 %v9860_v34, %v9636_v53  ;;  %v3844_v59 = vmul.f32 %v9860_v34, %v9652_v41  ;;  %v3847_v20 = vmul.f32 %v9860_v34, %v11708_v51  ;;  %v11717_v62 = vld [vmem:[#allocation53_spill] sm:$0xff] }
 0x34b   : > { %4011 = vst [vmem:[#allocation2 + $0x240] sm:$0xff] %v3867_v15  ;;  %4014 = vst [vmem:[#allocation2 + $0x258] sm:$0xff] %v3870_v58  ;;  %v3850_v56 = vmul.f32 %v9860_v34, %v11709_v10  ;;  %v3853_v53 = vmul.f32 %v9860_v34, %v11710_v11  ;;  %v3856_v41 = vmul.f32 %v9860_v34, %v11711_v13 }
 0x34c   : > { %4017 = vst [vmem:[#allocation2 + $0x270] sm:$0xff] %v3873_v40  ;;  %3940 = vst [vmem:[#allocation2 + $0x8] sm:$0xff] %v3796_v2  ;;  %v3859_v5 = vmul.f32 %v9860_v34, %v11712_v27  ;;  %v3862_v49 = vmul.f32 %v9860_v34, %v11713_v48  ;;  %v3865_v0 = vmul.f32 %v9860_v34, %v11714_v9  ;;  %v3392_v40 = vpop.xlane.xlu1 %3391  ;;  %v11718_v2 = vld [vmem:[#allocation56_spill] sm:$0xff] }
 0x34d   : > { %3943 = vst [vmem:[#allocation2 + $0x20] sm:$0xff] %v3799_v43  ;;  %3946 = vst [vmem:[#allocation2 + $0x38] sm:$0xff] %v3802_v21  ;;  %v3868_v55 = vmul.f32 %v9860_v34, %v11715_v19  ;;  %v3871_v36 = vmul.f32 %v9860_v34, %v11716_v17  ;;  %v3874_v46 = vmul.f32 %v9860_v34, %v9774_v4  ;;  %v6418_v21 = vpop.f32.mrf.mxu1  ;;  %v11731_v27 = vld [vmem:[#allocation64_spill] sm:$0xff]  ;;  %6594 = vrsqrt.f32 %v3392_v40 }
 0x34e   : > { %3949 = vst [vmem:[#allocation2 + $0x50] sm:$0xff] %v3805_v47  ;;  %3952 = vst [vmem:[#allocation2 + $0x68] sm:$0xff] %v3808_v37  ;;  %v3876_v15 = vmul.f32 %v9817_v14, %v11717_v62  ;;  %v3877_v58 = vmul.f32 %v9860_v34, %v9788_v12  ;;  %v3879_v45 = vmul.f32 %v9817_v14, %v9793_v22  ;;  %v11719_v47 = vld [vmem:[#allocation12_spill] sm:$0xff]  ;;  %v2763_v62 = vand.u32 2147483647, %v6418_v21 }
 0x34f   : > { %3955 = vst [vmem:[#allocation2 + $0x80] sm:$0xff] %v3811_v29  ;;  %3958 = vst [vmem:[#allocation2 + $0x98] sm:$0xff] %v3814_v57  ;;  %v3880_v4 = vmul.f32 %v9860_v34, %v9798_v60  ;;  %v3882_v44 = vmul.f32 %v9817_v14, %v11718_v2  ;;  %v3883_v43 = vmul.f32 %v9860_v34, %v9814_v31  ;;  %v11720_v37 = vand.u32 2147483647, %v11719_v47  ;;  %v11721_v29 = vld [vmem:[#allocation25_spill] sm:$0xff]  ;;  %v11722_v31 = vld [vmem:[#allocation14_spill] sm:$0xff]  ;;  %v2611_v13 = vpop.f32.mrf.mxu1 }
 0x350   : > { %3961 = vst [vmem:[#allocation2 + $0xb0] sm:$0xff] %v3817_v33  ;;  %3964 = vst [vmem:[#allocation2 + $0xc8] sm:$0xff] %v3820_v25  ;;  %v3885_v12 = vmul.f32 %v9817_v14, %v9822_v39  ;;  %v3886_v22 = vmul.f32 %v9860_v34, %v9826_v8  ;;  %v3745_v57 = vmul.f32 %v9912_v63, %v11721_v29  ;;  %v3396_v33 = vpop.xlane.xlu0 %3395  ;;  %v11723_v25 = vand.u32 2147483647, %v11722_v31  ;;  %v11724_v39 = vld [vmem:[#allocation18_spill] sm:$0xff]  ;;  %v3400_v10 = vpop.xlane.xlu1 %3399  ;;  %v11733_v17 = vld [vmem:[#allocation4_spill] sm:$0xff] }
 0x351   : > { %3967 = vst [vmem:[#allocation2 + $0xe0] sm:$0xff] %v3823_v6  ;;  %3970 = vst [vmem:[#allocation2 + $0xf8] sm:$0xff] %v3826_v54  ;;  %v3744_v60 = vmul.f32 %v9912_v63, %v11720_v37  ;;  %v11725_v54 = vand.u32 2147483647, %v11724_v39  ;;  %vm11732_vm15 = vcmp.eq.s32.totalorder %v11731_v27, %v8689_v7  ;;  %6596 = vrsqrt.f32 %v3396_v33  ;;  %v11738_v37 = vld [vmem:[#allocation77_spill] sm:$0xff] }
 0x352   : > { %3973 = vst [vmem:[#allocation2 + $0x110] sm:$0xff] %v3829_v35  ;;  %3976 = vst [vmem:[#allocation2 + $0x128] sm:$0xff] %v3832_v16  ;;  %v3747_v6 = vmul.f32 %v9922_v50, %v11723_v25  ;;  %v3889_v16 = vmul.f32 %v9860_v34, %v3745_v57  ;;  %vm11734_vm2 = vcmp.eq.s32.totalorder %v11733_v17, %v8689_v7  ;;  %6598 = vrsqrt.f32 %v3400_v10  ;;  %v11740_v57 = vld [vmem:[#allocation79_spill] sm:$0xff] }
 0x353   : > { %3979 = vst [vmem:[#allocation2 + $0x140] sm:$0xff] %v3835_v32  ;;  %3982 = vst [vmem:[#allocation2 + $0x158] sm:$0xff] %v3838_v61  ;;  %v3748_v8 = vmul.f32 %v9922_v50, %v11725_v54  ;;  %v3888_v35 = vmul.f32 %v9817_v14, %v3744_v60  ;;  %v11726_v32 = vld [vmem:[#allocation73_spill] sm:$0xff]  ;;  %v11739_v60 = vand.u32 2147483647, %v11738_v37 }
 0x354   : > { %3985 = vst [vmem:[#allocation2 + $0x170] sm:$0xff] %v3841_v24  ;;  %3988 = vst [vmem:[#allocation2 + $0x188] sm:$0xff] %v3844_v59  ;;  %v11727_v61 = vand.u32 2147483647, %v11726_v32  ;;  %v11728_v59 = vld [vmem:[#allocation75_spill] sm:$0xff]  ;;  %v3404_v9 = vpop.xlane.xlu0 %3403 }
 0x355   : > { %3991 = vst [vmem:[#allocation2 + $0x1a0] sm:$0xff] %v3847_v20  ;;  %3994 = vst [vmem:[#allocation2 + $0x1b8] sm:$0xff] %v3850_v56  ;;  %v11729_v51 = vand.u32 2147483647, %v11728_v59  ;;  %v3891_v56 = vmul.f32 %v9817_v14, %v3747_v6  ;;  %v3892_v11 = vmul.f32 %v9860_v34, %v3748_v8  ;;  %6600 = vrsqrt.f32 %v3404_v9  ;;  %v11742_v6 = vld [vmem:[#allocation80_spill] sm:$0xff]  ;;  %v11744_v8 = vld [vmem:[#allocation83_spill] sm:$0xff] }
 0x356   : > { %3997 = vst [vmem:[#allocation2 + $0x1d0] sm:$0xff] %v3853_v53  ;;  %4000 = vst [vmem:[#allocation2 + $0x1e8] sm:$0xff] %v3856_v41  ;;  %v3750_v24 = vmul.f32 %v9934_v52, %v11727_v61  ;;  %v3636_v53 = vadd.f32 %v9834_v26, %v9831_v1  ;;  %v11730_v41 = vand.u32 2147483647, %v9763_v3  ;;  %v2757_v26 = vand.u32 2147483647, %v9894_v23 }
 0x357   : > { %4003 = vst [vmem:[#allocation2 + $0x200] sm:$0xff] %v3859_v5  ;;  %4006 = vst [vmem:[#allocation2 + $0x218] sm:$0xff] %v3862_v49  ;;  %v3751_v20 = vmul.f32 %v9934_v52, %v11729_v51  ;;  %v2760_v3 = vand.u32 2147483647, %v2611_v13  ;;  %v11741_v33 = vand.u32 2147483647, %v11740_v57 }
 0x358   : > { %4009 = vst [vmem:[#allocation2 + $0x230] sm:$0xff] %v3865_v0  ;;  %4012 = vst [vmem:[#allocation2 + $0x248] sm:$0xff] %v3868_v55  ;;  %v10000_v5 = vsel %vm11732_vm15, 1.0, %v11730_v41  ;;  %v3894_v48 = vmul.f32 %v9817_v14, %v3750_v24  ;;  %v2754_v0 = vand.u32 2147483647, %v9932_v42  ;;  %v3408_v55 = vpop.xlane.xlu1 %3407  ;;  %v3412_v23 = vpop.xlane.xlu0 %3411  ;;  %v10016_v42 = vsel %vm2954_vm11, 1.0, %v2757_v26 }
 0x359   : > { %4015 = vst [vmem:[#allocation2 + $0x260] sm:$0xff] %v3871_v36  ;;  %4018 = vst [vmem:[#allocation2 + $0x278] sm:$0xff] %v3874_v46  ;;  %v3895_v49 = vmul.f32 %v9860_v34, %v3751_v20  ;;  %v3637_v19 = vadd.f32 %v3636_v53, %v10000_v5  ;;  %6602 = vrsqrt.f32 %v3408_v55  ;;  %v11743_v39 = vand.u32 2147483647, %v11742_v6  ;;  %v11746_v51 = vld [vmem:[#allocation84_spill] sm:$0xff]  ;;  %v11748_v13 = vld [vmem:[#allocation87_spill] sm:$0xff] }
 0x35a   : > { %4020 = vst [vmem:[#allocation2 + $0x288] sm:$0xff] %v3876_v15  ;;  %4021 = vst [vmem:[#allocation2 + $0x290] sm:$0xff] %v3877_v58  ;;  %v10010_v36 = vsel %vm11734_vm2, 1.0, %v2754_v0  ;;  %v10021_v58 = vsel %vm2957_vm14, 1.0, %v2760_v3  ;;  %6604 = vrsqrt.f32 %v3412_v23  ;;  %v11747_v20 = vand.u32 2147483647, %v11746_v51 }
 0x35b   : > { %4023 = vst [vmem:[#allocation2 + $0x2a0] sm:$0xff] %v3879_v45  ;;  %4024 = vst [vmem:[#allocation2 + $0x2a8] sm:$0xff] %v3880_v4  ;;  %v3638_v28 = vadd.f32 %v3637_v19, %v10010_v36  ;;  %v11749_v41 = vand.u32 2147483647, %v11748_v13  ;;  %v11750_v26 = vld [vmem:[#allocation88_spill] sm:$0xff]  ;;  %v11752_v3 = vld [vmem:[#allocation91_spill] sm:$0xff] }
 0x35c   : > { %4026 = vst [vmem:[#allocation2 + $0x2b8] sm:$0xff] %v3882_v44  ;;  %4027 = vst [vmem:[#allocation2 + $0x2c0] sm:$0xff] %v3883_v43  ;;  %v3416_v4 = vpop.xlane.xlu1 %3415  ;;  %v10028_v44 = vsel %vm2960_vm1, 1.0, %v2763_v62  ;;  %v11751_v0 = vand.u32 2147483647, %v11750_v26  ;;  %v11754_v46 = vld [vmem:[#allocation93_spill] sm:$0xff] }
 0x35d   : > { %4029 = vst [vmem:[#allocation2 + $0x2d0] sm:$0xff] %v3885_v12  ;;  %4030 = vst [vmem:[#allocation2 + $0x2d8] sm:$0xff] %v3886_v22  ;;  %v3639_v40 = vadd.f32 %v3638_v28, %v10016_v42  ;;  %6606 = vrsqrt.f32 %v3416_v4  ;;  %v3420_v12 = vpop.xlane.xlu0 %3419  ;;  %v10031_v22 = vpop.eup %6592  ;;  %v11753_v55 = vand.u32 2147483647, %v11752_v3  ;;  %v11755_v62 = vand.u32 2147483647, %v11754_v46 }
 0x35e   : > { %4032 = vst [vmem:[#allocation2 + $0x2e8] sm:$0xff] %v3888_v35  ;;  %4033 = vst [vmem:[#allocation2 + $0x2f0] sm:$0xff] %v3889_v16  ;;  %6608 = vrsqrt.f32 %v3420_v12  ;;  %v10033_v47 = vpop.eup %6594  ;;  %v3753_v29 = vmul.f32 %v10031_v22, %v11739_v60  ;;  %v3754_v7 = vmul.f32 %v10031_v22, %v11741_v33  ;;  %v11745_v35 = vand.u32 2147483647, %v11744_v8  ;;  %v11758_v60 = vld [vmem:[#allocation97_spill] sm:$0xff]  ;;  %v11760_v33 = vld [vmem:[#allocation99_spill] sm:$0xff] }
 0x35f   : > { %4035 = vst [vmem:[#allocation2 + $0x300] sm:$0xff] %v3891_v56  ;;  %4036 = vst [vmem:[#allocation2 + $0x308] sm:$0xff] %v3892_v11  ;;  %v3640_v45 = vadd.f32 %v3639_v40, %v10021_v58  ;;  %v10041_v25 = vpop.eup %6596  ;;  %v3756_v54 = vmul.f32 %v10033_v47, %v11743_v39  ;;  %v11756_v40 = vld [vmem:[#allocation95_spill] sm:$0xff]  ;;  %v11770_v3 = vld [vmem:[#allocation108_spill] sm:$0xff] }
 0x360   : > { %4038 = vst [vmem:[#allocation2 + $0x318] sm:$0xff] %v3894_v48  ;;  %4039 = vst [vmem:[#allocation2 + $0x320] sm:$0xff] %v3895_v49  ;;  %v3757_v16 = vmul.f32 %v10033_v47, %v11745_v35  ;;  %v10049_v32 = vpop.eup %6598  ;;  %v3897_v61 = vmul.f32 %v9817_v14, %v3753_v29  ;;  %v3898_v24 = vmul.f32 %v9860_v34, %v3754_v7  ;;  %v11759_v29 = vand.u32 2147483647, %v11758_v60 }
 0x361   : > { %v3641_v43 = vadd.f32 %v3640_v45, %v10028_v44  ;;  %v3759_v10 = vmul.f32 %v10041_v25, %v11747_v20  ;;  %v3900_v11 = vmul.f32 %v9817_v14, %v3756_v54  ;;  %v3760_v27 = vmul.f32 %v10041_v25, %v11749_v41  ;;  %v11762_v54 = vld [vmem:[#allocation101_spill] sm:$0xff]  ;;  %v11766_v20 = vld [vmem:[#allocation104_spill] sm:$0xff]  ;;  %v11768_v41 = vld [vmem:[#allocation106_spill] sm:$0xff] }
 0x362   : > { %v10056_v56 = vpop.eup %6600  ;;  %v3901_v53 = vmul.f32 %v9860_v34, %v3757_v16  ;;  %4041 = vst [vmem:[#allocation2 + $0x330] sm:$0xff] %v3897_v61  ;;  %4042 = vst [vmem:[#allocation2 + $0x338] sm:$0xff] %v3898_v24  ;;  %v3762_v19 = vmul.f32 %v10049_v32, %v11751_v0  ;;  %v3763_v17 = vmul.f32 %v10049_v32, %v11753_v55  ;;  %v11757_v45 = vand.u32 2147483647, %v11756_v40  ;;  %v11764_v16 = vld [vmem:[#allocation103_spill] sm:$0xff] }
 0x363   : > { %v3642_v21 = vrot.slane %v3641_v43, 4  ;;  %v3903_v9 = vmul.f32 %v9817_v14, %v3759_v10  ;;  %4044 = vst [vmem:[#allocation2 + $0x348] sm:$0xff] %v3900_v11  ;;  %v3904_v23 = vmul.f32 %v9860_v34, %v3760_v27  ;;  %v3765_v15 = vmul.f32 %v10056_v56, %v11755_v62 }
 0x364   : > { %4045 = vst [vmem:[#allocation2 + $0x350] sm:$0xff] %v3901_v53  ;;  %v3766_v4 = vmul.f32 %v10056_v56, %v11757_v45  ;;  %v11761_v7 = vand.u32 2147483647, %v11760_v33  ;;  %v11763_v8 = vand.u32 2147483647, %v11762_v54  ;;  %v3428_v45 = vpop.xlane.xlu0 %3427  ;;  %v11780_v33 = vld [vmem:[#allocation117_spill] sm:$0xff] }
 0x365   : > { %v3643_v31 = vadd.f32 %v3642_v21, %v3641_v43  ;;  %4047 = vst [vmem:[#allocation2 + $0x360] sm:$0xff] %v3903_v9  ;;  %v3906_v43 = vmul.f32 %v9817_v14, %v3762_v19  ;;  %v3907_v21 = vmul.f32 %v9860_v34, %v3763_v17  ;;  %4048 = vst [vmem:[#allocation2 + $0x368] sm:$0xff] %v3904_v23  ;;  %v11765_v61 = vand.u32 2147483647, %v11764_v16  ;;  %v3424_v19 = vpop.xlane.xlu1 %3423  ;;  %v11772_v23 = vld [vmem:[#allocation8_spill] sm:$0xff]  ;;  %v11782_v54 = vld [vmem:[#allocation122_spill] sm:$0xff] }
 0x366   : > { %v10063_v48 = vpop.eup %6602  ;;  %v3909_v12 = vmul.f32 %v9817_v14, %v3765_v15  ;;  %v3910_v37 = vmul.f32 %v9860_v34, %v3766_v4  ;;  %v11767_v10 = vand.u32 2147483647, %v11766_v20  ;;  %v11769_v27 = vand.u32 2147483647, %v11768_v41  ;;  %v11784_v16 = vld [vmem:[#allocation121_spill] sm:$0xff] }
 0x367   : > { %v3644_v59 = vrot.slane %v3643_v31, 2  ;;  %v10072_v28 = vpop.eup %6604  ;;  %v3768_v57 = vmul.f32 %v10063_v48, %v11759_v29  ;;  %4050 = vst [vmem:[#allocation2 + $0x378] sm:$0xff] %v3906_v43  ;;  %4051 = vst [vmem:[#allocation2 + $0x380] sm:$0xff] %v3907_v21  ;;  %v11771_v55 = vand.u32 2147483647, %v11770_v3  ;;  %v11776_v21 = vld [vmem:[#allocation7_spill] sm:$0xff] }
 0x368   : > { %v3771_v35 = vmul.f32 %v10072_v28, %v11763_v8  ;;  %v3772_v24 = vmul.f32 %v10072_v28, %v11765_v61  ;;  %4053 = vst [vmem:[#allocation2 + $0x390] sm:$0xff] %v3909_v12  ;;  %4054 = vst [vmem:[#allocation2 + $0x398] sm:$0xff] %v3910_v37  ;;  %v11773_v46 = vand.u32 2147483647, %v11772_v23  ;;  %v11777_v37 = vld [vmem:[#allocation120_spill] sm:$0xff]  ;;  %v11779_v29 = vld [vmem:[#allocation5_spill] sm:$0xff] }
 0x369   : > { %v3645_v49 = vadd.f32 %v3644_v59, %v3643_v31  ;;  %v3769_v31 = vmul.f32 %v10063_v48, %v11761_v7  ;;  %v3912_v59 = vmul.f32 %v9817_v14, %v3768_v57  ;;  %v3432_v4 = vpop.xlane.xlu1 %3431  ;;  %v11778_v60 = vand.u32 2147483647, %v11777_v37  ;;  %v11805_v37 = vld [vmem:[#allocation94_spill] sm:$0xff] }
 0x36a   : > { %v6607_v6 = vpop.eup %6606  ;;  %v3915_v53 = vmul.f32 %v9817_v14, %v3771_v35  ;;  %v3916_v13 = vmul.f32 %v9860_v34, %v3772_v24  ;;  %v11781_v7 = vand.u32 2147483647, %v11780_v33  ;;  %v11783_v8 = vand.u32 2147483647, %v11782_v54  ;;  %v11808_v54 = vld [vmem:[#allocation96_spill] sm:$0xff] }
 0x36b   : > { %v3646_v2 = vrot.slane %v3645_v49, 1  ;;  %v3913_v51 = vmul.f32 %v9860_v34, %v3769_v31  ;;  %v3774_v11 = vmul.f32 %v6607_v6, %v11767_v10  ;;  %4056 = vst [vmem:[#allocation2 + $0x3a8] sm:$0xff] %v3912_v59  ;;  %v6609_v26 = vpop.eup %6608  ;;  %v10121_v57 = vmul.f32 %v11779_v29, %v11778_v60  ;;  %v11786_v59 = vld [vmem:[#allocation41_spill] sm:$0xff]  ;;  %v11806_v29 = vld [vmem:[#allocation92_spill] sm:$0xff] }
 0x36c   : > { %4059 = vst [vmem:[#allocation2 + $0x3c0] sm:$0xff] %v3915_v53  ;;  %4060 = vst [vmem:[#allocation2 + $0x3c8] sm:$0xff] %v3916_v13  ;;  %v3777_v17 = vmul.f32 %v6609_v26, %v11771_v55  ;;  %v3778_v62 = vmul.f32 %v6609_v26, %v11773_v46  ;;  %v10126_v31 = vmul.f32 %v9765_v18, %v11781_v7  ;;  %v11785_v61 = vand.u32 2147483647, %v11784_v16  ;;  %v11787_v18 = vld [vmem:[#allocation39_spill] sm:$0xff]  ;;  %v11796_v55 = vld [vmem:[#allocation72_spill] sm:$0xff] }
 0x36d   : > { %v3647_v39 = vadd.f32 %v3646_v2, %v3645_v49  ;;  %v3775_v49 = vmul.f32 %v6607_v6, %v11769_v27  ;;  %4057 = vst [vmem:[#allocation2 + $0x3b0] sm:$0xff] %v3913_v51  ;;  %v3918_v9 = vmul.f32 %v9817_v14, %v3774_v11  ;;  %v11774_v2 = vld [vmem:[#allocation17_spill] sm:$0xff]  ;;  %v10131_v35 = vmul.f32 %v9805_v30, %v11783_v8  ;;  %v3440_v20 = vpop.xlane.xlu1 %3439  ;;  %v11788_v11 = vld [vmem:[#allocation44_spill] sm:$0xff]  ;;  %v11789_v30 = vld [vmem:[#allocation46_spill] sm:$0xff] }
 0x36e   : > { %v3921_v15 = vmul.f32 %v9817_v14, %v3777_v17  ;;  %v3922_v40 = vmul.f32 %v9860_v34, %v3778_v62  ;;  %v11775_v43 = vand.u32 2147483647, %v11774_v2  ;;  %v10136_v24 = vmul.f32 %v9912_v63, %v11785_v61  ;;  %v11790_v63 = vld [vmem:[#allocation67_spill] sm:$0xff]  ;;  %v11797_v17 = vld [vmem:[#allocation78_spill] sm:$0xff]  ;;  %v11798_v46 = vld [vmem:[#allocation76_spill] sm:$0xff] }
 0x36f   : > { %6610 = vrsqrt.f32 %v3647_v39  ;;  %v3919_v0 = vmul.f32 %v9860_v34, %v3775_v49  ;;  %4062 = vst [vmem:[#allocation2 + $0x3d8] sm:$0xff] %v3918_v9  ;;  %v3436_v39 = vpop.xlane.xlu0 %3435  ;;  %v10140_v51 = vmul.f32 %v9922_v50, %v11786_v59  ;;  %v10144_v10 = vmul.f32 %v9934_v52, %v11787_v18  ;;  %v11791_v50 = vld [vmem:[#allocation51_spill] sm:$0xff]  ;;  %v11792_v49 = vld [vmem:[#allocation48_spill] sm:$0xff]  ;;  %v11799_v62 = vld [vmem:[#allocation82_spill] sm:$0xff] }
 0x370   : > { %4065 = vst [vmem:[#allocation2 + $0x3f0] sm:$0xff] %v3921_v15  ;;  %4066 = vst [vmem:[#allocation2 + $0x3f8] sm:$0xff] %v3922_v40  ;;  %6612 = vrsqrt.f32 %v3424_v19  ;;  %v10116_v12 = vmul.f32 %v11776_v21, %v11775_v43  ;;  %v10148_v53 = vmul.f32 %v10031_v22, %v11788_v11  ;;  %v10152_v13 = vmul.f32 %v10033_v47, %v11789_v30  ;;  %v11793_v9 = vld [vmem:[#allocation52_spill] sm:$0xff]  ;;  %v11794_v47 = vld [vmem:[#allocation6_spill] sm:$0xff] }
 0x371   : > { %4063 = vst [vmem:[#allocation2 + $0x3e0] sm:$0xff] %v3919_v0  ;;  %6614 = vrsqrt.f32 %v3428_v45  ;;  %v10156_v41 = vmul.f32 %v10041_v25, %v11790_v63  ;;  %v10160_v27 = vmul.f32 %v10049_v32, %v11791_v50  ;;  %v10164_v52 = vmul.f32 %v10056_v56, %v11792_v49  ;;  %v11795_v56 = vld [vmem:[#allocation74_spill] sm:$0xff]  ;;  %v11802_v40 = vld [vmem:[#allocation85_spill] sm:$0xff]  ;;  %v11810_v59 = vld [vmem:[#allocation100_spill] sm:$0xff] }
 0x372   : > { %6616 = vrsqrt.f32 %v3432_v4  ;;  %v10168_v22 = vmul.f32 %v10063_v48, %v11793_v9  ;;  %v10174_v19 = vmul.f32 %v10072_v28, %v11794_v47  ;;  %v10177_v25 = vmul.f32 %v6607_v6, %v9803_v38  ;;  %v11800_v6 = vld [vmem:[#allocation81_spill] sm:$0xff]  ;;  %v11803_v4 = vld [vmem:[#allocation90_spill] sm:$0xff]  ;;  %v11812_v30 = vld [vmem:[#allocation107_spill] sm:$0xff] }
 0x373   : > { %6618 = vrsqrt.f32 %v3436_v39  ;;  %v10180_v32 = vmul.f32 %v6609_v26, %v9831_v1  ;;  %v11801_v26 = vld [vmem:[#allocation86_spill] sm:$0xff]  ;;  %v11804_v43 = vld [vmem:[#allocation89_spill] sm:$0xff]  ;;  %v11814_v9 = vld [vmem:[#allocation111_spill] sm:$0xff] }
 0x374   : > { %6620 = vrsqrt.f32 %v3440_v20  ;;  %v11807_v7 = vld [vmem:[#allocation98_spill] sm:$0xff]  ;;  %v11811_v18 = vld [vmem:[#allocation105_spill] sm:$0xff] }
 0x375   : > { %v11809_v16 = vld [vmem:[#allocation102_spill] sm:$0xff]  ;;  %v11813_v50 = vld [vmem:[#allocation109_spill] sm:$0xff] }
 0x37c   : > { %v10170_v0 = vpop.eup %6610 }
 0x37d   : > { %v3797_v3 = vmul.f32 %v10170_v0, %v11795_v56  ;;  %v3800_v48 = vmul.f32 %v10170_v0, %v11796_v55  ;;  %v3803_v23 = vmul.f32 %v10170_v0, %v11797_v17  ;;  %v3806_v28 = vmul.f32 %v10170_v0, %v11798_v46  ;;  %v11815_v56 = vld [vmem:[#allocation15_spill] sm:$0xff]  ;;  %v11817_v17 = vld [vmem:[#allocation118_spill] sm:$0xff]  ;;  %v11818_v46 = vld [vmem:[#allocation21_spill] sm:$0xff] }
 0x37e   : > { %v3809_v38 = vmul.f32 %v10170_v0, %v11799_v62  ;;  %v3812_v1 = vmul.f32 %v10170_v0, %v11800_v6  ;;  %v3815_v15 = vmul.f32 %v10170_v0, %v11801_v26  ;;  %v3818_v45 = vmul.f32 %v10170_v0, %v11802_v40  ;;  %v11816_v55 = vld [vmem:[#allocation115_spill] sm:$0xff]  ;;  %v11819_v62 = vld [vmem:[#allocation37_spill] sm:$0xff]  ;;  %v11821_v26 = vld [vmem:[#allocation42_spill] sm:$0xff] }
 0x37f   : > { %v3821_v2 = vmul.f32 %v10170_v0, %v11803_v4  ;;  %v3824_v21 = vmul.f32 %v10170_v0, %v11804_v43  ;;  %v3827_v60 = vmul.f32 %v10170_v0, %v11805_v37  ;;  %v3830_v33 = vmul.f32 %v10170_v0, %v11806_v29  ;;  %3941 = vst [vmem:[#allocation2 + $0x10] sm:$0xff] %v3797_v3  ;;  %v11820_v6 = vld [vmem:[#allocation23_spill] sm:$0xff] }
 0x380   : > { %3944 = vst [vmem:[#allocation2 + $0x28] sm:$0xff] %v3800_v48  ;;  %3947 = vst [vmem:[#allocation2 + $0x40] sm:$0xff] %v3803_v23  ;;  %v3833_v39 = vmul.f32 %v10170_v0, %v11807_v7  ;;  %v3836_v8 = vmul.f32 %v10170_v0, %v11808_v54  ;;  %v3839_v61 = vmul.f32 %v10170_v0, %v11809_v16 }
 0x381   : > { %3950 = vst [vmem:[#allocation2 + $0x58] sm:$0xff] %v3806_v28  ;;  %v3842_v20 = vmul.f32 %v10170_v0, %v11810_v59  ;;  %3953 = vst [vmem:[#allocation2 + $0x70] sm:$0xff] %v3809_v38  ;;  %v3845_v11 = vmul.f32 %v10170_v0, %v11811_v18  ;;  %v3848_v63 = vmul.f32 %v10170_v0, %v11812_v30  ;;  %v11830_v30 = vld [vmem:[#allocation114_spill] sm:$0xff] }
 0x382   : > { %3956 = vst [vmem:[#allocation2 + $0x88] sm:$0xff] %v3812_v1  ;;  %3959 = vst [vmem:[#allocation2 + $0xa0] sm:$0xff] %v3815_v15  ;;  %v3851_v49 = vmul.f32 %v10170_v0, %v11813_v50  ;;  %v3854_v47 = vmul.f32 %v10170_v0, %v11814_v9  ;;  %v3857_v3 = vmul.f32 %v10170_v0, %v11815_v56 }
 0x383   : > { %3962 = vst [vmem:[#allocation2 + $0xb8] sm:$0xff] %v3818_v45  ;;  %3965 = vst [vmem:[#allocation2 + $0xd0] sm:$0xff] %v3821_v2  ;;  %v3860_v48 = vmul.f32 %v10170_v0, %v11816_v55  ;;  %v3863_v23 = vmul.f32 %v10170_v0, %v11817_v17  ;;  %v3866_v28 = vmul.f32 %v10170_v0, %v11818_v46  ;;  %v6613_v45 = vpop.eup %6612  ;;  %v11834_v46 = vld [vmem:[#allocation22_spill] sm:$0xff] }
 0x384   : > { %3968 = vst [vmem:[#allocation2 + $0xe8] sm:$0xff] %v3824_v21  ;;  %3971 = vst [vmem:[#allocation2 + $0x100] sm:$0xff] %v3827_v60  ;;  %v3869_v38 = vmul.f32 %v10170_v0, %v11819_v62  ;;  %v3872_v1 = vmul.f32 %v10170_v0, %v11820_v6  ;;  %v3875_v15 = vmul.f32 %v10170_v0, %v11821_v26 }
 0x385   : > { %3974 = vst [vmem:[#allocation2 + $0x118] sm:$0xff] %v3830_v33  ;;  %3977 = vst [vmem:[#allocation2 + $0x130] sm:$0xff] %v3833_v39  ;;  %v3878_v40 = vmul.f32 %v10170_v0, %v10116_v12  ;;  %v3881_v4 = vmul.f32 %v10170_v0, %v10121_v57  ;;  %v3884_v2 = vmul.f32 %v10170_v0, %v10126_v31  ;;  %v6615_v12 = vpop.eup %6614 }
 0x386   : > { %3980 = vst [vmem:[#allocation2 + $0x148] sm:$0xff] %v3836_v8  ;;  %3983 = vst [vmem:[#allocation2 + $0x160] sm:$0xff] %v3839_v61  ;;  %v3887_v43 = vmul.f32 %v10170_v0, %v10131_v35  ;;  %v3890_v21 = vmul.f32 %v10170_v0, %v10136_v24  ;;  %v3893_v37 = vmul.f32 %v10170_v0, %v10140_v51  ;;  %v6617_v24 = vpop.eup %6616 }
 0x387   : > { %3986 = vst [vmem:[#allocation2 + $0x178] sm:$0xff] %v3842_v20  ;;  %3989 = vst [vmem:[#allocation2 + $0x190] sm:$0xff] %v3845_v11  ;;  %v3896_v57 = vmul.f32 %v10170_v0, %v10144_v10  ;;  %v3899_v31 = vmul.f32 %v10170_v0, %v10148_v53  ;;  %v3902_v35 = vmul.f32 %v10170_v0, %v10152_v13 }
 0x388   : > { %3992 = vst [vmem:[#allocation2 + $0x1a8] sm:$0xff] %v3848_v63  ;;  %3995 = vst [vmem:[#allocation2 + $0x1c0] sm:$0xff] %v3851_v49  ;;  %v3905_v51 = vmul.f32 %v10170_v0, %v10156_v41  ;;  %v3908_v10 = vmul.f32 %v10170_v0, %v10160_v27  ;;  %v3911_v53 = vmul.f32 %v10170_v0, %v10164_v52  ;;  %v11822_v27 = vld [vmem:[#allocation11_spill] sm:$0xff]  ;;  %v6619_v52 = vpop.eup %6618  ;;  %v11831_v63 = vand.u32 2147483647, %v11830_v30  ;;  %v11832_v49 = vld [vmem:[#allocation116_spill] sm:$0xff] }
 0x389   : > { %3998 = vst [vmem:[#allocation2 + $0x1d8] sm:$0xff] %v3854_v47  ;;  %4001 = vst [vmem:[#allocation2 + $0x1f0] sm:$0xff] %v3857_v3  ;;  %v3914_v13 = vmul.f32 %v10170_v0, %v10168_v22  ;;  %v3917_v60 = vmul.f32 %v10170_v0, %v10174_v19  ;;  %v3920_v29 = vmul.f32 %v10170_v0, %v10177_v25  ;;  %v11823_v33 = vand.u32 2147483647, %v11822_v27  ;;  %v11824_v22 = vld [vmem:[#allocation110_spill] sm:$0xff]  ;;  %v11826_v19 = vld [vmem:[#allocation112_spill] sm:$0xff] }
 0x38a   : > { %4004 = vst [vmem:[#allocation2 + $0x208] sm:$0xff] %v3860_v48  ;;  %4007 = vst [vmem:[#allocation2 + $0x220] sm:$0xff] %v3863_v23  ;;  %v3923_v41 = vmul.f32 %v10170_v0, %v10180_v32  ;;  %v11825_v39 = vand.u32 2147483647, %v11824_v22  ;;  %v3782_v8 = vmul.f32 %v6613_v45, %v10000_v5  ;;  %v11827_v16 = vand.u32 2147483647, %v11826_v19  ;;  %v6621_v32 = vpop.eup %6620 }
 0x38b   : > { %4010 = vst [vmem:[#allocation2 + $0x238] sm:$0xff] %v3866_v28  ;;  %4013 = vst [vmem:[#allocation2 + $0x250] sm:$0xff] %v3869_v38  ;;  %v3780_v7 = vmul.f32 %v6613_v45, %v11823_v33  ;;  %v11828_v25 = vld [vmem:[#allocation113_spill] sm:$0xff]  ;;  %v3785_v11 = vmul.f32 %v6615_v12, %v10010_v36  ;;  %v3786_v50 = vmul.f32 %v6617_v24, %v11831_v63  ;;  %v11833_v9 = vand.u32 2147483647, %v11832_v49  ;;  %v11836_v38 = vld [vmem:[#allocation119_spill] sm:$0xff] }
 0x38c   : > { %4016 = vst [vmem:[#allocation2 + $0x268] sm:$0xff] %v3872_v1  ;;  %4019 = vst [vmem:[#allocation2 + $0x280] sm:$0xff] %v3875_v15  ;;  %v3781_v54 = vmul.f32 %v6613_v45, %v11825_v39  ;;  %v3783_v61 = vmul.f32 %v6615_v12, %v11827_v16  ;;  %v11829_v59 = vand.u32 2147483647, %v11828_v25  ;;  %v3926_v56 = vmul.f32 %v10170_v0, %v3782_v8  ;;  %v11838_v15 = vld [vmem:[#allocation34_spill] sm:$0xff] }
 0x38d   : > { %4022 = vst [vmem:[#allocation2 + $0x298] sm:$0xff] %v3878_v40  ;;  %4025 = vst [vmem:[#allocation2 + $0x2b0] sm:$0xff] %v3881_v4  ;;  %v3924_v18 = vmul.f32 %v9817_v14, %v3780_v7  ;;  %v3787_v5 = vmul.f32 %v6617_v24, %v11833_v9  ;;  %v3929_v48 = vmul.f32 %v10170_v0, %v3785_v11  ;;  %v11835_v28 = vand.u32 2147483647, %v11834_v46  ;;  %v11840_v4 = vld [vmem:[#allocation35_spill] sm:$0xff] }
 0x38e   : > { %4028 = vst [vmem:[#allocation2 + $0x2c8] sm:$0xff] %v3884_v2  ;;  %4031 = vst [vmem:[#allocation2 + $0x2e0] sm:$0xff] %v3887_v43  ;;  %v3784_v20 = vmul.f32 %v6615_v12, %v11829_v59  ;;  %v3925_v47 = vmul.f32 %v9860_v34, %v3781_v54  ;;  %v3927_v3 = vmul.f32 %v9817_v14, %v3783_v61  ;;  %v11837_v6 = vand.u32 2147483647, %v11836_v38 }
 0x38f   : > { %4034 = vst [vmem:[#allocation2 + $0x2f8] sm:$0xff] %v3890_v21  ;;  %4037 = vst [vmem:[#allocation2 + $0x310] sm:$0xff] %v3893_v37  ;;  %v3788_v17 = vmul.f32 %v6617_v24, %v10016_v42  ;;  %v3930_v36 = vmul.f32 %v9817_v14, %v3786_v50  ;;  %v3931_v23 = vmul.f32 %v9860_v34, %v3787_v5  ;;  %v11839_v40 = vand.u32 2147483647, %v11838_v15 }
 0x390   : > { %4040 = vst [vmem:[#allocation2 + $0x328] sm:$0xff] %v3896_v57  ;;  %4043 = vst [vmem:[#allocation2 + $0x340] sm:$0xff] %v3899_v31  ;;  %v3928_v55 = vmul.f32 %v9860_v34, %v3784_v20  ;;  %v3789_v62 = vmul.f32 %v6619_v52, %v11835_v28  ;;  %v3790_v1 = vmul.f32 %v6619_v52, %v11837_v6  ;;  %v11841_v2 = vand.u32 2147483647, %v11840_v4 }
 0x391   : > { %4046 = vst [vmem:[#allocation2 + $0x358] sm:$0xff] %v3902_v35  ;;  %4049 = vst [vmem:[#allocation2 + $0x370] sm:$0xff] %v3905_v51  ;;  %v3791_v26 = vmul.f32 %v6619_v52, %v10021_v58  ;;  %v3792_v45 = vmul.f32 %v6621_v32, %v11839_v40  ;;  %v3932_v42 = vmul.f32 %v10170_v0, %v3788_v17 }
 0x392   : > { %4052 = vst [vmem:[#allocation2 + $0x388] sm:$0xff] %v3908_v10  ;;  %4055 = vst [vmem:[#allocation2 + $0x3a0] sm:$0xff] %v3911_v53  ;;  %v3793_v43 = vmul.f32 %v6621_v32, %v11841_v2  ;;  %v3794_v21 = vmul.f32 %v6621_v32, %v10028_v44  ;;  %v3933_v12 = vmul.f32 %v9817_v14, %v3789_v62 }
 0x393   : > { %4058 = vst [vmem:[#allocation2 + $0x3b8] sm:$0xff] %v3914_v13  ;;  %4061 = vst [vmem:[#allocation2 + $0x3d0] sm:$0xff] %v3917_v60  ;;  %v3934_v37 = vmul.f32 %v9860_v34, %v3790_v1  ;;  %v3935_v57 = vmul.f32 %v10170_v0, %v3791_v26  ;;  %v3936_v58 = vmul.f32 %v9817_v14, %v3792_v45 }
 0x394   : > { %4064 = vst [vmem:[#allocation2 + $0x3e8] sm:$0xff] %v3920_v29  ;;  %4067 = vst [vmem:[#allocation2 + $0x400] sm:$0xff] %v3923_v41  ;;  %v3937_v31 = vmul.f32 %v9860_v34, %v3793_v43  ;;  %v3938_v35 = vmul.f32 %v10170_v0, %v3794_v21 }
 0x395   : > { %4068 = vst [vmem:[#allocation2 + $0x408] sm:$0xff] %v3924_v18  ;;  %4069 = vst [vmem:[#allocation2 + $0x410] sm:$0xff] %v3925_v47 }
 0x396   : > { %4070 = vst [vmem:[#allocation2 + $0x418] sm:$0xff] %v3926_v56  ;;  %4071 = vst [vmem:[#allocation2 + $0x420] sm:$0xff] %v3927_v3 }
 0x397   : > { %4072 = vst [vmem:[#allocation2 + $0x428] sm:$0xff] %v3928_v55  ;;  %4073 = vst [vmem:[#allocation2 + $0x430] sm:$0xff] %v3929_v48 }
 0x398   : > { %4074 = vst [vmem:[#allocation2 + $0x438] sm:$0xff] %v3930_v36  ;;  %4075 = vst [vmem:[#allocation2 + $0x440] sm:$0xff] %v3931_v23 }
 0x399   : > { %4076 = vst [vmem:[#allocation2 + $0x448] sm:$0xff] %v3932_v42  ;;  %4077 = vst [vmem:[#allocation2 + $0x450] sm:$0xff] %v3933_v12 }
 0x39a   : > { %4078 = vst [vmem:[#allocation2 + $0x458] sm:$0xff] %v3934_v37  ;;  %4079 = vst [vmem:[#allocation2 + $0x460] sm:$0xff] %v3935_v57 }
 0x39b   : > { %4080 = vst [vmem:[#allocation2 + $0x468] sm:$0xff] %v3936_v58  ;;  %4081 = vst [vmem:[#allocation2 + $0x470] sm:$0xff] %v3937_v31 }
 0x39c   : > { %4082 = vst [vmem:[#allocation2 + $0x478] sm:$0xff] %v3938_v35 }
 0x39d PF: > { %v4231_v44 = vld [vmem:[#allocation2 + $0x170] sm:$0xff]  ;;  %v4280_v24 = vld [vmem:[#allocation2 + $0x2f8] sm:$0xff]  ;;  %v4230_v51 = vld [vmem:[#allocation2 + $0x168] sm:$0xff]  ;;  %s5600_s25 = sshll.u32 %s6666_s19, 7 }
 0x39e   : > { %4329 = vmatprep.subr.mxu0 %v4231_v44  ;;  %6039 = vmatprep.subr.mxu1 %v4280_v24  ;;  %v4232_v10 = vld [vmem:[#allocation2 + $0x178] sm:$0xff]  ;;  %v4277_v14 = vld [vmem:[#allocation2 + $0x2e0] sm:$0xff]  ;;  %v4227_v34 = vld [vmem:[#allocation2 + $0x150] sm:$0xff]  ;;  %s4084_s26 = sshra.s32 %s5600_s25, 3 }
 0x39f   : > { %v4228_v53 = vld [vmem:[#allocation2 + $0x158] sm:$0xff]  ;;  %4330 = vmatpush1.xpose.msra.mxu0 %v4230_v51  ;;  %6040 = vmatpush3.xpose.msra.mxu1 %v4232_v10  ;;  %v4229_v0 = vld [vmem:[#allocation2 + $0x160] sm:$0xff]  ;;  %v4274_v60 = vld [vmem:[#allocation2 + $0x2c8] sm:$0xff]  ;;  %s5604_s28 = smul.u32 24, %s4084_s26 }
 0x3a0   : > { %4331 = vmatprep.subr.mxu0 %v4228_v53  ;;  %6041 = vmatprep.subr.mxu1 %v4277_v14  ;;  %v4225_v13 = vld [vmem:[#allocation2 + $0x140] sm:$0xff]  ;;  %v4224_v29 = vld [vmem:[#allocation2 + $0x138] sm:$0xff]  ;;  %v4226_v41 = vld [vmem:[#allocation2 + $0x148] sm:$0xff] }
 0x3a1   : > { %v4222_v27 = vld [vmem:[#allocation2 + $0x128] sm:$0xff]  ;;  %v4271_v33 = vld [vmem:[#allocation2 + $0x2b0] sm:$0xff]  ;;  %v4221_v7 = vld [vmem:[#allocation2 + $0x120] sm:$0xff]  ;;  %s10311_s29 = scalar_lea.vmem [#allocation2], %s5604_s28 }
 0x3a2   : > { %v4223_v52 = vld [vmem:[#allocation2 + $0x130] sm:$0xff]  ;;  %v4268_v39 = vld [vmem:[#allocation2 + $0x298] sm:$0xff]  ;;  %v4218_v54 = vld [vmem:[#allocation2 + $0x108] sm:$0xff] }
 0x3a3   : > { %4332 = vmatpush1.xpose.msra.mxu0 %v4227_v34  ;;  %6042 = vmatpush3.xpose.msra.mxu1 %v4229_v0  ;;  %v4219_v22 = vld [vmem:[#allocation2 + $0x110] sm:$0xff]  ;;  %v4220_v8 = vld [vmem:[#allocation2 + $0x118] sm:$0xff]  ;;  %v4265_v16 = vld [vmem:[#allocation2 + $0x280] sm:$0xff] }
 0x3a4   : > { %4333 = vmatprep.subr.mxu0 %v4225_v13  ;;  %6043 = vmatprep.subr.mxu1 %v4274_v60  ;;  %v4216_v19 = vld [vmem:[#allocation2 + $0xf8] sm:$0xff]  ;;  %v4215_v61 = vld [vmem:[#allocation2 + $0xf0] sm:$0xff]  ;;  %v4217_v25 = vld [vmem:[#allocation2 + $0x100] sm:$0xff] }
 0x3a5   : > { %v4213_v59 = vld [vmem:[#allocation2 + $0xe0] sm:$0xff]  ;;  %v4262_v20 = vld [vmem:[#allocation2 + $0x268] sm:$0xff]  ;;  %v10314_v32 = vld [vmem:[%s10311_s29 + $0x10] sm:$0xff] }
 0x3a6   : > { %4139 = vst [vmem:[%s6674_s24 + $0x10] sm:$0xff] %v10314_v32  ;;  %v4212_v18 = vld [vmem:[#allocation2 + $0xd8] sm:$0xff]  ;;  %v4214_v11 = vld [vmem:[#allocation2 + $0xe8] sm:$0xff]  ;;  %v4259_v50 = vld [vmem:[#allocation2 + $0x250] sm:$0xff]  ;;  %6071 = vmatprep.mubr.f32.mxu1 %v10314_v32 }
 0x3a7   : > { %4334 = vmatpush1.xpose.msra.mxu0 %v4224_v29  ;;  %6044 = vmatpush3.xpose.msra.mxu1 %v4226_v41  ;;  %v10319_v30 = vld [vmem:[%s10311_s29 + $0x28] sm:$0xff]  ;;  %v10325_v49 = vld [vmem:[%s10311_s29 + $0x40] sm:$0xff]  ;;  %v10330_v9 = vld [vmem:[%s10311_s29 + $0x58] sm:$0xff] }
 0x3a8   : > { %4335 = vmatprep.subr.mxu0 %v4222_v27  ;;  %6045 = vmatprep.subr.mxu1 %v4271_v33  ;;  %v4210_v63 = vld [vmem:[#allocation2 + $0xc8] sm:$0xff]  ;;  %4142 = vst [vmem:[%s6674_s24 + $0x28] sm:$0xff] %v10319_v30  ;;  %4145 = vst [vmem:[%s6674_s24 + $0x40] sm:$0xff] %v10325_v49  ;;  %v4209_v5 = vld [vmem:[#allocation2 + $0xc0] sm:$0xff] }
 0x3a9   : > { %v4211_v47 = vld [vmem:[#allocation2 + $0xd0] sm:$0xff]  ;;  %4148 = vst [vmem:[%s6674_s24 + $0x58] sm:$0xff] %v10330_v9  ;;  %v4256_v3 = vld [vmem:[#allocation2 + $0x238] sm:$0xff]  ;;  %v10340_v48 = vld [vmem:[%s10311_s29 + $0x88] sm:$0xff] }
 0x3aa   : > { %v4207_v56 = vld [vmem:[#allocation2 + $0xb0] sm:$0xff]  ;;  %4154 = vst [vmem:[%s6674_s24 + $0x88] sm:$0xff] %v10340_v48  ;;  %v4206_v17 = vld [vmem:[#allocation2 + $0xa8] sm:$0xff]  ;;  %v4208_v36 = vld [vmem:[#allocation2 + $0xb8] sm:$0xff] }
 0x3ab   : > { %4336 = vmatpush1.xpose.msra.mxu0 %v4221_v7  ;;  %6046 = vmatpush3.xpose.msra.mxu1 %v4223_v52  ;;  %v10335_v55 = vld [vmem:[%s10311_s29 + $0x70] sm:$0xff]  ;;  %v10345_v23 = vld [vmem:[%s10311_s29 + $0xa0] sm:$0xff]  ;;  %v4204_v46 = vld [vmem:[#allocation2 + $0x98] sm:$0xff] }
 0x3ac   : > { %4337 = vmatprep.subr.mxu0 %v4219_v22  ;;  %6047 = vmatprep.subr.mxu1 %v4268_v39  ;;  %4151 = vst [vmem:[%s6674_s24 + $0x70] sm:$0xff] %v10335_v55  ;;  %v4253_v28 = vld [vmem:[#allocation2 + $0x220] sm:$0xff]  ;;  %4157 = vst [vmem:[%s6674_s24 + $0xa0] sm:$0xff] %v10345_v23  ;;  %v10350_v62 = vld [vmem:[%s10311_s29 + $0xb8] sm:$0xff] }
 0x3ad   : > { %4160 = vst [vmem:[%s6674_s24 + $0xb8] sm:$0xff] %v10350_v62  ;;  %v10355_v38 = vld [vmem:[%s10311_s29 + $0xd0] sm:$0xff]  ;;  %v4205_v1 = vld [vmem:[#allocation2 + $0xa0] sm:$0xff]  ;;  %v4250_v15 = vld [vmem:[#allocation2 + $0x208] sm:$0xff] }
 0x3ae   : > { %v4203_v6 = vld [vmem:[#allocation2 + $0x90] sm:$0xff]  ;;  %4163 = vst [vmem:[%s6674_s24 + $0xd0] sm:$0xff] %v10355_v38  ;;  %v4201_v26 = vld [vmem:[#allocation2 + $0x80] sm:$0xff]  ;;  %v10360_v40 = vld [vmem:[%s10311_s29 + $0xe8] sm:$0xff] }
 0x3af   : > { %4338 = vmatpush1.xpose.msra.mxu0 %v4218_v54  ;;  %6048 = vmatpush3.xpose.msra.mxu1 %v4220_v8  ;;  %4166 = vst [vmem:[%s6674_s24 + $0xe8] sm:$0xff] %v10360_v40  ;;  %v10365_v45 = vld [vmem:[%s10311_s29 + $0x100] sm:$0xff]  ;;  %v4200_v42 = vld [vmem:[#allocation2 + $0x78] sm:$0xff]  ;;  %v4202_v4 = vld [vmem:[#allocation2 + $0x88] sm:$0xff] }
 0x3b0   : > { %4339 = vmatprep.subr.mxu0 %v4216_v19  ;;  %6049 = vmatprep.subr.mxu1 %v4265_v16  ;;  %4169 = vst [vmem:[%s6674_s24 + $0x100] sm:$0xff] %v10365_v45  ;;  %v10370_v2 = vld [vmem:[%s10311_s29 + $0x118] sm:$0xff]  ;;  %v4198_v43 = vld [vmem:[#allocation2 + $0x68] sm:$0xff]  ;;  %v4247_v21 = vld [vmem:[#allocation2 + $0x1f0] sm:$0xff] }
 0x3b1   : > { %4172 = vst [vmem:[%s6674_s24 + $0x118] sm:$0xff] %v10370_v2  ;;  %v10375_v12 = vld [vmem:[%s10311_s29 + $0x130] sm:$0xff]  ;;  %v4197_v37 = vld [vmem:[#allocation2 + $0x60] sm:$0xff]  ;;  %v10380_v58 = vld [vmem:[%s10311_s29 + $0x148] sm:$0xff] }
 0x3b2   : > { %4175 = vst [vmem:[%s6674_s24 + $0x130] sm:$0xff] %v10375_v12  ;;  %v4199_v57 = vld [vmem:[#allocation2 + $0x70] sm:$0xff]  ;;  %v4244_v35 = vld [vmem:[#allocation2 + $0x1d8] sm:$0xff]  ;;  %4178 = vst [vmem:[%s6674_s24 + $0x148] sm:$0xff] %v10380_v58 }
 0x3b3   : > { %4340 = vmatpush1.xpose.msra.mxu0 %v4215_v61  ;;  %6050 = vmatpush3.xpose.msra.mxu1 %v4217_v25  ;;  %v4195_v31 = vld [vmem:[#allocation2 + $0x50] sm:$0xff]  ;;  %v10385_v44 = vld [vmem:[%s10311_s29 + $0x160] sm:$0xff]  ;;  %v10390_v24 = vld [vmem:[%s10311_s29 + $0x178] sm:$0xff] }
 0x3b4   : > { %4341 = vmatprep.subr.mxu0 %v4213_v59  ;;  %6051 = vmatprep.subr.mxu1 %v4262_v20  ;;  %4181 = vst [vmem:[%s6674_s24 + $0x160] sm:$0xff] %v10385_v44  ;;  %v4194_v51 = vld [vmem:[#allocation2 + $0x48] sm:$0xff]  ;;  %v4196_v10 = vld [vmem:[#allocation2 + $0x58] sm:$0xff]  ;;  %4184 = vst [vmem:[%s6674_s24 + $0x178] sm:$0xff] %v10390_v24 }
 0x3b5   : > { %v4192_v53 = vld [vmem:[#allocation2 + $0x38] sm:$0xff]  ;;  %v4241_v14 = vld [vmem:[#allocation2 + $0x1c0] sm:$0xff]  ;;  %v10395_v34 = vld [vmem:[%s10311_s29 + $0x8] sm:$0xff] }
 0x3b6   : > { %v10398_v0 = vld [vmem:[%s10311_s29] sm:$0xff]  ;;  %v4191_v13 = vld [vmem:[#allocation2 + $0x30] sm:$0xff]  ;;  %4138 = vst [vmem:[%s6674_s24 + $0x8] sm:$0xff] %v10395_v34  ;;  %4393 = vmatprep.mubr.f32.mxu0 %v10395_v34  ;;  %v10409_v29 = vld [vmem:[%s10311_s29 + $0x18] sm:$0xff] }
 0x3b7   : > { %4342 = vmatpush1.xpose.msra.mxu0 %v4212_v18  ;;  %6052 = vmatpush3.xpose.msra.mxu1 %v4214_v11  ;;  %4137 = vst [vmem:[%s6674_s24] sm:$0xff] %v10398_v0  ;;  %v10406_v60 = vld [vmem:[%s10311_s29 + $0x20] sm:$0xff]  ;;  %4140 = vst [vmem:[%s6674_s24 + $0x18] sm:$0xff] %v10409_v29  ;;  %v10416_v27 = vld [vmem:[%s10311_s29 + $0x38] sm:$0xff] }
 0x3b8   : > { %4343 = vmatprep.subr.mxu0 %v4210_v63  ;;  %6053 = vmatprep.subr.mxu1 %v4259_v50  ;;  %v4193_v41 = vld [vmem:[#allocation2 + $0x40] sm:$0xff]  ;;  %4141 = vst [vmem:[%s6674_s24 + $0x20] sm:$0xff] %v10406_v60  ;;  %v10419_v33 = vld [vmem:[%s10311_s29 + $0x30] sm:$0xff]  ;;  %4144 = vst [vmem:[%s6674_s24 + $0x38] sm:$0xff] %v10416_v27 }
 0x3b9   : > { %v4189_v7 = vld [vmem:[#allocation2 + $0x20] sm:$0xff]  ;;  %4143 = vst [vmem:[%s6674_s24 + $0x30] sm:$0xff] %v10419_v33  ;;  %v10426_v52 = vld [vmem:[%s10311_s29 + $0x50] sm:$0xff]  ;;  %v10429_v22 = vld [vmem:[%s10311_s29 + $0x48] sm:$0xff] }
 0x3ba   : > { %v4238_v39 = vld [vmem:[#allocation2 + $0x1a8] sm:$0xff]  ;;  %4147 = vst [vmem:[%s6674_s24 + $0x50] sm:$0xff] %v10426_v52  ;;  %4146 = vst [vmem:[%s6674_s24 + $0x48] sm:$0xff] %v10429_v22  ;;  %v10439_v8 = vld [vmem:[%s10311_s29 + $0x60] sm:$0xff] }
 0x3bb   : > { %4344 = vmatpush1.xpose.msra.mxu0 %v4209_v5  ;;  %6054 = vmatpush3.xpose.msra.mxu1 %v4211_v47  ;;  %v10436_v54 = vld [vmem:[%s10311_s29 + $0x68] sm:$0xff]  ;;  %v4188_v19 = vld [vmem:[#allocation2 + $0x18] sm:$0xff]  ;;  %4149 = vst [vmem:[%s6674_s24 + $0x60] sm:$0xff] %v10439_v8  ;;  %v10446_v16 = vld [vmem:[%s10311_s29 + $0x80] sm:$0xff] }
 0x3bc   : > { %4345 = vmatprep.subr.mxu0 %v4207_v56  ;;  %6055 = vmatprep.subr.mxu1 %v4256_v3  ;;  %4150 = vst [vmem:[%s6674_s24 + $0x68] sm:$0xff] %v10436_v54  ;;  %v10449_v61 = vld [vmem:[%s10311_s29 + $0x78] sm:$0xff]  ;;  %v4190_v25 = vld [vmem:[#allocation2 + $0x28] sm:$0xff]  ;;  %4153 = vst [vmem:[%s6674_s24 + $0x80] sm:$0xff] %v10446_v16 }
 0x3bd   : > { %4152 = vst [vmem:[%s6674_s24 + $0x78] sm:$0xff] %v10449_v61  ;;  %v10456_v59 = vld [vmem:[%s10311_s29 + $0x98] sm:$0xff]  ;;  %v10459_v20 = vld [vmem:[%s10311_s29 + $0x90] sm:$0xff]  ;;  %v4186_v18 = vld [vmem:[#allocation2 + $0x8] sm:$0xff] }
 0x3be   : > { %4156 = vst [vmem:[%s6674_s24 + $0x98] sm:$0xff] %v10456_v59  ;;  %4155 = vst [vmem:[%s6674_s24 + $0x90] sm:$0xff] %v10459_v20  ;;  %v10466_v11 = vld [vmem:[%s10311_s29 + $0xb0] sm:$0xff]  ;;  %v10469_v63 = vld [vmem:[%s10311_s29 + $0xa8] sm:$0xff] }
 0x3bf   : > { %4346 = vmatpush1.xpose.msra.mxu0 %v4206_v17  ;;  %6056 = vmatpush3.xpose.msra.mxu1 %v4208_v36  ;;  %v4235_v50 = vld [vmem:[#allocation2 + $0x190] sm:$0xff]  ;;  %4159 = vst [vmem:[%s6674_s24 + $0xb0] sm:$0xff] %v10466_v11  ;;  %4158 = vst [vmem:[%s6674_s24 + $0xa8] sm:$0xff] %v10469_v63  ;;  %v10476_v5 = vld [vmem:[%s10311_s29 + $0xc8] sm:$0xff] }
 0x3c0   : > { %4347 = vmatprep.subr.mxu0 %v4204_v46  ;;  %6057 = vmatprep.subr.mxu1 %v4253_v28  ;;  %v10479_v47 = vld [vmem:[%s10311_s29 + $0xc0] sm:$0xff]  ;;  %4162 = vst [vmem:[%s6674_s24 + $0xc8] sm:$0xff] %v10476_v5  ;;  %v10489_v17 = vld [vmem:[%s10311_s29 + $0xd8] sm:$0xff]  ;;  %v4187_v36 = vld [vmem:[#allocation2 + $0x10] sm:$0xff] }
 0x3c1   : > { %v4185_v56 = vld [vmem:[#allocation2] sm:$0xff]  ;;  %4161 = vst [vmem:[%s6674_s24 + $0xc0] sm:$0xff] %v10479_v47  ;;  %4164 = vst [vmem:[%s6674_s24 + $0xd8] sm:$0xff] %v10489_v17  ;;  %v10496_v46 = vld [vmem:[%s10311_s29 + $0xf8] sm:$0xff] }
 0x3c2   : > { %v10486_v3 = vld [vmem:[%s10311_s29 + $0xe0] sm:$0xff]  ;;  %v10499_v28 = vld [vmem:[%s10311_s29 + $0xf0] sm:$0xff]  ;;  %4168 = vst [vmem:[%s6674_s24 + $0xf8] sm:$0xff] %v10496_v46 }
 0x3c3   : > { %4348 = vmatpush1.xpose.msra.mxu0 %v4203_v6  ;;  %6058 = vmatpush3.xpose.msra.mxu1 %v4205_v1  ;;  %4165 = vst [vmem:[%s6674_s24 + $0xe0] sm:$0xff] %v10486_v3  ;;  %v4279_v6 = vld [vmem:[#allocation2 + $0x2f0] sm:$0xff]  ;;  %4167 = vst [vmem:[%s6674_s24 + $0xf0] sm:$0xff] %v10499_v28 }
 0x3c4   : > { %4349 = vmatprep.subr.mxu0 %v4201_v26  ;;  %6059 = vmatprep.subr.mxu1 %v4250_v15  ;;  %v10506_v1 = vld [vmem:[%s10311_s29 + $0x110] sm:$0xff]  ;;  %v10509_v26 = vld [vmem:[%s10311_s29 + $0x108] sm:$0xff] }
 0x3c5   : > { %v4327_v15 = vld [vmem:[#allocation2 + $0x470] sm:$0xff]  ;;  %4171 = vst [vmem:[%s6674_s24 + $0x110] sm:$0xff] %v10506_v1  ;;  %4170 = vst [vmem:[%s6674_s24 + $0x108] sm:$0xff] %v10509_v26 }
 0x3c7   : > { %4350 = vmatpush1.xpose.msra.mxu0 %v4200_v42  ;;  %6060 = vmatpush3.xpose.msra.mxu1 %v4202_v4  ;;  %v10516_v42 = vld [vmem:[%s10311_s29 + $0x128] sm:$0xff]  ;;  %v10519_v4 = vld [vmem:[%s10311_s29 + $0x120] sm:$0xff] }
 0x3c8   : > { %4351 = vmatprep.subr.mxu0 %v4198_v43  ;;  %6061 = vmatprep.subr.mxu1 %v4247_v21  ;;  %4174 = vst [vmem:[%s6674_s24 + $0x128] sm:$0xff] %v10516_v42  ;;  %4173 = vst [vmem:[%s6674_s24 + $0x120] sm:$0xff] %v10519_v4  ;;  %v10526_v43 = vld [vmem:[%s10311_s29 + $0x140] sm:$0xff]  ;;  %v10529_v21 = vld [vmem:[%s10311_s29 + $0x138] sm:$0xff] }
 0x3c9   : > { %4177 = vst [vmem:[%s6674_s24 + $0x140] sm:$0xff] %v10526_v43  ;;  %4176 = vst [vmem:[%s6674_s24 + $0x138] sm:$0xff] %v10529_v21 }
 0x3cb   : > { %4352 = vmatpush1.xpose.msra.mxu0 %v4197_v37  ;;  %6062 = vmatpush3.xpose.msra.mxu1 %v4199_v57  ;;  %v4278_v37 = vld [vmem:[#allocation2 + $0x2e8] sm:$0xff]  ;;  %v10536_v57 = vld [vmem:[%s10311_s29 + $0x158] sm:$0xff] }
 0x3cc   : > { %4353 = vmatprep.subr.mxu0 %v4195_v31  ;;  %6063 = vmatprep.subr.mxu1 %v4244_v35  ;;  %v10539_v31 = vld [vmem:[%s10311_s29 + $0x150] sm:$0xff]  ;;  %v4326_v35 = vld [vmem:[#allocation2 + $0x468] sm:$0xff]  ;;  %4180 = vst [vmem:[%s6674_s24 + $0x158] sm:$0xff] %v10536_v57 }
 0x3cd   : > { %4179 = vst [vmem:[%s6674_s24 + $0x150] sm:$0xff] %v10539_v31 }
 0x3cf   : > { %4354 = vmatpush1.xpose.msra.mxu0 %v4194_v51  ;;  %6064 = vmatpush3.xpose.msra.mxu1 %v4196_v10  ;;  %v10546_v51 = vld [vmem:[%s10311_s29 + $0x170] sm:$0xff]  ;;  %v10549_v10 = vld [vmem:[%s10311_s29 + $0x168] sm:$0xff] }
 0x3d0   : > { %4355 = vmatprep.subr.mxu0 %v4192_v53  ;;  %6065 = vmatprep.subr.mxu1 %v4241_v14  ;;  %v4276_v53 = vld [vmem:[#allocation2 + $0x2d8] sm:$0xff]  ;;  %4183 = vst [vmem:[%s6674_s24 + $0x170] sm:$0xff] %v10546_v51  ;;  %4182 = vst [vmem:[%s6674_s24 + $0x168] sm:$0xff] %v10549_v10 }
 0x3d1   : > { %v4324_v14 = vld [vmem:[#allocation2 + $0x458] sm:$0xff] }
 0x3d3   : > { %4356 = vmatpush1.xpose.msra.mxu0 %v4191_v13  ;;  %6066 = vmatpush3.xpose.msra.mxu1 %v4193_v41  ;;  %v4275_v13 = vld [vmem:[#allocation2 + $0x2d0] sm:$0xff] }
 0x3d4   : > { %4357 = vmatprep.subr.mxu0 %v4189_v7  ;;  %6067 = vmatprep.subr.mxu1 %v4238_v39  ;;  %v4323_v41 = vld [vmem:[#allocation2 + $0x450] sm:$0xff]  ;;  %v4273_v7 = vld [vmem:[#allocation2 + $0x2c0] sm:$0xff] }
 0x3d5   : > { %v4321_v39 = vld [vmem:[#allocation2 + $0x440] sm:$0xff] }
 0x3d7   : > { %4358 = vmatpush1.xpose.msra.mxu0 %v4188_v19  ;;  %6068 = vmatpush3.xpose.msra.mxu1 %v4190_v25  ;;  %v4272_v19 = vld [vmem:[#allocation2 + $0x2b8] sm:$0xff] }
 0x3d8   : > { %4359 = vmatprep.subr.mxu0 %v4186_v18  ;;  %6069 = vmatprep.subr.mxu1 %v4235_v50  ;;  %v4320_v25 = vld [vmem:[#allocation2 + $0x438] sm:$0xff]  ;;  %v4270_v18 = vld [vmem:[#allocation2 + $0x2a8] sm:$0xff] }
 0x3d9   : > { %v4318_v50 = vld [vmem:[#allocation2 + $0x428] sm:$0xff] }
 0x3db   : > { %4360 = vmatpush1.xpose.msra.mxu0 %v4185_v56  ;;  %6070 = vmatpush3.xpose.msra.mxu1 %v4187_v36  ;;  %v4269_v56 = vld [vmem:[#allocation2 + $0x2a0] sm:$0xff] }
 0x3dc   : > { %4361 = vmatprep.subr.mxu0 %v4279_v6  ;;  %4651 = vmatprep.subr.mxu1 %v4327_v15  ;;  %v4317_v36 = vld [vmem:[#allocation2 + $0x420] sm:$0xff]  ;;  %v4267_v6 = vld [vmem:[#allocation2 + $0x290] sm:$0xff] }
 0x3dd   : > { %v4315_v15 = vld [vmem:[#allocation2 + $0x410] sm:$0xff] }
 0x3de   : > { %6072 = vmatmul.mubr.f32.vlgmr.msra.gmra.mxu1 %v10314_v32 }
 0x3df   : > { %4362 = vmatpush2.xpose.msra.mxu0 %v4278_v37  ;;  %4652 = vmatpush1.xpose.msra.mxu1 %v4326_v35  ;;  %v4266_v37 = vld [vmem:[#allocation2 + $0x288] sm:$0xff] }
 0x3e0   : > { %6073 = vmatprep.mubr.f32.mxu1 %v10319_v30  ;;  %4363 = vmatprep.subr.mxu0 %v4276_v53  ;;  %v4314_v35 = vld [vmem:[#allocation2 + $0x408] sm:$0xff]  ;;  %v4264_v53 = vld [vmem:[#allocation2 + $0x278] sm:$0xff] }
 0x3e1   : > { %4653 = vmatprep.subr.mxu1 %v4324_v14  ;;  %v4312_v14 = vld [vmem:[#allocation2 + $0x3f8] sm:$0xff] }
 0x3e2   : > { %6074 = vmatmul.mubr.f32.gmra.mxu1 %v10319_v30 }
 0x3e3   : > { %4364 = vmatpush2.xpose.msra.mxu0 %v4275_v13  ;;  %4654 = vmatpush1.xpose.msra.mxu1 %v4323_v41  ;;  %v4263_v13 = vld [vmem:[#allocation2 + $0x270] sm:$0xff] }
 0x3e4   : > { %6075 = vmatprep.mubr.f32.mxu1 %v10325_v49  ;;  %4365 = vmatprep.subr.mxu0 %v4273_v7  ;;  %v4311_v41 = vld [vmem:[#allocation2 + $0x3f0] sm:$0xff]  ;;  %v4261_v7 = vld [vmem:[#allocation2 + $0x260] sm:$0xff] }
 0x3e5   : > { %4655 = vmatprep.subr.mxu1 %v4321_v39  ;;  %v4309_v39 = vld [vmem:[#allocation2 + $0x3e0] sm:$0xff] }
 0x3e6   : > { %6076 = vmatmul.mubr.f32.gmra.mxu1 %v10325_v49 }
 0x3e7   : > { %4366 = vmatpush2.xpose.msra.mxu0 %v4272_v19  ;;  %4656 = vmatpush1.xpose.msra.mxu1 %v4320_v25  ;;  %v4260_v19 = vld [vmem:[#allocation2 + $0x258] sm:$0xff] }
 0x3e8   : > { %6077 = vmatprep.mubr.f32.mxu1 %v10330_v9  ;;  %4367 = vmatprep.subr.mxu0 %v4270_v18  ;;  %v4308_v25 = vld [vmem:[#allocation2 + $0x3d8] sm:$0xff]  ;;  %v4258_v18 = vld [vmem:[#allocation2 + $0x248] sm:$0xff] }
 0x3e9   : > { %4657 = vmatprep.subr.mxu1 %v4318_v50  ;;  %v4306_v50 = vld [vmem:[#allocation2 + $0x3c8] sm:$0xff] }
 0x3ea   : > { %6078 = vmatmul.mubr.f32.gmra.mxu1 %v10330_v9 }
 0x3eb   : > { %4368 = vmatpush2.xpose.msra.mxu0 %v4269_v56  ;;  %4658 = vmatpush1.xpose.msra.mxu1 %v4317_v36  ;;  %v4257_v56 = vld [vmem:[#allocation2 + $0x240] sm:$0xff] }
 0x3ec   : > { %6079 = vmatprep.mubr.f32.mxu1 %v10335_v55  ;;  %4369 = vmatprep.subr.mxu0 %v4267_v6  ;;  %v4305_v36 = vld [vmem:[#allocation2 + $0x3c0] sm:$0xff]  ;;  %v4255_v6 = vld [vmem:[#allocation2 + $0x230] sm:$0xff] }
 0x3ed   : > { %4659 = vmatprep.subr.mxu1 %v4315_v15  ;;  %v4303_v15 = vld [vmem:[#allocation2 + $0x3b0] sm:$0xff] }
 0x3ee   : > { %6080 = vmatmul.mubr.f32.gmra.mxu1 %v10335_v55 }
 0x3ef   : > { %4370 = vmatpush2.xpose.msra.mxu0 %v4266_v37  ;;  %4660 = vmatpush1.xpose.msra.mxu1 %v4314_v35  ;;  %v4254_v37 = vld [vmem:[#allocation2 + $0x228] sm:$0xff] }
 0x3f0   : > { %6081 = vmatprep.mubr.f32.mxu1 %v10340_v48  ;;  %4371 = vmatprep.subr.mxu0 %v4264_v53  ;;  %v4302_v35 = vld [vmem:[#allocation2 + $0x3a8] sm:$0xff]  ;;  %v4252_v53 = vld [vmem:[#allocation2 + $0x218] sm:$0xff] }
 0x3f1   : > { %4661 = vmatprep.subr.mxu1 %v4312_v14  ;;  %v4300_v14 = vld [vmem:[#allocation2 + $0x398] sm:$0xff] }
 0x3f2   : > { %6082 = vmatmul.mubr.f32.gmra.mxu1 %v10340_v48 }
 0x3f3   : > { %4372 = vmatpush2.xpose.msra.mxu0 %v4263_v13  ;;  %4662 = vmatpush1.xpose.msra.mxu1 %v4311_v41  ;;  %v4251_v13 = vld [vmem:[#allocation2 + $0x210] sm:$0xff] }
 0x3f4   : > { %6083 = vmatprep.mubr.f32.mxu1 %v10345_v23  ;;  %4373 = vmatprep.subr.mxu0 %v4261_v7  ;;  %v4299_v41 = vld [vmem:[#allocation2 + $0x390] sm:$0xff]  ;;  %v4249_v7 = vld [vmem:[#allocation2 + $0x200] sm:$0xff] }
 0x3f5   : > { %4663 = vmatprep.subr.mxu1 %v4309_v39  ;;  %v4297_v39 = vld [vmem:[#allocation2 + $0x380] sm:$0xff] }
 0x3f6   : > { %6084 = vmatmul.mubr.f32.gmra.mxu1 %v10345_v23 }
 0x3f7   : > { %4374 = vmatpush2.xpose.msra.mxu0 %v4260_v19  ;;  %4664 = vmatpush1.xpose.msra.mxu1 %v4308_v25  ;;  %v4248_v19 = vld [vmem:[#allocation2 + $0x1f8] sm:$0xff] }
 0x3f8   : > { %6085 = vmatprep.mubr.f32.mxu1 %v10350_v62  ;;  %4375 = vmatprep.subr.mxu0 %v4258_v18  ;;  %v4296_v25 = vld [vmem:[#allocation2 + $0x378] sm:$0xff]  ;;  %v4246_v18 = vld [vmem:[#allocation2 + $0x1e8] sm:$0xff] }
 0x3f9   : > { %4665 = vmatprep.subr.mxu1 %v4306_v50  ;;  %v4294_v50 = vld [vmem:[#allocation2 + $0x368] sm:$0xff] }
 0x3fa   : > { %6086 = vmatmul.mubr.f32.gmra.mxu1 %v10350_v62 }
 0x3fb   : > { %4376 = vmatpush2.xpose.msra.mxu0 %v4257_v56  ;;  %4666 = vmatpush1.xpose.msra.mxu1 %v4305_v36  ;;  %v4245_v56 = vld [vmem:[#allocation2 + $0x1e0] sm:$0xff] }
 0x3fc   : > { %6087 = vmatprep.mubr.f32.mxu1 %v10355_v38  ;;  %4377 = vmatprep.subr.mxu0 %v4255_v6  ;;  %v4293_v36 = vld [vmem:[#allocation2 + $0x360] sm:$0xff]  ;;  %v4243_v6 = vld [vmem:[#allocation2 + $0x1d0] sm:$0xff] }
 0x3fd   : > { %4667 = vmatprep.subr.mxu1 %v4303_v15  ;;  %v4291_v15 = vld [vmem:[#allocation2 + $0x350] sm:$0xff] }
 0x3fe   : > { %6088 = vmatmul.mubr.f32.gmra.mxu1 %v10355_v38 }
 0x3ff   : > { %4378 = vmatpush2.xpose.msra.mxu0 %v4254_v37  ;;  %4668 = vmatpush1.xpose.msra.mxu1 %v4302_v35  ;;  %v4242_v37 = vld [vmem:[#allocation2 + $0x1c8] sm:$0xff] }
 0x400   : > { %6089 = vmatprep.mubr.f32.mxu1 %v10360_v40  ;;  %4379 = vmatprep.subr.mxu0 %v4252_v53  ;;  %v4290_v35 = vld [vmem:[#allocation2 + $0x348] sm:$0xff]  ;;  %v4240_v53 = vld [vmem:[#allocation2 + $0x1b8] sm:$0xff] }
 0x401   : > { %4669 = vmatprep.subr.mxu1 %v4300_v14  ;;  %v4288_v14 = vld [vmem:[#allocation2 + $0x338] sm:$0xff] }
 0x402   : > { %6090 = vmatmul.mubr.f32.gmra.mxu1 %v10360_v40 }
 0x403   : > { %4380 = vmatpush2.xpose.msra.mxu0 %v4251_v13  ;;  %4670 = vmatpush1.xpose.msra.mxu1 %v4299_v41  ;;  %v4239_v13 = vld [vmem:[#allocation2 + $0x1b0] sm:$0xff] }
 0x404   : > { %6091 = vmatprep.mubr.f32.mxu1 %v10365_v45  ;;  %4381 = vmatprep.subr.mxu0 %v4249_v7  ;;  %v4287_v41 = vld [vmem:[#allocation2 + $0x330] sm:$0xff]  ;;  %v4237_v7 = vld [vmem:[#allocation2 + $0x1a0] sm:$0xff] }
 0x405   : > { %4671 = vmatprep.subr.mxu1 %v4297_v39  ;;  %v4285_v39 = vld [vmem:[#allocation2 + $0x320] sm:$0xff] }
 0x406   : > { %6092 = vmatmul.mubr.f32.gmra.mxu1 %v10365_v45 }
 0x407   : > { %4382 = vmatpush2.xpose.msra.mxu0 %v4248_v19  ;;  %4672 = vmatpush1.xpose.msra.mxu1 %v4296_v25  ;;  %v4236_v19 = vld [vmem:[#allocation2 + $0x198] sm:$0xff] }
 0x408   : > { %6093 = vmatprep.mubr.f32.mxu1 %v10370_v2  ;;  %4383 = vmatprep.subr.mxu0 %v4246_v18  ;;  %v4284_v25 = vld [vmem:[#allocation2 + $0x318] sm:$0xff]  ;;  %v4234_v18 = vld [vmem:[#allocation2 + $0x188] sm:$0xff] }
 0x409   : > { %4673 = vmatprep.subr.mxu1 %v4294_v50  ;;  %v4282_v50 = vld [vmem:[#allocation2 + $0x308] sm:$0xff] }
 0x40a   : > { %6094 = vmatmul.mubr.f32.gmra.mxu1 %v10370_v2 }
 0x40b   : > { %4384 = vmatpush2.xpose.msra.mxu0 %v4245_v56  ;;  %4674 = vmatpush1.xpose.msra.mxu1 %v4293_v36  ;;  %v4233_v56 = vld [vmem:[#allocation2 + $0x180] sm:$0xff] }
 0x40c   : > { %6095 = vmatprep.mubr.f32.mxu1 %v10375_v12  ;;  %4385 = vmatprep.subr.mxu0 %v4243_v6  ;;  %v4281_v36 = vld [vmem:[#allocation2 + $0x300] sm:$0xff]  ;;  %v4328_v6 = vld [vmem:[#allocation2 + $0x478] sm:$0xff] }
 0x40d   : > { %4675 = vmatprep.subr.mxu1 %v4291_v15  ;;  %v4325_v15 = vld [vmem:[#allocation2 + $0x460] sm:$0xff] }
 0x40e   : > { %6096 = vmatmul.mubr.f32.gmra.mxu1 %v10375_v12 }
 0x40f   : > { %4386 = vmatpush2.xpose.msra.mxu0 %v4242_v37  ;;  %4676 = vmatpush1.xpose.msra.mxu1 %v4290_v35 }
 0x410   : > { %6097 = vmatprep.mubr.f32.mxu1 %v10380_v58  ;;  %4387 = vmatprep.subr.mxu0 %v4240_v53 }
 0x411   : > { %4677 = vmatprep.subr.mxu1 %v4288_v14 }
 0x412   : > { %6098 = vmatmul.mubr.f32.gmra.mxu1 %v10380_v58 }
 0x413   : > { %4388 = vmatpush2.xpose.msra.mxu0 %v4239_v13  ;;  %4678 = vmatpush1.xpose.msra.mxu1 %v4287_v41 }
 0x414   : > { %6099 = vmatprep.mubr.f32.mxu1 %v10385_v44  ;;  %4389 = vmatprep.subr.mxu0 %v4237_v7 }
 0x415   : > { %4679 = vmatprep.subr.mxu1 %v4285_v39 }
 0x416   : > { %6100 = vmatmul.mubr.f32.gmra.mxu1 %v10385_v44 }
 0x417   : > { %4390 = vmatpush2.xpose.msra.mxu0 %v4236_v19  ;;  %4680 = vmatpush1.xpose.msra.mxu1 %v4284_v25 }
 0x418   : > { %6101 = vmatprep.mubr.f32.mxu1 %v10390_v24  ;;  %4391 = vmatprep.subr.mxu0 %v4234_v18 }
 0x419   : > { %4681 = vmatprep.subr.mxu1 %v4282_v50 }
 0x41a   : > { %6102 = vmatmul.mubr.f32.gmra.mxu1 %v10390_v24 }
 0x41b   : > { %4392 = vmatpush2.xpose.msra.mxu0 %v4233_v56  ;;  %4682 = vmatpush1.xpose.msra.mxu1 %v4281_v36 }
 0x41c   : > { %4715 = vmatprep.mubr.f32.mxu1 %v10395_v34  ;;  %6419 = vmatprep.subr.mxu0 %v4328_v6  ;;  %v4322_v34 = vld [vmem:[#allocation2 + $0x448] sm:$0xff] }
 0x41d   : > { %6479 = vmatprep.subr.mxu1 %v4328_v6 }
 0x41e   : > { %4394 = vmatmul.mubr.f32.vlgmr.msra.gmra.mxu0 %v10398_v0  ;;  %4716 = vmatmul.mubr.f32.vlgmr.msra.gmra.mxu1 %v10398_v0  ;;  %v4319_v0 = vld [vmem:[#allocation2 + $0x430] sm:$0xff] }
 0x41f   : > { %6420 = vmatpush3.xpose.msra.mxu0 %v4328_v6  ;;  %6495 = vmatpush3.xpose.msra.mxu1 %v4328_v6 }
 0x420   : > { %4399 = vmatprep.mubr.f32.mxu0 %v10406_v60  ;;  %4720 = vmatprep.mubr.f32.mxu1 %v10406_v60  ;;  %v4316_v60 = vld [vmem:[#allocation2 + $0x418] sm:$0xff] }
 0x421   : > { %6421 = vmatprep.subr.mxu0 %v4325_v15  ;;  %6480 = vmatprep.subr.mxu1 %v4325_v15 }
 0x422   : > { %4400 = vmatmul.mubr.f32.gmra.mxu0 %v10409_v29  ;;  %4721 = vmatmul.mubr.f32.gmra.mxu1 %v10409_v29  ;;  %v4313_v29 = vld [vmem:[#allocation2 + $0x400] sm:$0xff] }
 0x423   : > { %6422 = vmatpush3.xpose.msra.mxu0 %v4325_v15  ;;  %6496 = vmatpush3.xpose.msra.mxu1 %v4325_v15 }
 0x424   : > { %4405 = vmatprep.mubr.f32.mxu0 %v10416_v27  ;;  %4725 = vmatprep.mubr.f32.mxu1 %v10416_v27  ;;  %v4310_v27 = vld [vmem:[#allocation2 + $0x3e8] sm:$0xff] }
 0x425   : > { %6423 = vmatprep.subr.mxu0 %v4322_v34  ;;  %6481 = vmatprep.subr.mxu1 %v4322_v34 }
 0x426   : > { %4406 = vmatmul.mubr.f32.gmra.mxu0 %v10419_v33  ;;  %4726 = vmatmul.mubr.f32.gmra.mxu1 %v10419_v33  ;;  %v4307_v33 = vld [vmem:[#allocation2 + $0x3d0] sm:$0xff] }
 0x427   : > { %6424 = vmatpush3.xpose.msra.mxu0 %v4322_v34  ;;  %6497 = vmatpush3.xpose.msra.mxu1 %v4322_v34 }
 0x428   : > { %4411 = vmatprep.mubr.f32.mxu0 %v10426_v52  ;;  %4730 = vmatprep.mubr.f32.mxu1 %v10426_v52  ;;  %v4304_v52 = vld [vmem:[#allocation2 + $0x3b8] sm:$0xff] }
 0x429   : > { %6425 = vmatprep.subr.mxu0 %v4319_v0  ;;  %6482 = vmatprep.subr.mxu1 %v4319_v0 }
 0x42a   : > { %4412 = vmatmul.mubr.f32.gmra.mxu0 %v10429_v22  ;;  %4731 = vmatmul.mubr.f32.gmra.mxu1 %v10429_v22  ;;  %v4301_v22 = vld [vmem:[#allocation2 + $0x3a0] sm:$0xff] }
 0x42b   : > { %6426 = vmatpush3.xpose.msra.mxu0 %v4319_v0  ;;  %6498 = vmatpush3.xpose.msra.mxu1 %v4319_v0 }
 0x42c   : > { %4417 = vmatprep.mubr.f32.mxu0 %v10436_v54  ;;  %4735 = vmatprep.mubr.f32.mxu1 %v10436_v54  ;;  %v4298_v54 = vld [vmem:[#allocation2 + $0x388] sm:$0xff] }
 0x42d   : > { %6427 = vmatprep.subr.mxu0 %v4316_v60  ;;  %6483 = vmatprep.subr.mxu1 %v4316_v60 }
 0x42e   : > { %4418 = vmatmul.mubr.f32.gmra.mxu0 %v10439_v8  ;;  %4736 = vmatmul.mubr.f32.gmra.mxu1 %v10439_v8  ;;  %v4295_v8 = vld [vmem:[#allocation2 + $0x370] sm:$0xff] }
 0x42f   : > { %6428 = vmatpush3.xpose.msra.mxu0 %v4316_v60  ;;  %6499 = vmatpush3.xpose.msra.mxu1 %v4316_v60 }
 0x430   : > { %4423 = vmatprep.mubr.f32.mxu0 %v10446_v16  ;;  %4740 = vmatprep.mubr.f32.mxu1 %v10446_v16  ;;  %v4292_v16 = vld [vmem:[#allocation2 + $0x358] sm:$0xff] }
 0x431   : > { %6429 = vmatprep.subr.mxu0 %v4313_v29  ;;  %6484 = vmatprep.subr.mxu1 %v4313_v29 }
 0x432   : > { %4424 = vmatmul.mubr.f32.gmra.mxu0 %v10449_v61  ;;  %4741 = vmatmul.mubr.f32.gmra.mxu1 %v10449_v61  ;;  %v4289_v61 = vld [vmem:[#allocation2 + $0x340] sm:$0xff] }
 0x433   : > { %6430 = vmatpush3.xpose.msra.mxu0 %v4313_v29  ;;  %6500 = vmatpush3.xpose.msra.mxu1 %v4313_v29 }
 0x434   : > { %4429 = vmatprep.mubr.f32.mxu0 %v10456_v59  ;;  %4745 = vmatprep.mubr.f32.mxu1 %v10456_v59  ;;  %v4286_v59 = vld [vmem:[#allocation2 + $0x328] sm:$0xff] }
 0x435   : > { %6431 = vmatprep.subr.mxu0 %v4310_v27  ;;  %6485 = vmatprep.subr.mxu1 %v4310_v27 }
 0x436   : > { %4430 = vmatmul.mubr.f32.gmra.mxu0 %v10459_v20  ;;  %4746 = vmatmul.mubr.f32.gmra.mxu1 %v10459_v20  ;;  %v4283_v20 = vld [vmem:[#allocation2 + $0x310] sm:$0xff] }
 0x437   : > { %6432 = vmatpush3.xpose.msra.mxu0 %v4310_v27  ;;  %6501 = vmatpush3.xpose.msra.mxu1 %v4310_v27 }
 0x438   : > { %4435 = vmatprep.mubr.f32.mxu0 %v10466_v11  ;;  %4750 = vmatprep.mubr.f32.mxu1 %v10466_v11 }
 0x439   : > { %6433 = vmatprep.subr.mxu0 %v4307_v33  ;;  %6486 = vmatprep.subr.mxu1 %v4307_v33 }
 0x43a   : > { %4436 = vmatmul.mubr.f32.gmra.mxu0 %v10469_v63  ;;  %4751 = vmatmul.mubr.f32.gmra.mxu1 %v10469_v63 }
 0x43b   : > { %6434 = vmatpush3.xpose.msra.mxu0 %v4307_v33  ;;  %6502 = vmatpush3.xpose.msra.mxu1 %v4307_v33 }
 0x43c   : > { %4441 = vmatprep.mubr.f32.mxu0 %v10476_v5  ;;  %4755 = vmatprep.mubr.f32.mxu1 %v10476_v5 }
 0x43d   : > { %6435 = vmatprep.subr.mxu0 %v4304_v52  ;;  %6487 = vmatprep.subr.mxu1 %v4304_v52 }
 0x43e   : > { %4442 = vmatmul.mubr.f32.gmra.mxu0 %v10479_v47  ;;  %4756 = vmatmul.mubr.f32.gmra.mxu1 %v10479_v47 }
 0x43f   : > { %6436 = vmatpush3.xpose.msra.mxu0 %v4304_v52  ;;  %6503 = vmatpush3.xpose.msra.mxu1 %v4304_v52 }
 0x440   : > { %4447 = vmatprep.mubr.f32.mxu0 %v10486_v3  ;;  %4760 = vmatprep.mubr.f32.mxu1 %v10486_v3 }
 0x441   : > { %6437 = vmatprep.subr.mxu0 %v4301_v22  ;;  %6488 = vmatprep.subr.mxu1 %v4301_v22 }
 0x442   : > { %4448 = vmatmul.mubr.f32.gmra.mxu0 %v10489_v17  ;;  %4761 = vmatmul.mubr.f32.gmra.mxu1 %v10489_v17 }
 0x443   : > { %6438 = vmatpush3.xpose.msra.mxu0 %v4301_v22  ;;  %6504 = vmatpush3.xpose.msra.mxu1 %v4301_v22 }
 0x444   : > { %4453 = vmatprep.mubr.f32.mxu0 %v10496_v46  ;;  %4765 = vmatprep.mubr.f32.mxu1 %v10496_v46 }
 0x445   : > { %6439 = vmatprep.subr.mxu0 %v4298_v54  ;;  %6489 = vmatprep.subr.mxu1 %v4298_v54 }
 0x446   : > { %4454 = vmatmul.mubr.f32.gmra.mxu0 %v10499_v28  ;;  %4766 = vmatmul.mubr.f32.gmra.mxu1 %v10499_v28 }
 0x447   : > { %6440 = vmatpush3.xpose.msra.mxu0 %v4298_v54  ;;  %6505 = vmatpush3.xpose.msra.mxu1 %v4298_v54 }
 0x448   : > { %4459 = vmatprep.mubr.f32.mxu0 %v10506_v1  ;;  %4770 = vmatprep.mubr.f32.mxu1 %v10506_v1 }
 0x449   : > { %6441 = vmatprep.subr.mxu0 %v4295_v8  ;;  %6490 = vmatprep.subr.mxu1 %v4295_v8 }
 0x44a   : > { %4460 = vmatmul.mubr.f32.gmra.mxu0 %v10509_v26  ;;  %4771 = vmatmul.mubr.f32.gmra.mxu1 %v10509_v26 }
 0x44b   : > { %6442 = vmatpush3.xpose.msra.mxu0 %v4295_v8  ;;  %6506 = vmatpush3.xpose.msra.mxu1 %v4295_v8 }
 0x44c   : > { %4465 = vmatprep.mubr.f32.mxu0 %v10516_v42  ;;  %4775 = vmatprep.mubr.f32.mxu1 %v10516_v42 }
 0x44d   : > { %6443 = vmatprep.subr.mxu0 %v4292_v16  ;;  %6491 = vmatprep.subr.mxu1 %v4292_v16 }
 0x44e   : > { %4466 = vmatmul.mubr.f32.gmra.mxu0 %v10519_v4  ;;  %4776 = vmatmul.mubr.f32.gmra.mxu1 %v10519_v4  ;;  %v4941_v4 = vlaneseq }
 0x44f   : > { %6444 = vmatpush3.xpose.msra.mxu0 %v4292_v16  ;;  %6507 = vmatpush3.xpose.msra.mxu1 %v4292_v16 }
 0x450   : > { %4471 = vmatprep.mubr.f32.mxu0 %v10526_v43  ;;  %4780 = vmatprep.mubr.f32.mxu1 %v10526_v43 }
 0x451   : > { %6445 = vmatprep.subr.mxu0 %v4289_v61  ;;  %6492 = vmatprep.subr.mxu1 %v4289_v61 }
 0x452   : > { %4472 = vmatmul.mubr.f32.gmra.mxu0 %v10529_v21  ;;  %4781 = vmatmul.mubr.f32.gmra.mxu1 %v10529_v21 }
 0x453   : > { %6446 = vmatpush3.xpose.msra.mxu0 %v4289_v61  ;;  %6508 = vmatpush3.xpose.msra.mxu1 %v4289_v61 }
 0x454   : > { %4477 = vmatprep.mubr.f32.mxu0 %v10536_v57  ;;  %4785 = vmatprep.mubr.f32.mxu1 %v10536_v57  ;;  %v10715_v57 = vshrl.u32 %v4941_v4, 7 }
 0x455   : > { %6447 = vmatprep.subr.mxu0 %v4286_v59  ;;  %6493 = vmatprep.subr.mxu1 %v4286_v59 }
 0x456   : > { %4478 = vmatmul.mubr.f32.gmra.mxu0 %v10539_v31  ;;  %4786 = vmatmul.mubr.f32.gmra.mxu1 %v10539_v31  ;;  %v10719_v31 = vstv %s5600_s25  ;;  %v4943_v53 = vadd.s32 8, %v10715_v57  ;;  %v4944_v19 = vadd.s32 16, %v10715_v57  ;;  %v4945_v60 = vadd.s32 24, %v10715_v57 }
 0x457   : > { %6448 = vmatpush3.xpose.msra.mxu0 %v4286_v59  ;;  %6509 = vmatpush3.xpose.msra.mxu1 %v4286_v59  ;;  %v10729_v35 = vadd.s32 %v10719_v31, %v10715_v57 }
 0x458   : > { %4483 = vmatprep.mubr.f32.mxu0 %v10546_v51  ;;  %4790 = vmatprep.mubr.f32.mxu1 %v10546_v51  ;;  %v10742_v39 = vadd.s32 %v10719_v31, %v4943_v53  ;;  %v10752_v0 = vadd.s32 %v10719_v31, %v4944_v19 }
 0x459   : > { %6449 = vmatprep.subr.mxu0 %v4283_v20  ;;  %6494 = vmatprep.subr.mxu1 %v4283_v20 }
 0x45a   : > { %4484 = vmatmul.mubr.f32.gmra.mxu0 %v10549_v10  ;;  %4791 = vmatmul.mubr.f32.gmra.mxu1 %v10549_v10  ;;  %v10723_v10 = vand.u32 127, %v4941_v4 }
 0x45b   : > { %6450 = vmatpush3.xpose.msra.mxu0 %v4283_v20  ;;  %6510 = vmatpush3.xpose.msra.mxu1 %v4283_v20  ;;  %v10764_v20 = vadd.s32 %v10719_v31, %v4945_v60 }
 0x45c   : > { %6451 = vmatprep.mubr.f32.mxu0 %v10314_v32  ;;  %6463 = vmatprep.mubr.f32.mxu1 %v10355_v38  ;;  %v10735_v13 = vadd.s32 128, %v10723_v10  ;;  %vm4979_vm11 = vcmp.eq.s32.totalorder %v10729_v35, %v10723_v10  ;;  %vm4982_vm1 = vcmp.eq.s32.totalorder %v10742_v39, %v10723_v10  ;;  %vm4985_vm4 = vcmp.eq.s32.totalorder %v10752_v0, %v10723_v10 }
 0x45d   : > { %vm4988_vm6 = vcmp.eq.s32.totalorder %v10764_v20, %v10723_v10 }
 0x45e   : > { %6452 = vmatmul.mubr.f32.vlgmr.msra.gmra.mxu0 %v10319_v30  ;;  %6464 = vmatmul.mubr.f32.vlgmr.msra.gmra.mxu1 %v10360_v40  ;;  %vm4980_vm14 = vcmp.eq.s32.totalorder %v10729_v35, %v10735_v13  ;;  %vm4983_vm3 = vcmp.eq.s32.totalorder %v10742_v39, %v10735_v13  ;;  %vm4986_vm5 = vcmp.eq.s32.totalorder %v10752_v0, %v10735_v13 }
 0x45f   : > { %6454 = vmatprep.mubr.f32.mxu0 %v10325_v49  ;;  %6466 = vmatprep.mubr.f32.mxu1 %v10365_v45  ;;  %vm4989_vm7 = vcmp.eq.s32.totalorder %v10764_v20, %v10735_v13 }
 0x462   : > { %6455 = vmatmul.mubr.f32.gmra.mxu0 %v10330_v9  ;;  %6467 = vmatmul.mubr.f32.gmra.mxu1 %v10370_v2 }
 0x463   : > { %6457 = vmatprep.mubr.f32.mxu0 %v10335_v55  ;;  %6469 = vmatprep.mubr.f32.mxu1 %v10375_v12 }
 0x466   : > { %6458 = vmatmul.mubr.f32.gmra.mxu0 %v10340_v48  ;;  %6470 = vmatmul.mubr.f32.gmra.mxu1 %v10380_v58 }
 0x467   : > { %6460 = vmatprep.mubr.f32.mxu0 %v10345_v23  ;;  %6472 = vmatprep.mubr.f32.mxu1 %v10385_v44 }
 0x46a   : > { %6461 = vmatmul.mubr.f32.gmra.mxu0 %v10350_v62  ;;  %6473 = vmatmul.mubr.f32.gmra.mxu1 %v10390_v24 }
 0x49e   : > { %v4556_v32 = vpop.f32.mrf.mxu1 }
 0x4a0   : > { %v4558_v30 = vpop.f32.mrf.mxu1 }
 0x4a2   : > { %v4562_v49 = vpop.f32.mrf.mxu1 }
 0x4a4   : > { %v4564_v9 = vpop.f32.mrf.mxu1 }
 0x4a6   : > { %v10665_v38 = vpop.f32.mrf.mxu1 }
 0x4a8   : > { %v10667_v55 = vpop.f32.mrf.mxu1 }
 0x4aa   : > { %v10669_v40 = vpop.f32.mrf.mxu1 }
 0x4ac   : > { %v10671_v48 = vpop.f32.mrf.mxu1 }
 0x4ae   : > { %v10673_v45 = vpop.f32.mrf.mxu1 }
 0x4b0   : > { %v10675_v23 = vpop.f32.mrf.mxu1 }
 0x4b2   : > { %v10677_v2 = vpop.f32.mrf.mxu1 }
 0x4b4   : > { %v10679_v62 = vpop.f32.mrf.mxu1 }
 0x4b6   : > { %v10681_v12 = vpop.f32.mrf.mxu1 }
 0x4b8   : > { %v10683_v58 = vpop.f32.mrf.mxu1 }
 0x4ba   : > { %v10685_v44 = vpop.f32.mrf.mxu1 }
 0x4bc   : > { %v10687_v24 = vpop.f32.mrf.mxu1 }
 0x4be   : > { %v10689_v11 = vpop.f32.mrf.mxu1 }
 0x4c0   : > { %v10691_v63 = vpop.f32.mrf.mxu1 }
 0x4c2   : > { %v10693_v5 = vpop.f32.mrf.mxu1 }
 0x4c4   : > { %v10695_v47 = vpop.f32.mrf.mxu1 }
 0x4c6   : > { %v10697_v3 = vpop.f32.mrf.mxu1 }
 0x4c8   : > { %v10699_v17 = vpop.f32.mrf.mxu1 }
 0x4ca   : > { %v10701_v46 = vpop.f32.mrf.mxu1 }
 0x4cc   : > { %v10703_v28 = vpop.f32.mrf.mxu1 }
 0x4ce   : > { %v10705_v1 = vpop.f32.mrf.mxu1 }
 0x4d0   : > { %v10707_v26 = vpop.f32.mrf.mxu1 }
 0x4d2   : > { %v10709_v42 = vpop.f32.mrf.mxu1 }
 0x4d4   : > { %v10711_v43 = vpop.f32.mrf.mxu1 }
 0x4d6   : > { %v10713_v21 = vpop.f32.mrf.mxu1 }
 0x4d8   : > { %v10721_v51 = vpop.f32.mrf.mxu1 }
 0x4da   : > { %v10725_v37 = vpop.f32.mrf.mxu1 }
 0x4dc   : > { %v10732_v14 = vpop.f32.mrf.mxu1 }
 0x4de   : > { %v4395_v41 = vpop.f32.mrf.mxu0  ;;  %v10739_v7 = vpop.f32.mrf.mxu1 }
 0x4df   : > { %v4557_v25 = vadd.f32 %v4556_v32, %v4395_v41  ;;  %v4946_v32 = vadd.s32 32, %v10715_v57 }
 0x4e0   : > { %v4397_v18 = vpop.f32.mrf.mxu0  ;;  %v4719_v50 = vpop.f32.mrf.mxu1 }
 0x4e1   : > { %v5027_v56 = vsel %vm4979_vm11, 1.0, %v4557_v25  ;;  %v4559_v36 = vadd.f32 %v4558_v30, %v4397_v18 }
 0x4e2   : > { %v5075_v6 = vand.u32 2147483647, %v5027_v56  ;;  %v4401_v15 = vpop.f32.mrf.mxu0  ;;  %v10749_v34 = vpop.f32.mrf.mxu1  ;;  %v4947_v56 = vadd.s32 40, %v10715_v57 }
 0x4e3   : > { %v5028_v29 = vsel %vm4980_vm14, 1.0, %v4559_v36  ;;  %v4563_v27 = vadd.f32 %v4562_v49, %v4401_v15 }
 0x4e4   : > { %5123 = vst [vmem:[%s6679_s27] sm:$0xff] %v5075_v6  ;;  %v5076_v33 = vand.u32 2147483647, %v5028_v29  ;;  %v4403_v52 = vpop.f32.mrf.mxu0  ;;  %v4724_v22 = vpop.f32.mrf.mxu1 }
 0x4e5   : > { %v5030_v54 = vsel %vm4982_vm1, 1.0, %v4563_v27  ;;  %v4565_v8 = vadd.f32 %v4564_v9, %v4403_v52 }
 0x4e6   : > { %5124 = vst [vmem:[%s6679_s27 + $0x8] sm:$0xff] %v5076_v33  ;;  %v5078_v16 = vand.u32 2147483647, %v5030_v54  ;;  %v4407_v61 = vpop.f32.mrf.mxu0  ;;  %v10761_v59 = vpop.f32.mrf.mxu1  ;;  %v4948_v54 = vadd.s32 48, %v10715_v57 }
 0x4e7   : > { %v5031_v30 = vsel %vm4983_vm3, 1.0, %v4565_v8  ;;  %v4569_v49 = vadd.f32 %v10665_v38, %v4407_v61  ;;  %v10778_v38 = vadd.s32 %v10719_v31, %v4946_v32 }
 0x4e8   : > { %5126 = vst [vmem:[%s6679_s27 + $0x18] sm:$0xff] %v5078_v16  ;;  %v5079_v9 = vand.u32 2147483647, %v5031_v30  ;;  %v4409_v4 = vpop.f32.mrf.mxu0  ;;  %v4729_v53 = vpop.f32.mrf.mxu1 }
 0x4e9   : > { %v5033_v41 = vsel %vm4985_vm4, 1.0, %v4569_v49  ;;  %v4571_v19 = vadd.f32 %v10667_v55, %v4409_v4  ;;  %vm4991_vm0 = vcmp.eq.s32.totalorder %v10778_v38, %v10723_v10  ;;  %vm4992_vm8 = vcmp.eq.s32.totalorder %v10778_v38, %v10735_v13 }
 0x4ea   : > { %5127 = vst [vmem:[%s6679_s27 + $0x20] sm:$0xff] %v5079_v9  ;;  %v5081_v25 = vand.u32 2147483647, %v5033_v41  ;;  %v4413_v18 = vpop.f32.mrf.mxu0  ;;  %v10775_v50 = vpop.f32.mrf.mxu1  ;;  %v4949_v41 = vadd.s32 56, %v10715_v57 }
 0x4eb   : > { %v5034_v36 = vsel %vm4986_vm5, 1.0, %v4571_v19  ;;  %v4575_v6 = vadd.f32 %v10669_v40, %v4413_v18  ;;  %v10792_v40 = vadd.s32 %v10719_v31, %v4947_v56 }
 0x4ec   : > { %5129 = vst [vmem:[%s6679_s27 + $0x30] sm:$0xff] %v5081_v25  ;;  %v5082_v55 = vand.u32 2147483647, %v5034_v36  ;;  %v4415_v15 = vpop.f32.mrf.mxu0  ;;  %v4734_v60 = vpop.f32.mrf.mxu1 }
 0x4ed   : > { %v5036_v29 = vsel %vm4988_vm6, 1.0, %v4575_v6  ;;  %v4577_v27 = vadd.f32 %v10671_v48, %v4415_v15  ;;  %vm4994_vm9 = vcmp.eq.s32.totalorder %v10792_v40, %v10723_v10  ;;  %vm4995_vm10 = vcmp.eq.s32.totalorder %v10792_v40, %v10735_v13 }
 0x4ee   : > { %5130 = vst [vmem:[%s6679_s27 + $0x38] sm:$0xff] %v5082_v55  ;;  %v5084_v33 = vand.u32 2147483647, %v5036_v29  ;;  %v4419_v52 = vpop.f32.mrf.mxu0  ;;  %v10789_v22 = vpop.f32.mrf.mxu1  ;;  %v4950_v29 = vadd.s32 64, %v10715_v57 }
 0x4ef   : > { %v5037_v8 = vsel %vm4989_vm7, 1.0, %v4577_v27  ;;  %v4581_v16 = vadd.f32 %v10673_v45, %v4419_v52  ;;  %v10806_v45 = vadd.s32 %v10719_v31, %v4948_v54 }
 0x4f0   : > { %5132 = vst [vmem:[%s6679_s27 + $0x48] sm:$0xff] %v5084_v33  ;;  %v5085_v48 = vand.u32 2147483647, %v5037_v8  ;;  %v4421_v61 = vpop.f32.mrf.mxu0  ;;  %v4739_v32 = vpop.f32.mrf.mxu1 }
 0x4f1   : > { %v5039_v30 = vsel %vm4991_vm0, 1.0, %v4581_v16  ;;  %v4583_v49 = vadd.f32 %v10675_v23, %v4421_v61  ;;  %vm4997_vm12 = vcmp.eq.s32.totalorder %v10806_v45, %v10723_v10  ;;  %vm4998_vm13 = vcmp.eq.s32.totalorder %v10806_v45, %v10735_v13 }
 0x4f2   : > { %5133 = vst [vmem:[%s6679_s27 + $0x50] sm:$0xff] %v5085_v48  ;;  %v5087_v9 = vand.u32 2147483647, %v5039_v30  ;;  %v4425_v4 = vpop.f32.mrf.mxu0  ;;  %v10803_v53 = vpop.f32.mrf.mxu1  ;;  %v4951_v30 = vadd.s32 72, %v10715_v57 }
 0x4f3   : > { %v5040_v19 = vsel %vm4992_vm8, 1.0, %v4583_v49  ;;  %v4587_v25 = vadd.f32 %v10677_v2, %v4425_v4  ;;  %v10820_v2 = vadd.s32 %v10719_v31, %v4949_v41 }
 0x4f4   : > { %5135 = vst [vmem:[%s6679_s27 + $0x60] sm:$0xff] %v5087_v9  ;;  %v5088_v23 = vand.u32 2147483647, %v5040_v19  ;;  %v4427_v18 = vpop.f32.mrf.mxu0  ;;  %v4744_v56 = vpop.f32.mrf.mxu1 }
 0x4f5   : > { %v5042_v36 = vsel %vm4994_vm9, 1.0, %v4587_v25  ;;  %v4589_v6 = vadd.f32 %v10679_v62, %v4427_v18  ;;  %vm5000_vm15 = vcmp.eq.s32.totalorder %v10820_v2, %v10723_v10  ;;  %vm5001_vm2 = vcmp.eq.s32.totalorder %v10820_v2, %v10735_v13 }
 0x4f6   : > { %5136 = vst [vmem:[%s6679_s27 + $0x68] sm:$0xff] %v5088_v23  ;;  %v5090_v55 = vand.u32 2147483647, %v5042_v36  ;;  %v4431_v15 = vpop.f32.mrf.mxu0  ;;  %v10817_v60 = vpop.f32.mrf.mxu1  ;;  %v4952_v36 = vadd.s32 80, %v10715_v57 }
 0x4f7   : > { %v5043_v27 = vsel %vm4995_vm10, 1.0, %v4589_v6  ;;  %v4593_v33 = vadd.f32 %v10681_v12, %v4431_v15  ;;  %v10834_v12 = vadd.s32 %v10719_v31, %v4950_v29 }
 0x4f8   : > { %5138 = vst [vmem:[%s6679_s27 + $0x78] sm:$0xff] %v5090_v55  ;;  %v5091_v62 = vand.u32 2147483647, %v5043_v27  ;;  %v4433_v52 = vpop.f32.mrf.mxu0  ;;  %v4749_v54 = vpop.f32.mrf.mxu1 }
 0x4f9   : > { %v5045_v8 = vsel %vm4997_vm12, 1.0, %v4593_v33  ;;  %v4595_v16 = vadd.f32 %v10683_v58, %v4433_v52  ;;  %vm5003_vm11 = vcmp.eq.s32.totalorder %v10834_v12, %v10723_v10  ;;  %vm5004_vm14 = vcmp.eq.s32.totalorder %v10834_v12, %v10735_v13 }
 0x4fa   : > { %5139 = vst [vmem:[%s6679_s27 + $0x80] sm:$0xff] %v5091_v62  ;;  %v5093_v48 = vand.u32 2147483647, %v5045_v8  ;;  %v4437_v61 = vpop.f32.mrf.mxu0  ;;  %v10831_v32 = vpop.f32.mrf.mxu1  ;;  %v4953_v8 = vadd.s32 88, %v10715_v57 }
 0x4fb   : > { %v5046_v49 = vsel %vm4998_vm13, 1.0, %v4595_v16  ;;  %v4599_v9 = vadd.f32 %v10685_v44, %v4437_v61  ;;  %v10848_v44 = vadd.s32 %v10719_v31, %v4951_v30 }
 0x4fc   : > { %5141 = vst [vmem:[%s6679_s27 + $0x90] sm:$0xff] %v5093_v48  ;;  %v5094_v58 = vand.u32 2147483647, %v5046_v49  ;;  %v4439_v4 = vpop.f32.mrf.mxu0  ;;  %v4754_v41 = vpop.f32.mrf.mxu1 }
 0x4fd   : > { %v5048_v19 = vsel %vm5000_vm15, 1.0, %v4599_v9  ;;  %v4601_v25 = vadd.f32 %v10687_v24, %v4439_v4  ;;  %vm5006_vm1 = vcmp.eq.s32.totalorder %v10848_v44, %v10723_v10  ;;  %vm5007_vm3 = vcmp.eq.s32.totalorder %v10848_v44, %v10735_v13 }
 0x4fe   : > { %5142 = vst [vmem:[%s6679_s27 + $0x98] sm:$0xff] %v5094_v58  ;;  %v5096_v23 = vand.u32 2147483647, %v5048_v19  ;;  %v4443_v18 = vpop.f32.mrf.mxu0  ;;  %v10845_v56 = vpop.f32.mrf.mxu1  ;;  %v4954_v19 = vadd.s32 96, %v10715_v57 }
 0x4ff   : > { %v5049_v6 = vsel %vm5001_vm2, 1.0, %v4601_v25  ;;  %v4605_v55 = vadd.f32 %v10689_v11, %v4443_v18  ;;  %v10862_v11 = vadd.s32 %v10719_v31, %v4952_v36 }
 0x500   : > { %5144 = vst [vmem:[%s6679_s27 + $0xa8] sm:$0xff] %v5096_v23  ;;  %v5097_v24 = vand.u32 2147483647, %v5049_v6  ;;  %v4445_v15 = vpop.f32.mrf.mxu0  ;;  %v4759_v29 = vpop.f32.mrf.mxu1 }
 0x501   : > { %v5051_v27 = vsel %vm5003_vm11, 1.0, %v4605_v55  ;;  %v4607_v33 = vadd.f32 %v10691_v63, %v4445_v15  ;;  %vm5009_vm4 = vcmp.eq.s32.totalorder %v10862_v11, %v10723_v10  ;;  %vm5010_vm5 = vcmp.eq.s32.totalorder %v10862_v11, %v10735_v13 }
 0x502   : > { %5145 = vst [vmem:[%s6679_s27 + $0xb0] sm:$0xff] %v5097_v24  ;;  %v5099_v62 = vand.u32 2147483647, %v5051_v27  ;;  %v4449_v52 = vpop.f32.mrf.mxu0  ;;  %v10859_v54 = vpop.f32.mrf.mxu1  ;;  %v4955_v27 = vadd.s32 104, %v10715_v57 }
 0x503   : > { %v5052_v16 = vsel %vm5004_vm14, 1.0, %v4607_v33  ;;  %v4611_v48 = vadd.f32 %v10693_v5, %v4449_v52  ;;  %v10876_v5 = vadd.s32 %v10719_v31, %v4953_v8 }
 0x504   : > { %5147 = vst [vmem:[%s6679_s27 + $0xc0] sm:$0xff] %v5099_v62  ;;  %v5100_v63 = vand.u32 2147483647, %v5052_v16  ;;  %v4451_v61 = vpop.f32.mrf.mxu0  ;;  %v4764_v30 = vpop.f32.mrf.mxu1 }
 0x505   : > { %v5054_v49 = vsel %vm5006_vm1, 1.0, %v4611_v48  ;;  %v4613_v9 = vadd.f32 %v10695_v47, %v4451_v61  ;;  %vm5012_vm6 = vcmp.eq.s32.totalorder %v10876_v5, %v10723_v10  ;;  %vm5013_vm7 = vcmp.eq.s32.totalorder %v10876_v5, %v10735_v13 }
 0x506   : > { %5148 = vst [vmem:[%s6679_s27 + $0xc8] sm:$0xff] %v5100_v63  ;;  %v5102_v58 = vand.u32 2147483647, %v5054_v49  ;;  %v4455_v4 = vpop.f32.mrf.mxu0  ;;  %v10873_v41 = vpop.f32.mrf.mxu1  ;;  %v4956_v49 = vadd.s32 112, %v10715_v57 }
 0x507   : > { %v5055_v25 = vsel %vm5007_vm3, 1.0, %v4613_v9  ;;  %v4617_v23 = vadd.f32 %v10697_v3, %v4455_v4  ;;  %v10890_v3 = vadd.s32 %v10719_v31, %v4954_v19 }
 0x508   : > { %5150 = vst [vmem:[%s6679_s27 + $0xd8] sm:$0xff] %v5102_v58  ;;  %v5103_v47 = vand.u32 2147483647, %v5055_v25  ;;  %v4457_v18 = vpop.f32.mrf.mxu0  ;;  %v4769_v36 = vpop.f32.mrf.mxu1 }
 0x509   : > { %v5057_v6 = vsel %vm5009_vm4, 1.0, %v4617_v23  ;;  %v4619_v55 = vadd.f32 %v10699_v17, %v4457_v18  ;;  %vm5015_vm0 = vcmp.eq.s32.totalorder %v10890_v3, %v10723_v10  ;;  %vm5016_vm8 = vcmp.eq.s32.totalorder %v10890_v3, %v10735_v13 }
 0x50a   : > { %5151 = vst [vmem:[%s6679_s27 + $0xe0] sm:$0xff] %v5103_v47  ;;  %v5105_v24 = vand.u32 2147483647, %v5057_v6  ;;  %v4461_v15 = vpop.f32.mrf.mxu0  ;;  %v10887_v29 = vpop.f32.mrf.mxu1  ;;  %v4957_v6 = vadd.s32 120, %v10715_v57 }
 0x50b   : > { %v5058_v33 = vsel %vm5010_vm5, 1.0, %v4619_v55  ;;  %v4623_v62 = vadd.f32 %v10701_v46, %v4461_v15  ;;  %v10904_v46 = vadd.s32 %v10719_v31, %v4955_v27 }
 0x50c   : > { %5153 = vst [vmem:[%s6679_s27 + $0xf0] sm:$0xff] %v5105_v24  ;;  %v5106_v17 = vand.u32 2147483647, %v5058_v33  ;;  %v4463_v52 = vpop.f32.mrf.mxu0  ;;  %v4774_v8 = vpop.f32.mrf.mxu1 }
 0x50d   : > { %v5060_v16 = vsel %vm5012_vm6, 1.0, %v4623_v62  ;;  %v4625_v48 = vadd.f32 %v10703_v28, %v4463_v52  ;;  %vm5018_vm9 = vcmp.eq.s32.totalorder %v10904_v46, %v10723_v10  ;;  %vm5019_vm10 = vcmp.eq.s32.totalorder %v10904_v46, %v10735_v13 }
 0x50e   : > { %5154 = vst [vmem:[%s6679_s27 + $0xf8] sm:$0xff] %v5106_v17  ;;  %v5108_v63 = vand.u32 2147483647, %v5060_v16  ;;  %v4467_v61 = vpop.f32.mrf.mxu0  ;;  %v10901_v30 = vpop.f32.mrf.mxu1 }
 0x50f   : > { %v5061_v9 = vsel %vm5013_vm7, 1.0, %v4625_v48  ;;  %v4629_v58 = vadd.f32 %v10705_v1, %v4467_v61  ;;  %v10918_v1 = vadd.s32 %v10719_v31, %v4956_v49 }
 0x510   : > { %5156 = vst [vmem:[%s6679_s27 + $0x108] sm:$0xff] %v5108_v63  ;;  %v5109_v28 = vand.u32 2147483647, %v5061_v9  ;;  %v4469_v4 = vpop.f32.mrf.mxu0  ;;  %v4779_v19 = vpop.f32.mrf.mxu1 }
 0x511   : > { %v5063_v25 = vsel %vm5015_vm0, 1.0, %v4629_v58  ;;  %v4631_v23 = vadd.f32 %v10707_v26, %v4469_v4  ;;  %vm5021_vm12 = vcmp.eq.s32.totalorder %v10918_v1, %v10723_v10  ;;  %vm5022_vm13 = vcmp.eq.s32.totalorder %v10918_v1, %v10735_v13 }
 0x512   : > { %5157 = vst [vmem:[%s6679_s27 + $0x110] sm:$0xff] %v5109_v28  ;;  %v5111_v47 = vand.u32 2147483647, %v5063_v25  ;;  %v4473_v18 = vpop.f32.mrf.mxu0  ;;  %v10915_v36 = vpop.f32.mrf.mxu1 }
 0x513   : > { %v5064_v55 = vsel %vm5016_vm8, 1.0, %v4631_v23  ;;  %v4635_v24 = vadd.f32 %v10709_v42, %v4473_v18  ;;  %v10932_v42 = vadd.s32 %v10719_v31, %v4957_v6 }
 0x514   : > { %5159 = vst [vmem:[%s6679_s27 + $0x120] sm:$0xff] %v5111_v47  ;;  %v5112_v26 = vand.u32 2147483647, %v5064_v55  ;;  %v4475_v15 = vpop.f32.mrf.mxu0  ;;  %v4784_v27 = vpop.f32.mrf.mxu1 }
 0x515   : > { %v5066_v33 = vsel %vm5018_vm9, 1.0, %v4635_v24  ;;  %v4637_v62 = vadd.f32 %v10711_v43, %v4475_v15  ;;  %vm5024_vm15 = vcmp.eq.s32.totalorder %v10932_v42, %v10723_v10  ;;  %vm5025_vm2 = vcmp.eq.s32.totalorder %v10932_v42, %v10735_v13 }
 0x516   : > { %5160 = vst [vmem:[%s6679_s27 + $0x128] sm:$0xff] %v5112_v26  ;;  %v5114_v17 = vand.u32 2147483647, %v5066_v33  ;;  %v4479_v52 = vpop.f32.mrf.mxu0  ;;  %v10929_v57 = vpop.f32.mrf.mxu1 }
 0x517   : > { %v5067_v8 = vsel %vm5019_vm10, 1.0, %v4637_v62  ;;  %v4641_v16 = vadd.f32 %v10713_v21, %v4479_v52  ;;  %v10945_v21 = vadd.s32 256, %v10723_v10 }
 0x518   : > { %5162 = vst [vmem:[%s6679_s27 + $0x138] sm:$0xff] %v5114_v17  ;;  %v5115_v48 = vand.u32 2147483647, %v5067_v8  ;;  %v4481_v63 = vpop.f32.mrf.mxu0  ;;  %v4789_v43 = vpop.f32.mrf.mxu1 }
 0x519   : > { %v5069_v61 = vsel %vm5021_vm12, 1.0, %v4641_v16  ;;  %v4643_v49 = vadd.f32 %v10721_v51, %v4481_v63  ;;  %vm4984_vm11 = vcmp.eq.s32.totalorder %v10742_v39, %v10945_v21  ;;  %vm5008_vm14 = vcmp.eq.s32.totalorder %v10848_v44, %v10945_v21 }
 0x51a   : > { %5163 = vst [vmem:[%s6679_s27 + $0x140] sm:$0xff] %v5115_v48  ;;  %v5117_v9 = vand.u32 2147483647, %v5069_v61  ;;  %v4485_v58 = vpop.f32.mrf.mxu0  ;;  %v10942_v31 = vpop.f32.mrf.mxu1  ;;  %vm4981_vm1 = vcmp.eq.s32.totalorder %v10729_v35, %v10945_v21  ;;  %vm5005_vm3 = vcmp.eq.s32.totalorder %v10834_v12, %v10945_v21  ;;  %vm4990_vm4 = vcmp.eq.s32.totalorder %v10764_v20, %v10945_v21 }
 0x51b   : > { %v5070_v28 = vsel %vm5022_vm13, 1.0, %v4643_v49  ;;  %v4647_v4 = vadd.f32 %v10725_v37, %v4485_v58  ;;  %vm5014_vm5 = vcmp.eq.s32.totalorder %v10876_v5, %v10945_v21  ;;  %vm4987_vm6 = vcmp.eq.s32.totalorder %v10752_v0, %v10945_v21 }
 0x51c   : > { %5165 = vst [vmem:[%s6679_s27 + $0x150] sm:$0xff] %v5117_v9  ;;  %v5118_v19 = vand.u32 2147483647, %v5070_v28  ;;  %v4487_v25 = vpop.f32.mrf.mxu0  ;;  %v4794_v51 = vpop.f32.mrf.mxu1  ;;  %vm5011_vm7 = vcmp.eq.s32.totalorder %v10862_v11, %v10945_v21  ;;  %vm4996_vm0 = vcmp.eq.s32.totalorder %v10792_v40, %v10945_v21  ;;  %vm5020_vm8 = vcmp.eq.s32.totalorder %v10904_v46, %v10945_v21 }
 0x51d   : > { %v5072_v23 = vsel %vm5024_vm15, 1.0, %v4647_v4  ;;  %v4649_v47 = vadd.f32 %v10732_v14, %v4487_v25  ;;  %vm4993_vm9 = vcmp.eq.s32.totalorder %v10778_v38, %v10945_v21  ;;  %vm5017_vm10 = vcmp.eq.s32.totalorder %v10890_v3, %v10945_v21 }
 0x51e   : > { %5166 = vst [vmem:[%s6679_s27 + $0x158] sm:$0xff] %v5118_v19  ;;  %v5120_v18 = vand.u32 2147483647, %v5072_v23  ;;  %v6453_v6 = vpop.f32.mrf.mxu0  ;;  %v6465_v10 = vpop.f32.mrf.mxu1  ;;  %vm5002_vm12 = vcmp.eq.s32.totalorder %v10820_v2, %v10945_v21  ;;  %vm5026_vm13 = vcmp.eq.s32.totalorder %v10932_v42, %v10945_v21  ;;  %vm4999_vm15 = vcmp.eq.s32.totalorder %v10806_v45, %v10945_v21 }
 0x51f   : > { %v5073_v37 = vsel %vm5025_vm2, 1.0, %v4649_v47  ;;  %v4868_v55 = vadd.f32 %v6453_v6, %v10749_v34  ;;  %v4908_v13 = vadd.f32 %v6465_v10, %v10859_v54  ;;  %vm5023_vm2 = vcmp.eq.s32.totalorder %v10918_v1, %v10945_v21 }
 0x520   : > { %5168 = vst [vmem:[%s6679_s27 + $0x168] sm:$0xff] %v5120_v18  ;;  %v5121_v24 = vand.u32 2147483647, %v5073_v37  ;;  %v4862_v26 = vpop.f32.mrf.mxu0  ;;  %v4902_v14 = vpop.f32.mrf.mxu1 }
 0x521   : > { %v5032_v39 = vsel %vm4984_vm11, 1.0, %v4868_v55  ;;  %v5056_v15 = vsel %vm5008_vm14, 1.0, %v4908_v13  ;;  %v4863_v44 = vadd.f32 %v4862_v26, %v10739_v7  ;;  %v4903_v34 = vadd.f32 %v4902_v14, %v10845_v56 }
 0x522   : > { %5169 = vst [vmem:[%s6679_s27 + $0x170] sm:$0xff] %v5121_v24  ;;  %v5080_v54 = vand.u32 2147483647, %v5032_v39  ;;  %v5104_v27 = vand.u32 2147483647, %v5056_v15  ;;  %v6456_v33 = vpop.f32.mrf.mxu0  ;;  %v6468_v35 = vpop.f32.mrf.mxu1 }
 0x523   : > { %v5029_v12 = vsel %vm4981_vm1, 1.0, %v4863_v44  ;;  %v5053_v62 = vsel %vm5005_vm3, 1.0, %v4903_v34  ;;  %v4878_v17 = vadd.f32 %v6456_v33, %v10775_v50  ;;  %v4918_v7 = vadd.f32 %v6468_v35, %v10887_v29 }
 0x524   : > { %5128 = vst [vmem:[%s6679_s27 + $0x28] sm:$0xff] %v5080_v54  ;;  %5152 = vst [vmem:[%s6679_s27 + $0xe8] sm:$0xff] %v5104_v27  ;;  %v5077_v56 = vand.u32 2147483647, %v5029_v12  ;;  %v5101_v52 = vand.u32 2147483647, %v5053_v62  ;;  %v4872_v8 = vpop.f32.mrf.mxu0  ;;  %v4912_v20 = vpop.f32.mrf.mxu1 }
 0x525   : > { %v5038_v5 = vsel %vm4990_vm4, 1.0, %v4878_v17  ;;  %v5062_v16 = vsel %vm5014_vm5, 1.0, %v4918_v7  ;;  %v4873_v50 = vadd.f32 %v4872_v8, %v10761_v59  ;;  %v4913_v29 = vadd.f32 %v4912_v20, %v10873_v41 }
 0x526   : > { %5125 = vst [vmem:[%s6679_s27 + $0x10] sm:$0xff] %v5077_v56  ;;  %5149 = vst [vmem:[%s6679_s27 + $0xd0] sm:$0xff] %v5101_v52  ;;  %v5086_v48 = vand.u32 2147483647, %v5038_v5  ;;  %v5110_v63 = vand.u32 2147483647, %v5062_v16  ;;  %v6459_v43 = vpop.f32.mrf.mxu0  ;;  %v6471_v0 = vpop.f32.mrf.mxu1 }
 0x527   : > { %v5035_v11 = vsel %vm4987_vm6, 1.0, %v4873_v50  ;;  %v5059_v61 = vsel %vm5011_vm7, 1.0, %v4913_v29  ;;  %v4888_v59 = vadd.f32 %v6459_v43, %v10803_v53  ;;  %v4928_v41 = vadd.f32 %v6471_v0, %v10915_v36 }
 0x528   : > { %5134 = vst [vmem:[%s6679_s27 + $0x58] sm:$0xff] %v5086_v48  ;;  %5158 = vst [vmem:[%s6679_s27 + $0x118] sm:$0xff] %v5110_v63  ;;  %v5083_v49 = vand.u32 2147483647, %v5035_v11  ;;  %v5107_v9 = vand.u32 2147483647, %v5059_v61  ;;  %v4882_v58 = vpop.f32.mrf.mxu0  ;;  %v4922_v40 = vpop.f32.mrf.mxu1 }
 0x529   : > { %v5044_v46 = vsel %vm4996_vm0, 1.0, %v4888_v59  ;;  %v5068_v28 = vsel %vm5020_vm8, 1.0, %v4928_v41  ;;  %v4883_v53 = vadd.f32 %v4882_v58, %v10789_v22  ;;  %v4923_v36 = vadd.f32 %v4922_v40, %v10901_v30 }
 0x52a   : > { %5131 = vst [vmem:[%s6679_s27 + $0x40] sm:$0xff] %v5083_v49  ;;  %5155 = vst [vmem:[%s6679_s27 + $0x100] sm:$0xff] %v5107_v9  ;;  %v5092_v4 = vand.u32 2147483647, %v5044_v46  ;;  %v5116_v19 = vand.u32 2147483647, %v5068_v28  ;;  %v6462_v25 = vpop.f32.mrf.mxu0  ;;  %v6474_v38 = vpop.f32.mrf.mxu1 }
 0x52b   : > { %v5041_v3 = vsel %vm4993_vm9, 1.0, %v4883_v53  ;;  %v5065_v51 = vsel %vm5017_vm10, 1.0, %v4923_v36  ;;  %v4898_v22 = vadd.f32 %v6462_v25, %v10831_v32  ;;  %v4938_v30 = vadd.f32 %v6474_v38, %v10942_v31 }
 0x52c   : > { %5140 = vst [vmem:[%s6679_s27 + $0x88] sm:$0xff] %v5092_v4  ;;  %5164 = vst [vmem:[%s6679_s27 + $0x148] sm:$0xff] %v5116_v19  ;;  %v5089_v23 = vand.u32 2147483647, %v5041_v3  ;;  %v5113_v47 = vand.u32 2147483647, %v5065_v51  ;;  %v4892_v18 = vpop.f32.mrf.mxu0  ;;  %v4932_v2 = vpop.f32.mrf.mxu1 }
 0x52d   : > { %v5050_v42 = vsel %vm5002_vm12, 1.0, %v4898_v22  ;;  %v5074_v32 = vsel %vm5026_vm13, 1.0, %v4938_v30  ;;  %v4893_v31 = vadd.f32 %v4892_v18, %v10817_v60  ;;  %v4933_v6 = vadd.f32 %v4932_v2, %v10929_v57 }
 0x52e   : > { %5137 = vst [vmem:[%s6679_s27 + $0x70] sm:$0xff] %v5089_v23  ;;  %5161 = vst [vmem:[%s6679_s27 + $0x130] sm:$0xff] %v5113_v47  ;;  %v5098_v10 = vand.u32 2147483647, %v5050_v42  ;;  %v5122_v37 = vand.u32 2147483647, %v5074_v32 }
 0x52f   : > { %v5047_v55 = vsel %vm4999_vm15, 1.0, %v4893_v31  ;;  %v5071_v13 = vsel %vm5023_vm2, 1.0, %v4933_v6 }
 0x530   : > { %5146 = vst [vmem:[%s6679_s27 + $0xb8] sm:$0xff] %v5098_v10  ;;  %5170 = vst [vmem:[%s6679_s27 + $0x178] sm:$0xff] %v5122_v37  ;;  %v5095_v45 = vand.u32 2147483647, %v5047_v55  ;;  %v5119_v24 = vand.u32 2147483647, %v5071_v13 }
 0x532   : > { %5143 = vst [vmem:[%s6679_s27 + $0xa0] sm:$0xff] %v5095_v45  ;;  %5167 = vst [vmem:[%s6679_s27 + $0x160] sm:$0xff] %v5119_v24 }
 0x533 PF: > { %s16_s18 = sadd.s32 1, %s6628_s18  }
 0x534   : > { %p13_p5 = scmp.ge.s32.totalorder %s16_s18, 5  }
 0x536   :  { %15 = sbr.rel (!%p13_p5) target bundleno = 1 (0x1), region = 80 }

</bundles_post_ra>
